<compile_context>
chip_gen: v7x
topology: tpu7x:2x2x1
jax: 0.10.0
libtpu: 0.0.40
codegen_flags: <defaults>
</compile_context>

<pallas_src>
import functools

import jax
import jax.numpy as jnp
from jax import lax
from jax.experimental import pallas as pl
from jax.experimental.pallas import tpu as pltpu


# ----------------------------------------------------------------------------
# Single fused kernel: conv stack + avg-pool + LSTM (input proj hoisted) + FC
# ----------------------------------------------------------------------------
def _model_kernel(p1_ref, w1_ref, b1_ref, w2_ref, b2_ref, w3_ref, b3_ref,
                  wih_ref, bl_ref, whh_ref, fcw_ref, fcb_ref,
                  o_ref, gx_scr, hs_scr, *, N, H):
    NH = N * H

    # ---- conv1 (+bn1, relu): one matmul on the pre-built im2col patches ----
    y1 = jnp.dot(p1_ref[...], w1_ref[...], preferred_element_type=jnp.float32)
    y1 = jnp.maximum(y1 + b1_ref[...], 0.0)              # (wo1*NH, 64)
    wo1 = p1_ref.shape[0] // NH
    blocks = [y1[j * NH:(j + 1) * NH, :] for j in range(wo1)]

    # ---- conv2 / conv3 (kernel (1,3), stride 3, pad 1; BN+ReLU folded) as
    # "tap" matmuls on contiguous (NH, C_in) row blocks: no in-kernel
    # patch building or reshapes at all. ----
    def conv_taps(blocks_in, w_ref, b_ref):
        wo_in = len(blocks_in)
        wo_out = (wo_in - 1) // 3 + 1
        c_in = w_ref.shape[0] // 3
        wv = w_ref[...]
        outs = []
        for j in range(wo_out):
            acc = None
            for k in range(3):
                src = 3 * j + k - 1                      # left zero-pad of 1
                if 0 <= src < wo_in:
                    part = jnp.dot(blocks_in[src],
                                   wv[k * c_in:(k + 1) * c_in, :],
                                   preferred_element_type=jnp.float32)
                    acc = part if acc is None else acc + part
            outs.append(jnp.maximum(acc + b_ref[...], 0.0))
        return outs

    blocks = conv_taps(blocks, w2_ref, b2_ref)           # wo2 x (NH, 256)
    blocks = conv_taps(blocks, w3_ref, b3_ref)           # wo3 x (NH, 256)

    # ---- AvgPool2d over the remaining W positions ----
    feat = blocks[0]
    for blk in blocks[1:]:
        feat = feat + blk
    feat = feat * (1.0 / float(len(blocks)))             # (NH, 256), row = h*N+n

    # ---- LSTM input projection (hoisted out of the recurrent time loop) ----
    gx_scr[...] = (jnp.dot(feat, wih_ref[...], preferred_element_type=jnp.float32)
                   + bl_ref[...])                        # (NH, 4*HS)

    # ---- LSTM recurrence (only h @ W_hh inside the sequential loop) ----
    HS = whh_ref.shape[0]
    whh = whh_ref[...]
    h = jnp.zeros((N, HS), jnp.float32)
    c = jnp.zeros((N, HS), jnp.float32)
    for t in range(H):                                   # unrolled: H static, small
        gates = gx_scr[pl.ds(t * N, N), :] + jnp.dot(
            h, whh, preferred_element_type=jnp.float32)
        # PyTorch gate order: i, f, g, o
        i = jax.nn.sigmoid(gates[:, 0:HS])
        f = jax.nn.sigmoid(gates[:, HS:2 * HS])
        g = jnp.tanh(gates[:, 2 * HS:3 * HS])
        o = jax.nn.sigmoid(gates[:, 3 * HS:4 * HS])
        c = f * c + i * g
        h = o * jnp.tanh(c)
        hs_scr[pl.ds(t * N, N), :] = h                   # row = t*N + n

    # ---- Dropout(0.3) identity in eval; FC over all timesteps in ONE matmul,
    # whole output written back with a single store. ----
    o_ref[...] = (jnp.dot(hs_scr[...], fcw_ref[...],
                          preferred_element_type=jnp.float32)
                  + fcb_ref[...])                        # (H*N, 64)


def fused_forward(p1, prep, *, N, H):
    args = (p1, prep["w1"], prep["b1"], prep["w2"], prep["b2"],
            prep["w3"], prep["b3"], prep["w_ih_t"], prep["b_lstm"],
            prep["w_hh_t"], prep["fc_w_t"], prep["fc_b"])
    HS = prep["w_hh_t"].shape[0]
    HS4 = prep["w_ih_t"].shape[1]
    Dout = prep["fc_w_t"].shape[1]
    NH = N * H

    def full_spec(a):
        nd = a.ndim
        return pl.BlockSpec(a.shape, lambda i, _nd=nd: (0,) * _nd)

    return pl.pallas_call(
        functools.partial(_model_kernel, N=N, H=H),
        out_shape=jax.ShapeDtypeStruct((NH, Dout), jnp.float32),
        grid=(1,),
        in_specs=[full_spec(a) for a in args],
        out_specs=pl.BlockSpec((NH, Dout), lambda i: (0, 0)),
        scratch_shapes=[
            pltpu.VMEM((NH, HS4), jnp.float32),   # gates_x (input projection)
            pltpu.VMEM((NH, HS), jnp.float32),    # all hidden states
        ],
        compiler_params=pltpu.CompilerParams(dimension_semantics=("arbitrary",)),
    )(*args)


# ----------------------------------------------------------------------------
# One-time parameter preparation: BN folds, weight transposes, bias sums.
# ----------------------------------------------------------------------------
def prepare_params(params, eps=1e-5):
    def bn_scale_shift(bn):
        gamma, beta, mean, var = bn
        s = gamma / jnp.sqrt(var + eps)
        return s, beta - mean * s

    def fold_conv(conv, bn):
        w, b = conv                                  # torch layout (Cout, Cin, 1, 3)
        s, t = bn_scale_shift(bn)
        cout, cin = w.shape[0], w.shape[1]
        # column layout of the patch matrices is (kw, c): row = kw*Cin + c
        wm = jnp.transpose(w[:, :, 0, :], (2, 1, 0)).reshape(3 * cin, cout)
        wm = wm * s[None, :]
        bm = (b * s + t).reshape(1, cout)
        return wm.astype(jnp.float32), bm.astype(jnp.float32)

    s0, t0 = bn_scale_shift(params["bn0"])
    w1m, b1m = fold_conv(params["conv1"], params["bn1"])
    w2m, b2m = fold_conv(params["conv2"], params["bn2"])
    w3m, b3m = fold_conv(params["conv3"], params["bn3"])

    w_ih, w_hh, b_ih, b_hh = params["lstm"]
    fc_w, fc_b = params["fc"]
    return {
        "bn0_scale": s0.astype(jnp.float32), "bn0_shift": t0.astype(jnp.float32),
        "w1": w1m, "b1": b1m, "w2": w2m, "b2": b2m, "w3": w3m, "b3": b3m,
        "w_ih_t": jnp.transpose(w_ih).astype(jnp.float32),       # (256, 1024)
        "w_hh_t": jnp.transpose(w_hh).astype(jnp.float32),       # (256, 1024)
        "b_lstm": (b_ih + b_hh).reshape(1, -1).astype(jnp.float32),
        "fc_w_t": jnp.transpose(fc_w).astype(jnp.float32),       # (256, 64)
        "fc_b": fc_b.reshape(1, -1).astype(jnp.float32),
    }


# ----------------------------------------------------------------------------
# Full forward pass (mirrors Model_3D.forward, inference semantics)
# ----------------------------------------------------------------------------
@functools.partial(jax.jit, static_argnames=("pre_points",))
def model_forward(x_nchw, prep, pre_points=9):
    N, C, H, W = x_nchw.shape
    # bn0 (running stats).  Applied before padding so conv1's zero-padding of
    # bn0's output stays exact (cannot be folded into conv1 because of the pad).
    x = (x_nchw * prep["bn0_scale"][None, :, None, None]
         + prep["bn0_shift"][None, :, None, None])
    x = jnp.transpose(x, (0, 2, 3, 1))                            # NHWC

    # im2col for conv1 (kernel (1,3), stride (1,3), pad (0,1)): windows are
    # non-overlapping -> pad + slice + reshape, no gather/stack.
    wo1 = (W + 2 - 3) // 3 + 1
    xp = jnp.pad(x, ((0, 0), (0, 0), (1, 1), (0, 0)))[:, :, :3 * wo1, :]
    p1 = xp.reshape(N, H, wo1, 3, C)
    # row order (wo1, h, n), column order (kw, c)
    p1 = jnp.transpose(p1, (2, 1, 0, 3, 4)).reshape(wo1 * H * N, 3 * C)

    # Dropout(0.3): identity in eval.  # TODO(synk): training-mode dropout not modeled
    y_flat = fused_forward(p1, prep, N=N, H=H)                    # (H*N, 64)
    y = y_flat.reshape(H, N, -1)                                  # (T, B, 64)

    # torch: unsqueeze + repeated concat -> pre_points identical copies
    return jnp.broadcast_to(y[None], (pre_points,) + y.shape)


# ----------------------------------------------------------------------------
# Pure-JAX reference (independent math: lax conv + scan LSTM) for validation
# ----------------------------------------------------------------------------
def reference_forward(x, params, pre_points=9, eps=1e-5):
    hi = lax.Precision.HIGHEST

    def bn(x, p):
        g, b, m, v = p
        return ((x - m[None, :, None, None])
                / jnp.sqrt(v[None, :, None, None] + eps)
                * g[None, :, None, None] + b[None, :, None, None])

    def conv(x, wb):
        w, b = wb
        y = lax.conv_general_dilated(
            x, w, window_strides=(1, 3), padding=((0, 0), (1, 1)),
            dimension_numbers=("NCHW", "OIHW", "NCHW"), precision=hi)
        return y + b[None, :, None, None]

    x = bn(x, params["bn0"])
    x = jax.nn.relu(bn(conv(x, params["conv1"]), params["bn1"]))
    x = jax.nn.relu(bn(conv(x, params["conv2"]), params["bn2"]))
    x = jax.nn.relu(bn(conv(x, params["conv3"]), params["bn3"]))
    x = jnp.mean(x, axis=3)                     # (N, 256, H)
    x = jnp.transpose(x, (2, 0, 1))             # (T=H, B=N, 256)

    w_ih, w_hh, b_ih, b_hh = params["lstm"]
    HS = w_hh.shape[1]
    B = x.shape[1]

    def step(carry, xt):
        h, c = carry
        gates = (jnp.dot(xt, w_ih.T, precision=hi) + b_ih
                 + jnp.dot(h, w_hh.T, precision=hi) + b_hh)
        i, f, g, o = jnp.split(gates, 4, axis=-1)
        i, f, o = jax.nn.sigmoid(i), jax.nn.sigmoid(f), jax.nn.sigmoid(o)
        g = jnp.tanh(g)
        c = f * c + i * g
        h = o * jnp.tanh(c)
        return (h, c), h

    init = (jnp.zeros((B, HS), jnp.float32), jnp.zeros((B, HS), jnp.float32))
    _, ys = lax.scan(step, init, x)             # (T, B, HS)
    fc_w, fc_b = params["fc"]
    y = jnp.dot(ys, fc_w.T, precision=hi) + fc_b
    return jnp.broadcast_to(y[None], (pre_points,) + y.shape)


# ----------------------------------------------------------------------------
# Deterministic synthetic parameters (shapes from Model_3D.__init__)
# ----------------------------------------------------------------------------
def init_params(key):
    kit = iter(jax.random.split(key, 28))

    def nrm(shape, s=0.05):
        return (s * jax.random.normal(next(kit), shape)).astype(jnp.float32)

    def bn(c):
        return (1.0 + nrm((c,)), nrm((c,)), nrm((c,)), 0.5 + jnp.abs(nrm((c,))))

    return {
        "bn0": bn(2),
        "conv1": (nrm((64, 2, 1, 3)), nrm((64,))),
        "bn1": bn(64),
        "conv2": (nrm((256, 64, 1, 3)), nrm((256,))),
        "bn2": bn(256),
        "conv3": (nrm((256, 256, 1, 3)), nrm((256,))),
        "bn3": bn(256),
        "lstm": (nrm((1024, 256)), nrm((1024, 256)), nrm((1024,)), nrm((1024,))),
        "fc": (nrm((64, 256)), nrm((64,))),
    }


if __name__ == "__main__":
    key = jax.random.PRNGKey(0)
    k_x, k_p = jax.random.split(key)

    # N=2 batch, 2 channels, H=8 (LSTM sequence length), W=27 (27 -> 9 -> 3 -> 1).
    N, C, H, W = 2, 2, 8, 27
    x = jax.random.normal(k_x, (N, C, H, W), dtype=jnp.float32)

    params = init_params(k_p)
    prep = prepare_params(params)

    out = model_forward(x, prep, pre_points=9)
    out = jax.block_until_ready(out)
    assert out.shape == (9, H, N, 64), out.shape

    ref = jax.block_until_ready(reference_forward(x, params, pre_points=9))
    max_err = float(jnp.max(jnp.abs(out - ref)))
    assert jnp.allclose(out, ref, atol=2e-3, rtol=2e-2), max_err

    print("KERNEL_OK")
</pallas_src>

<mosaic_0001>
module attributes {stable_mosaic.version = 11 : i64} {
  func.func @_model_kernel(%arg0: i32, %arg1: memref<144x6xf32, #tpu.memory_space<vmem>>, %arg2: memref<6x64xf32, #tpu.memory_space<vmem>>, %arg3: memref<1x64xf32, #tpu.memory_space<vmem>>, %arg4: memref<192x256xf32, #tpu.memory_space<vmem>>, %arg5: memref<1x256xf32, #tpu.memory_space<vmem>>, %arg6: memref<768x256xf32, #tpu.memory_space<vmem>>, %arg7: memref<1x256xf32, #tpu.memory_space<vmem>>, %arg8: memref<256x1024xf32, #tpu.memory_space<vmem>>, %arg9: memref<1x1024xf32, #tpu.memory_space<vmem>>, %arg10: memref<256x1024xf32, #tpu.memory_space<vmem>>, %arg11: memref<256x64xf32, #tpu.memory_space<vmem>>, %arg12: memref<1x64xf32, #tpu.memory_space<vmem>>, %arg13: memref<16x64xf32, #tpu.memory_space<vmem>>, %arg14: memref<16x1024xf32, #tpu.memory_space<vmem>>, %arg15: memref<16x256xf32, #tpu.memory_space<vmem>>) attributes {dimension_semantics = [#tpu.dimension_semantics<arbitrary>], iteration_bounds = array<i64: 1>, scalar_prefetch = 0 : i64, scratch_operands = 2 : i64, tpu.core_type = #tpu.core_type<tc>, window_params = [{pipeline_mode = #tpu.pipeline_mode<synchronous>, transform_indices = @transform_0, window_bounds = array<i64: 144, 6>}, {pipeline_mode = #tpu.pipeline_mode<synchronous>, transform_indices = @transform_1, window_bounds = array<i64: 6, 64>}, {pipeline_mode = #tpu.pipeline_mode<synchronous>, transform_indices = @transform_2, window_bounds = array<i64: 1, 64>}, {pipeline_mode = #tpu.pipeline_mode<synchronous>, transform_indices = @transform_3, window_bounds = array<i64: 192, 256>}, {pipeline_mode = #tpu.pipeline_mode<synchronous>, transform_indices = @transform_4, window_bounds = array<i64: 1, 256>}, {pipeline_mode = #tpu.pipeline_mode<synchronous>, transform_indices = @transform_5, window_bounds = array<i64: 768, 256>}, {pipeline_mode = #tpu.pipeline_mode<synchronous>, transform_indices = @transform_6, window_bounds = array<i64: 1, 256>}, {pipeline_mode = #tpu.pipeline_mode<synchronous>, transform_indices = @transform_7, window_bounds = array<i64: 256, 1024>}, {pipeline_mode = #tpu.pipeline_mode<synchronous>, transform_indices = @transform_8, window_bounds = array<i64: 1, 1024>}, {pipeline_mode = #tpu.pipeline_mode<synchronous>, transform_indices = @transform_9, window_bounds = array<i64: 256, 1024>}, {pipeline_mode = #tpu.pipeline_mode<synchronous>, transform_indices = @transform_10, window_bounds = array<i64: 256, 64>}, {pipeline_mode = #tpu.pipeline_mode<synchronous>, transform_indices = @transform_11, window_bounds = array<i64: 1, 64>}, {pipeline_mode = #tpu.pipeline_mode<synchronous>, transform_indices = @transform_12, window_bounds = array<i64: 16, 64>}]} {
    %c0 = arith.constant 0 : index
    %c0_0 = arith.constant 0 : index
    %0 = vector.load %arg1[%c0, %c0_0] : memref<144x6xf32, #tpu.memory_space<vmem>>, vector<144x6xf32>
    %c0_1 = arith.constant 0 : index
    %c0_2 = arith.constant 0 : index
    %1 = vector.load %arg2[%c0_1, %c0_2] : memref<6x64xf32, #tpu.memory_space<vmem>>, vector<6x64xf32>
    %cst = arith.constant dense<0.000000e+00> : vector<144x64xf32>
    %2 = tpu.matmul %0, %1, %cst {dimension_numbers = #tpu.dot_dimension_numbers<[1], [0], [0], [1], [0, 0, 1, 1], [], []>} : vector<144x6xf32>, vector<6x64xf32>, vector<144x64xf32> -> vector<144x64xf32>
    %c0_3 = arith.constant 0 : index
    %c0_4 = arith.constant 0 : index
    %3 = vector.load %arg3[%c0_3, %c0_4] : memref<1x64xf32, #tpu.memory_space<vmem>>, vector<1x64xf32>
    %4 = vector.broadcast %3 : vector<1x64xf32> to vector<144x64xf32>
    %5 = arith.addf %2, %4 : vector<144x64xf32>
    %cst_5 = arith.constant 0.000000e+00 : f32
    %6 = vector.broadcast %cst_5 : f32 to vector<144x64xf32>
    %7 = arith.maximumf %5, %6 : vector<144x64xf32>
    %8 = vector.extract_strided_slice %7 {offsets = [0, 0], sizes = [16, 64], strides = [1, 1]} : vector<144x64xf32> to vector<16x64xf32>
    %9 = vector.extract_strided_slice %7 {offsets = [16, 0], sizes = [16, 64], strides = [1, 1]} : vector<144x64xf32> to vector<16x64xf32>
    %10 = vector.extract_strided_slice %7 {offsets = [32, 0], sizes = [16, 64], strides = [1, 1]} : vector<144x64xf32> to vector<16x64xf32>
    %11 = vector.extract_strided_slice %7 {offsets = [48, 0], sizes = [16, 64], strides = [1, 1]} : vector<144x64xf32> to vector<16x64xf32>
    %12 = vector.extract_strided_slice %7 {offsets = [64, 0], sizes = [16, 64], strides = [1, 1]} : vector<144x64xf32> to vector<16x64xf32>
    %c0_6 = arith.constant 0 : index
    %c0_7 = arith.constant 0 : index
    %13 = vector.load %arg4[%c0_6, %c0_7] : memref<192x256xf32, #tpu.memory_space<vmem>>, vector<192x256xf32>
    %14 = vector.extract_strided_slice %13 {offsets = [64, 0], sizes = [64, 256], strides = [1, 1]} : vector<192x256xf32> to vector<64x256xf32>
    %cst_8 = arith.constant dense<0.000000e+00> : vector<16x256xf32>
    %15 = tpu.matmul %8, %14, %cst_8 {dimension_numbers = #tpu.dot_dimension_numbers<[1], [0], [0], [1], [0, 0, 1, 1], [], []>} : vector<16x64xf32>, vector<64x256xf32>, vector<16x256xf32> -> vector<16x256xf32>
    %16 = vector.extract_strided_slice %13 {offsets = [128, 0], sizes = [64, 256], strides = [1, 1]} : vector<192x256xf32> to vector<64x256xf32>
    %cst_9 = arith.constant dense<0.000000e+00> : vector<16x256xf32>
    %17 = tpu.matmul %9, %16, %cst_9 {dimension_numbers = #tpu.dot_dimension_numbers<[1], [0], [0], [1], [0, 0, 1, 1], [], []>} : vector<16x64xf32>, vector<64x256xf32>, vector<16x256xf32> -> vector<16x256xf32>
    %18 = arith.addf %15, %17 : vector<16x256xf32>
    %c0_10 = arith.constant 0 : index
    %c0_11 = arith.constant 0 : index
    %19 = vector.load %arg5[%c0_10, %c0_11] : memref<1x256xf32, #tpu.memory_space<vmem>>, vector<1x256xf32>
    %20 = vector.broadcast %19 : vector<1x256xf32> to vector<16x256xf32>
    %21 = arith.addf %18, %20 : vector<16x256xf32>
    %cst_12 = arith.constant 0.000000e+00 : f32
    %22 = vector.broadcast %cst_12 : f32 to vector<16x256xf32>
    %23 = arith.maximumf %21, %22 : vector<16x256xf32>
    %24 = vector.extract_strided_slice %13 {offsets = [0, 0], sizes = [64, 256], strides = [1, 1]} : vector<192x256xf32> to vector<64x256xf32>
    %cst_13 = arith.constant dense<0.000000e+00> : vector<16x256xf32>
    %25 = tpu.matmul %10, %24, %cst_13 {dimension_numbers = #tpu.dot_dimension_numbers<[1], [0], [0], [1], [0, 0, 1, 1], [], []>} : vector<16x64xf32>, vector<64x256xf32>, vector<16x256xf32> -> vector<16x256xf32>
    %26 = vector.extract_strided_slice %13 {offsets = [64, 0], sizes = [64, 256], strides = [1, 1]} : vector<192x256xf32> to vector<64x256xf32>
    %cst_14 = arith.constant dense<0.000000e+00> : vector<16x256xf32>
    %27 = tpu.matmul %11, %26, %cst_14 {dimension_numbers = #tpu.dot_dimension_numbers<[1], [0], [0], [1], [0, 0, 1, 1], [], []>} : vector<16x64xf32>, vector<64x256xf32>, vector<16x256xf32> -> vector<16x256xf32>
    %28 = arith.addf %25, %27 : vector<16x256xf32>
    %29 = vector.extract_strided_slice %13 {offsets = [128, 0], sizes = [64, 256], strides = [1, 1]} : vector<192x256xf32> to vector<64x256xf32>
    %cst_15 = arith.constant dense<0.000000e+00> : vector<16x256xf32>
    %30 = tpu.matmul %12, %29, %cst_15 {dimension_numbers = #tpu.dot_dimension_numbers<[1], [0], [0], [1], [0, 0, 1, 1], [], []>} : vector<16x64xf32>, vector<64x256xf32>, vector<16x256xf32> -> vector<16x256xf32>
    %31 = arith.addf %28, %30 : vector<16x256xf32>
    %c0_16 = arith.constant 0 : index
    %c0_17 = arith.constant 0 : index
    %32 = vector.load %arg5[%c0_16, %c0_17] : memref<1x256xf32, #tpu.memory_space<vmem>>, vector<1x256xf32>
    %33 = vector.broadcast %32 : vector<1x256xf32> to vector<16x256xf32>
    %34 = arith.addf %31, %33 : vector<16x256xf32>
    %cst_18 = arith.constant 0.000000e+00 : f32
    %35 = vector.broadcast %cst_18 : f32 to vector<16x256xf32>
    %36 = arith.maximumf %34, %35 : vector<16x256xf32>
    %c0_19 = arith.constant 0 : index
    %c0_20 = arith.constant 0 : index
    %37 = vector.load %arg6[%c0_19, %c0_20] : memref<768x256xf32, #tpu.memory_space<vmem>>, vector<768x256xf32>
    %38 = vector.extract_strided_slice %37 {offsets = [256, 0], sizes = [256, 256], strides = [1, 1]} : vector<768x256xf32> to vector<256x256xf32>
    %cst_21 = arith.constant dense<0.000000e+00> : vector<16x256xf32>
    %39 = tpu.matmul %23, %38, %cst_21 {dimension_numbers = #tpu.dot_dimension_numbers<[1], [0], [0], [1], [0, 0, 1, 1], [], []>} : vector<16x256xf32>, vector<256x256xf32>, vector<16x256xf32> -> vector<16x256xf32>
    %40 = vector.extract_strided_slice %37 {offsets = [512, 0], sizes = [256, 256], strides = [1, 1]} : vector<768x256xf32> to vector<256x256xf32>
    %cst_22 = arith.constant dense<0.000000e+00> : vector<16x256xf32>
    %41 = tpu.matmul %36, %40, %cst_22 {dimension_numbers = #tpu.dot_dimension_numbers<[1], [0], [0], [1], [0, 0, 1, 1], [], []>} : vector<16x256xf32>, vector<256x256xf32>, vector<16x256xf32> -> vector<16x256xf32>
    %42 = arith.addf %39, %41 : vector<16x256xf32>
    %c0_23 = arith.constant 0 : index
    %c0_24 = arith.constant 0 : index
    %43 = vector.load %arg7[%c0_23, %c0_24] : memref<1x256xf32, #tpu.memory_space<vmem>>, vector<1x256xf32>
    %44 = vector.broadcast %43 : vector<1x256xf32> to vector<16x256xf32>
    %45 = arith.addf %42, %44 : vector<16x256xf32>
    %cst_25 = arith.constant 0.000000e+00 : f32
    %46 = vector.broadcast %cst_25 : f32 to vector<16x256xf32>
    %47 = arith.maximumf %45, %46 : vector<16x256xf32>
    %cst_26 = arith.constant 1.000000e+00 : f32
    %48 = vector.broadcast %cst_26 : f32 to vector<16x256xf32>
    %49 = arith.mulf %47, %48 : vector<16x256xf32>
    %c0_27 = arith.constant 0 : index
    %c0_28 = arith.constant 0 : index
    %50 = vector.load %arg8[%c0_27, %c0_28] : memref<256x1024xf32, #tpu.memory_space<vmem>>, vector<256x1024xf32>
    %cst_29 = arith.constant dense<0.000000e+00> : vector<16x1024xf32>
    %51 = tpu.matmul %49, %50, %cst_29 {dimension_numbers = #tpu.dot_dimension_numbers<[1], [0], [0], [1], [0, 0, 1, 1], [], []>} : vector<16x256xf32>, vector<256x1024xf32>, vector<16x1024xf32> -> vector<16x1024xf32>
    %c0_30 = arith.constant 0 : index
    %c0_31 = arith.constant 0 : index
    %52 = vector.load %arg9[%c0_30, %c0_31] : memref<1x1024xf32, #tpu.memory_space<vmem>>, vector<1x1024xf32>
    %53 = vector.broadcast %52 : vector<1x1024xf32> to vector<16x1024xf32>
    %54 = arith.addf %51, %53 : vector<16x1024xf32>
    %c0_32 = arith.constant 0 : index
    %c0_33 = arith.constant 0 : index
    %55 = vector.load %arg14[%c0_32, %c0_33] : memref<16x1024xf32, #tpu.memory_space<vmem>>, vector<16x1024xf32>
    tpu.vector_store %arg14[%c0_32, %c0_33], %54 {strides = array<i32>} : memref<16x1024xf32, #tpu.memory_space<vmem>>, vector<16x1024xf32>,
    %c0_34 = arith.constant 0 : index
    %c0_35 = arith.constant 0 : index
    %56 = vector.load %arg10[%c0_34, %c0_35] : memref<256x1024xf32, #tpu.memory_space<vmem>>, vector<256x1024xf32>
    %cst_36 = arith.constant 0.000000e+00 : f32
    %57 = vector.broadcast %cst_36 : f32 to vector<2x256xf32>
    %cst_37 = arith.constant 0.000000e+00 : f32
    %58 = vector.broadcast %cst_37 : f32 to vector<2x256xf32>
    %c0_38 = arith.constant 0 : index
    %c0_39 = arith.constant 0 : index
    %59 = vector.load %arg14[%c0_38, %c0_39] : memref<16x1024xf32, #tpu.memory_space<vmem>>, vector<2x1024xf32>
    %cst_40 = arith.constant dense<0.000000e+00> : vector<2x1024xf32>
    %60 = tpu.matmul %57, %56, %cst_40 {dimension_numbers = #tpu.dot_dimension_numbers<[1], [0], [0], [1], [0, 0, 1, 1], [], []>} : vector<2x256xf32>, vector<256x1024xf32>, vector<2x1024xf32> -> vector<2x1024xf32>
    %61 = arith.addf %59, %60 : vector<2x1024xf32>
    %62 = vector.extract_strided_slice %61 {offsets = [0, 0], sizes = [2, 256], strides = [1, 1]} : vector<2x1024xf32> to vector<2x256xf32>
    %63 = arith.negf %62 : vector<2x256xf32>
    %64 = math.exp %63 : vector<2x256xf32>
    %cst_41 = arith.constant 1.000000e+00 : f32
    %65 = vector.broadcast %cst_41 : f32 to vector<2x256xf32>
    %66 = arith.addf %65, %64 : vector<2x256xf32>
    %67 = arith.divf %65, %66 : vector<2x256xf32>
    %68 = vector.extract_strided_slice %61 {offsets = [0, 256], sizes = [2, 256], strides = [1, 1]} : vector<2x1024xf32> to vector<2x256xf32>
    %69 = arith.negf %68 : vector<2x256xf32>
    %70 = math.exp %69 : vector<2x256xf32>
    %cst_42 = arith.constant 1.000000e+00 : f32
    %71 = vector.broadcast %cst_42 : f32 to vector<2x256xf32>
    %72 = arith.addf %71, %70 : vector<2x256xf32>
    %73 = arith.divf %71, %72 : vector<2x256xf32>
    %74 = vector.extract_strided_slice %61 {offsets = [0, 512], sizes = [2, 256], strides = [1, 1]} : vector<2x1024xf32> to vector<2x256xf32>
    %75 = math.tanh %74 : vector<2x256xf32>
    %76 = vector.extract_strided_slice %61 {offsets = [0, 768], sizes = [2, 256], strides = [1, 1]} : vector<2x1024xf32> to vector<2x256xf32>
    %77 = arith.negf %76 : vector<2x256xf32>
    %78 = math.exp %77 : vector<2x256xf32>
    %cst_43 = arith.constant 1.000000e+00 : f32
    %79 = vector.broadcast %cst_43 : f32 to vector<2x256xf32>
    %80 = arith.addf %79, %78 : vector<2x256xf32>
    %81 = arith.divf %79, %80 : vector<2x256xf32>
    %82 = arith.mulf %73, %58 : vector<2x256xf32>
    %83 = arith.mulf %67, %75 : vector<2x256xf32>
    %84 = arith.addf %82, %83 : vector<2x256xf32>
    %85 = math.tanh %84 : vector<2x256xf32>
    %86 = arith.mulf %81, %85 : vector<2x256xf32>
    %c0_44 = arith.constant 0 : index
    %c0_45 = arith.constant 0 : index
    %87 = vector.load %arg15[%c0_44, %c0_45] : memref<16x256xf32, #tpu.memory_space<vmem>>, vector<2x256xf32>
    tpu.vector_store %arg15[%c0_44, %c0_45], %86 {strides = array<i32>} : memref<16x256xf32, #tpu.memory_space<vmem>>, vector<2x256xf32>,
    %c2 = arith.constant 2 : index
    %c0_46 = arith.constant 0 : index
    %88 = vector.load %arg14[%c2, %c0_46] : memref<16x1024xf32, #tpu.memory_space<vmem>>, vector<2x1024xf32>
    %cst_47 = arith.constant dense<0.000000e+00> : vector<2x1024xf32>
    %89 = tpu.matmul %86, %56, %cst_47 {dimension_numbers = #tpu.dot_dimension_numbers<[1], [0], [0], [1], [0, 0, 1, 1], [], []>} : vector<2x256xf32>, vector<256x1024xf32>, vector<2x1024xf32> -> vector<2x1024xf32>
    %90 = arith.addf %88, %89 : vector<2x1024xf32>
    %91 = vector.extract_strided_slice %90 {offsets = [0, 0], sizes = [2, 256], strides = [1, 1]} : vector<2x1024xf32> to vector<2x256xf32>
    %92 = arith.negf %91 : vector<2x256xf32>
    %93 = math.exp %92 : vector<2x256xf32>
    %cst_48 = arith.constant 1.000000e+00 : f32
    %94 = vector.broadcast %cst_48 : f32 to vector<2x256xf32>
    %95 = arith.addf %94, %93 : vector<2x256xf32>
    %96 = arith.divf %94, %95 : vector<2x256xf32>
    %97 = vector.extract_strided_slice %90 {offsets = [0, 256], sizes = [2, 256], strides = [1, 1]} : vector<2x1024xf32> to vector<2x256xf32>
    %98 = arith.negf %97 : vector<2x256xf32>
    %99 = math.exp %98 : vector<2x256xf32>
    %cst_49 = arith.constant 1.000000e+00 : f32
    %100 = vector.broadcast %cst_49 : f32 to vector<2x256xf32>
    %101 = arith.addf %100, %99 : vector<2x256xf32>
    %102 = arith.divf %100, %101 : vector<2x256xf32>
    %103 = vector.extract_strided_slice %90 {offsets = [0, 512], sizes = [2, 256], strides = [1, 1]} : vector<2x1024xf32> to vector<2x256xf32>
    %104 = math.tanh %103 : vector<2x256xf32>
    %105 = vector.extract_strided_slice %90 {offsets = [0, 768], sizes = [2, 256], strides = [1, 1]} : vector<2x1024xf32> to vector<2x256xf32>
    %106 = arith.negf %105 : vector<2x256xf32>
    %107 = math.exp %106 : vector<2x256xf32>
    %cst_50 = arith.constant 1.000000e+00 : f32
    %108 = vector.broadcast %cst_50 : f32 to vector<2x256xf32>
    %109 = arith.addf %108, %107 : vector<2x256xf32>
    %110 = arith.divf %108, %109 : vector<2x256xf32>
    %111 = arith.mulf %102, %84 : vector<2x256xf32>
    %112 = arith.mulf %96, %104 : vector<2x256xf32>
    %113 = arith.addf %111, %112 : vector<2x256xf32>
    %114 = math.tanh %113 : vector<2x256xf32>
    %115 = arith.mulf %110, %114 : vector<2x256xf32>
    %c2_51 = arith.constant 2 : index
    %c0_52 = arith.constant 0 : index
    %116 = vector.load %arg15[%c2_51, %c0_52] : memref<16x256xf32, #tpu.memory_space<vmem>>, vector<2x256xf32>
    tpu.vector_store %arg15[%c2_51, %c0_52], %115 {strides = array<i32>} : memref<16x256xf32, #tpu.memory_space<vmem>>, vector<2x256xf32>,
    %c4 = arith.constant 4 : index
    %c0_53 = arith.constant 0 : index
    %117 = vector.load %arg14[%c4, %c0_53] : memref<16x1024xf32, #tpu.memory_space<vmem>>, vector<2x1024xf32>
    %cst_54 = arith.constant dense<0.000000e+00> : vector<2x1024xf32>
    %118 = tpu.matmul %115, %56, %cst_54 {dimension_numbers = #tpu.dot_dimension_numbers<[1], [0], [0], [1], [0, 0, 1, 1], [], []>} : vector<2x256xf32>, vector<256x1024xf32>, vector<2x1024xf32> -> vector<2x1024xf32>
    %119 = arith.addf %117, %118 : vector<2x1024xf32>
    %120 = vector.extract_strided_slice %119 {offsets = [0, 0], sizes = [2, 256], strides = [1, 1]} : vector<2x1024xf32> to vector<2x256xf32>
    %121 = arith.negf %120 : vector<2x256xf32>
    %122 = math.exp %121 : vector<2x256xf32>
    %cst_55 = arith.constant 1.000000e+00 : f32
    %123 = vector.broadcast %cst_55 : f32 to vector<2x256xf32>
    %124 = arith.addf %123, %122 : vector<2x256xf32>
    %125 = arith.divf %123, %124 : vector<2x256xf32>
    %126 = vector.extract_strided_slice %119 {offsets = [0, 256], sizes = [2, 256], strides = [1, 1]} : vector<2x1024xf32> to vector<2x256xf32>
    %127 = arith.negf %126 : vector<2x256xf32>
    %128 = math.exp %127 : vector<2x256xf32>
    %cst_56 = arith.constant 1.000000e+00 : f32
    %129 = vector.broadcast %cst_56 : f32 to vector<2x256xf32>
    %130 = arith.addf %129, %128 : vector<2x256xf32>
    %131 = arith.divf %129, %130 : vector<2x256xf32>
    %132 = vector.extract_strided_slice %119 {offsets = [0, 512], sizes = [2, 256], strides = [1, 1]} : vector<2x1024xf32> to vector<2x256xf32>
    %133 = math.tanh %132 : vector<2x256xf32>
    %134 = vector.extract_strided_slice %119 {offsets = [0, 768], sizes = [2, 256], strides = [1, 1]} : vector<2x1024xf32> to vector<2x256xf32>
    %135 = arith.negf %134 : vector<2x256xf32>
    %136 = math.exp %135 : vector<2x256xf32>
    %cst_57 = arith.constant 1.000000e+00 : f32
    %137 = vector.broadcast %cst_57 : f32 to vector<2x256xf32>
    %138 = arith.addf %137, %136 : vector<2x256xf32>
    %139 = arith.divf %137, %138 : vector<2x256xf32>
    %140 = arith.mulf %131, %113 : vector<2x256xf32>
    %141 = arith.mulf %125, %133 : vector<2x256xf32>
    %142 = arith.addf %140, %141 : vector<2x256xf32>
    %143 = math.tanh %142 : vector<2x256xf32>
    %144 = arith.mulf %139, %143 : vector<2x256xf32>
    %c4_58 = arith.constant 4 : index
    %c0_59 = arith.constant 0 : index
    %145 = vector.load %arg15[%c4_58, %c0_59] : memref<16x256xf32, #tpu.memory_space<vmem>>, vector<2x256xf32>
    tpu.vector_store %arg15[%c4_58, %c0_59], %144 {strides = array<i32>} : memref<16x256xf32, #tpu.memory_space<vmem>>, vector<2x256xf32>,
    %c6 = arith.constant 6 : index
    %c0_60 = arith.constant 0 : index
    %146 = vector.load %arg14[%c6, %c0_60] : memref<16x1024xf32, #tpu.memory_space<vmem>>, vector<2x1024xf32>
    %cst_61 = arith.constant dense<0.000000e+00> : vector<2x1024xf32>
    %147 = tpu.matmul %144, %56, %cst_61 {dimension_numbers = #tpu.dot_dimension_numbers<[1], [0], [0], [1], [0, 0, 1, 1], [], []>} : vector<2x256xf32>, vector<256x1024xf32>, vector<2x1024xf32> -> vector<2x1024xf32>
    %148 = arith.addf %146, %147 : vector<2x1024xf32>
    %149 = vector.extract_strided_slice %148 {offsets = [0, 0], sizes = [2, 256], strides = [1, 1]} : vector<2x1024xf32> to vector<2x256xf32>
    %150 = arith.negf %149 : vector<2x256xf32>
    %151 = math.exp %150 : vector<2x256xf32>
    %cst_62 = arith.constant 1.000000e+00 : f32
    %152 = vector.broadcast %cst_62 : f32 to vector<2x256xf32>
    %153 = arith.addf %152, %151 : vector<2x256xf32>
    %154 = arith.divf %152, %153 : vector<2x256xf32>
    %155 = vector.extract_strided_slice %148 {offsets = [0, 256], sizes = [2, 256], strides = [1, 1]} : vector<2x1024xf32> to vector<2x256xf32>
    %156 = arith.negf %155 : vector<2x256xf32>
    %157 = math.exp %156 : vector<2x256xf32>
    %cst_63 = arith.constant 1.000000e+00 : f32
    %158 = vector.broadcast %cst_63 : f32 to vector<2x256xf32>
    %159 = arith.addf %158, %157 : vector<2x256xf32>
    %160 = arith.divf %158, %159 : vector<2x256xf32>
    %161 = vector.extract_strided_slice %148 {offsets = [0, 512], sizes = [2, 256], strides = [1, 1]} : vector<2x1024xf32> to vector<2x256xf32>
    %162 = math.tanh %161 : vector<2x256xf32>
    %163 = vector.extract_strided_slice %148 {offsets = [0, 768], sizes = [2, 256], strides = [1, 1]} : vector<2x1024xf32> to vector<2x256xf32>
    %164 = arith.negf %163 : vector<2x256xf32>
    %165 = math.exp %164 : vector<2x256xf32>
    %cst_64 = arith.constant 1.000000e+00 : f32
    %166 = vector.broadcast %cst_64 : f32 to vector<2x256xf32>
    %167 = arith.addf %166, %165 : vector<2x256xf32>
    %168 = arith.divf %166, %167 : vector<2x256xf32>
    %169 = arith.mulf %160, %142 : vector<2x256xf32>
    %170 = arith.mulf %154, %162 : vector<2x256xf32>
    %171 = arith.addf %169, %170 : vector<2x256xf32>
    %172 = math.tanh %171 : vector<2x256xf32>
    %173 = arith.mulf %168, %172 : vector<2x256xf32>
    %c6_65 = arith.constant 6 : index
    %c0_66 = arith.constant 0 : index
    %174 = vector.load %arg15[%c6_65, %c0_66] : memref<16x256xf32, #tpu.memory_space<vmem>>, vector<2x256xf32>
    tpu.vector_store %arg15[%c6_65, %c0_66], %173 {strides = array<i32>} : memref<16x256xf32, #tpu.memory_space<vmem>>, vector<2x256xf32>,
    %c8 = arith.constant 8 : index
    %c0_67 = arith.constant 0 : index
    %175 = vector.load %arg14[%c8, %c0_67] : memref<16x1024xf32, #tpu.memory_space<vmem>>, vector<2x1024xf32>
    %cst_68 = arith.constant dense<0.000000e+00> : vector<2x1024xf32>
    %176 = tpu.matmul %173, %56, %cst_68 {dimension_numbers = #tpu.dot_dimension_numbers<[1], [0], [0], [1], [0, 0, 1, 1], [], []>} : vector<2x256xf32>, vector<256x1024xf32>, vector<2x1024xf32> -> vector<2x1024xf32>
    %177 = arith.addf %175, %176 : vector<2x1024xf32>
    %178 = vector.extract_strided_slice %177 {offsets = [0, 0], sizes = [2, 256], strides = [1, 1]} : vector<2x1024xf32> to vector<2x256xf32>
    %179 = arith.negf %178 : vector<2x256xf32>
    %180 = math.exp %179 : vector<2x256xf32>
    %cst_69 = arith.constant 1.000000e+00 : f32
    %181 = vector.broadcast %cst_69 : f32 to vector<2x256xf32>
    %182 = arith.addf %181, %180 : vector<2x256xf32>
    %183 = arith.divf %181, %182 : vector<2x256xf32>
    %184 = vector.extract_strided_slice %177 {offsets = [0, 256], sizes = [2, 256], strides = [1, 1]} : vector<2x1024xf32> to vector<2x256xf32>
    %185 = arith.negf %184 : vector<2x256xf32>
    %186 = math.exp %185 : vector<2x256xf32>
    %cst_70 = arith.constant 1.000000e+00 : f32
    %187 = vector.broadcast %cst_70 : f32 to vector<2x256xf32>
    %188 = arith.addf %187, %186 : vector<2x256xf32>
    %189 = arith.divf %187, %188 : vector<2x256xf32>
    %190 = vector.extract_strided_slice %177 {offsets = [0, 512], sizes = [2, 256], strides = [1, 1]} : vector<2x1024xf32> to vector<2x256xf32>
    %191 = math.tanh %190 : vector<2x256xf32>
    %192 = vector.extract_strided_slice %177 {offsets = [0, 768], sizes = [2, 256], strides = [1, 1]} : vector<2x1024xf32> to vector<2x256xf32>
    %193 = arith.negf %192 : vector<2x256xf32>
    %194 = math.exp %193 : vector<2x256xf32>
    %cst_71 = arith.constant 1.000000e+00 : f32
    %195 = vector.broadcast %cst_71 : f32 to vector<2x256xf32>
    %196 = arith.addf %195, %194 : vector<2x256xf32>
    %197 = arith.divf %195, %196 : vector<2x256xf32>
    %198 = arith.mulf %189, %171 : vector<2x256xf32>
    %199 = arith.mulf %183, %191 : vector<2x256xf32>
    %200 = arith.addf %198, %199 : vector<2x256xf32>
    %201 = math.tanh %200 : vector<2x256xf32>
    %202 = arith.mulf %197, %201 : vector<2x256xf32>
    %c8_72 = arith.constant 8 : index
    %c0_73 = arith.constant 0 : index
    %203 = vector.load %arg15[%c8_72, %c0_73] : memref<16x256xf32, #tpu.memory_space<vmem>>, vector<2x256xf32>
    tpu.vector_store %arg15[%c8_72, %c0_73], %202 {strides = array<i32>} : memref<16x256xf32, #tpu.memory_space<vmem>>, vector<2x256xf32>,
    %c10 = arith.constant 10 : index
    %c0_74 = arith.constant 0 : index
    %204 = vector.load %arg14[%c10, %c0_74] : memref<16x1024xf32, #tpu.memory_space<vmem>>, vector<2x1024xf32>
    %cst_75 = arith.constant dense<0.000000e+00> : vector<2x1024xf32>
    %205 = tpu.matmul %202, %56, %cst_75 {dimension_numbers = #tpu.dot_dimension_numbers<[1], [0], [0], [1], [0, 0, 1, 1], [], []>} : vector<2x256xf32>, vector<256x1024xf32>, vector<2x1024xf32> -> vector<2x1024xf32>
    %206 = arith.addf %204, %205 : vector<2x1024xf32>
    %207 = vector.extract_strided_slice %206 {offsets = [0, 0], sizes = [2, 256], strides = [1, 1]} : vector<2x1024xf32> to vector<2x256xf32>
    %208 = arith.negf %207 : vector<2x256xf32>
    %209 = math.exp %208 : vector<2x256xf32>
    %cst_76 = arith.constant 1.000000e+00 : f32
    %210 = vector.broadcast %cst_76 : f32 to vector<2x256xf32>
    %211 = arith.addf %210, %209 : vector<2x256xf32>
    %212 = arith.divf %210, %211 : vector<2x256xf32>
    %213 = vector.extract_strided_slice %206 {offsets = [0, 256], sizes = [2, 256], strides = [1, 1]} : vector<2x1024xf32> to vector<2x256xf32>
    %214 = arith.negf %213 : vector<2x256xf32>
    %215 = math.exp %214 : vector<2x256xf32>
    %cst_77 = arith.constant 1.000000e+00 : f32
    %216 = vector.broadcast %cst_77 : f32 to vector<2x256xf32>
    %217 = arith.addf %216, %215 : vector<2x256xf32>
    %218 = arith.divf %216, %217 : vector<2x256xf32>
    %219 = vector.extract_strided_slice %206 {offsets = [0, 512], sizes = [2, 256], strides = [1, 1]} : vector<2x1024xf32> to vector<2x256xf32>
    %220 = math.tanh %219 : vector<2x256xf32>
    %221 = vector.extract_strided_slice %206 {offsets = [0, 768], sizes = [2, 256], strides = [1, 1]} : vector<2x1024xf32> to vector<2x256xf32>
    %222 = arith.negf %221 : vector<2x256xf32>
    %223 = math.exp %222 : vector<2x256xf32>
    %cst_78 = arith.constant 1.000000e+00 : f32
    %224 = vector.broadcast %cst_78 : f32 to vector<2x256xf32>
    %225 = arith.addf %224, %223 : vector<2x256xf32>
    %226 = arith.divf %224, %225 : vector<2x256xf32>
    %227 = arith.mulf %218, %200 : vector<2x256xf32>
    %228 = arith.mulf %212, %220 : vector<2x256xf32>
    %229 = arith.addf %227, %228 : vector<2x256xf32>
    %230 = math.tanh %229 : vector<2x256xf32>
    %231 = arith.mulf %226, %230 : vector<2x256xf32>
    %c10_79 = arith.constant 10 : index
    %c0_80 = arith.constant 0 : index
    %232 = vector.load %arg15[%c10_79, %c0_80] : memref<16x256xf32, #tpu.memory_space<vmem>>, vector<2x256xf32>
    tpu.vector_store %arg15[%c10_79, %c0_80], %231 {strides = array<i32>} : memref<16x256xf32, #tpu.memory_space<vmem>>, vector<2x256xf32>,
    %c12 = arith.constant 12 : index
    %c0_81 = arith.constant 0 : index
    %233 = vector.load %arg14[%c12, %c0_81] : memref<16x1024xf32, #tpu.memory_space<vmem>>, vector<2x1024xf32>
    %cst_82 = arith.constant dense<0.000000e+00> : vector<2x1024xf32>
    %234 = tpu.matmul %231, %56, %cst_82 {dimension_numbers = #tpu.dot_dimension_numbers<[1], [0], [0], [1], [0, 0, 1, 1], [], []>} : vector<2x256xf32>, vector<256x1024xf32>, vector<2x1024xf32> -> vector<2x1024xf32>
    %235 = arith.addf %233, %234 : vector<2x1024xf32>
    %236 = vector.extract_strided_slice %235 {offsets = [0, 0], sizes = [2, 256], strides = [1, 1]} : vector<2x1024xf32> to vector<2x256xf32>
    %237 = arith.negf %236 : vector<2x256xf32>
    %238 = math.exp %237 : vector<2x256xf32>
    %cst_83 = arith.constant 1.000000e+00 : f32
    %239 = vector.broadcast %cst_83 : f32 to vector<2x256xf32>
    %240 = arith.addf %239, %238 : vector<2x256xf32>
    %241 = arith.divf %239, %240 : vector<2x256xf32>
    %242 = vector.extract_strided_slice %235 {offsets = [0, 256], sizes = [2, 256], strides = [1, 1]} : vector<2x1024xf32> to vector<2x256xf32>
    %243 = arith.negf %242 : vector<2x256xf32>
    %244 = math.exp %243 : vector<2x256xf32>
    %cst_84 = arith.constant 1.000000e+00 : f32
    %245 = vector.broadcast %cst_84 : f32 to vector<2x256xf32>
    %246 = arith.addf %245, %244 : vector<2x256xf32>
    %247 = arith.divf %245, %246 : vector<2x256xf32>
    %248 = vector.extract_strided_slice %235 {offsets = [0, 512], sizes = [2, 256], strides = [1, 1]} : vector<2x1024xf32> to vector<2x256xf32>
    %249 = math.tanh %248 : vector<2x256xf32>
    %250 = vector.extract_strided_slice %235 {offsets = [0, 768], sizes = [2, 256], strides = [1, 1]} : vector<2x1024xf32> to vector<2x256xf32>
    %251 = arith.negf %250 : vector<2x256xf32>
    %252 = math.exp %251 : vector<2x256xf32>
    %cst_85 = arith.constant 1.000000e+00 : f32
    %253 = vector.broadcast %cst_85 : f32 to vector<2x256xf32>
    %254 = arith.addf %253, %252 : vector<2x256xf32>
    %255 = arith.divf %253, %254 : vector<2x256xf32>
    %256 = arith.mulf %247, %229 : vector<2x256xf32>
    %257 = arith.mulf %241, %249 : vector<2x256xf32>
    %258 = arith.addf %256, %257 : vector<2x256xf32>
    %259 = math.tanh %258 : vector<2x256xf32>
    %260 = arith.mulf %255, %259 : vector<2x256xf32>
    %c12_86 = arith.constant 12 : index
    %c0_87 = arith.constant 0 : index
    %261 = vector.load %arg15[%c12_86, %c0_87] : memref<16x256xf32, #tpu.memory_space<vmem>>, vector<2x256xf32>
    tpu.vector_store %arg15[%c12_86, %c0_87], %260 {strides = array<i32>} : memref<16x256xf32, #tpu.memory_space<vmem>>, vector<2x256xf32>,
    %c14 = arith.constant 14 : index
    %c0_88 = arith.constant 0 : index
    %262 = vector.load %arg14[%c14, %c0_88] : memref<16x1024xf32, #tpu.memory_space<vmem>>, vector<2x1024xf32>
    %cst_89 = arith.constant dense<0.000000e+00> : vector<2x1024xf32>
    %263 = tpu.matmul %260, %56, %cst_89 {dimension_numbers = #tpu.dot_dimension_numbers<[1], [0], [0], [1], [0, 0, 1, 1], [], []>} : vector<2x256xf32>, vector<256x1024xf32>, vector<2x1024xf32> -> vector<2x1024xf32>
    %264 = arith.addf %262, %263 : vector<2x1024xf32>
    %265 = vector.extract_strided_slice %264 {offsets = [0, 0], sizes = [2, 256], strides = [1, 1]} : vector<2x1024xf32> to vector<2x256xf32>
    %266 = arith.negf %265 : vector<2x256xf32>
    %267 = math.exp %266 : vector<2x256xf32>
    %cst_90 = arith.constant 1.000000e+00 : f32
    %268 = vector.broadcast %cst_90 : f32 to vector<2x256xf32>
    %269 = arith.addf %268, %267 : vector<2x256xf32>
    %270 = arith.divf %268, %269 : vector<2x256xf32>
    %271 = vector.extract_strided_slice %264 {offsets = [0, 256], sizes = [2, 256], strides = [1, 1]} : vector<2x1024xf32> to vector<2x256xf32>
    %272 = arith.negf %271 : vector<2x256xf32>
    %273 = math.exp %272 : vector<2x256xf32>
    %cst_91 = arith.constant 1.000000e+00 : f32
    %274 = vector.broadcast %cst_91 : f32 to vector<2x256xf32>
    %275 = arith.addf %274, %273 : vector<2x256xf32>
    %276 = arith.divf %274, %275 : vector<2x256xf32>
    %277 = vector.extract_strided_slice %264 {offsets = [0, 512], sizes = [2, 256], strides = [1, 1]} : vector<2x1024xf32> to vector<2x256xf32>
    %278 = math.tanh %277 : vector<2x256xf32>
    %279 = vector.extract_strided_slice %264 {offsets = [0, 768], sizes = [2, 256], strides = [1, 1]} : vector<2x1024xf32> to vector<2x256xf32>
    %280 = arith.negf %279 : vector<2x256xf32>
    %281 = math.exp %280 : vector<2x256xf32>
    %cst_92 = arith.constant 1.000000e+00 : f32
    %282 = vector.broadcast %cst_92 : f32 to vector<2x256xf32>
    %283 = arith.addf %282, %281 : vector<2x256xf32>
    %284 = arith.divf %282, %283 : vector<2x256xf32>
    %285 = arith.mulf %276, %258 : vector<2x256xf32>
    %286 = arith.mulf %270, %278 : vector<2x256xf32>
    %287 = arith.addf %285, %286 : vector<2x256xf32>
    %288 = math.tanh %287 : vector<2x256xf32>
    %289 = arith.mulf %284, %288 : vector<2x256xf32>
    %c14_93 = arith.constant 14 : index
    %c0_94 = arith.constant 0 : index
    %290 = vector.load %arg15[%c14_93, %c0_94] : memref<16x256xf32, #tpu.memory_space<vmem>>, vector<2x256xf32>
    tpu.vector_store %arg15[%c14_93, %c0_94], %289 {strides = array<i32>} : memref<16x256xf32, #tpu.memory_space<vmem>>, vector<2x256xf32>,
    %c0_95 = arith.constant 0 : index
    %c0_96 = arith.constant 0 : index
    %291 = vector.load %arg15[%c0_95, %c0_96] : memref<16x256xf32, #tpu.memory_space<vmem>>, vector<16x256xf32>
    %c0_97 = arith.constant 0 : index
    %c0_98 = arith.constant 0 : index
    %292 = vector.load %arg11[%c0_97, %c0_98] : memref<256x64xf32, #tpu.memory_space<vmem>>, vector<256x64xf32>
    %cst_99 = arith.constant dense<0.000000e+00> : vector<16x64xf32>
    %293 = tpu.matmul %291, %292, %cst_99 {dimension_numbers = #tpu.dot_dimension_numbers<[1], [0], [0], [1], [0, 0, 1, 1], [], []>} : vector<16x256xf32>, vector<256x64xf32>, vector<16x64xf32> -> vector<16x64xf32>
    %c0_100 = arith.constant 0 : index
    %c0_101 = arith.constant 0 : index
    %294 = vector.load %arg12[%c0_100, %c0_101] : memref<1x64xf32, #tpu.memory_space<vmem>>, vector<1x64xf32>
    %295 = vector.broadcast %294 : vector<1x64xf32> to vector<16x64xf32>
    %296 = arith.addf %293, %295 : vector<16x64xf32>
    %c0_102 = arith.constant 0 : index
    %c0_103 = arith.constant 0 : index
    %297 = vector.load %arg13[%c0_102, %c0_103] : memref<16x64xf32, #tpu.memory_space<vmem>>, vector<16x64xf32>
    tpu.vector_store %arg13[%c0_102, %c0_103], %296 {strides = array<i32>} : memref<16x64xf32, #tpu.memory_space<vmem>>, vector<16x64xf32>,
    return
  }
  func.func @transform_0(%arg0: i32) -> (i32, i32) {
    %c0_i32 = arith.constant 0 : i32
    %c0_i32_0 = arith.constant 0 : i32
    %c0_i32_1 = arith.constant 0 : i32
    return %c0_i32, %c0_i32_0 : i32, i32
  }
  func.func @transform_1(%arg0: i32) -> (i32, i32) {
    %c0_i32 = arith.constant 0 : i32
    %c0_i32_0 = arith.constant 0 : i32
    %c0_i32_1 = arith.constant 0 : i32
    return %c0_i32, %c0_i32_0 : i32, i32
  }
  func.func @transform_2(%arg0: i32) -> (i32, i32) {
    %c0_i32 = arith.constant 0 : i32
    %c0_i32_0 = arith.constant 0 : i32
    %c0_i32_1 = arith.constant 0 : i32
    return %c0_i32, %c0_i32_0 : i32, i32
  }
  func.func @transform_3(%arg0: i32) -> (i32, i32) {
    %c0_i32 = arith.constant 0 : i32
    %c0_i32_0 = arith.constant 0 : i32
    %c0_i32_1 = arith.constant 0 : i32
    return %c0_i32, %c0_i32_0 : i32, i32
  }
  func.func @transform_4(%arg0: i32) -> (i32, i32) {
    %c0_i32 = arith.constant 0 : i32
    %c0_i32_0 = arith.constant 0 : i32
    %c0_i32_1 = arith.constant 0 : i32
    return %c0_i32, %c0_i32_0 : i32, i32
  }
  func.func @transform_5(%arg0: i32) -> (i32, i32) {
    %c0_i32 = arith.constant 0 : i32
    %c0_i32_0 = arith.constant 0 : i32
    %c0_i32_1 = arith.constant 0 : i32
    return %c0_i32, %c0_i32_0 : i32, i32
  }
  func.func @transform_6(%arg0: i32) -> (i32, i32) {
    %c0_i32 = arith.constant 0 : i32
    %c0_i32_0 = arith.constant 0 : i32
    %c0_i32_1 = arith.constant 0 : i32
    return %c0_i32, %c0_i32_0 : i32, i32
  }
  func.func @transform_7(%arg0: i32) -> (i32, i32) {
    %c0_i32 = arith.constant 0 : i32
    %c0_i32_0 = arith.constant 0 : i32
    %c0_i32_1 = arith.constant 0 : i32
    return %c0_i32, %c0_i32_0 : i32, i32
  }
  func.func @transform_8(%arg0: i32) -> (i32, i32) {
    %c0_i32 = arith.constant 0 : i32
    %c0_i32_0 = arith.constant 0 : i32
    %c0_i32_1 = arith.constant 0 : i32
    return %c0_i32, %c0_i32_0 : i32, i32
  }
  func.func @transform_9(%arg0: i32) -> (i32, i32) {
    %c0_i32 = arith.constant 0 : i32
    %c0_i32_0 = arith.constant 0 : i32
    %c0_i32_1 = arith.constant 0 : i32
    return %c0_i32, %c0_i32_0 : i32, i32
  }
  func.func @transform_10(%arg0: i32) -> (i32, i32) {
    %c0_i32 = arith.constant 0 : i32
    %c0_i32_0 = arith.constant 0 : i32
    %c0_i32_1 = arith.constant 0 : i32
    return %c0_i32, %c0_i32_0 : i32, i32
  }
  func.func @transform_11(%arg0: i32) -> (i32, i32) {
    %c0_i32 = arith.constant 0 : i32
    %c0_i32_0 = arith.constant 0 : i32
    %c0_i32_1 = arith.constant 0 : i32
    return %c0_i32, %c0_i32_0 : i32, i32
  }
  func.func @transform_12(%arg0: i32) -> (i32, i32) {
    %c0_i32 = arith.constant 0 : i32
    %c0_i32_0 = arith.constant 0 : i32
    %c0_i32_1 = arith.constant 0 : i32
    return %c0_i32, %c0_i32_0 : i32, i32
  }
}

</mosaic_0001>

<bundles_post_ra>
// kernel: model_forward.1
= control target key start
LH: loop header
LB: loop body
LE: loop exit
PB: predicated region body
PF: predicated region fallthrough
CT: control target
= control target key end

     0   :  { %17 = vsyncpa [#allocation5], 0  ;;  %s10464_s0 = inlined_call_operand.vmem [shape: f32[144,6], index: 0, kind: input, shape index: {}]   ;;  %s10465_s1 = inlined_call_operand.vmem [shape: f32[6,64], index: 1, kind: input, shape index: {}]   ;;  %s10466_s2 = inlined_call_operand.vmem [shape: f32[1,64], index: 2, kind: input, shape index: {}]   ;;  %s10467_s3 = inlined_call_operand.hbm [shape: f32[192,256], index: 3, kind: input, shape index: {}]   ;;  %s10468_s4 = inlined_call_operand.vmem [shape: f32[1,256], index: 4, kind: input, shape index: {}]   ;;  %s10469_s5 = inlined_call_operand.vmem [shape: f32[768,256], index: 5, kind: input, shape index: {}]   ;;  %s10470_s6 = inlined_call_operand.vmem [shape: f32[1,256], index: 6, kind: input, shape index: {}]   ;;  %s10471_s7 = inlined_call_operand.hbm [shape: f32[256,1024], index: 7, kind: input, shape index: {}]   ;;  %s10472_s8 = inlined_call_operand.vmem [shape: f32[1,1024], index: 8, kind: input, shape index: {}]   ;;  %s10473_s9 = inlined_call_operand.hbm [shape: f32[256,1024], index: 9, kind: input, shape index: {}]   ;;  %s10474_s10 = inlined_call_operand.vmem [shape: f32[256,64], index: 10, kind: input, shape index: {}]   ;;  %s10475_s11 = inlined_call_operand.vmem [shape: f32[1,64], index: 11, kind: input, shape index: {}]   ;;  %s10476_s12 = inlined_call_operand.vmem [shape: f32[16,64], index: 12, kind: output, shape index: {}]  }
   0x1   :  { %18 = vsyncpa [#allocation7], 0  ;;  %s8201_s21 = smov [#allocation6]   ;;  %s8131_s25 = scalar_lea.hbm %s10471_s7, 32768 }
   0x2   :  { %s48_s22 = sshll.u32 %s8201_s21, 4  ;;  %p8132_p0 = scmp.ne.s32.totalorder %s10471_s7, %s8131_s25  ;;  %s49_s22 = int_to_ptr.vmem [resolvable:$true] %s48_s22 }
   0x3   :  { %p8135_p1 = scmp.lt.u32.totalorder %s8131_s25, %s10471_s7 }
   0x5   :  { %p8137_p2 = pnand %p8135_p1, %p8132_p0 }
   0x7   :  { %8140 = shalt.err (!%p8137_p2)
}
   0x8   :  { %s8141_s30 = scalar_lea.vmem %s49_s22, 32768  ;;  %p8146_p4 = scmp.lt.s32.totalorder %s49_s22, %s49_s22 }
   0x9   :  { %p8142_p3 = scmp.ne.s32.totalorder %s49_s22, %s8141_s30  ;;  %p8147_p5 = scmp.lt.s32.totalorder %s8141_s30, %s8141_s30 }
   0xb   :  { %p8148_p6 = por %p8147_p5, %p8146_p4 }
   0xd   :  { %p8149_p7 = pnand %p8148_p6, %p8142_p3 }
   0xf   :  { %8152 = shalt.err (!%p8149_p7)
}
  0x10   :  { %s8202_s13 = smov 1024   ;;  %s8203_s14 = smov 64  }
  0x11   :  { %54 = dma.hbm_to_vmem [thread:$0]  %s10471_s7, 32768, %s49_s22, [#allocation7], %s8202_s13, %s8202_s13, %s8203_s14  }
  0x12   :  { %s8204_s17 = smov [#allocation4]   ;;  %s8153_s21 = scalar_lea.hbm %s10467_s3, 6144 }
  0x13   :  { %s30_s18 = sshll.u32 %s8204_s17, 4  ;;  %p8154_p8 = scmp.ne.s32.totalorder %s10467_s3, %s8153_s21  ;;  %s31_s18 = int_to_ptr.vmem [resolvable:$true] %s30_s18 }
  0x14   :  { %p8157_p9 = scmp.lt.u32.totalorder %s8153_s21, %s10467_s3 }
  0x16   :  { %p8159_p10 = pnand %p8157_p9, %p8154_p8 }
  0x18   :  { %8162 = shalt.err (!%p8159_p10)
}
  0x19   :  { %s8163_s27 = scalar_lea.vmem %s31_s18, 6144  ;;  %p8168_p12 = scmp.lt.s32.totalorder %s31_s18, %s31_s18 }
  0x1a   :  { %p8164_p11 = scmp.ne.s32.totalorder %s31_s18, %s8163_s27  ;;  %p8169_p13 = scmp.lt.s32.totalorder %s8163_s27, %s8163_s27 }
  0x1c   :  { %p8170_p0 = por %p8169_p13, %p8168_p12 }
  0x1e   :  { %p8171_p1 = pnand %p8170_p0, %p8164_p11 }
  0x20   :  { %8174 = shalt.err (!%p8171_p1)
}
  0x21   :  { %s8205_s7 = smov 256   ;;  %s8206_s22 = smov 16  }
  0x22   :  { %36 = dma.hbm_to_vmem [thread:$0]  %s10467_s3, 6144, %s31_s18, [#allocation5], %s8205_s7, %s8205_s7, %s8206_s22  }
  0x23   :  { %s8207_s30 = smov [#allocation8]   ;;  %s8175_s19 = scalar_lea.hbm %s10473_s9, 32768 }
  0x24   :  { %s62_s15 = sshll.u32 %s8207_s30, 4  ;;  %p8176_p2 = scmp.ne.s32.totalorder %s10473_s9, %s8175_s19  ;;  %s63_s15 = int_to_ptr.vmem [resolvable:$true] %s62_s15 }
  0x25   :  { %p8179_p3 = scmp.lt.u32.totalorder %s8175_s19, %s10473_s9 }
  0x27   :  { %p8181_p4 = pnand %p8179_p3, %p8176_p2 }
  0x29   :  { %8184 = shalt.err (!%p8181_p4)
}
  0x2a   :  { %s8185_s25 = scalar_lea.vmem %s63_s15, 32768  ;;  %p8190_p6 = scmp.lt.s32.totalorder %s63_s15, %s63_s15 }
  0x2b   :  { %p8186_p5 = scmp.ne.s32.totalorder %s63_s15, %s8185_s25  ;;  %p8191_p7 = scmp.lt.s32.totalorder %s8185_s25, %s8185_s25 }
  0x2d   :  { %p8192_p8 = por %p8191_p7, %p8190_p6 }
  0x2f   :  { %p8193_p9 = pnand %p8192_p8, %p8186_p5 }
  0x31   :  { %8196 = shalt.err (!%p8193_p9)
}
  0x32   :  { %68 = dma.hbm_to_vmem [thread:$0]  %s10473_s9, 32768, %s63_s15, [#allocation7], %s8202_s13, %s8202_s13, %s8203_s14  }
  0x33   :  { %8197 = dma.done.wait [#allocation5], 6144  }
  0x34   :  { %8198 = vsyncadd [#allocation5], 4294961152 }
  0x35   :  { %8199 = dma.done.wait [#allocation7], 65536  }
  0x36   :  { %8200 = vsyncadd [#allocation7], 4294901760  ;;  %vm163_vm0 = vcmask 1045504   ;;  %vm108_vm1 = vcmask 48128   ;;  %v100_v0 = vld [vmem:[%s10465_s1] sm:$0x3f] }
  0x37   :  { %v82_v1 = vld [vmem:[%s10464_s0] sm:$0xff]  ;;  %v83_v2 = vld [vmem:[%s10464_s0 + $0x8] sm:$0xff]  ;;  %5278 = vmatprep.subr.msk.mxu0 %vm163_vm0, %v100_v0  ;;  %v84_v3 = vld [vmem:[%s10464_s0 + $0x10] sm:$0xff]  ;;  %v10477_v59 = vmov 0.0   ;;  %vm372_vm2 = vcmask 523264  }
  0x38   :  { %5280 = vmatprep.mubr.msk.f32.mxu0 %vm108_vm1, %v82_v1  ;;  %5279 = vmatpush3.msk.msra.mxu0 %vm163_vm0, %v100_v0  ;;  %v85_v4 = vld [vmem:[%s10464_s0 + $0x18] sm:$0xff]  ;;  %v86_v5 = vld [vmem:[%s10464_s0 + $0x20] sm:$0xff]  ;;  %v341_v6 = vld [vmem:[#allocation4 + $0x88] sm:$0xff] }
  0x39   :  { %5281 = vmatmul.mubr.msk.f32.vlgmr.msra.gmra.mrb[0].mxu0 %vm108_vm1, %v83_v2  ;;  %v343_v7 = vld [vmem:[#allocation4 + $0x98] sm:$0xff]  ;;  %v340_v8 = vld [vmem:[#allocation4 + $0x80] sm:$0xff]  ;;  %v342_v9 = vld [vmem:[#allocation4 + $0x90] sm:$0xff]  ;;  %443 = vmatprep.mubr.f32.mxu1 %v10477_v59 }
  0x3a   :  { %5283 = vmatprep.mubr.msk.f32.mxu0 %vm108_vm1, %v84_v3  ;;  %v8337_v10 = vpack.c.bf16 %v343_v7, %v341_v6  ;;  %v8339_v11 = vpack.c.bf16 %v342_v9, %v340_v8  ;;  %v345_v12 = vld [vmem:[#allocation4 + $0xa8] sm:$0xff]  ;;  %v347_v13 = vld [vmem:[#allocation4 + $0xb8] sm:$0xff]  ;;  %v344_v14 = vld [vmem:[#allocation4 + $0xa0] sm:$0xff] }
  0x3b   :  { %v87_v15 = vld [vmem:[%s10464_s0 + $0x28] sm:$0xff]  ;;  %v8344_v16 = vpack.c.bf16 %v347_v13, %v345_v12  ;;  %v346_v17 = vld [vmem:[#allocation4 + $0xb0] sm:$0xff]  ;;  %v359_v19 = vld [vmem:[#allocation4 + $0x118] sm:$0xff] }
  0x3c   :  { %v357_v18 = vld [vmem:[#allocation4 + $0x108] sm:$0xff]  ;;  %5340 = vmatprep.subr.bf16.mxu0 %v8337_v10  ;;  %v356_v21 = vld [vmem:[#allocation4 + $0x100] sm:$0xff]  ;;  %v358_v22 = vld [vmem:[#allocation4 + $0x110] sm:$0xff]  ;;  %v8352_v24 = vpack.c.bf16 %v346_v17, %v344_v14 }
  0x3d   :  { %5284 = vmatmul.mubr.msk.f32.gmra.mrb[2].mxu0 %vm108_vm1, %v85_v4  ;;  %v8348_v20 = vpack.c.bf16 %v359_v19, %v357_v18  ;;  %v361_v23 = vld [vmem:[#allocation4 + $0x128] sm:$0xff]  ;;  %v8354_v25 = vpack.c.bf16 %v358_v22, %v356_v21  ;;  %v363_v26 = vld [vmem:[#allocation4 + $0x138] sm:$0xff]  ;;  %v360_v27 = vld [vmem:[#allocation4 + $0x120] sm:$0xff] }
  0x3e   :  { %5286 = vmatprep.mubr.msk.f32.mxu0 %vm108_vm1, %v86_v5  ;;  %5342 = vmatpush1.bf16.msra.mxu0 %v8339_v11  ;;  %v362_v28 = vld [vmem:[#allocation4 + $0x130] sm:$0xff]  ;;  %v8361_v30 = vpack.c.bf16 %v363_v26, %v361_v23  ;;  %v349_v31 = vld [vmem:[#allocation4 + $0xc8] sm:$0xff]  ;;  %v351_v32 = vld [vmem:[#allocation4 + $0xd8] sm:$0xff] }
  0x3f   :  { %v88_v29 = vld [vmem:[%s10464_s0 + $0x30] sm:$0xff]  ;;  %5344 = vmatprep.subr.bf16.mxu0 %v8344_v16  ;;  %5308 = vmatprep.subr.bf16.mxu1 %v8348_v20  ;;  %v8364_v33 = vpack.c.bf16 %v362_v28, %v360_v27  ;;  %v8366_v34 = vpack.c.bf16 %v351_v32, %v349_v31  ;;  %v89_v35 = vld [vmem:[%s10464_s0 + $0x38] sm:$0xff]  ;;  %v90_v36 = vld [vmem:[%s10464_s0 + $0x40] sm:$0xff] }
  0x40   :  { %5310 = vmatpush1.bf16.msra.mxu1 %v8354_v25  ;;  %v91_v37 = vld [vmem:[%s10464_s0 + $0x48] sm:$0xff]  ;;  %v367_v39 = vld [vmem:[#allocation4 + $0x158] sm:$0xff]  ;;  %v92_v40 = vld [vmem:[%s10464_s0 + $0x50] sm:$0xff] }
  0x41   :  { %5287 = vmatmul.mubr.msk.f32.gmra.mrb[4].mxu0 %vm108_vm1, %v87_v15  ;;  %5312 = vmatprep.subr.bf16.mxu1 %v8361_v30  ;;  %v365_v38 = vld [vmem:[#allocation4 + $0x148] sm:$0xff]  ;;  %v364_v42 = vld [vmem:[#allocation4 + $0x140] sm:$0xff]  ;;  %v366_v43 = vld [vmem:[#allocation4 + $0x150] sm:$0xff] }
  0x42   :  { %5289 = vmatprep.mubr.msk.f32.mxu0 %vm108_vm1, %v88_v29  ;;  %5346 = vmatpush1.bf16.msra.mxu0 %v8352_v24  ;;  %v8389_v41 = vpack.c.bf16 %v367_v39, %v365_v38  ;;  %v93_v44 = vld [vmem:[%s10464_s0 + $0x58] sm:$0xff]  ;;  %v8395_v45 = vpack.c.bf16 %v366_v43, %v364_v42  ;;  %v369_v46 = vld [vmem:[#allocation4 + $0x168] sm:$0xff]  ;;  %v348_v48 = vld [vmem:[#allocation4 + $0xc0] sm:$0xff] }
  0x43   :  { %5348 = vmatprep.subr.bf16.mxu0 %v8366_v34  ;;  %v371_v47 = vld [vmem:[#allocation4 + $0x178] sm:$0xff]  ;;  %v350_v49 = vld [vmem:[#allocation4 + $0xd0] sm:$0xff]  ;;  %v94_v50 = vld [vmem:[%s10464_s0 + $0x60] sm:$0xff] }
  0x44   :  { %5314 = vmatpush1.bf16.msra.mxu1 %v8364_v33  ;;  %v8403_v51 = vpack.c.bf16 %v371_v47, %v369_v46  ;;  %v8405_v52 = vpack.c.bf16 %v350_v49, %v348_v48  ;;  %v95_v53 = vld [vmem:[%s10464_s0 + $0x68] sm:$0xff]  ;;  %v368_v54 = vld [vmem:[#allocation4 + $0x160] sm:$0xff]  ;;  %v370_v55 = vld [vmem:[#allocation4 + $0x170] sm:$0xff] }
  0x45   :  { %5290 = vmatmul.mubr.msk.f32.gmra.mrb[6].mxu0 %vm108_vm1, %v89_v35  ;;  %5316 = vmatprep.subr.bf16.mxu1 %v8389_v41  ;;  %v8413_v56 = vpack.c.bf16 %v370_v55, %v368_v54  ;;  %v96_v57 = vld [vmem:[%s10464_s0 + $0x70] sm:$0xff]  ;;  %v97_v58 = vld [vmem:[%s10464_s0 + $0x78] sm:$0xff]  ;;  %v353_v60 = vld [vmem:[#allocation4 + $0xe8] sm:$0xff] }
  0x46   :  { %5292 = vmatprep.mubr.msk.f32.mxu0 %vm108_vm1, %v90_v36  ;;  %5350 = vmatpush1.bf16.msra.mxu0 %v8405_v52  ;;  %v355_v61 = vld [vmem:[#allocation4 + $0xf8] sm:$0xff]  ;;  %v352_v63 = vld [vmem:[#allocation4 + $0xe0] sm:$0xff]  ;;  %v354_v0 = vld [vmem:[#allocation4 + $0xf0] sm:$0xff] }
  0x47   :  { %v5335_v62 = vpack.c.bf16 %v355_v61, %v353_v60  ;;  %v8427_v1 = vpack.c.bf16 %v354_v0, %v352_v63  ;;  %v98_v2 = vld [vmem:[%s10464_s0 + $0x80] sm:$0xff]  ;;  %v99_v3 = vld [vmem:[%s10464_s0 + $0x88] sm:$0xff]  ;;  %v327_v5 = vld [vmem:[#allocation4 + $0x18] sm:$0xff] }
  0x48   :  { %5318 = vmatpush1.bf16.msra.mxu1 %v8395_v45  ;;  %v325_v4 = vld [vmem:[#allocation4 + $0x8] sm:$0xff]  ;;  %v324_v22 = vld [vmem:[#allocation4] sm:$0xff]  ;;  %v326_v23 = vld [vmem:[#allocation4 + $0x10] sm:$0xff] }
  0x49   :  { %5293 = vmatmul.mubr.msk.f32.gmra.mrb[8].mxu0 %vm108_vm1, %v91_v37  ;;  %5320 = vmatprep.subr.bf16.mxu1 %v8403_v51  ;;  %v5355_v6 = vpack.c.bf16 %v327_v5, %v325_v4  ;;  %v329_v28 = vld [vmem:[#allocation4 + $0x28] sm:$0xff]  ;;  %v331_v29 = vld [vmem:[#allocation4 + $0x38] sm:$0xff]  ;;  %v5357_v31 = vpack.c.bf16 %v326_v23, %v324_v22  ;;  %v330_v35 = vld [vmem:[#allocation4 + $0x30] sm:$0xff] }
  0x4a   :  { %5295 = vmatprep.mubr.msk.f32.mxu0 %vm108_vm1, %v92_v40  ;;  %5352 = vmatprep.subr.bf16.mxu0 %v5335_v62  ;;  %v5359_v37 = vpack.c.bf16 %v331_v29, %v329_v28  ;;  %v333_v38 = vld [vmem:[#allocation4 + $0x48] sm:$0xff]  ;;  %v335_v39 = vld [vmem:[#allocation4 + $0x58] sm:$0xff]  ;;  %v332_v47 = vld [vmem:[#allocation4 + $0x40] sm:$0xff] }
  0x4b   :  { %5354 = vmatpush1.bf16.msra.mxu0 %v8427_v1  ;;  %v887_v42 = vld [vmem:[%s10469_s5 + $0x418] sm:$0xff]  ;;  %v5363_v46 = vpack.c.bf16 %v335_v39, %v333_v38  ;;  %v334_v48 = vld [vmem:[#allocation4 + $0x50] sm:$0xff]  ;;  %v337_v49 = vld [vmem:[#allocation4 + $0x68] sm:$0xff] }
  0x4c   :  { %5322 = vmatpush1.bf16.msra.mxu1 %v8413_v56  ;;  %5356 = vmatprep.subr.bf16.mxu0 %v5355_v6  ;;  %v884_v54 = vld [vmem:[%s10469_s5 + $0x400] sm:$0xff]  ;;  %v889_v55 = vld [vmem:[%s10469_s5 + $0x428] sm:$0xff]  ;;  %v338_v0 = vld [vmem:[#allocation4 + $0x70] sm:$0xff] }
  0x4d   :  { %5296 = vmatmul.mubr.msk.f32.gmra.mrb[10].mxu0 %vm108_vm1, %v93_v44  ;;  %5324 = vmatprep.subr.bf16.mxu1 %v8337_v10  ;;  %v8442_v10 = vld [vmem:[%s10466_s2] ss:$0 sm:$0xff]  ;;  %v893_v5 = vld [vmem:[%s10469_s5 + $0x448] sm:$0xff]  ;;  %v895_v6 = vld [vmem:[%s10469_s5 + $0x458] sm:$0xff] }
  0x4e   :  { %5298 = vmatprep.mubr.msk.f32.mxu0 %vm108_vm1, %v94_v50  ;;  %v339_v50 = vld [vmem:[#allocation4 + $0x78] sm:$0xff]  ;;  %v336_v63 = vld [vmem:[#allocation4 + $0x60] sm:$0xff]  ;;  %v898_v28 = vld [vmem:[%s10469_s5 + $0x470] sm:$0xff] }
  0x4f   :  { %v888_v4 = vld [vmem:[%s10469_s5 + $0x420] sm:$0xff]  ;;  %v906_v39 = vld [vmem:[%s10469_s5 + $0x4b0] sm:$0xff] }
  0x50   :  { %v904_v38 = vld [vmem:[%s10469_s5 + $0x4a0] sm:$0xff] }
  0x51   :  { %5299 = vmatmul.mubr.msk.f32.gmra.mrb[12].mxu0 %vm108_vm1, %v95_v53 }
  0x52   :  { %5301 = vmatprep.mubr.msk.f32.mxu0 %vm108_vm1, %v96_v57  ;;  %v891_v57 = vld [vmem:[%s10469_s5 + $0x438] sm:$0xff] }
  0x55   :  { %5302 = vmatmul.mubr.msk.f32.gmra.mrb[14].mxu0 %vm108_vm1, %v97_v58  ;;  %v5365_v58 = vpack.c.bf16 %v334_v48, %v332_v47 }
  0x56   :  { %5304 = vmatprep.mubr.msk.f32.mxu0 %vm108_vm1, %v98_v2 }
  0x59   :  { %5305 = vmatmul.mubr.msk.f32.gmra.mrb[16].mxu0 %vm108_vm1, %v99_v3  ;;  %v5391_v3 = vpack.c.bf16 %v891_v57, %v889_v55  ;;  %v918_v55 = vld [vmem:[%s10469_s5 + $0x510] sm:$0xff] }
  0x5a   :  { %629 = vmatprep.mubr.f32.mxu0 %v10477_v59 }
 0x10c   :  { %v5282_v7 = vpop.f32.mrb[0].mxu0 }
 0x10d   :  { %v233_v8 = vpop.f32.mrb[1].mxu0  ;;  %v239_v60 = vadd.f32 %v5282_v7, %v8442_v10  ;;  %v5369_v7 = vpack.c.bf16 %v338_v0, %v336_v63 }
 0x10e   :  { %v234_v43 = vadd.f32 %v8442_v10, %v233_v8 }
 0x10f   :  { %v315_v8 = vmax.f32 %v239_v60, 0.0 }
 0x110   :  { %v5285_v9 = vpop.f32.mrb[2].mxu0  ;;  %v314_v61 = vmax.f32 %v234_v43, 0.0  ;;  %v910_v43 = vld [vmem:[%s10469_s5 + $0x4d0] sm:$0xff] }
 0x111   :  { %v243_v12 = vpop.f32.mrb[3].mxu0  ;;  %v249_v14 = vadd.f32 %v5285_v9, %v8442_v10 }
 0x112   :  { %v244_v13 = vadd.f32 %v8442_v10, %v243_v12 }
 0x113   :  { %v317_v19 = vmax.f32 %v249_v14, 0.0  ;;  %v892_v14 = vld [vmem:[%s10469_s5 + $0x440] sm:$0xff] }
 0x114   :  { %v316_v15 = vmax.f32 %v244_v13, 0.0  ;;  %v8446_v17 = vpop.f32.mrb[4].mxu0  ;;  %v5395_v13 = vpack.c.bf16 %v895_v6, %v893_v5  ;;  %v920_v6 = vld [vmem:[%s10469_s5 + $0x520] sm:$0xff] }
 0x115   :  { %v8448_v18 = vpop.f32.mrb[5].mxu0 }
 0x116   :  { %5162 = vmatmul.mubr.msk.f32.vlgmr.msra.gmra.mrb[0].mxu1 %vm372_vm2, %v316_v15  ;;  %v254_v9 = vadd.f32 %v8442_v10, %v8448_v18  ;;  %v894_v15 = vld [vmem:[%s10469_s5 + $0x450] sm:$0xff]  ;;  %v899_v18 = vld [vmem:[%s10469_s5 + $0x478] sm:$0xff] }
 0x117   :  { %5326 = vmatpush1.bf16.msra.mxu1 %v8339_v11  ;;  %449 = vmatprep.mubr.f32.mxu1 %v10477_v59  ;;  %v5397_v23 = vpack.c.bf16 %v894_v15, %v892_v14  ;;  %v924_v14 = vld [vmem:[%s10469_s5 + $0x540] sm:$0xff]  ;;  %v926_v15 = vld [vmem:[%s10469_s5 + $0x550] sm:$0xff] }
 0x118   :  { %v5291_v21 = vpop.f32.mrb[6].mxu0  ;;  %5328 = vmatprep.subr.bf16.mxu1 %v8344_v16  ;;  %v328_v16 = vld [vmem:[#allocation4 + $0x20] sm:$0xff]  ;;  %v318_v22 = vmax.f32 %v254_v9, 0.0  ;;  %v925_v9 = vld [vmem:[%s10469_s5 + $0x548] sm:$0xff] }
 0x119   :  { %v263_v26 = vpop.f32.mrb[7].mxu0  ;;  %v269_v11 = vadd.f32 %v5291_v21, %v8442_v10  ;;  %v259_v21 = vadd.f32 %v8446_v17, %v8442_v10  ;;  %v901_v17 = vld [vmem:[%s10469_s5 + $0x488] sm:$0xff] }
 0x11a   :  { %v264_v27 = vadd.f32 %v8442_v10, %v263_v26  ;;  %5163 = vmatmul.mubr.msk.f32.gmra.mrb[2].mxu1 %vm372_vm2, %v317_v19  ;;  %v897_v19 = vld [vmem:[%s10469_s5 + $0x468] sm:$0xff] }
 0x11b   :  { %5330 = vmatpush1.bf16.msra.mxu1 %v8352_v24  ;;  %526 = vmatprep.mubr.f32.mxu1 %v10477_v59  ;;  %v885_v24 = vld [vmem:[%s10469_s5 + $0x408] sm:$0xff]  ;;  %v321_v44 = vmax.f32 %v269_v11, 0.0  ;;  %v5399_v26 = vpack.c.bf16 %v899_v18, %v897_v19  ;;  %v319_v29 = vmax.f32 %v259_v21, 0.0  ;;  %v5429_v19 = vpack.c.bf16 %v926_v15, %v924_v14  ;;  %v931_v21 = vld [vmem:[%s10469_s5 + $0x578] sm:$0xff]  ;;  %v1186_v14 = vld [vmem:[#allocation6 + $0x200] sm:$0xff] }
 0x11c   :  { %v320_v32 = vmax.f32 %v264_v27, 0.0  ;;  %5332 = vmatprep.subr.bf16.mxu1 %v8366_v34  ;;  %v8460_v36 = vpop.f32.mrb[8].mxu0  ;;  %v5361_v34 = vpack.c.bf16 %v330_v35, %v328_v16  ;;  %v5387_v53 = vpack.c.bf16 %v887_v42, %v885_v24  ;;  %v896_v27 = vld [vmem:[%s10469_s5 + $0x460] sm:$0xff]  ;;  %v902_v16 = vld [vmem:[%s10469_s5 + $0x490] sm:$0xff]  ;;  %v5409_v42 = vpack.c.bf16 %v906_v39, %v904_v38  ;;  %v929_v18 = vld [vmem:[%s10469_s5 + $0x568] sm:$0xff] }
 0x11d   :  { %v8462_v40 = vpop.f32.mrb[9].mxu0  ;;  %v943_v38 = vld [vmem:[%s10469_s5 + $0x5d8] sm:$0xff]  ;;  %v1194_v15 = vld [vmem:[#allocation6 + $0x240] sm:$0xff] }
 0x11e   :  { %5166 = vmatmul.mubr.msk.f32.vlgmr.msra.gmra.mrb[18].mxu0 %vm372_vm2, %v320_v32  ;;  %v900_v32 = vld [vmem:[%s10469_s5 + $0x480] sm:$0xff]  ;;  %v274_v24 = vadd.f32 %v8442_v10, %v8462_v40 }
 0x11f   :  { %5334 = vmatpush1.bf16.msra.mxu1 %v8405_v52  ;;  %5358 = vmatpush1.bf16.msra.mxu0 %v5357_v31  ;;  %v886_v52 = vld [vmem:[%s10469_s5 + $0x410] sm:$0xff]  ;;  %v5401_v31 = vpack.c.bf16 %v898_v28, %v896_v27  ;;  %v5405_v35 = vpack.c.bf16 %v902_v16, %v900_v32  ;;  %v908_v40 = vld [vmem:[%s10469_s5 + $0x4c0] sm:$0xff]  ;;  %v933_v27 = vld [vmem:[%s10469_s5 + $0x588] sm:$0xff] }
 0x120   :  { %5336 = vmatprep.subr.bf16.mxu1 %v5335_v62  ;;  %635 = vmatprep.mubr.f32.mxu0 %v10477_v59  ;;  %v5367_v62 = vpack.c.bf16 %v339_v50, %v337_v49  ;;  %v5389_v2 = vpack.c.bf16 %v886_v52, %v884_v54  ;;  %v5413_v47 = vpack.c.bf16 %v910_v43, %v908_v40  ;;  %v912_v49 = vld [vmem:[%s10469_s5 + $0x4e0] sm:$0xff]  ;;  %v914_v50 = vld [vmem:[%s10469_s5 + $0x4f0] sm:$0xff]  ;;  %v939_v32 = vld [vmem:[%s10469_s5 + $0x5b8] sm:$0xff] }
 0x121   :  { %5360 = vmatprep.subr.bf16.mxu0 %v5359_v37  ;;  %v916_v52 = vld [vmem:[%s10469_s5 + $0x500] sm:$0xff]  ;;  %v947_v40 = vld [vmem:[%s10469_s5 + $0x5f8] sm:$0xff] }
 0x122   :  { %5167 = vmatmul.mubr.msk.f32.gmra.mrb[20].mxu0 %vm372_vm2, %v321_v44  ;;  %v322_v44 = vmax.f32 %v274_v24, 0.0  ;;  %v5421_v57 = vpack.c.bf16 %v918_v55, %v916_v52  ;;  %v1147_v52 = vld [vmem:[#allocation6 + $0xc8] sm:$0xff] }
 0x123   :  { %5338 = vmatpush1.bf16.msra.mxu1 %v8427_v1  ;;  %5362 = vmatpush1.bf16.msra.mxu0 %v5361_v34  ;;  %v890_v1 = vld [vmem:[%s10469_s5 + $0x430] sm:$0xff] }
 0x124   :  { %5364 = vmatprep.subr.bf16.mxu0 %v5363_v46  ;;  %712 = vmatprep.mubr.f32.mxu0 %v10477_v59  ;;  %v5393_v12 = vpack.c.bf16 %v890_v1, %v888_v4  ;;  %v913_v46 = vld [vmem:[%s10469_s5 + $0x4e8] sm:$0xff]  ;;  %v923_v1 = vld [vmem:[%s10469_s5 + $0x538] sm:$0xff] }
 0x125   :  { %5388 = vmatprep.subr.bf16.mxu1 %v5387_v53  ;;  %v5417_v53 = vpack.c.bf16 %v914_v50, %v912_v49  ;;  %v921_v4 = vld [vmem:[%s10469_s5 + $0x528] sm:$0xff] }
 0x126   :  { %5164 = vmatmul.mubr.msk.f32.vlgmr.msra.gmra.mrb[0].mxu1 %vm372_vm2, %v314_v61  ;;  %v5423_v5 = vpack.c.bf16 %v923_v1, %v921_v4  ;;  %v1123_v49 = vld [vmem:[#allocation6 + $0x8] sm:$0xff] }
 0x127   :  { %5366 = vmatpush1.bf16.msra.mxu0 %v5365_v58  ;;  %532 = vmatprep.mubr.f32.mxu1 %v10477_v59  ;;  %v5297_v58 = vpop.f32.mrb[10].mxu0  ;;  %v1131_v50 = vld [vmem:[#allocation6 + $0x48] sm:$0xff] }
 0x128   :  { %5368 = vmatprep.subr.bf16.mxu0 %v5367_v62  ;;  %5390 = vmatpush1.bf16.msra.mxu1 %v5389_v2  ;;  %v283_v60 = vpop.f32.mrb[11].mxu0  ;;  %v1146_v58 = vld [vmem:[#allocation6 + $0xc0] sm:$0xff]  ;;  %v1171_v4 = vld [vmem:[#allocation6 + $0x188] sm:$0xff] }
 0x129   :  { %5392 = vmatprep.subr.bf16.mxu1 %v5391_v3  ;;  %v5300_v61 = vpop.f32.mrb[12].mxu0  ;;  %v1179_v1 = vld [vmem:[#allocation6 + $0x1c8] sm:$0xff] }
 0x12a   :  { %5165 = vmatmul.mubr.msk.f32.gmra.mrb[2].mxu1 %vm372_vm2, %v315_v8  ;;  %v291_v62 = vpop.f32.mrb[13].mxu0  ;;  %v1155_v61 = vld [vmem:[#allocation6 + $0x108] sm:$0xff] }
 0x12b   :  { %5370 = vmatpush1.bf16.msra.mxu0 %v5369_v7  ;;  %v5303_v63 = vpop.f32.mrb[14].mxu0  ;;  %v922_v7 = vld [vmem:[%s10469_s5 + $0x530] sm:$0xff]  ;;  %v1163_v62 = vld [vmem:[#allocation6 + $0x148] sm:$0xff] }
 0x12c   :  { %5372 = vmatprep.subr.bf16.mxu0 %v8348_v20  ;;  %5394 = vmatpush1.bf16.msra.mxu1 %v5393_v12  ;;  %v903_v20 = vld [vmem:[%s10469_s5 + $0x498] sm:$0xff]  ;;  %v299_v0 = vpop.f32.mrb[15].mxu0  ;;  %v5425_v8 = vpack.c.bf16 %v922_v7, %v920_v6  ;;  %v5523_v63 = vpack.c.bf16 %v1163_v62, %v1155_v61  ;;  %v1170_v6 = vld [vmem:[#allocation6 + $0x180] sm:$0xff] }
 0x12d   :  { %5396 = vmatprep.subr.bf16.mxu1 %v5395_v13  ;;  %v5403_v11 = vpack.c.bf16 %v903_v20, %v901_v17  ;;  %v5306_v2 = vpop.f32.mrb[16].mxu0  ;;  %v927_v12 = vld [vmem:[%s10469_s5 + $0x558] sm:$0xff]  ;;  %v932_v20 = vld [vmem:[%s10469_s5 + $0x580] sm:$0xff] }
 0x12e   :  { %5168 = vmatmul.mubr.msk.f32.vlgmr.msra.gmra.mrb[18].mxu0 %vm372_vm2, %v318_v22  ;;  %v307_v3 = vpop.f32.mrb[17].mxu0  ;;  %v5427_v13 = vpack.c.bf16 %v927_v12, %v925_v9  ;;  %v5431_v22 = vpack.c.bf16 %v931_v21, %v929_v18  ;;  %v935_v17 = vld [vmem:[%s10469_s5 + $0x598] sm:$0xff]  ;;  %v1154_v0 = vld [vmem:[#allocation6 + $0x100] sm:$0xff]  ;;  %v1195_v9 = vld [vmem:[#allocation6 + $0x248] sm:$0xff] }
 0x12f   :  { %5374 = vmatpush1.bf16.msra.mxu0 %v8354_v25  ;;  %718 = vmatprep.mubr.f32.mxu0 %v10477_v59  ;;  %v905_v25 = vld [vmem:[%s10469_s5 + $0x4a8] sm:$0xff]  ;;  %v1162_v2 = vld [vmem:[#allocation6 + $0x140] sm:$0xff] }
 0x130   :  { %5376 = vmatprep.subr.bf16.mxu0 %v8361_v30  ;;  %5398 = vmatpush1.bf16.msra.mxu1 %v5397_v23  ;;  %v907_v30 = vld [vmem:[%s10469_s5 + $0x4b8] sm:$0xff]  ;;  %v928_v23 = vld [vmem:[%s10469_s5 + $0x560] sm:$0xff]  ;;  %v5525_v3 = vpack.c.bf16 %v1162_v2, %v1154_v0  ;;  %v1203_v18 = vld [vmem:[#allocation6 + $0x288] sm:$0xff] }
 0x131   :  { %5400 = vmatprep.subr.bf16.mxu1 %v5399_v26  ;;  %v5407_v37 = vpack.c.bf16 %v907_v30, %v905_v25  ;;  %v930_v26 = vld [vmem:[%s10469_s5 + $0x570] sm:$0xff]  ;;  %v936_v30 = vld [vmem:[%s10469_s5 + $0x5a0] sm:$0xff]  ;;  %v1211_v21 = vld [vmem:[#allocation6 + $0x2c8] sm:$0xff] }
 0x132   :  { %5169 = vmatmul.mubr.msk.f32.gmra.mrb[20].mxu0 %vm372_vm2, %v319_v29  ;;  %v5433_v28 = vpack.c.bf16 %v930_v26, %v928_v23  ;;  %v934_v29 = vld [vmem:[%s10469_s5 + $0x590] sm:$0xff]  ;;  %v1178_v7 = vld [vmem:[#allocation6 + $0x1c0] sm:$0xff]  ;;  %v5535_v23 = vpack.c.bf16 %v1211_v21, %v1203_v18  ;;  %v1299_v2 = vld [vmem:[#allocation6 + $0x588] sm:$0xff] }
 0x133   :  { %5378 = vmatpush1.bf16.msra.mxu0 %v8364_v33  ;;  %795 = vmatprep.mubr.f32.mxu0 %v10477_v59  ;;  %v909_v33 = vld [vmem:[%s10469_s5 + $0x4c8] sm:$0xff]  ;;  %v5437_v16 = vpack.c.bf16 %v934_v29, %v932_v20  ;;  %v5529_v12 = vpack.c.bf16 %v1178_v7, %v1170_v6  ;;  %v1202_v26 = vld [vmem:[#allocation6 + $0x280] sm:$0xff] }
 0x134   :  { %5380 = vmatprep.subr.bf16.mxu0 %v8389_v41  ;;  %5402 = vmatpush1.bf16.msra.mxu1 %v5401_v31  ;;  %v911_v41 = vld [vmem:[%s10469_s5 + $0x4d8] sm:$0xff]  ;;  %v5435_v31 = vpack.c.bf16 %v935_v17, %v933_v27  ;;  %v1210_v27 = vld [vmem:[#allocation6 + $0x2c0] sm:$0xff]  ;;  %v1219_v17 = vld [vmem:[#allocation6 + $0x308] sm:$0xff] }
 0x135   :  { %5404 = vmatprep.subr.bf16.mxu1 %v5403_v11  ;;  %v5411_v34 = vpack.c.bf16 %v911_v41, %v909_v33  ;;  %v937_v11 = vld [vmem:[%s10469_s5 + $0x5a8] sm:$0xff]  ;;  %v940_v33 = vld [vmem:[%s10469_s5 + $0x5c0] sm:$0xff]  ;;  %v942_v41 = vld [vmem:[%s10469_s5 + $0x5d0] sm:$0xff]  ;;  %v5537_v29 = vpack.c.bf16 %v1210_v27, %v1202_v26 }
 0x136   :  { %v5439_v25 = vpack.c.bf16 %v939_v32, %v937_v11  ;;  %v1227_v20 = vld [vmem:[#allocation6 + $0x348] sm:$0xff]  ;;  %v1218_v11 = vld [vmem:[#allocation6 + $0x300] sm:$0xff] }
 0x137   :  { %5382 = vmatpush1.bf16.msra.mxu0 %v8395_v45  ;;  %v915_v45 = vld [vmem:[%s10469_s5 + $0x4f8] sm:$0xff]  ;;  %v1226_v32 = vld [vmem:[#allocation6 + $0x340] sm:$0xff]  ;;  %v1315_v7 = vld [vmem:[#allocation6 + $0x608] sm:$0xff] }
 0x138   :  { %5384 = vmatprep.subr.bf16.mxu0 %v8403_v51  ;;  %5406 = vmatpush1.bf16.msra.mxu1 %v5405_v35  ;;  %v279_v51 = vadd.f32 %v8460_v36, %v8442_v10  ;;  %v5415_v48 = vpack.c.bf16 %v915_v45, %v913_v46  ;;  %v919_v10 = vld [vmem:[%s10469_s5 + $0x518] sm:$0xff]  ;;  %v938_v35 = vld [vmem:[%s10469_s5 + $0x5b0] sm:$0xff]  ;;  %v1290_v0 = vld [vmem:[#allocation6 + $0x540] sm:$0xff] }
 0x139   :  { %5408 = vmatprep.subr.bf16.mxu1 %v5407_v37  ;;  %v941_v37 = vld [vmem:[%s10469_s5 + $0x5c8] sm:$0xff]  ;;  %v5441_v39 = vpack.c.bf16 %v938_v35, %v936_v30  ;;  %v946_v46 = vld [vmem:[%s10469_s5 + $0x5f0] sm:$0xff]  ;;  %v539_v35 = vld [vmem:[%s10468_s4] sm:$0x3] }
 0x13a   :  { %v323_v36 = vmax.f32 %v279_v51, 0.0  ;;  %v5443_v24 = vpack.c.bf16 %v943_v38, %v941_v37  ;;  %v821_v51 = vld [vmem:[%s10469_s5 + $0x208] sm:$0xff]  ;;  %v5541_v37 = vpack.c.bf16 %v1226_v32, %v1218_v11  ;;  %v1306_v6 = vld [vmem:[#allocation6 + $0x5c0] sm:$0xff] }
 0x13b   :  { %5386 = vmatpush1.bf16.msra.mxu0 %v8413_v56  ;;  %v917_v56 = vld [vmem:[%s10469_s5 + $0x508] sm:$0xff]  ;;  %v1354_v11 = vld [vmem:[#allocation6 + $0x740] sm:$0xff] }
 0x13c   :  { %5410 = vmatpush1.bf16.msra.mxu1 %v5409_v42  ;;  %v5419_v54 = vpack.c.bf16 %v919_v10, %v917_v56  ;;  %v5445_v42 = vpack.c.bf16 %v942_v41, %v940_v33  ;;  %v5515_v56 = vpack.c.bf16 %v1131_v50, %v1123_v49  ;;  %v1122_v10 = vld [vmem:[#allocation6] sm:$0xff]  ;;  %v1243_v30 = vld [vmem:[#allocation6 + $0x3c8] sm:$0xff] }
 0x13d   :  { %5412 = vmatprep.subr.bf16.mxu1 %v5411_v34  ;;  %v945_v34 = vld [vmem:[%s10469_s5 + $0x5e8] sm:$0xff] }
 0x13e   :  { %5170 = vmatmul.mubr.msk.f32.vlgmr.msra.gmra.mrb[18].mxu0 %vm372_vm2, %v322_v44  ;;  %v5447_v43 = vpack.c.bf16 %v947_v40, %v945_v34  ;;  %v944_v44 = vld [vmem:[%s10469_s5 + $0x5e0] sm:$0xff]  ;;  %5516 = vmatprep.subr.bf16.mxu0 %v5515_v56  ;;  %v1251_v41 = vld [vmem:[#allocation6 + $0x408] sm:$0xff] }
 0x13f   :  { %801 = vmatprep.mubr.f32.mxu0 %v10477_v59  ;;  %v5449_v45 = vpack.c.bf16 %v946_v46, %v944_v44  ;;  %v1250_v46 = vld [vmem:[#allocation6 + $0x400] sm:$0xff]  ;;  %v1275_v49 = vld [vmem:[#allocation6 + $0x4c8] sm:$0xff] }
 0x140   :  { %5414 = vmatpush1.bf16.msra.mxu1 %v5413_v47  ;;  %v823_v47 = vld [vmem:[%s10469_s5 + $0x218] sm:$0xff]  ;;  %v1347_v26 = vld [vmem:[#allocation6 + $0x708] sm:$0xff] }
 0x141   :  { %5416 = vmatprep.subr.bf16.mxu1 %v5415_v48  ;;  %v5451_v48 = vpack.c.bf16 %v823_v47, %v821_v51  ;;  %v1355_v27 = vld [vmem:[#allocation6 + $0x748] sm:$0xff] }
 0x142   :  { %5171 = vmatmul.mubr.msk.f32.gmra.mrb[20].mxu0 %vm372_vm2, %v323_v36  ;;  %v1130_v36 = vld [vmem:[#allocation6 + $0x40] sm:$0xff] }
 0x144   :  { %5418 = vmatpush1.bf16.msra.mxu1 %v5417_v53  ;;  %v5517_v53 = vpack.c.bf16 %v1130_v36, %v1122_v10 }
 0x145   :  { %5420 = vmatprep.subr.bf16.mxu1 %v5419_v54  ;;  %v1139_v54 = vld [vmem:[#allocation6 + $0x88] sm:$0xff] }
 0x146   :  { %5518 = vmatpush1.bf16.msra.mxu0 %v5517_v53  ;;  %v5519_v55 = vpack.c.bf16 %v1147_v52, %v1139_v54  ;;  %v1266_v53 = vld [vmem:[#allocation6 + $0x480] sm:$0xff] }
 0x147   :  { %v1274_v54 = vld [vmem:[#allocation6 + $0x4c0] sm:$0xff] }
 0x148   :  { %5422 = vmatpush1.bf16.msra.mxu1 %v5421_v57  ;;  %v1138_v57 = vld [vmem:[#allocation6 + $0x80] sm:$0xff]  ;;  %5520 = vmatprep.subr.bf16.mxu0 %v5519_v55  ;;  %v5553_v61 = vpack.c.bf16 %v1274_v54, %v1266_v53 }
 0x149   :  { %5424 = vmatprep.subr.bf16.mxu1 %v5423_v5  ;;  %v5521_v60 = vpack.c.bf16 %v1146_v58, %v1138_v57  ;;  %v5527_v5 = vpack.c.bf16 %v1179_v1, %v1171_v4  ;;  %v1283_v57 = vld [vmem:[#allocation6 + $0x508] sm:$0xff] }
 0x14a   :  { %v1291_v58 = vld [vmem:[#allocation6 + $0x548] sm:$0xff] }
 0x14b   :  { %5522 = vmatpush1.bf16.msra.mxu0 %v5521_v60  ;;  %v5555_v62 = vpack.c.bf16 %v1291_v58, %v1283_v57 }
 0x14c   :  { %5426 = vmatpush1.bf16.msra.mxu1 %v5425_v8  ;;  %5524 = vmatprep.subr.bf16.mxu0 %v5523_v63  ;;  %v1187_v8 = vld [vmem:[#allocation6 + $0x208] sm:$0xff]  ;;  %v1282_v63 = vld [vmem:[#allocation6 + $0x500] sm:$0xff] }
 0x14d   :  { %5428 = vmatprep.subr.bf16.mxu1 %v5427_v13  ;;  %v5531_v13 = vpack.c.bf16 %v1195_v9, %v1187_v8  ;;  %v5557_v4 = vpack.c.bf16 %v1290_v0, %v1282_v63  ;;  %v1323_v8 = vld [vmem:[#allocation6 + $0x648] sm:$0xff] }
 0x14f   :  { %5526 = vmatpush1.bf16.msra.mxu0 %v5525_v3  ;;  %v1307_v3 = vld [vmem:[#allocation6 + $0x5c8] sm:$0xff] }
 0x150   :  { %5430 = vmatpush1.bf16.msra.mxu1 %v5429_v19  ;;  %5528 = vmatprep.subr.bf16.mxu0 %v5527_v5  ;;  %v541_v19 = vlaneseq  ;;  %v5559_v1 = vpack.c.bf16 %v1307_v3, %v1299_v2  ;;  %v1298_v5 = vld [vmem:[#allocation6 + $0x580] sm:$0xff]  ;;  %v834_v3 = vld [vmem:[%s10469_s5 + $0x270] sm:$0xff] }
 0x151   :  { %5432 = vmatprep.subr.bf16.mxu1 %v5431_v22  ;;  %v5533_v22 = vpack.c.bf16 %v1194_v15, %v1186_v14  ;;  %v5561_v9 = vpack.c.bf16 %v1306_v6, %v1298_v5  ;;  %v1322_v14 = vld [vmem:[#allocation6 + $0x640] sm:$0xff]  ;;  %v1331_v15 = vld [vmem:[#allocation6 + $0x688] sm:$0xff] }
 0x152   :  { %v832_v2 = vld [vmem:[%s10469_s5 + $0x260] sm:$0xff] }
 0x153   :  { %5530 = vmatpush1.bf16.msra.mxu0 %v5529_v12  ;;  %v5563_v12 = vpack.c.bf16 %v1323_v8, %v1315_v7  ;;  %v5465_v5 = vpack.c.bf16 %v834_v3, %v832_v2  ;;  %v836_v7 = vld [vmem:[%s10469_s5 + $0x280] sm:$0xff]  ;;  %v838_v8 = vld [vmem:[%s10469_s5 + $0x290] sm:$0xff]  ;;  %v875_v2 = vld [vmem:[%s10469_s5 + $0x3b8] sm:$0xff] }
 0x154   :  { %5434 = vmatpush1.bf16.msra.mxu1 %v5433_v28  ;;  %5532 = vmatprep.subr.bf16.mxu0 %v5531_v13  ;;  %v8696_v28 = vshrl.u32 %v541_v19, 7  ;;  %v1314_v13 = vld [vmem:[#allocation6 + $0x600] sm:$0xff]  ;;  %v1339_v19 = vld [vmem:[#allocation6 + $0x6c8] sm:$0xff] }
 0x155   :  { %5436 = vmatprep.subr.bf16.mxu1 %v5435_v31  ;;  %v5539_v31 = vpack.c.bf16 %v1227_v20, %v1219_v17  ;;  %v5565_v18 = vpack.c.bf16 %v1322_v14, %v1314_v13  ;;  %v5567_v21 = vpack.c.bf16 %v1339_v19, %v1331_v15  ;;  %v5469_v13 = vpack.c.bf16 %v838_v8, %v836_v7  ;;  %v840_v15 = vld [vmem:[%s10469_s5 + $0x2a0] sm:$0xff]  ;;  %v842_v19 = vld [vmem:[%s10469_s5 + $0x2b0] sm:$0xff]  ;;  %v879_v7 = vld [vmem:[%s10469_s5 + $0x3d8] sm:$0xff] }
 0x157   :  { %5534 = vmatpush1.bf16.msra.mxu0 %v5533_v22  ;;  %v1330_v22 = vld [vmem:[#allocation6 + $0x680] sm:$0xff] }
 0x158   :  { %5438 = vmatpush1.bf16.msra.mxu1 %v5437_v16  ;;  %5536 = vmatprep.subr.bf16.mxu0 %v5535_v23  ;;  %v8699_v16 = vsub.s32 0, %v8696_v28  ;;  %v1338_v23 = vld [vmem:[#allocation6 + $0x6c0] sm:$0xff] }
 0x159   :  { %5440 = vmatprep.subr.bf16.mxu1 %v5439_v25  ;;  %v1235_v25 = vld [vmem:[#allocation6 + $0x388] sm:$0xff]  ;;  %v5569_v17 = vpack.c.bf16 %v1338_v23, %v1330_v22  ;;  %v5473_v22 = vpack.c.bf16 %v842_v19, %v840_v15  ;;  %v883_v15 = vld [vmem:[%s10469_s5 + $0x3f8] sm:$0xff] }
 0x15a   :  { %v5543_v38 = vpack.c.bf16 %v1243_v30, %v1235_v25  ;;  %v8705_v33 = vrot.slane %v539_v35, %v8699_v16  ;;  %v820_v30 = vld [vmem:[%s10469_s5 + $0x200] sm:$0xff] }
 0x15b   :  { %5538 = vmatpush1.bf16.msra.mxu0 %v5537_v29  ;;  %v5571_v29 = vpack.c.bf16 %v1355_v27, %v1347_v26  ;;  %v844_v26 = vld [vmem:[%s10469_s5 + $0x2c0] sm:$0xff]  ;;  %v846_v27 = vld [vmem:[%s10469_s5 + $0x2d0] sm:$0xff] }
 0x15c   :  { %5442 = vmatpush1.bf16.msra.mxu1 %v5441_v39  ;;  %5540 = vmatprep.subr.bf16.mxu0 %v5539_v31  ;;  %v1234_v39 = vld [vmem:[#allocation6 + $0x380] sm:$0xff] }
 0x15d   :  { %5444 = vmatprep.subr.bf16.mxu1 %v5443_v24  ;;  %v1242_v24 = vld [vmem:[#allocation6 + $0x3c0] sm:$0xff] }
 0x15e   :  { %v5545_v34 = vpack.c.bf16 %v1242_v24, %v1234_v39  ;;  %v1346_v31 = vld [vmem:[#allocation6 + $0x700] sm:$0xff]  ;;  %v827_v39 = vld [vmem:[%s10469_s5 + $0x238] sm:$0xff] }
 0x15f   :  { %5542 = vmatpush1.bf16.msra.mxu0 %v5541_v37  ;;  %v5573_v24 = vpack.c.bf16 %v1354_v11, %v1346_v31  ;;  %v848_v11 = vld [vmem:[%s10469_s5 + $0x2e0] sm:$0xff] }
 0x160   :  { %5446 = vmatpush1.bf16.msra.mxu1 %v5445_v42  ;;  %v1259_v42 = vld [vmem:[#allocation6 + $0x448] sm:$0xff]  ;;  %5544 = vmatprep.subr.bf16.mxu0 %v5543_v38 }
 0x161   :  { %5448 = vmatprep.subr.bf16.mxu1 %v5447_v43  ;;  %v8708_v43 = vsub.s32 1, %v8696_v28  ;;  %v5547_v44 = vpack.c.bf16 %v1259_v42, %v1251_v41  ;;  %v825_v38 = vld [vmem:[%s10469_s5 + $0x228] sm:$0xff] }
 0x163   :  { %5546 = vmatpush1.bf16.msra.mxu0 %v5545_v34  ;;  %v8716_v56 = vrot.slane %v539_v35, %v8708_v43  ;;  %v822_v35 = vld [vmem:[%s10469_s5 + $0x210] sm:$0xff] }
 0x164   :  { %5450 = vmatpush1.bf16.msra.mxu1 %v5449_v45  ;;  %v1258_v45 = vld [vmem:[#allocation6 + $0x440] sm:$0xff]  ;;  %5548 = vmatprep.subr.bf16.mxu0 %v5547_v44  ;;  %v5453_v34 = vpack.c.bf16 %v822_v35, %v820_v30  ;;  %v855_v30 = vld [vmem:[%s10469_s5 + $0x318] sm:$0xff] }
 0x165   :  { %5452 = vmatprep.subr.bf16.mxu1 %v5451_v48  ;;  %v1267_v48 = vld [vmem:[#allocation6 + $0x488] sm:$0xff]  ;;  %v5549_v50 = vpack.c.bf16 %v1258_v45, %v1250_v46  ;;  %v5455_v45 = vpack.c.bf16 %v827_v39, %v825_v38  ;;  %v852_v38 = vld [vmem:[%s10469_s5 + $0x300] sm:$0xff]  ;;  %v854_v39 = vld [vmem:[%s10469_s5 + $0x310] sm:$0xff] }
 0x166   :  { %v5551_v36 = vpack.c.bf16 %v1275_v49, %v1267_v48  ;;  %v824_v48 = vld [vmem:[%s10469_s5 + $0x220] sm:$0xff]  ;;  %v826_v49 = vld [vmem:[%s10469_s5 + $0x230] sm:$0xff] }
 0x167   :  { %5550 = vmatpush1.bf16.msra.mxu0 %v5549_v50  ;;  %v5457_v54 = vpack.c.bf16 %v826_v49, %v824_v48 }
 0x168   :  { %5552 = vmatprep.subr.bf16.mxu0 %v5551_v36  ;;  %v831_v36 = vld [vmem:[%s10469_s5 + $0x258] sm:$0xff] }
 0x16b   :  { %5554 = vmatpush1.bf16.msra.mxu0 %v5553_v61  ;;  %v833_v61 = vld [vmem:[%s10469_s5 + $0x268] sm:$0xff] }
 0x16c   :  { %5556 = vmatprep.subr.bf16.mxu0 %v5555_v62  ;;  %v835_v62 = vld [vmem:[%s10469_s5 + $0x278] sm:$0xff] }
 0x16d   :  { %v5463_v0 = vpack.c.bf16 %v835_v62, %v833_v61  ;;  %v868_v62 = vld [vmem:[%s10469_s5 + $0x380] sm:$0xff] }
 0x16f   :  { %5558 = vmatpush1.bf16.msra.mxu0 %v5557_v4  ;;  %v837_v4 = vld [vmem:[%s10469_s5 + $0x288] sm:$0xff] }
 0x170   :  { %5560 = vmatprep.subr.bf16.mxu0 %v5559_v1  ;;  %v839_v1 = vld [vmem:[%s10469_s5 + $0x298] sm:$0xff] }
 0x171   :  { %v5467_v6 = vpack.c.bf16 %v839_v1, %v837_v4  ;;  %v872_v1 = vld [vmem:[%s10469_s5 + $0x3a0] sm:$0xff] }
 0x173   :  { %5562 = vmatpush1.bf16.msra.mxu0 %v5561_v9  ;;  %v841_v9 = vld [vmem:[%s10469_s5 + $0x2a8] sm:$0xff] }
 0x174   :  { %5564 = vmatprep.subr.bf16.mxu0 %v5563_v12  ;;  %v843_v12 = vld [vmem:[%s10469_s5 + $0x2b8] sm:$0xff] }
 0x175   :  { %v5471_v14 = vpack.c.bf16 %v843_v12, %v841_v9  ;;  %v876_v12 = vld [vmem:[%s10469_s5 + $0x3c0] sm:$0xff] }
 0x177   :  { %5566 = vmatpush1.bf16.msra.mxu0 %v5565_v18  ;;  %v845_v18 = vld [vmem:[%s10469_s5 + $0x2c8] sm:$0xff] }
 0x178   :  { %5568 = vmatprep.subr.bf16.mxu0 %v5567_v21  ;;  %v847_v21 = vld [vmem:[%s10469_s5 + $0x2d8] sm:$0xff] }
 0x179   :  { %v5475_v23 = vpack.c.bf16 %v847_v21, %v845_v18  ;;  %v880_v21 = vld [vmem:[%s10469_s5 + $0x3e0] sm:$0xff] }
 0x17b   :  { %5570 = vmatpush1.bf16.msra.mxu0 %v5569_v17  ;;  %v849_v17 = vld [vmem:[%s10469_s5 + $0x2e8] sm:$0xff] }
 0x17c   :  { %5572 = vmatprep.subr.bf16.mxu0 %v5571_v29  ;;  %v5477_v29 = vpack.c.bf16 %v846_v27, %v844_v26  ;;  %v1135_v26 = vld [vmem:[#allocation6 + $0x68] sm:$0xff] }
 0x17f   :  { %5574 = vmatpush1.bf16.msra.mxu0 %v5573_v24  ;;  %v857_v24 = vld [vmem:[%s10469_s5 + $0x328] sm:$0xff] }
 0x1f9   :  { %v528_v40 = vpop.f32.mrb[0].mxu1 }
 0x1fa   :  { %v8711_v51 = vadd.f32 %v8705_v33, %v528_v40  ;;  %v8713_v47 = vpop.f32.mrb[1].mxu1 }
 0x1fb   :  { %v552_v50 = vadd.f32 %v8716_v56, %v8713_v47  ;;  %v828_v47 = vld [vmem:[%s10469_s5 + $0x240] sm:$0xff] }
 0x1fd   :  { %v534_v10 = vpop.f32.mrb[2].mxu1  ;;  %v556_v58 = vmax.f32 %v552_v50, 0.0  ;;  %v860_v50 = vld [vmem:[%s10469_s5 + $0x340] sm:$0xff] }
 0x1fe   :  { %v8719_v52 = vadd.f32 %v8705_v33, %v534_v10  ;;  %v536_v55 = vpop.f32.mrb[3].mxu1 }
 0x1ff   :  { %v8722_v60 = vadd.f32 %v8716_v56, %v536_v55 }
 0x211   :  { %v797_v20 = vpop.f32.mrb[18].mxu0 }
 0x212   :  { %v812_v32 = vadd.f32 %v797_v20, %v8705_v33  ;;  %v799_v25 = vpop.f32.mrb[19].mxu0  ;;  %v851_v20 = vld [vmem:[%s10469_s5 + $0x2f8] sm:$0xff] }
 0x213   :  { %v813_v37 = vadd.f32 %v799_v25, %v8716_v56  ;;  %v5479_v31 = vpack.c.bf16 %v851_v20, %v849_v17  ;;  %v853_v25 = vld [vmem:[%s10469_s5 + $0x308] sm:$0xff]  ;;  %v1126_v20 = vld [vmem:[#allocation6 + $0x20] sm:$0xff] }
 0x214   :  { %v816_v40 = vmax.f32 %v812_v32, 0.0  ;;  %v850_v32 = vld [vmem:[%s10469_s5 + $0x2f0] sm:$0xff] }
 0x215   :  { %v817_v41 = vmax.f32 %v813_v37, 0.0  ;;  %v803_v42 = vpop.f32.mrb[20].mxu0  ;;  %v5481_v35 = vpack.c.bf16 %v850_v32, %v848_v11  ;;  %v5483_v37 = vpack.c.bf16 %v855_v30, %v853_v25  ;;  %v1151_v11 = vld [vmem:[#allocation6 + $0xe8] sm:$0xff]  ;;  %v555_v25 = vmax.f32 %v8711_v51, 0.0 }
 0x216   :  { %v814_v44 = vadd.f32 %v803_v42, %v8705_v33  ;;  %v805_v46 = vpop.f32.mrb[21].mxu0  ;;  %v829_v33 = vld [vmem:[%s10469_s5 + $0x248] sm:$0xff]  ;;  %v5485_v42 = vpack.c.bf16 %v854_v39, %v852_v38  ;;  %v558_v38 = vmax.f32 %v8722_v60, 0.0  ;;  %v1174_v60 = vld [vmem:[#allocation6 + $0x1a0] sm:$0xff] }
 0x217   :  { %v815_v10 = vadd.f32 %v805_v46, %v8716_v56  ;;  %1012 = vmatprep.mubr.f32.mxu1 %v817_v41  ;;  %v5459_v57 = vpack.c.bf16 %v831_v36, %v829_v33  ;;  %v830_v56 = vld [vmem:[%s10469_s5 + $0x250] sm:$0xff]  ;;  %v859_v41 = vld [vmem:[%s10469_s5 + $0x338] sm:$0xff]  ;;  %v861_v46 = vld [vmem:[%s10469_s5 + $0x348] sm:$0xff] }
 0x218   :  { %1013 = vmatmul.mubr.f32.vlgmr.msra.gmra.mrb[4].mxu1 %v816_v40  ;;  %v818_v55 = vmax.f32 %v814_v44, 0.0  ;;  %v5461_v63 = vpack.c.bf16 %v830_v56, %v828_v47  ;;  %v856_v40 = vld [vmem:[%s10469_s5 + $0x320] sm:$0xff]  ;;  %v858_v44 = vld [vmem:[%s10469_s5 + $0x330] sm:$0xff]  ;;  %v865_v33 = vld [vmem:[%s10469_s5 + $0x368] sm:$0xff] }
 0x219   :  { %v819_v53 = vmax.f32 %v815_v10, 0.0  ;;  %5454 = vmatpush1.bf16.msra.mxu1 %v5453_v34  ;;  %v5487_v34 = vpack.c.bf16 %v859_v41, %v857_v24  ;;  %v5489_v48 = vpack.c.bf16 %v858_v44, %v856_v40  ;;  %v862_v10 = vld [vmem:[%s10469_s5 + $0x350] sm:$0xff]  ;;  %v867_v36 = vld [vmem:[%s10469_s5 + $0x378] sm:$0xff]  ;;  %v869_v47 = vld [vmem:[%s10469_s5 + $0x388] sm:$0xff] }
 0x21a   :  { %5456 = vmatprep.subr.bf16.mxu1 %v5455_v45  ;;  %v863_v45 = vld [vmem:[%s10469_s5 + $0x358] sm:$0xff]  ;;  %v1159_v39 = vld [vmem:[#allocation6 + $0x128] sm:$0xff]  ;;  %v1158_v40 = vld [vmem:[#allocation6 + $0x120] sm:$0xff] }
 0x21b   :  { %1018 = vmatprep.mubr.f32.mxu1 %v819_v53  ;;  %v5491_v49 = vpack.c.bf16 %v863_v45, %v861_v46  ;;  %v5493_v53 = vpack.c.bf16 %v862_v10, %v860_v50  ;;  %v871_v56 = vld [vmem:[%s10469_s5 + $0x398] sm:$0xff]  ;;  %v1167_v24 = vld [vmem:[#allocation6 + $0x168] sm:$0xff]  ;;  %v1166_v44 = vld [vmem:[#allocation6 + $0x160] sm:$0xff] }
 0x21c   :  { %1019 = vmatmul.mubr.f32.gmra.mrb[6].mxu1 %v818_v55  ;;  %v864_v55 = vld [vmem:[%s10469_s5 + $0x360] sm:$0xff]  ;;  %v5499_v61 = vpack.c.bf16 %v871_v56, %v869_v47  ;;  %v1175_v46 = vld [vmem:[#allocation6 + $0x1a8] sm:$0xff]  ;;  %v5653_v45 = vpack.c.bf16 %v1166_v44, %v1158_v40 }
 0x21d   :  { %5458 = vmatpush1.bf16.msra.mxu1 %v5457_v54  ;;  %1089 = vmatprep.mubr.f32.mxu1 %v556_v58  ;;  %v5495_v54 = vpack.c.bf16 %v867_v36, %v865_v33  ;;  %v1183_v51 = vld [vmem:[#allocation6 + $0x1e8] sm:$0xff]  ;;  %v1206_v56 = vld [vmem:[#allocation6 + $0x2a0] sm:$0xff] }
 0x21e   :  { %5460 = vmatprep.subr.bf16.mxu1 %v5459_v57  ;;  %v866_v57 = vld [vmem:[%s10469_s5 + $0x370] sm:$0xff]  ;;  %v1191_v50 = vld [vmem:[#allocation6 + $0x228] sm:$0xff]  ;;  %v1318_v40 = vld [vmem:[#allocation6 + $0x620] sm:$0xff] }
 0x21f   :  { %v5497_v58 = vpack.c.bf16 %v866_v57, %v864_v55  ;;  %v1199_v10 = vld [vmem:[#allocation6 + $0x268] sm:$0xff]  ;;  %v1326_v44 = vld [vmem:[#allocation6 + $0x660] sm:$0xff] }
 0x220   :  { %v5659_v36 = vpack.c.bf16 %v1199_v10, %v1191_v50  ;;  %v1215_v55 = vld [vmem:[#allocation6 + $0x2e8] sm:$0xff] }
 0x221   :  { %5462 = vmatpush1.bf16.msra.mxu1 %v5461_v63  ;;  %v870_v63 = vld [vmem:[%s10469_s5 + $0x390] sm:$0xff]  ;;  %v1351_v50 = vld [vmem:[#allocation6 + $0x728] sm:$0xff] }
 0x222   :  { %5464 = vmatprep.subr.bf16.mxu1 %v5463_v0  ;;  %v873_v0 = vld [vmem:[%s10469_s5 + $0x3a8] sm:$0xff]  ;;  %v5501_v3 = vpack.c.bf16 %v870_v63, %v868_v62 }
 0x223   :  { %v5503_v4 = vpack.c.bf16 %v875_v2, %v873_v0  ;;  %v1231_v62 = vld [vmem:[#allocation6 + $0x368] sm:$0xff]  ;;  %v1222_v2 = vld [vmem:[#allocation6 + $0x320] sm:$0xff] }
 0x224   :  { %v1359_v10 = vld [vmem:[#allocation6 + $0x768] sm:$0xff] }
 0x225   :  { %5466 = vmatpush1.bf16.msra.mxu1 %v5465_v5  ;;  %v874_v5 = vld [vmem:[%s10469_s5 + $0x3b0] sm:$0xff] }
 0x226   :  { %5468 = vmatprep.subr.bf16.mxu1 %v5467_v6  ;;  %v877_v6 = vld [vmem:[%s10469_s5 + $0x3c8] sm:$0xff]  ;;  %v5505_v8 = vpack.c.bf16 %v874_v5, %v872_v1 }
 0x227   :  { %v5507_v9 = vpack.c.bf16 %v879_v7, %v877_v6  ;;  %v1247_v1 = vld [vmem:[#allocation6 + $0x3e8] sm:$0xff]  ;;  %v1238_v7 = vld [vmem:[#allocation6 + $0x3a0] sm:$0xff] }
 0x229   :  { %5470 = vmatpush1.bf16.msra.mxu1 %v5469_v13  ;;  %v878_v13 = vld [vmem:[%s10469_s5 + $0x3d0] sm:$0xff] }
 0x22a   :  { %5472 = vmatprep.subr.bf16.mxu1 %v5471_v14  ;;  %v881_v14 = vld [vmem:[%s10469_s5 + $0x3e8] sm:$0xff]  ;;  %v5509_v19 = vpack.c.bf16 %v878_v13, %v876_v12 }
 0x22b   :  { %v5511_v18 = vpack.c.bf16 %v883_v15, %v881_v14  ;;  %v1263_v12 = vld [vmem:[#allocation6 + $0x468] sm:$0xff]  ;;  %v1254_v15 = vld [vmem:[#allocation6 + $0x420] sm:$0xff] }
 0x22d   :  { %5474 = vmatpush1.bf16.msra.mxu1 %v5473_v22  ;;  %v882_v22 = vld [vmem:[%s10469_s5 + $0x3f0] sm:$0xff] }
 0x22e   :  { %5476 = vmatprep.subr.bf16.mxu1 %v5475_v23  ;;  %v1127_v23 = vld [vmem:[#allocation6 + $0x28] sm:$0xff]  ;;  %v5513_v27 = vpack.c.bf16 %v882_v22, %v880_v21 }
 0x22f   :  { %v5643_v17 = vpack.c.bf16 %v1135_v26, %v1127_v23  ;;  %v1279_v21 = vld [vmem:[#allocation6 + $0x4e8] sm:$0xff]  ;;  %v1270_v26 = vld [vmem:[#allocation6 + $0x4a0] sm:$0xff] }
 0x231   :  { %5478 = vmatpush1.bf16.msra.mxu1 %v5477_v29  ;;  %v1134_v29 = vld [vmem:[#allocation6 + $0x60] sm:$0xff] }
 0x232   :  { %5480 = vmatprep.subr.bf16.mxu1 %v5479_v31  ;;  %v1143_v31 = vld [vmem:[#allocation6 + $0xa8] sm:$0xff]  ;;  %v5645_v32 = vpack.c.bf16 %v1134_v29, %v1126_v20 }
 0x233   :  { %v5647_v30 = vpack.c.bf16 %v1151_v11, %v1143_v31  ;;  %v1295_v20 = vld [vmem:[#allocation6 + $0x568] sm:$0xff]  ;;  %v1286_v11 = vld [vmem:[#allocation6 + $0x520] sm:$0xff] }
 0x235   :  { %5482 = vmatpush1.bf16.msra.mxu1 %v5481_v35  ;;  %v1142_v35 = vld [vmem:[#allocation6 + $0xa0] sm:$0xff] }
 0x236   :  { %5484 = vmatprep.subr.bf16.mxu1 %v5483_v37  ;;  %v1150_v37 = vld [vmem:[#allocation6 + $0xe0] sm:$0xff] }
 0x237   :  { %v5649_v41 = vpack.c.bf16 %v1150_v37, %v1142_v35 }
 0x239   :  { %5486 = vmatpush1.bf16.msra.mxu1 %v5485_v42  ;;  %v557_v42 = vmax.f32 %v8719_v52, 0.0  ;;  %v1190_v52 = vld [vmem:[#allocation6 + $0x220] sm:$0xff] }
 0x23a   :  { %5488 = vmatprep.subr.bf16.mxu1 %v5487_v34  ;;  %v5651_v34 = vpack.c.bf16 %v1167_v24, %v1159_v39  ;;  %v1310_v39 = vld [vmem:[#allocation6 + $0x5e0] sm:$0xff]  ;;  %v1319_v24 = vld [vmem:[#allocation6 + $0x628] sm:$0xff] }
 0x23d   :  { %5490 = vmatpush1.bf16.msra.mxu1 %v5489_v48  ;;  %v5655_v48 = vpack.c.bf16 %v1183_v51, %v1175_v46  ;;  %v1335_v46 = vld [vmem:[#allocation6 + $0x6a8] sm:$0xff] }
 0x23e   :  { %5492 = vmatprep.subr.bf16.mxu1 %v5491_v49  ;;  %v1182_v49 = vld [vmem:[#allocation6 + $0x1e0] sm:$0xff]  ;;  %v1343_v51 = vld [vmem:[#allocation6 + $0x6e8] sm:$0xff] }
 0x23f   :  { %v5657_v33 = vpack.c.bf16 %v1182_v49, %v1174_v60  ;;  %v1334_v60 = vld [vmem:[#allocation6 + $0x6a0] sm:$0xff] }
 0x240   :  { %v1342_v49 = vld [vmem:[#allocation6 + $0x6e0] sm:$0xff] }
 0x241   :  { %5494 = vmatpush1.bf16.msra.mxu1 %v5493_v53  ;;  %v1198_v53 = vld [vmem:[#allocation6 + $0x260] sm:$0xff] }
 0x242   :  { %5496 = vmatprep.subr.bf16.mxu1 %v5495_v54  ;;  %v1207_v54 = vld [vmem:[#allocation6 + $0x2a8] sm:$0xff]  ;;  %v5661_v57 = vpack.c.bf16 %v1198_v53, %v1190_v52  ;;  %v1350_v52 = vld [vmem:[#allocation6 + $0x720] sm:$0xff] }
 0x243   :  { %v5663_v47 = vpack.c.bf16 %v1215_v55, %v1207_v54  ;;  %v1358_v53 = vld [vmem:[#allocation6 + $0x760] sm:$0xff]  ;;  %v1363_v55 = vld [vmem:[#allocation6 + $0x788] sm:$0xff] }
 0x244   :  { %v5701_v54 = vpack.c.bf16 %v1358_v53, %v1350_v52  ;;  %v1776_v53 = vld [vmem:[#allocation8 + $0x100] sm:$0xff] }
 0x245   :  { %5498 = vmatpush1.bf16.msra.mxu1 %v5497_v58  ;;  %v1214_v58 = vld [vmem:[#allocation6 + $0x2e0] sm:$0xff] }
 0x246   :  { %5500 = vmatprep.subr.bf16.mxu1 %v5499_v61  ;;  %v1223_v61 = vld [vmem:[#allocation6 + $0x328] sm:$0xff]  ;;  %v5665_v63 = vpack.c.bf16 %v1214_v58, %v1206_v56 }
 0x247   :  { %v5667_v0 = vpack.c.bf16 %v1231_v62, %v1223_v61  ;;  %v1375_v58 = vld [vmem:[#allocation6 + $0x7e8] sm:$0xff]  ;;  %v1362_v61 = vld [vmem:[#allocation6 + $0x780] sm:$0xff] }
 0x248   :  { %v1370_v62 = vld [vmem:[#allocation6 + $0x7c0] sm:$0xff] }
 0x249   :  { %5502 = vmatpush1.bf16.msra.mxu1 %v5501_v3  ;;  %v1230_v3 = vld [vmem:[#allocation6 + $0x360] sm:$0xff] }
 0x24a   :  { %5504 = vmatprep.subr.bf16.mxu1 %v5503_v4  ;;  %v1239_v4 = vld [vmem:[#allocation6 + $0x3a8] sm:$0xff]  ;;  %v5669_v5 = vpack.c.bf16 %v1230_v3, %v1222_v2  ;;  %v1366_v2 = vld [vmem:[#allocation6 + $0x7a0] sm:$0xff] }
 0x24b   :  { %v5671_v6 = vpack.c.bf16 %v1247_v1, %v1239_v4  ;;  %v1374_v3 = vld [vmem:[#allocation6 + $0x7e0] sm:$0xff]  ;;  %v1125_v1 = vld [vmem:[#allocation6 + $0x18] sm:$0xff] }
 0x24c   :  { %v5705_v4 = vpack.c.bf16 %v1374_v3, %v1366_v2 }
 0x24d   :  { %5506 = vmatpush1.bf16.msra.mxu1 %v5505_v8  ;;  %v1246_v8 = vld [vmem:[#allocation6 + $0x3e0] sm:$0xff] }
 0x24e   :  { %5508 = vmatprep.subr.bf16.mxu1 %v5507_v9  ;;  %v1255_v9 = vld [vmem:[#allocation6 + $0x428] sm:$0xff]  ;;  %v5673_v13 = vpack.c.bf16 %v1246_v8, %v1238_v7 }
 0x24f   :  { %v5675_v14 = vpack.c.bf16 %v1263_v12, %v1255_v9  ;;  %v1753_v8 = vld [vmem:[#allocation8 + $0x48] sm:$0xff]  ;;  %v1102_v12 = vld [vmem:[%s10470_s6] sm:$0x3] }
 0x251   :  { %5510 = vmatpush1.bf16.msra.mxu1 %v5509_v19  ;;  %v1262_v19 = vld [vmem:[#allocation6 + $0x460] sm:$0xff] }
 0x252   :  { %5512 = vmatprep.subr.bf16.mxu1 %v5511_v18  ;;  %v1271_v18 = vld [vmem:[#allocation6 + $0x4a8] sm:$0xff]  ;;  %v5677_v22 = vpack.c.bf16 %v1262_v19, %v1254_v15  ;;  %v1124_v19 = vld [vmem:[#allocation6 + $0x10] sm:$0xff] }
 0x253   :  { %v5679_v23 = vpack.c.bf16 %v1279_v21, %v1271_v18  ;;  %v1132_v18 = vld [vmem:[#allocation6 + $0x50] sm:$0xff] }
 0x255   :  { %5514 = vmatpush1.bf16.msra.mxu1 %v5513_v27  ;;  %v1278_v27 = vld [vmem:[#allocation6 + $0x4e0] sm:$0xff] }
 0x256   :  { %5644 = vmatprep.subr.bf16.mxu1 %v5643_v17  ;;  %v1287_v17 = vld [vmem:[#allocation6 + $0x528] sm:$0xff]  ;;  %v5681_v29 = vpack.c.bf16 %v1278_v27, %v1270_v26  ;;  %v1752_v26 = vld [vmem:[#allocation8 + $0x40] sm:$0xff]  ;;  %v1141_v27 = vld [vmem:[#allocation6 + $0x98] sm:$0xff] }
 0x257   :  { %v5683_v31 = vpack.c.bf16 %v1295_v20, %v1287_v17  ;;  %v1149_v20 = vld [vmem:[#allocation6 + $0xd8] sm:$0xff] }
 0x258   :  { %1090 = vmatmul.mubr.f32.vlgmr.msra.gmra.mrb[4].mxu1 %v555_v25  ;;  %v1303_v25 = vld [vmem:[#allocation6 + $0x5a8] sm:$0xff] }
 0x259   :  { %1095 = vmatprep.mubr.f32.mxu1 %v558_v38  ;;  %5646 = vmatpush1.bf16.msra.mxu1 %v5645_v32  ;;  %v1294_v32 = vld [vmem:[#allocation6 + $0x560] sm:$0xff] }
 0x25a   :  { %5648 = vmatprep.subr.bf16.mxu1 %v5647_v30  ;;  %v1311_v30 = vld [vmem:[#allocation6 + $0x5e8] sm:$0xff]  ;;  %v5685_v35 = vpack.c.bf16 %v1294_v32, %v1286_v11  ;;  %v1302_v38 = vld [vmem:[#allocation6 + $0x5a0] sm:$0xff] }
 0x25b   :  { %v5687_v37 = vpack.c.bf16 %v1311_v30, %v1303_v25  ;;  %v5581_v25 = vpack.c.bf16 %v1132_v18, %v1124_v19 }
 0x25c   :  { %1096 = vmatmul.mubr.f32.gmra.mrb[6].mxu1 %v557_v42  ;;  %v5689_v42 = vpack.c.bf16 %v1310_v39, %v1302_v38 }
 0x25d   :  { %5650 = vmatpush1.bf16.msra.mxu1 %v5649_v41  ;;  %v1327_v41 = vld [vmem:[#allocation6 + $0x668] sm:$0xff] }
 0x25e   :  { %5652 = vmatprep.subr.bf16.mxu1 %v5651_v34  ;;  %v5691_v34 = vpack.c.bf16 %v1327_v41, %v1319_v24  ;;  %v5583_v24 = vpack.c.bf16 %v1149_v20, %v1141_v27  ;;  %v1825_v27 = vld [vmem:[#allocation8 + $0x288] sm:$0xff] }
 0x261   :  { %5654 = vmatpush1.bf16.msra.mxu1 %v5653_v45  ;;  %v5693_v45 = vpack.c.bf16 %v1326_v44, %v1318_v40  ;;  %v1768_v40 = vld [vmem:[#allocation8 + $0xc0] sm:$0xff] }
 0x262   :  { %5656 = vmatprep.subr.bf16.mxu1 %v5655_v48  ;;  %v5695_v48 = vpack.c.bf16 %v1343_v51, %v1335_v46  ;;  %v1157_v46 = vld [vmem:[#allocation6 + $0x118] sm:$0xff] }
 0x263   :  { %v1165_v51 = vld [vmem:[#allocation6 + $0x158] sm:$0xff] }
 0x264   :  { %v5587_v52 = vpack.c.bf16 %v1165_v51, %v1157_v46  ;;  %v1220_v51 = vld [vmem:[#allocation6 + $0x310] sm:$0xff] }
 0x265   :  { %5658 = vmatpush1.bf16.msra.mxu1 %v5657_v33  ;;  %v5697_v33 = vpack.c.bf16 %v1342_v49, %v1334_v60 }
 0x266   :  { %5660 = vmatprep.subr.bf16.mxu1 %v5659_v36  ;;  %v5699_v36 = vpack.c.bf16 %v1359_v10, %v1351_v50  ;;  %v1156_v10 = vld [vmem:[#allocation6 + $0x110] sm:$0xff] }
 0x269   :  { %5662 = vmatpush1.bf16.msra.mxu1 %v5661_v57  ;;  %v1371_v57 = vld [vmem:[#allocation6 + $0x7c8] sm:$0xff] }
 0x26a   :  { %5664 = vmatprep.subr.bf16.mxu1 %v5663_v47  ;;  %v1367_v47 = vld [vmem:[#allocation6 + $0x7a8] sm:$0xff]  ;;  %v5575_v56 = vpack.c.bf16 %v1371_v57, %v1363_v55  ;;  %v1173_v55 = vld [vmem:[#allocation6 + $0x198] sm:$0xff] }
 0x26c   :  { %5576 = vmatprep.subr.bf16.mxu0 %v5575_v56  ;;  %v1793_v56 = vld [vmem:[#allocation8 + $0x188] sm:$0xff] }
 0x26d   :  { %5666 = vmatpush1.bf16.msra.mxu1 %v5665_v63  ;;  %v5703_v63 = vpack.c.bf16 %v1375_v58, %v1367_v47  ;;  %v1181_v47 = vld [vmem:[#allocation6 + $0x1d8] sm:$0xff]  ;;  %v1801_v58 = vld [vmem:[#allocation8 + $0x1c8] sm:$0xff] }
 0x26e   :  { %5668 = vmatprep.subr.bf16.mxu1 %v5667_v0  ;;  %v5577_v0 = vpack.c.bf16 %v1370_v62, %v1362_v61  ;;  %v5591_v2 = vpack.c.bf16 %v1181_v47, %v1173_v55  ;;  %v8957_v3 = vpack.c.bf16 %v1801_v58, %v1793_v56  ;;  %v1865_v55 = vld [vmem:[#allocation8 + $0x3c8] sm:$0xff]  ;;  %v1236_v58 = vld [vmem:[#allocation6 + $0x390] sm:$0xff] }
 0x270   :  { %5578 = vmatpush1.bf16.msra.mxu0 %v5577_v0  ;;  %v1180_v0 = vld [vmem:[#allocation6 + $0x1d0] sm:$0xff]  ;;  %10758 = vst [vmem:[#allocation17_spill] sm:$0xff] %v8957_v3 }
 0x271   :  { %5670 = vmatpush1.bf16.msra.mxu1 %v5669_v5  ;;  %v1133_v5 = vld [vmem:[#allocation6 + $0x58] sm:$0xff] }
 0x272   :  { %5672 = vmatprep.subr.bf16.mxu1 %v5671_v6  ;;  %v1745_v6 = vld [vmem:[#allocation8 + $0x8] sm:$0xff]  ;;  %v5579_v7 = vpack.c.bf16 %v1133_v5, %v1125_v1  ;;  %v1800_v1 = vld [vmem:[#allocation8 + $0x1c0] sm:$0xff]  ;;  %v1189_v5 = vld [vmem:[#allocation6 + $0x218] sm:$0xff] }
 0x273   :  { %v8919_v9 = vpack.c.bf16 %v1753_v8, %v1745_v6  ;;  %v1197_v6 = vld [vmem:[#allocation6 + $0x258] sm:$0xff]  ;;  %v1817_v8 = vld [vmem:[#allocation8 + $0x248] sm:$0xff] }
 0x274   :  { %5580 = vmatprep.subr.bf16.mxu0 %v5579_v7  ;;  %v1809_v7 = vld [vmem:[#allocation8 + $0x208] sm:$0xff]  ;;  %v5595_v19 = vpack.c.bf16 %v1197_v6, %v1189_v5  ;;  %v1261_v5 = vld [vmem:[#allocation6 + $0x458] sm:$0xff] }
 0x275   :  { %5674 = vmatpush1.bf16.msra.mxu1 %v5673_v13  ;;  %10752 = vst [vmem:[#allocation11_spill] sm:$0xff] %v8919_v9  ;;  %v1107_v13 = vrot.slane %v1102_v12, %v8699_v16  ;;  %v8965_v18 = vpack.c.bf16 %v1817_v8, %v1809_v7  ;;  %v1873_v6 = vld [vmem:[#allocation8 + $0x408] sm:$0xff] }
 0x276   :  { %5676 = vmatprep.subr.bf16.mxu1 %v5675_v14  ;;  %v1111_v14 = vrot.slane %v1102_v12, %v8708_v43  ;;  %v1881_v7 = vld [vmem:[#allocation8 + $0x448] sm:$0xff] }
 0x277   :  { %10760 = vst [vmem:[#allocation19_spill] sm:$0xff] %v8965_v18 }
 0x279   :  { %5678 = vmatpush1.bf16.msra.mxu1 %v5677_v22 }
 0x27a   :  { %5680 = vmatprep.subr.bf16.mxu1 %v5679_v23  ;;  %v1744_v23 = vld [vmem:[#allocation8] sm:$0xff] }
 0x27b   :  { %v8929_v30 = vpack.c.bf16 %v1752_v26, %v1744_v23  ;;  %v1205_v23 = vld [vmem:[#allocation6 + $0x298] sm:$0xff] }
 0x27c   :  { %v1213_v26 = vld [vmem:[#allocation6 + $0x2d8] sm:$0xff] }
 0x27d   :  { %5682 = vmatpush1.bf16.msra.mxu1 %v5681_v29  ;;  %v1761_v29 = vld [vmem:[#allocation8 + $0x88] sm:$0xff]  ;;  %10753 = vst [vmem:[#allocation12_spill] sm:$0xff] %v8929_v30 }
 0x27e   :  { %5684 = vmatprep.subr.bf16.mxu1 %v5683_v31  ;;  %v1769_v31 = vld [vmem:[#allocation8 + $0xc8] sm:$0xff] }
 0x27f   :  { %v8933_v41 = vpack.c.bf16 %v1769_v31, %v1761_v29  ;;  %v1204_v31 = vld [vmem:[#allocation6 + $0x290] sm:$0xff] }
 0x281   :  { %5686 = vmatpush1.bf16.msra.mxu1 %v5685_v35  ;;  %v1140_v35 = vld [vmem:[#allocation6 + $0x90] sm:$0xff]  ;;  %10754 = vst [vmem:[#allocation13_spill] sm:$0xff] %v8933_v41 }
 0x282   :  { %5688 = vmatprep.subr.bf16.mxu1 %v5687_v37 }
 0x285   :  { %5690 = vmatpush1.bf16.msra.mxu1 %v5689_v42  ;;  %v1148_v42 = vld [vmem:[#allocation6 + $0xd0] sm:$0xff] }
 0x286   :  { %5692 = vmatprep.subr.bf16.mxu1 %v5691_v34  ;;  %v1760_v34 = vld [vmem:[#allocation8 + $0x80] sm:$0xff]  ;;  %v5585_v49 = vpack.c.bf16 %v1148_v42, %v1140_v35  ;;  %v1229_v42 = vld [vmem:[#allocation6 + $0x358] sm:$0xff] }
 0x287   :  { %v8942_v50 = vpack.c.bf16 %v1768_v40, %v1760_v34  ;;  %v1841_v34 = vld [vmem:[#allocation8 + $0x308] sm:$0xff] }
 0x288   :  { %v1849_v40 = vld [vmem:[#allocation8 + $0x348] sm:$0xff] }
 0x289   :  { %5694 = vmatpush1.bf16.msra.mxu1 %v5693_v45  ;;  %v1777_v45 = vld [vmem:[#allocation8 + $0x108] sm:$0xff]  ;;  %10755 = vst [vmem:[#allocation14_spill] sm:$0xff] %v8942_v50 }
 0x28a   :  { %5696 = vmatprep.subr.bf16.mxu1 %v5695_v48  ;;  %v1785_v48 = vld [vmem:[#allocation8 + $0x148] sm:$0xff] }
 0x28b   :  { %v8949_v57 = vpack.c.bf16 %v1785_v48, %v1777_v45  ;;  %v1228_v45 = vld [vmem:[#allocation6 + $0x350] sm:$0xff] }
 0x28c   :  { %v5605_v47 = vpack.c.bf16 %v1228_v45, %v1220_v51  ;;  %v1905_v51 = vld [vmem:[#allocation8 + $0x508] sm:$0xff] }
 0x28d   :  { %5698 = vmatpush1.bf16.msra.mxu1 %v5697_v33  ;;  %v1164_v33 = vld [vmem:[#allocation6 + $0x150] sm:$0xff]  ;;  %10756 = vst [vmem:[#allocation15_spill] sm:$0xff] %v8949_v57  ;;  %v1913_v45 = vld [vmem:[#allocation8 + $0x548] sm:$0xff] }
 0x28e   :  { %5700 = vmatprep.subr.bf16.mxu1 %v5699_v36  ;;  %v5589_v61 = vpack.c.bf16 %v1164_v33, %v1156_v10  ;;  %v1840_v10 = vld [vmem:[#allocation8 + $0x300] sm:$0xff] }
 0x28f   :  { %v1848_v33 = vld [vmem:[#allocation8 + $0x340] sm:$0xff] }
 0x290   :  { %v8980_v56 = vpack.c.bf16 %v1848_v33, %v1840_v10  ;;  %v1284_v33 = vld [vmem:[#allocation6 + $0x510] sm:$0xff] }
 0x291   :  { %5702 = vmatpush1.bf16.msra.mxu1 %v5701_v54  ;;  %v1784_v54 = vld [vmem:[#allocation8 + $0x140] sm:$0xff] }
 0x292   :  { %5704 = vmatprep.subr.bf16.mxu1 %v5703_v63  ;;  %v8954_v62 = vpack.c.bf16 %v1784_v54, %v1776_v53  ;;  %v1172_v63 = vld [vmem:[#allocation6 + $0x190] sm:$0xff]  ;;  %v1245_v53 = vld [vmem:[#allocation6 + $0x3d8] sm:$0xff]  ;;  %v1857_v54 = vld [vmem:[#allocation8 + $0x388] sm:$0xff]  ;;  %10765 = vst [vmem:[#allocation24_spill] sm:$0xff] %v8980_v56 }
 0x293   :  { %v5593_v12 = vpack.c.bf16 %v1180_v0, %v1172_v63  ;;  %v8983_v0 = vpack.c.bf16 %v1865_v55, %v1857_v54  ;;  %v9001_v54 = vpack.c.bf16 %v1913_v45, %v1905_v51  ;;  %v1904_v55 = vld [vmem:[#allocation8 + $0x500] sm:$0xff]  ;;  %v1961_v51 = vld [vmem:[#allocation8 + $0x6c8] sm:$0xff] }
 0x294   :  { %10757 = vst [vmem:[#allocation16_spill] sm:$0xff] %v8954_v62 }
 0x295   :  { %5706 = vmatpush1.bf16.msra.mxu1 %v5705_v4  ;;  %v1792_v4 = vld [vmem:[#allocation8 + $0x180] sm:$0xff]  ;;  %10766 = vst [vmem:[#allocation25_spill] sm:$0xff] %v8983_v0  ;;  %10772 = vst [vmem:[#allocation31_spill] sm:$0xff] %v9001_v54 }
 0x296   :  { %5772 = vmatprep.subr.bf16.mxu1 %v8919_v9 }
 0x32b   :  { %v1091_v15 = vpop.f32.mrb[4].mxu1 }
 0x32c   :  { %v1114_v21 = vadd.f32 %v1107_v13, %v1091_v15  ;;  %v1093_v22 = vpop.f32.mrb[5].mxu1  ;;  %v1196_v15 = vld [vmem:[#allocation6 + $0x250] sm:$0xff] }
 0x32d   :  { %v1115_v17 = vadd.f32 %v1111_v14, %v1093_v22  ;;  %v1816_v22 = vld [vmem:[#allocation8 + $0x240] sm:$0xff] }
 0x32e   :  { %v8931_v37 = vmax.f32 %v1114_v21, 0.0  ;;  %v1808_v21 = vld [vmem:[#allocation8 + $0x200] sm:$0xff] }
 0x32f   :  { %v8927_v11 = vmax.f32 %v1115_v17, 0.0  ;;  %v1097_v32 = vpop.f32.mrb[6].mxu1  ;;  %v1833_v17 = vld [vmem:[#allocation8 + $0x2c8] sm:$0xff]  ;;  %v8968_v29 = vpack.c.bf16 %v1816_v22, %v1808_v21  ;;  %v8989_v21 = vpack.c.bf16 %v1881_v7, %v1873_v6  ;;  %v1872_v22 = vld [vmem:[#allocation8 + $0x400] sm:$0xff]  ;;  %v1308_v6 = vld [vmem:[#allocation6 + $0x5d0] sm:$0xff] }
 0x330   :  { %v1116_v38 = vadd.f32 %v1107_v13, %v1097_v32  ;;  %v1099_v39 = vpop.f32.mrb[7].mxu1  ;;  %v8962_v13 = vpack.c.bf16 %v1800_v1, %v1792_v4  ;;  %v1212_v32 = vld [vmem:[#allocation6 + $0x2d0] sm:$0xff]  ;;  %v8971_v35 = vpack.c.bf16 %v1833_v17, %v1825_v27  ;;  %v1864_v4 = vld [vmem:[#allocation8 + $0x3c0] sm:$0xff]  ;;  %v1253_v1 = vld [vmem:[#allocation6 + $0x418] sm:$0xff] }
 0x331   :  { %v1117_v44 = vadd.f32 %v1111_v14, %v1099_v39  ;;  %1484 = vmatprep.mubr.f32.mxu0 %v8927_v11  ;;  %1638 = vmatprep.mubr.f32.mxu1 %v8927_v11  ;;  %v1188_v14 = vld [vmem:[#allocation6 + $0x210] sm:$0xff]  ;;  %10761 = vst [vmem:[#allocation20_spill] sm:$0xff] %v8968_v29  ;;  %v1832_v39 = vld [vmem:[#allocation8 + $0x2c0] sm:$0xff]  ;;  %10768 = vst [vmem:[#allocation27_spill] sm:$0xff] %v8989_v21 }
 0x332   :  { %1485 = vmatmul.mubr.f32.vlgmr.msra.gmra.mrb[22].mxu0 %v8931_v37  ;;  %1639 = vmatmul.mubr.f32.vlgmr.msra.gmra.mrb[8].mxu1 %v8931_v37  ;;  %v8944_v36 = vmax.f32 %v1116_v38, 0.0  ;;  %10759 = vst [vmem:[#allocation18_spill] sm:$0xff] %v8962_v13  ;;  %v5597_v20 = vpack.c.bf16 %v1196_v15, %v1188_v14  ;;  %10762 = vst [vmem:[#allocation21_spill] sm:$0xff] %v8971_v35  ;;  %v1824_v38 = vld [vmem:[#allocation8 + $0x280] sm:$0xff]  ;;  %v1252_v14 = vld [vmem:[#allocation6 + $0x410] sm:$0xff] }
 0x333   :  { %v8939_v60 = vmax.f32 %v1117_v44, 0.0  ;;  %5582 = vmatpush1.bf16.msra.mxu0 %v5581_v25  ;;  %5774 = vmatpush1.bf16.msra.mxu1 %v8929_v30  ;;  %v5599_v25 = vpack.c.bf16 %v1213_v26, %v1205_v23  ;;  %v5601_v44 = vpack.c.bf16 %v1212_v32, %v1204_v31  ;;  %v8974_v46 = vpack.c.bf16 %v1832_v39, %v1824_v38  ;;  %v1260_v15 = vld [vmem:[#allocation6 + $0x450] sm:$0xff]  ;;  %v1880_v23 = vld [vmem:[#allocation8 + $0x440] sm:$0xff]  ;;  %v1269_v26 = vld [vmem:[#allocation6 + $0x498] sm:$0xff] }
 0x334   :  { %5584 = vmatprep.subr.bf16.mxu0 %v5583_v24  ;;  %5776 = vmatprep.subr.bf16.mxu1 %v8933_v41  ;;  %v1221_v24 = vld [vmem:[#allocation6 + $0x318] sm:$0xff]  ;;  %v1889_v17 = vld [vmem:[#allocation8 + $0x488] sm:$0xff]  ;;  %v5613_v31 = vpack.c.bf16 %v1260_v15, %v1252_v14  ;;  %v8992_v32 = vpack.c.bf16 %v1880_v23, %v1872_v22  ;;  %v1276_v38 = vld [vmem:[#allocation6 + $0x4d0] sm:$0xff] }
 0x335   :  { %1490 = vmatprep.mubr.f32.mxu0 %v8939_v60  ;;  %1644 = vmatprep.mubr.f32.mxu1 %v8939_v60  ;;  %10763 = vst [vmem:[#allocation22_spill] sm:$0xff] %v8974_v46  ;;  %v5603_v48 = vpack.c.bf16 %v1229_v42, %v1221_v24  ;;  %v1277_v27 = vld [vmem:[#allocation6 + $0x4d8] sm:$0xff]  ;;  %v1888_v42 = vld [vmem:[#allocation8 + $0x480] sm:$0xff]  ;;  %v1937_v23 = vld [vmem:[#allocation8 + $0x608] sm:$0xff] }
 0x336   :  { %1491 = vmatmul.mubr.f32.gmra.mrb[24].mxu0 %v8944_v36  ;;  %1645 = vmatmul.mubr.f32.gmra.mrb[10].mxu1 %v8944_v36  ;;  %10769 = vst [vmem:[#allocation28_spill] sm:$0xff] %v8992_v32  ;;  %v5615_v39 = vpack.c.bf16 %v1277_v27, %v1269_v26  ;;  %v1920_v14 = vld [vmem:[#allocation8 + $0x580] sm:$0xff]  ;;  %v1325_v22 = vld [vmem:[#allocation6 + $0x658] sm:$0xff]  ;;  %v1945_v26 = vld [vmem:[#allocation8 + $0x648] sm:$0xff] }
 0x337   :  { %5586 = vmatpush1.bf16.msra.mxu0 %v5585_v49  ;;  %5778 = vmatpush1.bf16.msra.mxu1 %v8942_v50  ;;  %v8977_v49 = vpack.c.bf16 %v1849_v40, %v1841_v34  ;;  %v1896_v34 = vld [vmem:[#allocation8 + $0x4c0] sm:$0xff]  ;;  %v1285_v40 = vld [vmem:[#allocation6 + $0x518] sm:$0xff] }
 0x338   :  { %1561 = vmatprep.mubr.f32.mxu0 %v8927_v11  ;;  %5588 = vmatprep.subr.bf16.mxu0 %v5587_v52  ;;  %v1237_v52 = vld [vmem:[#allocation6 + $0x398] sm:$0xff]  ;;  %v8998_v10 = vpack.c.bf16 %v1896_v34, %v1888_v42  ;;  %v1928_v15 = vld [vmem:[#allocation8 + $0x5c0] sm:$0xff] }
 0x339   :  { %5780 = vmatprep.subr.bf16.mxu1 %v8949_v57  ;;  %2072 = vmatprep.mubr.f32.mxu1 %v10477_v59  ;;  %10764 = vst [vmem:[#allocation23_spill] sm:$0xff] %v8977_v49  ;;  %v5607_v63 = vpack.c.bf16 %v1245_v53, %v1237_v52  ;;  %v1292_v52 = vld [vmem:[#allocation6 + $0x550] sm:$0xff]  ;;  %v1944_v42 = vld [vmem:[#allocation8 + $0x640] sm:$0xff]  ;;  %v1333_v34 = vld [vmem:[#allocation6 + $0x698] sm:$0xff] }
 0x33a   :  { %10771 = vst [vmem:[#allocation30_spill] sm:$0xff] %v8998_v10 }
 0x33b   :  { %5590 = vmatpush1.bf16.msra.mxu0 %v5589_v61  ;;  %5782 = vmatpush1.bf16.msra.mxu1 %v8954_v62  ;;  %v1244_v61 = vld [vmem:[#allocation6 + $0x3d0] sm:$0xff] }
 0x33c   :  { %5592 = vmatprep.subr.bf16.mxu0 %v5591_v2  ;;  %5784 = vmatprep.subr.bf16.mxu1 %v8957_v3  ;;  %v1856_v2 = vld [vmem:[#allocation8 + $0x380] sm:$0xff]  ;;  %v5609_v8 = vpack.c.bf16 %v1244_v61, %v1236_v58  ;;  %v1301_v58 = vld [vmem:[#allocation6 + $0x598] sm:$0xff] }
 0x33d   :  { %v1309_v61 = vld [vmem:[#allocation6 + $0x5d8] sm:$0xff] }
 0x33e   :  { %v5623_v7 = vpack.c.bf16 %v1309_v61, %v1301_v58  ;;  %v1960_v58 = vld [vmem:[#allocation8 + $0x6c0] sm:$0xff]  ;;  %v1349_v61 = vld [vmem:[#allocation6 + $0x718] sm:$0xff] }
 0x33f   :  { %5594 = vmatpush1.bf16.msra.mxu0 %v5593_v12  ;;  %5786 = vmatpush1.bf16.msra.mxu1 %v8962_v13  ;;  %v8986_v12 = vpack.c.bf16 %v1864_v4, %v1856_v2  ;;  %v1929_v2 = vld [vmem:[#allocation8 + $0x5c8] sm:$0xff]  ;;  %v5621_v4 = vpack.c.bf16 %v1292_v52, %v1284_v33  ;;  %v1332_v33 = vld [vmem:[#allocation6 + $0x690] sm:$0xff] }
 0x340   :  { %5596 = vmatprep.subr.bf16.mxu0 %v5595_v19  ;;  %5788 = vmatprep.subr.bf16.mxu1 %v8965_v18  ;;  %v5611_v19 = vpack.c.bf16 %v1261_v5, %v1253_v1  ;;  %v1300_v5 = vld [vmem:[#allocation6 + $0x590] sm:$0xff] }
 0x341   :  { %10767 = vst [vmem:[#allocation26_spill] sm:$0xff] %v8986_v12  ;;  %v5625_v27 = vpack.c.bf16 %v1308_v6, %v1300_v5  ;;  %v1340_v52 = vld [vmem:[#allocation6 + $0x6d0] sm:$0xff] }
 0x342   :  { %v5633_v5 = vpack.c.bf16 %v1340_v52, %v1332_v33  ;;  %v1129_v33 = vld [vmem:[#allocation6 + $0x38] sm:$0xff] }
 0x343   :  { %5598 = vmatpush1.bf16.msra.mxu0 %v5597_v20  ;;  %5790 = vmatpush1.bf16.msra.mxu1 %v8968_v29  ;;  %v1897_v20 = vld [vmem:[#allocation8 + $0x4c8] sm:$0xff]  ;;  %v1137_v52 = vld [vmem:[#allocation6 + $0x78] sm:$0xff] }
 0x344   :  { %5600 = vmatprep.subr.bf16.mxu0 %v5599_v25  ;;  %5792 = vmatprep.subr.bf16.mxu1 %v8971_v35  ;;  %v1268_v25 = vld [vmem:[#allocation6 + $0x490] sm:$0xff]  ;;  %v8995_v24 = vpack.c.bf16 %v1897_v20, %v1889_v17  ;;  %v9010_v17 = vpack.c.bf16 %v1928_v15, %v1920_v14 }
 0x345   :  { %v1316_v20 = vld [vmem:[#allocation6 + $0x610] sm:$0xff] }
 0x346   :  { %10770 = vst [vmem:[#allocation29_spill] sm:$0xff] %v8995_v24  ;;  %10775 = vst [vmem:[#allocation34_spill] sm:$0xff] %v9010_v17  ;;  %v1356_v14 = vld [vmem:[#allocation6 + $0x750] sm:$0xff] }
 0x347   :  { %5602 = vmatpush1.bf16.msra.mxu0 %v5601_v44  ;;  %5794 = vmatpush1.bf16.msra.mxu1 %v8974_v46  ;;  %v1293_v44 = vld [vmem:[#allocation6 + $0x558] sm:$0xff] }
 0x348   :  { %5604 = vmatprep.subr.bf16.mxu0 %v5603_v48  ;;  %5796 = vmatprep.subr.bf16.mxu1 %v8977_v49  ;;  %v5617_v48 = vpack.c.bf16 %v1276_v38, %v1268_v25  ;;  %v5619_v53 = vpack.c.bf16 %v1293_v44, %v1285_v40  ;;  %v9013_v38 = vpack.c.bf16 %v1945_v26, %v1937_v23  ;;  %v1341_v40 = vld [vmem:[#allocation6 + $0x6d8] sm:$0xff]  ;;  %v1953_v44 = vld [vmem:[#allocation8 + $0x688] sm:$0xff]  ;;  %v1976_v23 = vld [vmem:[#allocation8 + $0x740] sm:$0xff] }
 0x349   :  { %v1365_v26 = vld [vmem:[#allocation6 + $0x798] sm:$0xff] }
 0x34a   :  { %10776 = vst [vmem:[#allocation35_spill] sm:$0xff] %v9013_v38 }
 0x34b   :  { %5606 = vmatpush1.bf16.msra.mxu0 %v5605_v47  ;;  %5798 = vmatpush1.bf16.msra.mxu1 %v8980_v56  ;;  %v1912_v47 = vld [vmem:[#allocation8 + $0x540] sm:$0xff] }
 0x34c   :  { %5608 = vmatprep.subr.bf16.mxu0 %v5607_v63  ;;  %5800 = vmatprep.subr.bf16.mxu1 %v8983_v0  ;;  %v1921_v63 = vld [vmem:[#allocation8 + $0x588] sm:$0xff]  ;;  %v9004_v1 = vpack.c.bf16 %v1912_v47, %v1904_v55  ;;  %v9019_v55 = vpack.c.bf16 %v1961_v51, %v1953_v44  ;;  %v1952_v47 = vld [vmem:[#allocation8 + $0x680] sm:$0xff] }
 0x34d   :  { %v9022_v6 = vpack.c.bf16 %v1960_v58, %v1952_v47  ;;  %v1984_v51 = vld [vmem:[#allocation8 + $0x780] sm:$0xff]  ;;  %v1757_v47 = vld [vmem:[#allocation8 + $0x68] sm:$0xff] }
 0x34e   :  { %10773 = vst [vmem:[#allocation32_spill] sm:$0xff] %v9004_v1  ;;  %10778 = vst [vmem:[#allocation37_spill] sm:$0xff] %v9019_v55 }
 0x34f   :  { %5610 = vmatpush1.bf16.msra.mxu0 %v5609_v8  ;;  %5802 = vmatpush1.bf16.msra.mxu1 %v8986_v12  ;;  %v9007_v8 = vpack.c.bf16 %v1929_v2, %v1921_v63  ;;  %v1357_v63 = vld [vmem:[#allocation6 + $0x758] sm:$0xff]  ;;  %v1969_v2 = vld [vmem:[#allocation8 + $0x708] sm:$0xff]  ;;  %10779 = vst [vmem:[#allocation38_spill] sm:$0xff] %v9022_v6 }
 0x350   :  { %5612 = vmatprep.subr.bf16.mxu0 %v5611_v19  ;;  %5804 = vmatprep.subr.bf16.mxu1 %v8989_v21  ;;  %v1317_v19 = vld [vmem:[#allocation6 + $0x618] sm:$0xff]  ;;  %v5635_v15 = vpack.c.bf16 %v1357_v63, %v1349_v61  ;;  %v5707_v63 = vpack.c.bf16 %v1137_v52, %v1129_v33  ;;  %v1781_v52 = vld [vmem:[#allocation8 + $0x128] sm:$0xff] }
 0x351   :  { %10774 = vst [vmem:[#allocation33_spill] sm:$0xff] %v9007_v8  ;;  %v5627_v25 = vpack.c.bf16 %v1325_v22, %v1317_v19  ;;  %v1968_v22 = vld [vmem:[#allocation8 + $0x700] sm:$0xff]  ;;  %v1169_v33 = vld [vmem:[#allocation6 + $0x178] sm:$0xff] }
 0x353   :  { %5614 = vmatpush1.bf16.msra.mxu0 %v5613_v31  ;;  %5806 = vmatpush1.bf16.msra.mxu1 %v8992_v32  ;;  %v1324_v31 = vld [vmem:[#allocation6 + $0x650] sm:$0xff] }
 0x354   :  { %5616 = vmatprep.subr.bf16.mxu0 %v5615_v39  ;;  %5808 = vmatprep.subr.bf16.mxu1 %v8995_v24  ;;  %v1936_v39 = vld [vmem:[#allocation8 + $0x600] sm:$0xff]  ;;  %v5629_v45 = vpack.c.bf16 %v1324_v31, %v1316_v20  ;;  %v1985_v20 = vld [vmem:[#allocation8 + $0x788] sm:$0xff] }
 0x355   :  { %v1993_v31 = vld [vmem:[#allocation8 + $0x7c8] sm:$0xff] }
 0x356   :  { %v9031_v44 = vpack.c.bf16 %v1993_v31, %v1985_v20 }
 0x357   :  { %5618 = vmatpush1.bf16.msra.mxu0 %v5617_v48  ;;  %5810 = vmatpush1.bf16.msra.mxu1 %v8998_v10  ;;  %v9016_v48 = vpack.c.bf16 %v1944_v42, %v1936_v39  ;;  %v9028_v39 = vpack.c.bf16 %v1976_v23, %v1968_v22  ;;  %v1364_v42 = vld [vmem:[#allocation6 + $0x790] sm:$0xff]  ;;  %v1153_v22 = vld [vmem:[#allocation6 + $0xf8] sm:$0xff]  ;;  %v1765_v23 = vld [vmem:[#allocation8 + $0xa8] sm:$0xff] }
 0x358   :  { %5620 = vmatprep.subr.bf16.mxu0 %v5619_v53  ;;  %5812 = vmatprep.subr.bf16.mxu1 %v9001_v54  ;;  %v5631_v53 = vpack.c.bf16 %v1341_v40, %v1333_v34  ;;  %v1372_v34 = vld [vmem:[#allocation6 + $0x7d0] sm:$0xff]  ;;  %10782 = vst [vmem:[#allocation41_spill] sm:$0xff] %v9031_v44 }
 0x359   :  { %10777 = vst [vmem:[#allocation36_spill] sm:$0xff] %v9016_v48  ;;  %10781 = vst [vmem:[#allocation40_spill] sm:$0xff] %v9028_v39  ;;  %v5641_v58 = vpack.c.bf16 %v1372_v34, %v1364_v42  ;;  %v1152_v42 = vld [vmem:[#allocation6 + $0xf0] sm:$0xff]  ;;  %v1764_v34 = vld [vmem:[#allocation8 + $0xa0] sm:$0xff] }
 0x35b   :  { %5622 = vmatpush1.bf16.msra.mxu0 %v5621_v4  ;;  %5814 = vmatpush1.bf16.msra.mxu1 %v9004_v1  ;;  %v1977_v4 = vld [vmem:[#allocation8 + $0x748] sm:$0xff] }
 0x35c   :  { %5624 = vmatprep.subr.bf16.mxu0 %v5623_v7  ;;  %5816 = vmatprep.subr.bf16.mxu1 %v9007_v8  ;;  %v1348_v7 = vld [vmem:[#allocation6 + $0x710] sm:$0xff]  ;;  %v9025_v19 = vpack.c.bf16 %v1977_v4, %v1969_v2 }
 0x35d   :  { %v1128_v4 = vld [vmem:[#allocation6 + $0x30] sm:$0xff] }
 0x35e   :  { %10780 = vst [vmem:[#allocation39_spill] sm:$0xff] %v9025_v19 }
 0x35f   :  { %5626 = vmatpush1.bf16.msra.mxu0 %v5625_v27  ;;  %5818 = vmatpush1.bf16.msra.mxu1 %v9010_v17  ;;  %v1373_v27 = vld [vmem:[#allocation6 + $0x7d8] sm:$0xff] }
 0x360   :  { %5628 = vmatprep.subr.bf16.mxu0 %v5627_v25  ;;  %5820 = vmatprep.subr.bf16.mxu1 %v9013_v38  ;;  %v5637_v25 = vpack.c.bf16 %v1356_v14, %v1348_v7  ;;  %v5639_v40 = vpack.c.bf16 %v1373_v27, %v1365_v26  ;;  %v1748_v7 = vld [vmem:[#allocation8 + $0x20] sm:$0xff]  ;;  %v1773_v26 = vld [vmem:[#allocation8 + $0xe8] sm:$0xff] }
 0x361   :  { %v1756_v14 = vld [vmem:[#allocation8 + $0x60] sm:$0xff] }
 0x362   :  { %v9041_v20 = vpack.c.bf16 %v1756_v14, %v1748_v7  ;;  %v1780_v7 = vld [vmem:[#allocation8 + $0x120] sm:$0xff] }
 0x363   :  { %5630 = vmatpush1.bf16.msra.mxu0 %v5629_v45  ;;  %5822 = vmatpush1.bf16.msra.mxu1 %v9016_v48  ;;  %v1992_v45 = vld [vmem:[#allocation8 + $0x7c0] sm:$0xff] }
 0x364   :  { %5632 = vmatprep.subr.bf16.mxu0 %v5631_v53  ;;  %5824 = vmatprep.subr.bf16.mxu1 %v9019_v55  ;;  %v1749_v53 = vld [vmem:[#allocation8 + $0x28] sm:$0xff]  ;;  %v9034_v61 = vpack.c.bf16 %v1992_v45, %v1984_v51  ;;  %v1772_v51 = vld [vmem:[#allocation8 + $0xe0] sm:$0xff]  ;;  %v1161_v45 = vld [vmem:[#allocation6 + $0x138] sm:$0xff] }
 0x365   :  { %v9037_v2 = vpack.c.bf16 %v1757_v47, %v1749_v53  ;;  %v1789_v53 = vld [vmem:[#allocation8 + $0x168] sm:$0xff] }
 0x366   :  { %10783 = vst [vmem:[#allocation42_spill] sm:$0xff] %v9034_v61  ;;  %v9052_v14 = vpack.c.bf16 %v1789_v53, %v1781_v52  ;;  %v1804_v52 = vld [vmem:[#allocation8 + $0x1e0] sm:$0xff]  ;;  %v1193_v53 = vld [vmem:[#allocation6 + $0x238] sm:$0xff] }
 0x367   :  { %5634 = vmatpush1.bf16.msra.mxu0 %v5633_v5  ;;  %5826 = vmatpush1.bf16.msra.mxu1 %v9022_v6  ;;  %10784 = vst [vmem:[#allocation43_spill] sm:$0xff] %v9037_v2  ;;  %v1136_v5 = vld [vmem:[#allocation6 + $0x70] sm:$0xff] }
 0x368   :  { %5636 = vmatprep.subr.bf16.mxu0 %v5635_v15  ;;  %5828 = vmatprep.subr.bf16.mxu1 %v9025_v19  ;;  %v1145_v15 = vld [vmem:[#allocation6 + $0xb8] sm:$0xff]  ;;  %v5709_v27 = vpack.c.bf16 %v1136_v5, %v1128_v4  ;;  %v1160_v4 = vld [vmem:[#allocation6 + $0x130] sm:$0xff]  ;;  %10787 = vst [vmem:[#allocation46_spill] sm:$0xff] %v9052_v14 }
 0x369   :  { %v5711_v31 = vpack.c.bf16 %v1153_v22, %v1145_v15  ;;  %v1168_v5 = vld [vmem:[#allocation6 + $0x170] sm:$0xff]  ;;  %v1788_v15 = vld [vmem:[#allocation8 + $0x160] sm:$0xff]  ;;  %v1177_v22 = vld [vmem:[#allocation6 + $0x1b8] sm:$0xff] }
 0x36b   :  { %5638 = vmatpush1.bf16.msra.mxu0 %v5637_v25  ;;  %5830 = vmatpush1.bf16.msra.mxu1 %v9028_v39  ;;  %v1144_v25 = vld [vmem:[#allocation6 + $0xb0] sm:$0xff] }
 0x36c   :  { %5640 = vmatprep.subr.bf16.mxu0 %v5639_v40  ;;  %5832 = vmatprep.subr.bf16.mxu1 %v9031_v44  ;;  %v9043_v40 = vpack.c.bf16 %v1773_v26, %v1765_v23  ;;  %v5713_v47 = vpack.c.bf16 %v1152_v42, %v1144_v25  ;;  %v1185_v23 = vld [vmem:[#allocation6 + $0x1f8] sm:$0xff]  ;;  %v1797_v26 = vld [vmem:[#allocation8 + $0x1a8] sm:$0xff]  ;;  %v9058_v25 = vpack.c.bf16 %v1788_v15, %v1780_v7  ;;  %v1200_v7 = vld [vmem:[#allocation6 + $0x270] sm:$0xff] }
 0x36d   :  { %v5719_v42 = vpack.c.bf16 %v1185_v23, %v1177_v22  ;;  %v1812_v15 = vld [vmem:[#allocation8 + $0x220] sm:$0xff] }
 0x36e   :  { %10785 = vst [vmem:[#allocation44_spill] sm:$0xff] %v9043_v40  ;;  %10788 = vst [vmem:[#allocation47_spill] sm:$0xff] %v9058_v25  ;;  %v1820_v23 = vld [vmem:[#allocation8 + $0x260] sm:$0xff] }
 0x36f   :  { %5642 = vmatpush1.bf16.msra.mxu0 %v5641_v58  ;;  %5834 = vmatpush1.bf16.msra.mxu1 %v9034_v61  ;;  %v9049_v58 = vpack.c.bf16 %v1772_v51, %v1764_v34  ;;  %v1176_v34 = vld [vmem:[#allocation6 + $0x1b0] sm:$0xff] }
 0x370   :  { %5708 = vmatprep.subr.bf16.mxu0 %v5707_v63  ;;  %5900 = vmatprep.subr.bf16.mxu1 %v9037_v2  ;;  %v5715_v63 = vpack.c.bf16 %v1169_v33, %v1161_v45  ;;  %v1184_v51 = vld [vmem:[#allocation6 + $0x1f0] sm:$0xff]  ;;  %v1796_v45 = vld [vmem:[#allocation8 + $0x1a0] sm:$0xff] }
 0x371   :  { %10786 = vst [vmem:[#allocation45_spill] sm:$0xff] %v9049_v58 }
 0x372   :  { %1562 = vmatmul.mubr.f32.vlgmr.msra.gmra.mrb[26].mxu0 %v8931_v37  ;;  %2073 = vmatmul.mubr.f32.vlgmr.msra.gmra.mrb[12].mxu1 %v10477_v59 }
 0x373   :  { %1567 = vmatprep.mubr.f32.mxu0 %v8939_v60  ;;  %5710 = vmatpush1.bf16.msra.mxu0 %v5709_v27  ;;  %v1805_v27 = vld [vmem:[#allocation8 + $0x1e8] sm:$0xff] }
 0x374   :  { %5902 = vmatpush1.bf16.msra.mxu1 %v9041_v20  ;;  %5712 = vmatprep.subr.bf16.mxu0 %v5711_v31  ;;  %v5717_v31 = vpack.c.bf16 %v1168_v5, %v1160_v4  ;;  %v9061_v33 = vpack.c.bf16 %v1805_v27, %v1797_v26  ;;  %v1192_v5 = vld [vmem:[#allocation6 + $0x230] sm:$0xff]  ;;  %v1209_v26 = vld [vmem:[#allocation6 + $0x2b8] sm:$0xff] }
 0x375   :  { %5904 = vmatprep.subr.bf16.mxu1 %v9043_v40  ;;  %2214 = vmatprep.mubr.f32.mxu1 %v10477_v59  ;;  %v1201_v59 = vld [vmem:[#allocation6 + $0x278] sm:$0xff]  ;;  %v1821_v40 = vld [vmem:[#allocation8 + $0x268] sm:$0xff] }
 0x376   :  { %1568 = vmatmul.mubr.f32.gmra.mrb[28].mxu0 %v8944_v36  ;;  %10789 = vst [vmem:[#allocation48_spill] sm:$0xff] %v9061_v33  ;;  %v5723_v4 = vpack.c.bf16 %v1201_v59, %v1193_v53  ;;  %v1217_v27 = vld [vmem:[#allocation6 + $0x2f8] sm:$0xff] }
 0x377   :  { %5714 = vmatpush1.bf16.msra.mxu0 %v5713_v47  ;;  %1715 = vmatprep.mubr.f32.mxu0 %v8927_v11  ;;  %v1813_v47 = vld [vmem:[#allocation8 + $0x228] sm:$0xff]  ;;  %v5721_v11 = vpack.c.bf16 %v1184_v51, %v1176_v34  ;;  %v5727_v59 = vpack.c.bf16 %v1217_v27, %v1209_v26  ;;  %v1208_v34 = vld [vmem:[#allocation6 + $0x2b0] sm:$0xff]  ;;  %v1225_v53 = vld [vmem:[#allocation6 + $0x338] sm:$0xff] }
 0x378   :  { %5906 = vmatpush1.bf16.msra.mxu1 %v9049_v58  ;;  %5716 = vmatprep.subr.bf16.mxu0 %v5715_v63  ;;  %v9064_v63 = vpack.c.bf16 %v1804_v52, %v1796_v45  ;;  %v9067_v22 = vpack.c.bf16 %v1821_v40, %v1813_v47  ;;  %v1837_v58 = vld [vmem:[#allocation8 + $0x2e8] sm:$0xff]  ;;  %v1216_v51 = vld [vmem:[#allocation6 + $0x2f0] sm:$0xff]  ;;  %v1828_v45 = vld [vmem:[#allocation8 + $0x2a0] sm:$0xff] }
 0x379   :  { %5908 = vmatprep.subr.bf16.mxu1 %v9052_v14  ;;  %v1829_v14 = vld [vmem:[#allocation8 + $0x2a8] sm:$0xff]  ;;  %v1836_v52 = vld [vmem:[#allocation8 + $0x2e0] sm:$0xff]  ;;  %v1233_v47 = vld [vmem:[#allocation6 + $0x378] sm:$0xff] }
 0x37a   :  { %10790 = vst [vmem:[#allocation49_spill] sm:$0xff] %v9064_v63  ;;  %10791 = vst [vmem:[#allocation50_spill] sm:$0xff] %v9067_v22  ;;  %v9073_v40 = vpack.c.bf16 %v1837_v58, %v1829_v14  ;;  %v1852_v14 = vld [vmem:[#allocation8 + $0x360] sm:$0xff]  ;;  %v1241_v26 = vld [vmem:[#allocation6 + $0x3b8] sm:$0xff] }
 0x37b   :  { %5718 = vmatpush1.bf16.msra.mxu0 %v5717_v31  ;;  %v5725_v31 = vpack.c.bf16 %v1200_v7, %v1192_v5  ;;  %v5731_v5 = vpack.c.bf16 %v1233_v47, %v1225_v53  ;;  %v1224_v7 = vld [vmem:[#allocation6 + $0x330] sm:$0xff]  ;;  %v1249_v27 = vld [vmem:[#allocation6 + $0x3f8] sm:$0xff] }
 0x37c   :  { %5910 = vmatpush1.bf16.msra.mxu1 %v9058_v25  ;;  %5720 = vmatprep.subr.bf16.mxu0 %v5719_v42  ;;  %v9070_v42 = vpack.c.bf16 %v1820_v23, %v1812_v15  ;;  %10793 = vst [vmem:[#allocation52_spill] sm:$0xff] %v9073_v40  ;;  %v1853_v25 = vld [vmem:[#allocation8 + $0x368] sm:$0xff]  ;;  %v1232_v15 = vld [vmem:[#allocation6 + $0x370] sm:$0xff]  ;;  %v1844_v23 = vld [vmem:[#allocation8 + $0x320] sm:$0xff] }
 0x37d   :  { %5912 = vmatprep.subr.bf16.mxu1 %v9061_v33  ;;  %v1845_v33 = vld [vmem:[#allocation8 + $0x328] sm:$0xff]  ;;  %v1257_v53 = vld [vmem:[#allocation6 + $0x438] sm:$0xff] }
 0x37e   :  { %10792 = vst [vmem:[#allocation51_spill] sm:$0xff] %v9070_v42  ;;  %v9079_v58 = vpack.c.bf16 %v1853_v25, %v1845_v33  ;;  %v1868_v33 = vld [vmem:[#allocation8 + $0x3e0] sm:$0xff]  ;;  %v1265_v47 = vld [vmem:[#allocation6 + $0x478] sm:$0xff] }
 0x37f   :  { %5722 = vmatpush1.bf16.msra.mxu0 %v5721_v11  ;;  %v5729_v11 = vpack.c.bf16 %v1216_v51, %v1208_v34  ;;  %v5735_v34 = vpack.c.bf16 %v1249_v27, %v1241_v26  ;;  %v1240_v51 = vld [vmem:[#allocation6 + $0x3b0] sm:$0xff]  ;;  %v1273_v26 = vld [vmem:[#allocation6 + $0x4b8] sm:$0xff] }
 0x380   :  { %5914 = vmatpush1.bf16.msra.mxu1 %v9064_v63  ;;  %5724 = vmatprep.subr.bf16.mxu0 %v5723_v4  ;;  %v9076_v4 = vpack.c.bf16 %v1836_v52, %v1828_v45  ;;  %10795 = vst [vmem:[#allocation54_spill] sm:$0xff] %v9079_v58  ;;  %v1869_v63 = vld [vmem:[#allocation8 + $0x3e8] sm:$0xff]  ;;  %v1248_v45 = vld [vmem:[#allocation6 + $0x3f0] sm:$0xff]  ;;  %v1860_v52 = vld [vmem:[#allocation8 + $0x3a0] sm:$0xff] }
 0x381   :  { %5916 = vmatprep.subr.bf16.mxu1 %v9067_v22  ;;  %v1861_v22 = vld [vmem:[#allocation8 + $0x3a8] sm:$0xff]  ;;  %v1281_v27 = vld [vmem:[#allocation6 + $0x4f8] sm:$0xff] }
 0x382   :  { %10794 = vst [vmem:[#allocation53_spill] sm:$0xff] %v9076_v4  ;;  %v9085_v25 = vpack.c.bf16 %v1869_v63, %v1861_v22  ;;  %v1884_v22 = vld [vmem:[#allocation8 + $0x460] sm:$0xff] }
 0x383   :  { %5726 = vmatpush1.bf16.msra.mxu0 %v5725_v31  ;;  %v5733_v31 = vpack.c.bf16 %v1232_v15, %v1224_v7  ;;  %v5739_v7 = vpack.c.bf16 %v1265_v47, %v1257_v53  ;;  %v1256_v15 = vld [vmem:[#allocation6 + $0x430] sm:$0xff]  ;;  %v1289_v53 = vld [vmem:[#allocation6 + $0x538] sm:$0xff] }
 0x384   :  { %5918 = vmatpush1.bf16.msra.mxu1 %v9070_v42  ;;  %5728 = vmatprep.subr.bf16.mxu0 %v5727_v59  ;;  %v9082_v59 = vpack.c.bf16 %v1852_v14, %v1844_v23  ;;  %10797 = vst [vmem:[#allocation56_spill] sm:$0xff] %v9085_v25  ;;  %v1885_v42 = vld [vmem:[#allocation8 + $0x468] sm:$0xff]  ;;  %v1264_v23 = vld [vmem:[#allocation6 + $0x470] sm:$0xff]  ;;  %v1876_v14 = vld [vmem:[#allocation8 + $0x420] sm:$0xff] }
 0x385   :  { %5920 = vmatprep.subr.bf16.mxu1 %v9073_v40  ;;  %v1877_v40 = vld [vmem:[#allocation8 + $0x428] sm:$0xff]  ;;  %v1297_v47 = vld [vmem:[#allocation6 + $0x578] sm:$0xff] }
 0x386   :  { %10796 = vst [vmem:[#allocation55_spill] sm:$0xff] %v9082_v59  ;;  %v9091_v63 = vpack.c.bf16 %v1885_v42, %v1877_v40  ;;  %v1900_v40 = vld [vmem:[#allocation8 + $0x4e0] sm:$0xff] }
 0x387   :  { %5730 = vmatpush1.bf16.msra.mxu0 %v5729_v11  ;;  %v5737_v11 = vpack.c.bf16 %v1248_v45, %v1240_v51  ;;  %v5743_v51 = vpack.c.bf16 %v1281_v27, %v1273_v26  ;;  %v1272_v45 = vld [vmem:[#allocation6 + $0x4b0] sm:$0xff]  ;;  %v1305_v26 = vld [vmem:[#allocation6 + $0x5b8] sm:$0xff] }
 0x388   :  { %5922 = vmatpush1.bf16.msra.mxu1 %v9076_v4  ;;  %5732 = vmatprep.subr.bf16.mxu0 %v5731_v5  ;;  %v9088_v5 = vpack.c.bf16 %v1868_v33, %v1860_v52  ;;  %10799 = vst [vmem:[#allocation58_spill] sm:$0xff] %v9091_v63  ;;  %v1901_v4 = vld [vmem:[#allocation8 + $0x4e8] sm:$0xff]  ;;  %v1280_v52 = vld [vmem:[#allocation6 + $0x4f0] sm:$0xff]  ;;  %v1892_v33 = vld [vmem:[#allocation8 + $0x4a0] sm:$0xff] }
 0x389   :  { %5924 = vmatprep.subr.bf16.mxu1 %v9079_v58  ;;  %v1893_v58 = vld [vmem:[#allocation8 + $0x4a8] sm:$0xff]  ;;  %v1313_v27 = vld [vmem:[#allocation6 + $0x5f8] sm:$0xff] }
 0x38a   :  { %10798 = vst [vmem:[#allocation57_spill] sm:$0xff] %v9088_v5  ;;  %v9097_v42 = vpack.c.bf16 %v1901_v4, %v1893_v58  ;;  %v1916_v58 = vld [vmem:[#allocation8 + $0x560] sm:$0xff] }
 0x38b   :  { %5734 = vmatpush1.bf16.msra.mxu0 %v5733_v31  ;;  %v5741_v31 = vpack.c.bf16 %v1264_v23, %v1256_v15  ;;  %v5747_v15 = vpack.c.bf16 %v1297_v47, %v1289_v53  ;;  %v1288_v23 = vld [vmem:[#allocation6 + $0x530] sm:$0xff]  ;;  %v1321_v53 = vld [vmem:[#allocation6 + $0x638] sm:$0xff] }
 0x38c   :  { %5926 = vmatpush1.bf16.msra.mxu1 %v9082_v59  ;;  %5736 = vmatprep.subr.bf16.mxu0 %v5735_v34  ;;  %v9094_v34 = vpack.c.bf16 %v1884_v22, %v1876_v14  ;;  %10801 = vst [vmem:[#allocation60_spill] sm:$0xff] %v9097_v42  ;;  %v1917_v59 = vld [vmem:[#allocation8 + $0x568] sm:$0xff]  ;;  %v1296_v14 = vld [vmem:[#allocation6 + $0x570] sm:$0xff]  ;;  %v1908_v22 = vld [vmem:[#allocation8 + $0x520] sm:$0xff] }
 0x38d   :  { %5928 = vmatprep.subr.bf16.mxu1 %v9085_v25  ;;  %v1909_v25 = vld [vmem:[#allocation8 + $0x528] sm:$0xff]  ;;  %v1329_v47 = vld [vmem:[#allocation6 + $0x678] sm:$0xff] }
 0x38e   :  { %10800 = vst [vmem:[#allocation59_spill] sm:$0xff] %v9094_v34  ;;  %v9103_v4 = vpack.c.bf16 %v1917_v59, %v1909_v25  ;;  %v1932_v25 = vld [vmem:[#allocation8 + $0x5e0] sm:$0xff] }
 0x38f   :  { %5738 = vmatpush1.bf16.msra.mxu0 %v5737_v11  ;;  %v5745_v11 = vpack.c.bf16 %v1280_v52, %v1272_v45  ;;  %v5751_v45 = vpack.c.bf16 %v1313_v27, %v1305_v26  ;;  %v1304_v52 = vld [vmem:[#allocation6 + $0x5b0] sm:$0xff]  ;;  %v1337_v26 = vld [vmem:[#allocation6 + $0x6b8] sm:$0xff] }
 0x390   :  { %5930 = vmatpush1.bf16.msra.mxu1 %v9088_v5  ;;  %5740 = vmatprep.subr.bf16.mxu0 %v5739_v7  ;;  %v9100_v7 = vpack.c.bf16 %v1900_v40, %v1892_v33  ;;  %10803 = vst [vmem:[#allocation62_spill] sm:$0xff] %v9103_v4  ;;  %v1933_v5 = vld [vmem:[#allocation8 + $0x5e8] sm:$0xff]  ;;  %v1312_v33 = vld [vmem:[#allocation6 + $0x5f0] sm:$0xff]  ;;  %v1924_v40 = vld [vmem:[#allocation8 + $0x5a0] sm:$0xff] }
 0x391   :  { %5932 = vmatprep.subr.bf16.mxu1 %v9091_v63  ;;  %v1925_v63 = vld [vmem:[#allocation8 + $0x5a8] sm:$0xff]  ;;  %v1345_v27 = vld [vmem:[#allocation6 + $0x6f8] sm:$0xff] }
 0x392   :  { %10802 = vst [vmem:[#allocation61_spill] sm:$0xff] %v9100_v7  ;;  %v9109_v59 = vpack.c.bf16 %v1933_v5, %v1925_v63  ;;  %v1948_v63 = vld [vmem:[#allocation8 + $0x660] sm:$0xff] }
 0x393   :  { %5742 = vmatpush1.bf16.msra.mxu0 %v5741_v31  ;;  %v5749_v31 = vpack.c.bf16 %v1296_v14, %v1288_v23  ;;  %v5755_v23 = vpack.c.bf16 %v1329_v47, %v1321_v53  ;;  %v1320_v14 = vld [vmem:[#allocation6 + $0x630] sm:$0xff]  ;;  %v1353_v53 = vld [vmem:[#allocation6 + $0x738] sm:$0xff] }
 0x394   :  { %5934 = vmatpush1.bf16.msra.mxu1 %v9094_v34  ;;  %5744 = vmatprep.subr.bf16.mxu0 %v5743_v51  ;;  %v9106_v51 = vpack.c.bf16 %v1916_v58, %v1908_v22  ;;  %10805 = vst [vmem:[#allocation64_spill] sm:$0xff] %v9109_v59  ;;  %v1949_v34 = vld [vmem:[#allocation8 + $0x668] sm:$0xff]  ;;  %v1328_v22 = vld [vmem:[#allocation6 + $0x670] sm:$0xff]  ;;  %v1940_v58 = vld [vmem:[#allocation8 + $0x620] sm:$0xff] }
 0x395   :  { %5936 = vmatprep.subr.bf16.mxu1 %v9097_v42  ;;  %v1941_v42 = vld [vmem:[#allocation8 + $0x628] sm:$0xff]  ;;  %v1361_v47 = vld [vmem:[#allocation6 + $0x778] sm:$0xff] }
 0x396   :  { %10804 = vst [vmem:[#allocation63_spill] sm:$0xff] %v9106_v51  ;;  %v9115_v5 = vpack.c.bf16 %v1949_v34, %v1941_v42  ;;  %v1964_v42 = vld [vmem:[#allocation8 + $0x6e0] sm:$0xff] }
 0x397   :  { %5746 = vmatpush1.bf16.msra.mxu0 %v5745_v11  ;;  %v5753_v11 = vpack.c.bf16 %v1312_v33, %v1304_v52  ;;  %v5759_v52 = vpack.c.bf16 %v1345_v27, %v1337_v26  ;;  %v1336_v33 = vld [vmem:[#allocation6 + $0x6b0] sm:$0xff]  ;;  %v1369_v26 = vld [vmem:[#allocation6 + $0x7b8] sm:$0xff] }
 0x398   :  { %5938 = vmatpush1.bf16.msra.mxu1 %v9100_v7  ;;  %5748 = vmatprep.subr.bf16.mxu0 %v5747_v15  ;;  %v9112_v15 = vpack.c.bf16 %v1932_v25, %v1924_v40  ;;  %10807 = vst [vmem:[#allocation66_spill] sm:$0xff] %v9115_v5  ;;  %v1965_v7 = vld [vmem:[#allocation8 + $0x6e8] sm:$0xff]  ;;  %v1344_v40 = vld [vmem:[#allocation6 + $0x6f0] sm:$0xff]  ;;  %v1956_v25 = vld [vmem:[#allocation8 + $0x6a0] sm:$0xff] }
 0x399   :  { %5940 = vmatprep.subr.bf16.mxu1 %v9103_v4  ;;  %v1957_v4 = vld [vmem:[#allocation8 + $0x6a8] sm:$0xff]  ;;  %v1377_v27 = vld [vmem:[#allocation6 + $0x7f8] sm:$0xff] }
 0x39a   :  { %10806 = vst [vmem:[#allocation65_spill] sm:$0xff] %v9112_v15  ;;  %v9121_v34 = vpack.c.bf16 %v1965_v7, %v1957_v4  ;;  %v1980_v4 = vld [vmem:[#allocation8 + $0x760] sm:$0xff] }
 0x39b   :  { %5750 = vmatpush1.bf16.msra.mxu0 %v5749_v31  ;;  %v5757_v31 = vpack.c.bf16 %v1328_v22, %v1320_v14  ;;  %v5763_v14 = vpack.c.bf16 %v1361_v47, %v1353_v53  ;;  %v1352_v22 = vld [vmem:[#allocation6 + $0x730] sm:$0xff]  ;;  %v1747_v53 = vld [vmem:[#allocation8 + $0x18] sm:$0xff] }
 0x39c   :  { %5942 = vmatpush1.bf16.msra.mxu1 %v9106_v51  ;;  %5752 = vmatprep.subr.bf16.mxu0 %v5751_v45  ;;  %v9118_v45 = vpack.c.bf16 %v1948_v63, %v1940_v58  ;;  %10809 = vst [vmem:[#allocation68_spill] sm:$0xff] %v9121_v34  ;;  %v1981_v51 = vld [vmem:[#allocation8 + $0x768] sm:$0xff]  ;;  %v1360_v58 = vld [vmem:[#allocation6 + $0x770] sm:$0xff]  ;;  %v1972_v63 = vld [vmem:[#allocation8 + $0x720] sm:$0xff] }
 0x39d   :  { %5944 = vmatprep.subr.bf16.mxu1 %v9109_v59  ;;  %v1973_v59 = vld [vmem:[#allocation8 + $0x728] sm:$0xff]  ;;  %v1755_v47 = vld [vmem:[#allocation8 + $0x58] sm:$0xff] }
 0x39e   :  { %10808 = vst [vmem:[#allocation67_spill] sm:$0xff] %v9118_v45  ;;  %v9127_v7 = vpack.c.bf16 %v1981_v51, %v1973_v59  ;;  %v1996_v59 = vld [vmem:[#allocation8 + $0x7e0] sm:$0xff] }
 0x39f   :  { %5754 = vmatpush1.bf16.msra.mxu0 %v5753_v11  ;;  %v5761_v11 = vpack.c.bf16 %v1344_v40, %v1336_v33  ;;  %v5767_v33 = vpack.c.bf16 %v1377_v27, %v1369_v26  ;;  %v1368_v40 = vld [vmem:[#allocation6 + $0x7b0] sm:$0xff] }
 0x3a0   :  { %5946 = vmatpush1.bf16.msra.mxu1 %v9112_v15  ;;  %5756 = vmatprep.subr.bf16.mxu0 %v5755_v23  ;;  %v9124_v23 = vpack.c.bf16 %v1964_v42, %v1956_v25  ;;  %10811 = vst [vmem:[#allocation70_spill] sm:$0xff] %v9127_v7  ;;  %v1997_v15 = vld [vmem:[#allocation8 + $0x7e8] sm:$0xff]  ;;  %v1376_v25 = vld [vmem:[#allocation6 + $0x7f0] sm:$0xff]  ;;  %v1988_v42 = vld [vmem:[#allocation8 + $0x7a0] sm:$0xff] }
 0x3a1   :  { %5948 = vmatprep.subr.bf16.mxu1 %v9115_v5  ;;  %v1989_v5 = vld [vmem:[#allocation8 + $0x7a8] sm:$0xff]  ;;  %v1762_v26 = vld [vmem:[#allocation8 + $0x90] sm:$0xff] }
 0x3a2   :  { %10810 = vst [vmem:[#allocation69_spill] sm:$0xff] %v9124_v23  ;;  %v9133_v51 = vpack.c.bf16 %v1997_v15, %v1989_v5  ;;  %v1770_v27 = vld [vmem:[#allocation8 + $0xd0] sm:$0xff] }
 0x3a3   :  { %5758 = vmatpush1.bf16.msra.mxu0 %v5757_v31  ;;  %v5765_v31 = vpack.c.bf16 %v1360_v58, %v1352_v22  ;;  %v1746_v22 = vld [vmem:[#allocation8 + $0x10] sm:$0xff] }
 0x3a4   :  { %5950 = vmatpush1.bf16.msra.mxu1 %v9118_v45  ;;  %5760 = vmatprep.subr.bf16.mxu0 %v5759_v52  ;;  %v9130_v52 = vpack.c.bf16 %v1980_v4, %v1972_v63  ;;  %10813 = vst [vmem:[#allocation72_spill] sm:$0xff] %v9133_v51  ;;  %v1754_v58 = vld [vmem:[#allocation8 + $0x50] sm:$0xff]  ;;  %v1763_v63 = vld [vmem:[#allocation8 + $0x98] sm:$0xff] }
 0x3a5   :  { %5952 = vmatprep.subr.bf16.mxu1 %v9121_v34  ;;  %v5769_v34 = vpack.c.bf16 %v1376_v25, %v1368_v40  ;;  %v1771_v4 = vld [vmem:[#allocation8 + $0xd8] sm:$0xff]  ;;  %v9143_v15 = vpack.c.bf16 %v1754_v58, %v1746_v22  ;;  %v10818_v40 = vmov 0.0   ;;  %v1794_v22 = vld [vmem:[#allocation8 + $0x190] sm:$0xff] }
 0x3a6   :  { %10812 = vst [vmem:[#allocation71_spill] sm:$0xff] %v9130_v52  ;;  %v9145_v5 = vpack.c.bf16 %v1771_v4, %v1763_v63  ;;  %v1802_v58 = vld [vmem:[#allocation8 + $0x1d0] sm:$0xff]  ;;  %v1811_v63 = vld [vmem:[#allocation8 + $0x218] sm:$0xff] }
 0x3a7   :  { %5762 = vmatpush1.bf16.msra.mxu0 %v5761_v11  ;;  %v9136_v11 = vpack.c.bf16 %v1996_v59, %v1988_v42  ;;  %10816 = vst [vmem:[#allocation75_spill] sm:$0xff] %v9143_v15  ;;  %v1778_v42 = vld [vmem:[#allocation8 + $0x110] sm:$0xff]  ;;  %v9170_v4 = vpack.c.bf16 %v1802_v58, %v1794_v22  ;;  %v1843_v58 = vld [vmem:[#allocation8 + $0x318] sm:$0xff] }
 0x3a8   :  { %5954 = vmatpush1.bf16.msra.mxu1 %v9124_v23  ;;  %5764 = vmatprep.subr.bf16.mxu0 %v5763_v14  ;;  %v9138_v14 = vpack.c.bf16 %v1755_v47, %v1747_v53  ;;  %10817 = vst [vmem:[#allocation76_spill] sm:$0xff] %v9145_v5  ;;  %v1786_v59 = vld [vmem:[#allocation8 + $0x150] sm:$0xff]  ;;  %v1803_v53 = vld [vmem:[#allocation8 + $0x1d8] sm:$0xff] }
 0x3a9   :  { %5956 = vmatprep.subr.bf16.mxu1 %v9127_v7  ;;  %10814 = vst [vmem:[#allocation73_spill] sm:$0xff] %v9136_v11  ;;  %10823 = vst [vmem:[#allocation81_spill] sm:$0xff] %v9170_v4  ;;  %v1834_v22 = vld [vmem:[#allocation8 + $0x2d0] sm:$0xff] }
 0x3aa   :  { %10815 = vst [vmem:[#allocation74_spill] sm:$0xff] %v9138_v14  ;;  %v1854_v45 = vld [vmem:[#allocation8 + $0x370] sm:$0xff] }
 0x3ab   :  { %5766 = vmatpush1.bf16.msra.mxu0 %v5765_v31  ;;  %v1779_v31 = vld [vmem:[#allocation8 + $0x118] sm:$0xff] }
 0x3ac   :  { %5958 = vmatpush1.bf16.msra.mxu1 %v9130_v52  ;;  %5768 = vmatprep.subr.bf16.mxu0 %v5767_v33  ;;  %v1787_v33 = vld [vmem:[#allocation8 + $0x158] sm:$0xff] }
 0x3ad   :  { %5960 = vmatprep.subr.bf16.mxu1 %v9133_v51  ;;  %v9156_v25 = vpack.c.bf16 %v1787_v33, %v1779_v31  ;;  %v1818_v31 = vld [vmem:[#allocation8 + $0x250] sm:$0xff]  ;;  %v1827_v33 = vld [vmem:[#allocation8 + $0x298] sm:$0xff] }
 0x3ae   :  { %v1847_v51 = vld [vmem:[#allocation8 + $0x338] sm:$0xff] }
 0x3af   :  { %5770 = vmatpush1.bf16.msra.mxu0 %v5769_v34  ;;  %v9152_v34 = vpack.c.bf16 %v1770_v27, %v1762_v26  ;;  %10820 = vst [vmem:[#allocation78_spill] sm:$0xff] %v9156_v25  ;;  %v1810_v27 = vld [vmem:[#allocation8 + $0x210] sm:$0xff]  ;;  %v1855_v52 = vld [vmem:[#allocation8 + $0x378] sm:$0xff] }
 0x3b0   :  { %5962 = vmatpush1.bf16.msra.mxu1 %v9136_v11  ;;  %5836 = vmatprep.subr.bf16.mxu0 %v9138_v14 }
 0x3b1   :  { %6028 = vmatprep.subr.bf16.mxu1 %v8919_v9  ;;  %10819 = vst [vmem:[#allocation77_spill] sm:$0xff] %v9152_v34 }
 0x3b2   :  { %1716 = vmatmul.mubr.f32.vlgmr.msra.gmra.mrb[30].mxu0 %v8931_v37  ;;  %v1795_v37 = vld [vmem:[#allocation8 + $0x198] sm:$0xff] }
 0x3b3   :  { %2215 = vmatmul.mubr.f32.vlgmr.msra.gmra.mrb[14].mxu1 %v10818_v40  ;;  %1721 = vmatprep.mubr.f32.mxu0 %v8939_v60  ;;  %v9162_v60 = vpack.c.bf16 %v1786_v59, %v1778_v42  ;;  %v9166_v47 = vpack.c.bf16 %v1803_v53, %v1795_v37  ;;  %v1835_v42 = vld [vmem:[#allocation8 + $0x2d8] sm:$0xff]  ;;  %v9178_v59 = vpack.c.bf16 %v1818_v31, %v1810_v27  ;;  %v1826_v53 = vld [vmem:[#allocation8 + $0x290] sm:$0xff] }
 0x3b4   :  { %5838 = vmatpush1.bf16.msra.mxu0 %v9143_v15  ;;  %6030 = vmatpush1.bf16.msra.mxu1 %v8929_v30  ;;  %v9182_v37 = vpack.c.bf16 %v1835_v42, %v1827_v33  ;;  %v1842_v31 = vld [vmem:[#allocation8 + $0x310] sm:$0xff]  ;;  %v1859_v33 = vld [vmem:[#allocation8 + $0x398] sm:$0xff] }
 0x3b5   :  { %5840 = vmatprep.subr.bf16.mxu0 %v9145_v5  ;;  %6032 = vmatprep.subr.bf16.mxu1 %v8933_v41  ;;  %10821 = vst [vmem:[#allocation79_spill] sm:$0xff] %v9162_v60  ;;  %10822 = vst [vmem:[#allocation80_spill] sm:$0xff] %v9166_v47  ;;  %v1867_v42 = vld [vmem:[#allocation8 + $0x3d8] sm:$0xff]  ;;  %v1822_v41 = vld [vmem:[#allocation8 + $0x270] sm:$0xff] }
 0x3b6   :  { %1722 = vmatmul.mubr.f32.gmra.mrb[32].mxu0 %v8944_v36  ;;  %v1819_v36 = vld [vmem:[#allocation8 + $0x258] sm:$0xff]  ;;  %10825 = vst [vmem:[#allocation83_spill] sm:$0xff] %v9178_v59  ;;  %10826 = vst [vmem:[#allocation84_spill] sm:$0xff] %v9182_v37 }
 0x3b7   :  { %2143 = vmatprep.mubr.f32.mxu0 %v10818_v40  ;;  %v9174_v26 = vpack.c.bf16 %v1819_v36, %v1811_v63  ;;  %v1851_v63 = vld [vmem:[#allocation8 + $0x358] sm:$0xff]  ;;  %v9186_v36 = vpack.c.bf16 %v1834_v22, %v1826_v53  ;;  %v9198_v53 = vpack.c.bf16 %v1867_v42, %v1859_v33  ;;  %v1858_v22 = vld [vmem:[#allocation8 + $0x390] sm:$0xff] }
 0x3b8   :  { %5842 = vmatpush1.bf16.msra.mxu0 %v9152_v34  ;;  %6034 = vmatpush1.bf16.msra.mxu1 %v8942_v50  ;;  %v9190_v27 = vpack.c.bf16 %v1851_v63, %v1843_v58  ;;  %v1875_v58 = vld [vmem:[#allocation8 + $0x418] sm:$0xff]  ;;  %v1814_v50 = vld [vmem:[#allocation8 + $0x230] sm:$0xff] }
 0x3b9   :  { %5844 = vmatprep.subr.bf16.mxu0 %v9156_v25  ;;  %6036 = vmatprep.subr.bf16.mxu1 %v8949_v57  ;;  %10824 = vst [vmem:[#allocation82_spill] sm:$0xff] %v9174_v26  ;;  %10827 = vst [vmem:[#allocation85_spill] sm:$0xff] %v9186_v36  ;;  %v1883_v63 = vld [vmem:[#allocation8 + $0x458] sm:$0xff] }
 0x3ba   :  { %10828 = vst [vmem:[#allocation86_spill] sm:$0xff] %v9190_v27  ;;  %10830 = vst [vmem:[#allocation88_spill] sm:$0xff] %v9198_v53  ;;  %v1891_v33 = vld [vmem:[#allocation8 + $0x498] sm:$0xff] }
 0x3bb   :  { %v1899_v42 = vld [vmem:[#allocation8 + $0x4d8] sm:$0xff] }
 0x3bc   :  { %5846 = vmatpush1.bf16.msra.mxu0 %v9162_v60  ;;  %6038 = vmatpush1.bf16.msra.mxu1 %v8954_v62  ;;  %v1815_v62 = vld [vmem:[#allocation8 + $0x238] sm:$0xff] }
 0x3bd   :  { %5848 = vmatprep.subr.bf16.mxu0 %v9166_v47  ;;  %6040 = vmatprep.subr.bf16.mxu1 %v8957_v3  ;;  %v1823_v57 = vld [vmem:[#allocation8 + $0x278] sm:$0xff] }
 0x3be   :  { %v1839_v30 = vld [vmem:[#allocation8 + $0x2f8] sm:$0xff] }
 0x3c0   :  { %5850 = vmatpush1.bf16.msra.mxu0 %v9170_v4  ;;  %6042 = vmatpush1.bf16.msra.mxu1 %v8962_v13  ;;  %v1850_v13 = vld [vmem:[#allocation8 + $0x350] sm:$0xff] }
 0x3c1   :  { %5852 = vmatprep.subr.bf16.mxu0 %v9174_v26  ;;  %6044 = vmatprep.subr.bf16.mxu1 %v8965_v18  ;;  %v9194_v18 = vpack.c.bf16 %v1850_v13, %v1842_v31  ;;  %v9206_v13 = vpack.c.bf16 %v1883_v63, %v1875_v58  ;;  %v1874_v31 = vld [vmem:[#allocation8 + $0x410] sm:$0xff]  ;;  %v1907_v58 = vld [vmem:[#allocation8 + $0x518] sm:$0xff] }
 0x3c2   :  { %v1915_v63 = vld [vmem:[#allocation8 + $0x558] sm:$0xff] }
 0x3c3   :  { %10829 = vst [vmem:[#allocation87_spill] sm:$0xff] %v9194_v18  ;;  %10832 = vst [vmem:[#allocation90_spill] sm:$0xff] %v9206_v13 }
 0x3c4   :  { %5854 = vmatpush1.bf16.msra.mxu0 %v9178_v59  ;;  %6046 = vmatpush1.bf16.msra.mxu1 %v8968_v29  ;;  %v1866_v29 = vld [vmem:[#allocation8 + $0x3d0] sm:$0xff] }
 0x3c5   :  { %5856 = vmatprep.subr.bf16.mxu0 %v9182_v37  ;;  %6048 = vmatprep.subr.bf16.mxu1 %v8971_v35  ;;  %v9202_v35 = vpack.c.bf16 %v1866_v29, %v1858_v22  ;;  %v9214_v29 = vpack.c.bf16 %v1899_v42, %v1891_v33  ;;  %v1890_v22 = vld [vmem:[#allocation8 + $0x490] sm:$0xff]  ;;  %v1923_v33 = vld [vmem:[#allocation8 + $0x598] sm:$0xff] }
 0x3c6   :  { %v1931_v42 = vld [vmem:[#allocation8 + $0x5d8] sm:$0xff] }
 0x3c7   :  { %10831 = vst [vmem:[#allocation89_spill] sm:$0xff] %v9202_v35  ;;  %10834 = vst [vmem:[#allocation92_spill] sm:$0xff] %v9214_v29 }
 0x3c8   :  { %5858 = vmatpush1.bf16.msra.mxu0 %v9186_v36  ;;  %6050 = vmatpush1.bf16.msra.mxu1 %v8974_v46  ;;  %v1882_v46 = vld [vmem:[#allocation8 + $0x450] sm:$0xff] }
 0x3c9   :  { %5860 = vmatprep.subr.bf16.mxu0 %v9190_v27  ;;  %6052 = vmatprep.subr.bf16.mxu1 %v8977_v49  ;;  %v9210_v49 = vpack.c.bf16 %v1882_v46, %v1874_v31  ;;  %v9222_v46 = vpack.c.bf16 %v1915_v63, %v1907_v58  ;;  %v1906_v31 = vld [vmem:[#allocation8 + $0x510] sm:$0xff]  ;;  %v1939_v58 = vld [vmem:[#allocation8 + $0x618] sm:$0xff] }
 0x3ca   :  { %v1947_v63 = vld [vmem:[#allocation8 + $0x658] sm:$0xff] }
 0x3cb   :  { %10833 = vst [vmem:[#allocation91_spill] sm:$0xff] %v9210_v49  ;;  %10836 = vst [vmem:[#allocation94_spill] sm:$0xff] %v9222_v46 }
 0x3cc   :  { %5862 = vmatpush1.bf16.msra.mxu0 %v9194_v18  ;;  %6054 = vmatpush1.bf16.msra.mxu1 %v8980_v56  ;;  %v1898_v56 = vld [vmem:[#allocation8 + $0x4d0] sm:$0xff] }
 0x3cd   :  { %5864 = vmatprep.subr.bf16.mxu0 %v9198_v53  ;;  %6056 = vmatprep.subr.bf16.mxu1 %v8983_v0  ;;  %v9218_v0 = vpack.c.bf16 %v1898_v56, %v1890_v22  ;;  %v9230_v56 = vpack.c.bf16 %v1931_v42, %v1923_v33  ;;  %v1922_v22 = vld [vmem:[#allocation8 + $0x590] sm:$0xff]  ;;  %v1955_v33 = vld [vmem:[#allocation8 + $0x698] sm:$0xff] }
 0x3ce   :  { %v1963_v42 = vld [vmem:[#allocation8 + $0x6d8] sm:$0xff] }
 0x3cf   :  { %10835 = vst [vmem:[#allocation93_spill] sm:$0xff] %v9218_v0  ;;  %10838 = vst [vmem:[#allocation96_spill] sm:$0xff] %v9230_v56 }
 0x3d0   :  { %5866 = vmatpush1.bf16.msra.mxu0 %v9202_v35  ;;  %6058 = vmatpush1.bf16.msra.mxu1 %v8986_v12  ;;  %v1914_v12 = vld [vmem:[#allocation8 + $0x550] sm:$0xff] }
 0x3d1   :  { %5868 = vmatprep.subr.bf16.mxu0 %v9206_v13  ;;  %6060 = vmatprep.subr.bf16.mxu1 %v8989_v21  ;;  %v9226_v21 = vpack.c.bf16 %v1914_v12, %v1906_v31  ;;  %v9238_v12 = vpack.c.bf16 %v1947_v63, %v1939_v58  ;;  %v1938_v31 = vld [vmem:[#allocation8 + $0x610] sm:$0xff]  ;;  %v1971_v58 = vld [vmem:[#allocation8 + $0x718] sm:$0xff] }
 0x3d2   :  { %v1979_v63 = vld [vmem:[#allocation8 + $0x758] sm:$0xff] }
 0x3d3   :  { %10837 = vst [vmem:[#allocation95_spill] sm:$0xff] %v9226_v21  ;;  %10840 = vst [vmem:[#allocation98_spill] sm:$0xff] %v9238_v12 }
 0x3d4   :  { %5870 = vmatpush1.bf16.msra.mxu0 %v9210_v49  ;;  %6062 = vmatpush1.bf16.msra.mxu1 %v8992_v32  ;;  %v1930_v32 = vld [vmem:[#allocation8 + $0x5d0] sm:$0xff] }
 0x3d5   :  { %5872 = vmatprep.subr.bf16.mxu0 %v9214_v29  ;;  %6064 = vmatprep.subr.bf16.mxu1 %v8995_v24  ;;  %v9234_v24 = vpack.c.bf16 %v1930_v32, %v1922_v22  ;;  %v9246_v32 = vpack.c.bf16 %v1963_v42, %v1955_v33  ;;  %v1954_v22 = vld [vmem:[#allocation8 + $0x690] sm:$0xff]  ;;  %v1987_v33 = vld [vmem:[#allocation8 + $0x798] sm:$0xff] }
 0x3d6   :  { %v1995_v42 = vld [vmem:[#allocation8 + $0x7d8] sm:$0xff] }
 0x3d7   :  { %10839 = vst [vmem:[#allocation97_spill] sm:$0xff] %v9234_v24  ;;  %10842 = vst [vmem:[#allocation100_spill] sm:$0xff] %v9246_v32 }
 0x3d8   :  { %5874 = vmatpush1.bf16.msra.mxu0 %v9218_v0  ;;  %6066 = vmatpush1.bf16.msra.mxu1 %v8998_v10  ;;  %v1946_v10 = vld [vmem:[#allocation8 + $0x650] sm:$0xff] }
 0x3d9   :  { %5876 = vmatprep.subr.bf16.mxu0 %v9222_v46  ;;  %6068 = vmatprep.subr.bf16.mxu1 %v9001_v54  ;;  %v9242_v54 = vpack.c.bf16 %v1946_v10, %v1938_v31  ;;  %v9254_v10 = vpack.c.bf16 %v1979_v63, %v1971_v58  ;;  %v1970_v31 = vld [vmem:[#allocation8 + $0x710] sm:$0xff]  ;;  %v1751_v58 = vld [vmem:[#allocation8 + $0x38] sm:$0xff] }
 0x3da   :  { %v1759_v63 = vld [vmem:[#allocation8 + $0x78] sm:$0xff] }
 0x3db   :  { %10841 = vst [vmem:[#allocation99_spill] sm:$0xff] %v9242_v54  ;;  %10844 = vst [vmem:[#allocation102_spill] sm:$0xff] %v9254_v10 }
 0x3dc   :  { %5878 = vmatpush1.bf16.msra.mxu0 %v9226_v21  ;;  %6070 = vmatpush1.bf16.msra.mxu1 %v9004_v1  ;;  %v1962_v1 = vld [vmem:[#allocation8 + $0x6d0] sm:$0xff] }
 0x3dd   :  { %5880 = vmatprep.subr.bf16.mxu0 %v9230_v56  ;;  %6072 = vmatprep.subr.bf16.mxu1 %v9007_v8  ;;  %v9250_v8 = vpack.c.bf16 %v1962_v1, %v1954_v22  ;;  %v9262_v1 = vpack.c.bf16 %v1995_v42, %v1987_v33  ;;  %v1986_v22 = vld [vmem:[#allocation8 + $0x790] sm:$0xff]  ;;  %v1767_v33 = vld [vmem:[#allocation8 + $0xb8] sm:$0xff] }
 0x3de   :  { %v1775_v42 = vld [vmem:[#allocation8 + $0xf8] sm:$0xff] }
 0x3df   :  { %10843 = vst [vmem:[#allocation101_spill] sm:$0xff] %v9250_v8  ;;  %10846 = vst [vmem:[#allocation104_spill] sm:$0xff] %v9262_v1 }
 0x3e0   :  { %5882 = vmatpush1.bf16.msra.mxu0 %v9234_v24  ;;  %6074 = vmatpush1.bf16.msra.mxu1 %v9010_v17  ;;  %v1978_v17 = vld [vmem:[#allocation8 + $0x750] sm:$0xff] }
 0x3e1   :  { %5884 = vmatprep.subr.bf16.mxu0 %v9238_v12  ;;  %6076 = vmatprep.subr.bf16.mxu1 %v9013_v38  ;;  %v9258_v38 = vpack.c.bf16 %v1978_v17, %v1970_v31  ;;  %v9270_v17 = vpack.c.bf16 %v1759_v63, %v1751_v58  ;;  %v1750_v31 = vld [vmem:[#allocation8 + $0x30] sm:$0xff]  ;;  %v1783_v58 = vld [vmem:[#allocation8 + $0x138] sm:$0xff] }
 0x3e2   :  { %v1791_v63 = vld [vmem:[#allocation8 + $0x178] sm:$0xff] }
 0x3e3   :  { %10845 = vst [vmem:[#allocation103_spill] sm:$0xff] %v9258_v38  ;;  %10848 = vst [vmem:[#allocation106_spill] sm:$0xff] %v9270_v17 }
 0x3e4   :  { %5886 = vmatpush1.bf16.msra.mxu0 %v9242_v54  ;;  %6078 = vmatpush1.bf16.msra.mxu1 %v9016_v48  ;;  %v1994_v48 = vld [vmem:[#allocation8 + $0x7d0] sm:$0xff] }
 0x3e5   :  { %5888 = vmatprep.subr.bf16.mxu0 %v9246_v32  ;;  %6080 = vmatprep.subr.bf16.mxu1 %v9019_v55  ;;  %v9266_v55 = vpack.c.bf16 %v1994_v48, %v1986_v22  ;;  %v9278_v48 = vpack.c.bf16 %v1775_v42, %v1767_v33  ;;  %v1766_v22 = vld [vmem:[#allocation8 + $0xb0] sm:$0xff]  ;;  %v1799_v42 = vld [vmem:[#allocation8 + $0x1b8] sm:$0xff] }
 0x3e6   :  { %v1790_v33 = vld [vmem:[#allocation8 + $0x170] sm:$0xff] }
 0x3e7   :  { %10847 = vst [vmem:[#allocation105_spill] sm:$0xff] %v9266_v55 }
 0x3e8   :  { %5890 = vmatpush1.bf16.msra.mxu0 %v9250_v8  ;;  %6082 = vmatpush1.bf16.msra.mxu1 %v9022_v6  ;;  %v1758_v6 = vld [vmem:[#allocation8 + $0x70] sm:$0xff] }
 0x3e9   :  { %5892 = vmatprep.subr.bf16.mxu0 %v9254_v10  ;;  %6084 = vmatprep.subr.bf16.mxu1 %v9025_v19  ;;  %v9274_v19 = vpack.c.bf16 %v1758_v6, %v1750_v31  ;;  %v9287_v6 = vpack.c.bf16 %v1791_v63, %v1783_v58  ;;  %v1782_v31 = vld [vmem:[#allocation8 + $0x130] sm:$0xff]  ;;  %v9299_v63 = vpack.c.bf16 %v1823_v57, %v1815_v62 }
 0x3ea   :  { %v1830_v62 = vld [vmem:[#allocation8 + $0x2b0] sm:$0xff] }
 0x3eb   :  { %10850 = vst [vmem:[#allocation108_spill] sm:$0xff] %v9287_v6  ;;  %10854 = vst [vmem:[#allocation112_spill] sm:$0xff] %v9299_v63 }
 0x3ec   :  { %5894 = vmatpush1.bf16.msra.mxu0 %v9258_v38  ;;  %6086 = vmatpush1.bf16.msra.mxu1 %v9028_v39  ;;  %v1774_v39 = vld [vmem:[#allocation8 + $0xf0] sm:$0xff] }
 0x3ed   :  { %5896 = vmatprep.subr.bf16.mxu0 %v9262_v1  ;;  %6088 = vmatprep.subr.bf16.mxu1 %v9031_v44  ;;  %v9283_v44 = vpack.c.bf16 %v1774_v39, %v1766_v22  ;;  %v1798_v39 = vld [vmem:[#allocation8 + $0x1b0] sm:$0xff] }
 0x3ee   :  { %v1806_v22 = vld [vmem:[#allocation8 + $0x1f0] sm:$0xff] }
 0x3ef   :  { %10849 = vst [vmem:[#allocation107_spill] sm:$0xff] %v9283_v44  ;;  %v9296_v58 = vpack.c.bf16 %v1806_v22, %v1798_v39  ;;  %v9309_v39 = vpack.c.bf16 %v1822_v41, %v1814_v50  ;;  %v1838_v22 = vld [vmem:[#allocation8 + $0x2f0] sm:$0xff] }
 0x3f0   :  { %5898 = vmatpush1.bf16.msra.mxu0 %v9266_v55  ;;  %6090 = vmatpush1.bf16.msra.mxu1 %v9034_v61  ;;  %v1807_v61 = vld [vmem:[#allocation8 + $0x1f8] sm:$0xff]  ;;  %v9321_v41 = vpack.c.bf16 %v1838_v22, %v1830_v62 }
 0x3f1   :  { %5964 = vmatprep.subr.bf16.mxu0 %v9270_v17  ;;  %6156 = vmatprep.subr.bf16.mxu1 %v9037_v2  ;;  %v9290_v2 = vpack.c.bf16 %v1790_v33, %v1782_v31  ;;  %v9293_v3 = vpack.c.bf16 %v1807_v61, %v1799_v42  ;;  %10853 = vst [vmem:[#allocation111_spill] sm:$0xff] %v9296_v58  ;;  %v1398_v31 = vsub.s32 4, %v8696_v28  ;;  %v1831_v33 = vld [vmem:[#allocation8 + $0x2b8] sm:$0xff]  ;;  %v9305_v61 = vld [vmem:[%s10472_s8] sm:$0xff]  ;;  %v1402_v42 = vsub.s32 5, %v8696_v28 }
 0x3f2   :  { %10855 = vst [vmem:[#allocation113_spill] sm:$0xff] %v9309_v39  ;;  %v9312_v57 = vpack.c.bf16 %v1839_v30, %v1831_v33  ;;  %v1383_v9 = vrot.slane %v9305_v61, %v8699_v16  ;;  %v1387_v7 = vrot.slane %v9305_v61, %v8708_v43  ;;  %10857 = vst [vmem:[#allocation115_spill] sm:$0xff] %v9321_v41  ;;  %v1846_v16 = vld [vmem:[#allocation8 + $0x330] sm:$0xff]  ;;  %v1871_v43 = vld [vmem:[#allocation8 + $0x3f8] sm:$0xff] }
 0x3f3   :  { %2144 = vmatmul.mubr.f32.vlgmr.msra.gmra.mrb[34].mxu0 %v10818_v40  ;;  %10851 = vst [vmem:[#allocation109_spill] sm:$0xff] %v9290_v2  ;;  %10852 = vst [vmem:[#allocation110_spill] sm:$0xff] %v9293_v3  ;;  %v1399_v11 = vrot.slane %v9305_v61, %v1398_v31  ;;  %v1403_v23 = vrot.slane %v9305_v61, %v1402_v42  ;;  %v9324_v33 = vpack.c.bf16 %v1855_v52, %v1847_v51 }
 0x3f4   :  { %5966 = vmatpush1.bf16.msra.mxu0 %v9274_v19  ;;  %2285 = vmatprep.mubr.f32.mxu0 %v10818_v40  ;;  %10856 = vst [vmem:[#allocation114_spill] sm:$0xff] %v9312_v57  ;;  %v9327_v62 = vpack.c.bf16 %v1854_v45, %v1846_v16  ;;  %v1903_v16 = vld [vmem:[#allocation8 + $0x4f8] sm:$0xff] }
 0x3f5   :  { %5968 = vmatprep.subr.bf16.mxu0 %v9278_v48  ;;  %10858 = vst [vmem:[#allocation116_spill] sm:$0xff] %v9324_v33 }
 0x3f6   :  { %10859 = vst [vmem:[#allocation117_spill] sm:$0xff] %v9327_v62 }
 0x3f8   :  { %5970 = vmatpush1.bf16.msra.mxu0 %v9283_v44 }
 0x3f9   :  { %5972 = vmatprep.subr.bf16.mxu0 %v9287_v6 }
 0x3fc   :  { %5974 = vmatpush1.bf16.msra.mxu0 %v9290_v2  ;;  %v1863_v2 = vld [vmem:[#allocation8 + $0x3b8] sm:$0xff] }
 0x3fd   :  { %5976 = vmatprep.subr.bf16.mxu0 %v9293_v3  ;;  %v9330_v22 = vpack.c.bf16 %v1871_v43, %v1863_v2 }
 0x3ff   :  { %10860 = vst [vmem:[#allocation118_spill] sm:$0xff] %v9330_v22 }
 0x400   :  { %5978 = vmatpush1.bf16.msra.mxu0 %v9296_v58 }
 0x401   :  { %5980 = vmatprep.subr.bf16.mxu0 %v9299_v63 }
 0x404   :  { %5982 = vmatpush1.bf16.msra.mxu0 %v9309_v39 }
 0x405   :  { %v1486_v30 = vpop.f32.mrb[22].mxu0  ;;  %v1640_v50 = vpop.f32.mrb[8].mxu1  ;;  %5984 = vmatprep.subr.bf16.mxu0 %v9312_v57 }
 0x406   :  { %v1487_v31 = vadd.f32 %v1486_v30, %v1383_v9  ;;  %v1641_v63 = vadd.f32 %v1640_v50, %v1399_v11  ;;  %v1488_v58 = vpop.f32.mrb[23].mxu0  ;;  %v1642_v3 = vpop.f32.mrb[9].mxu1  ;;  %v1862_v30 = vld [vmem:[#allocation8 + $0x3b0] sm:$0xff] }
 0x407   :  { %v1489_v6 = vadd.f32 %v1488_v58, %v1387_v7  ;;  %v1643_v42 = vadd.f32 %v1642_v3, %v1403_v23  ;;  %v1870_v50 = vld [vmem:[#allocation8 + $0x3f0] sm:$0xff] }
 0x408   :  { %1728 = vst [vmem:[#allocation2] sm:$0xff] %v1487_v31  ;;  %1732 = vst [vmem:[#allocation2 + $0x20] sm:$0xff] %v1641_v63  ;;  %5986 = vmatpush1.bf16.msra.mxu0 %v9321_v41  ;;  %v1879_v31 = vld [vmem:[#allocation8 + $0x438] sm:$0xff]  ;;  %v9333_v45 = vpack.c.bf16 %v1870_v50, %v1862_v30 }
 0x409   :  { %1729 = vst [vmem:[#allocation2 + $0x8] sm:$0xff] %v1489_v6  ;;  %1733 = vst [vmem:[#allocation2 + $0x28] sm:$0xff] %v1643_v42  ;;  %v1492_v52 = vpop.f32.mrb[24].mxu0  ;;  %v1646_v51 = vpop.f32.mrb[10].mxu1  ;;  %5988 = vmatprep.subr.bf16.mxu0 %v9324_v33  ;;  %v1887_v63 = vld [vmem:[#allocation8 + $0x478] sm:$0xff] }
 0x40a   :  { %v1493_v57 = vadd.f32 %v1492_v52, %v1383_v9  ;;  %v1647_v39 = vadd.f32 %v1646_v51, %v1399_v11  ;;  %v1494_v58 = vpop.f32.mrb[25].mxu0  ;;  %v1648_v3 = vpop.f32.mrb[11].mxu1  ;;  %10861 = vst [vmem:[#allocation119_spill] sm:$0xff] %v9333_v45  ;;  %v9336_v2 = vpack.c.bf16 %v1887_v63, %v1879_v31  ;;  %v1878_v9 = vld [vmem:[#allocation8 + $0x430] sm:$0xff]  ;;  %v1895_v6 = vld [vmem:[#allocation8 + $0x4b8] sm:$0xff] }
 0x40b   :  { %v1495_v44 = vadd.f32 %v1494_v58, %v1387_v7  ;;  %v1649_v41 = vadd.f32 %v1648_v3, %v1403_v23  ;;  %v1886_v11 = vld [vmem:[#allocation8 + $0x470] sm:$0xff]  ;;  %v9342_v23 = vpack.c.bf16 %v1903_v16, %v1895_v6  ;;  %v1927_v30 = vld [vmem:[#allocation8 + $0x5b8] sm:$0xff] }
 0x40c   :  { %1736 = vst [vmem:[#allocation2 + $0x40] sm:$0xff] %v1493_v57  ;;  %1740 = vst [vmem:[#allocation2 + $0x60] sm:$0xff] %v1647_v39  ;;  %5990 = vmatpush1.bf16.msra.mxu0 %v9327_v62  ;;  %v9339_v7 = vpack.c.bf16 %v1886_v11, %v1878_v9  ;;  %v1894_v39 = vld [vmem:[#allocation8 + $0x4b0] sm:$0xff]  ;;  %v1935_v50 = vld [vmem:[#allocation8 + $0x5f8] sm:$0xff] }
 0x40d   :  { %1737 = vst [vmem:[#allocation2 + $0x48] sm:$0xff] %v1495_v44  ;;  %1741 = vst [vmem:[#allocation2 + $0x68] sm:$0xff] %v1649_v41  ;;  %5992 = vmatprep.subr.bf16.mxu0 %v9330_v22  ;;  %v1902_v57 = vld [vmem:[#allocation8 + $0x4f0] sm:$0xff]  ;;  %v1911_v44 = vld [vmem:[#allocation8 + $0x538] sm:$0xff]  ;;  %v9354_v3 = vpack.c.bf16 %v1935_v50, %v1927_v30 }
 0x40e   :  { %10862 = vst [vmem:[#allocation120_spill] sm:$0xff] %v9336_v2  ;;  %10863 = vst [vmem:[#allocation121_spill] sm:$0xff] %v9339_v7  ;;  %v1919_v41 = vld [vmem:[#allocation8 + $0x578] sm:$0xff]  ;;  %v9345_v43 = vpack.c.bf16 %v1902_v57, %v1894_v39  ;;  %v1910_v52 = vld [vmem:[#allocation8 + $0x530] sm:$0xff] }
 0x40f   :  { %10864 = vst [vmem:[#allocation122_spill] sm:$0xff] %v9342_v23  ;;  %v9348_v42 = vpack.c.bf16 %v1919_v41, %v1911_v44  ;;  %v1918_v51 = vld [vmem:[#allocation8 + $0x570] sm:$0xff]  ;;  %10868 = vst [vmem:[#allocation126_spill] sm:$0xff] %v9354_v3  ;;  %v1943_v9 = vld [vmem:[#allocation8 + $0x638] sm:$0xff] }
 0x410   :  { %5994 = vmatpush1.bf16.msra.mxu0 %v9333_v45  ;;  %10865 = vst [vmem:[#allocation123_spill] sm:$0xff] %v9345_v43  ;;  %v9351_v58 = vpack.c.bf16 %v1918_v51, %v1910_v52  ;;  %v1926_v31 = vld [vmem:[#allocation8 + $0x5b0] sm:$0xff]  ;;  %v1951_v11 = vld [vmem:[#allocation8 + $0x678] sm:$0xff] }
 0x411   :  { %5996 = vmatprep.subr.bf16.mxu0 %v9336_v2  ;;  %10866 = vst [vmem:[#allocation124_spill] sm:$0xff] %v9348_v42  ;;  %v1934_v63 = vld [vmem:[#allocation8 + $0x5f0] sm:$0xff]  ;;  %v9360_v16 = vpack.c.bf16 %v1951_v11, %v1943_v9  ;;  %v1959_v44 = vld [vmem:[#allocation8 + $0x6b8] sm:$0xff] }
 0x412   :  { %10867 = vst [vmem:[#allocation125_spill] sm:$0xff] %v9351_v58  ;;  %v9357_v6 = vpack.c.bf16 %v1934_v63, %v1926_v31  ;;  %v1942_v39 = vld [vmem:[#allocation8 + $0x630] sm:$0xff]  ;;  %v1967_v41 = vld [vmem:[#allocation8 + $0x6f8] sm:$0xff] }
 0x413   :  { %10870 = vst [vmem:[#allocation128_spill] sm:$0xff] %v9360_v16  ;;  %v1950_v57 = vld [vmem:[#allocation8 + $0x670] sm:$0xff]  ;;  %v9366_v51 = vpack.c.bf16 %v1967_v41, %v1959_v44  ;;  %v1975_v31 = vld [vmem:[#allocation8 + $0x738] sm:$0xff] }
 0x414   :  { %5998 = vmatpush1.bf16.msra.mxu0 %v9339_v7  ;;  %10869 = vst [vmem:[#allocation127_spill] sm:$0xff] %v9357_v6  ;;  %v9363_v52 = vpack.c.bf16 %v1950_v57, %v1942_v39  ;;  %v1958_v30 = vld [vmem:[#allocation8 + $0x6b0] sm:$0xff]  ;;  %v1983_v63 = vld [vmem:[#allocation8 + $0x778] sm:$0xff] }
 0x415   :  { %6000 = vmatprep.subr.bf16.mxu0 %v9342_v23  ;;  %10872 = vst [vmem:[#allocation130_spill] sm:$0xff] %v9366_v51  ;;  %v1966_v50 = vld [vmem:[#allocation8 + $0x6f0] sm:$0xff]  ;;  %v9372_v11 = vpack.c.bf16 %v1983_v63, %v1975_v31  ;;  %v1991_v39 = vld [vmem:[#allocation8 + $0x7b8] sm:$0xff] }
 0x416   :  { %10871 = vst [vmem:[#allocation129_spill] sm:$0xff] %v9363_v52  ;;  %v9369_v9 = vpack.c.bf16 %v1966_v50, %v1958_v30  ;;  %v1999_v57 = vld [vmem:[#allocation8 + $0x7f8] sm:$0xff] }
 0x417   :  { %10874 = vst [vmem:[#allocation132_spill] sm:$0xff] %v9372_v11  ;;  %v9378_v41 = vpack.c.bf16 %v1999_v57, %v1991_v39 }
 0x418   :  { %6002 = vmatpush1.bf16.msra.mxu0 %v9345_v43  ;;  %10873 = vst [vmem:[#allocation131_spill] sm:$0xff] %v9369_v9 }
 0x419   :  { %6004 = vmatprep.subr.bf16.mxu0 %v9348_v42  ;;  %10876 = vst [vmem:[#allocation134_spill] sm:$0xff] %v9378_v41 }
 0x41c   :  { %6006 = vmatpush1.bf16.msra.mxu0 %v9351_v58 }
 0x41d   :  { %6008 = vmatprep.subr.bf16.mxu0 %v9354_v3  ;;  %v1974_v3 = vld [vmem:[#allocation8 + $0x730] sm:$0xff] }
 0x420   :  { %6010 = vmatpush1.bf16.msra.mxu0 %v9357_v6  ;;  %v1982_v6 = vld [vmem:[#allocation8 + $0x770] sm:$0xff] }
 0x421   :  { %6012 = vmatprep.subr.bf16.mxu0 %v9360_v16  ;;  %v9375_v44 = vpack.c.bf16 %v1982_v6, %v1974_v3  ;;  %v1990_v16 = vld [vmem:[#allocation8 + $0x7b0] sm:$0xff]  ;;  %v1390_v3 = vsub.s32 2, %v8696_v28  ;;  %v1394_v6 = vsub.s32 3, %v8696_v28 }
 0x423   :  { %10875 = vst [vmem:[#allocation133_spill] sm:$0xff] %v9375_v44 }
 0x424   :  { %6014 = vmatpush1.bf16.msra.mxu0 %v9363_v52  ;;  %v1998_v52 = vld [vmem:[#allocation8 + $0x7f0] sm:$0xff] }
 0x425   :  { %6016 = vmatprep.subr.bf16.mxu0 %v9366_v51  ;;  %v9381_v30 = vpack.c.bf16 %v1998_v52, %v1990_v16  ;;  %v1395_v16 = vrot.slane %v9305_v61, %v1394_v6 }
 0x427   :  { %10877 = vst [vmem:[#allocation135_spill] sm:$0xff] %v9381_v30 }
 0x428   :  { %6018 = vmatpush1.bf16.msra.mxu0 %v9369_v9 }
 0x429   :  { %6020 = vmatprep.subr.bf16.mxu0 %v9372_v11 }
 0x42c   :  { %6022 = vmatpush1.bf16.msra.mxu0 %v9375_v44 }
 0x42d   :  { %6024 = vmatprep.subr.bf16.mxu0 %v9378_v41 }
 0x430   :  { %6026 = vmatpush1.bf16.msra.mxu0 %v9381_v30 }
 0x431   :  { %6092 = vmatprep.subr.bf16.mxu0 %v9138_v14 }
 0x433   :  { %2286 = vmatmul.mubr.f32.vlgmr.msra.gmra.mrb[36].mxu0 %v10818_v40  ;;  %v1391_v40 = vrot.slane %v9305_v61, %v1390_v3 }
 0x434   :  { %6094 = vmatpush1.bf16.msra.mxu0 %v9143_v15 }
 0x435   :  { %6096 = vmatprep.subr.bf16.mxu0 %v9145_v5 }
 0x438   :  { %6098 = vmatpush1.bf16.msra.mxu0 %v9152_v34 }
 0x439   :  { %6100 = vmatprep.subr.bf16.mxu0 %v9156_v25 }
 0x43c   :  { %6102 = vmatpush1.bf16.msra.mxu0 %v9162_v60 }
 0x43d   :  { %6104 = vmatprep.subr.bf16.mxu0 %v9166_v47 }
 0x440   :  { %6106 = vmatpush1.bf16.msra.mxu0 %v9170_v4 }
 0x441   :  { %6108 = vmatprep.subr.bf16.mxu0 %v9174_v26 }
 0x444   :  { %6110 = vmatpush1.bf16.msra.mxu0 %v9178_v59 }
 0x445   :  { %v1563_v52 = vpop.f32.mrb[26].mxu0  ;;  %v2074_v50 = vpop.f32.mrb[12].mxu1  ;;  %6112 = vmatprep.subr.bf16.mxu0 %v9182_v37 }
 0x446   :  { %v1564_v31 = vadd.f32 %v1563_v52, %v1391_v40  ;;  %v1565_v63 = vpop.f32.mrb[27].mxu0  ;;  %v2076_v39 = vpop.f32.mrb[13].mxu1 }
 0x447   :  { %v1566_v57 = vadd.f32 %v1565_v63, %v1395_v16  ;;  %v1406_v63 = vsub.s32 6, %v8696_v28 }
 0x448   :  { %1730 = vst [vmem:[#allocation2 + $0x10] sm:$0xff] %v1564_v31  ;;  %6114 = vmatpush1.bf16.msra.mxu0 %v9186_v36 }
 0x449   :  { %1731 = vst [vmem:[#allocation2 + $0x18] sm:$0xff] %v1566_v57  ;;  %v1569_v4 = vpop.f32.mrb[28].mxu0  ;;  %6116 = vmatprep.subr.bf16.mxu0 %v9190_v27  ;;  %v1410_v57 = vsub.s32 7, %v8696_v28 }
 0x44a   :  { %v1570_v3 = vadd.f32 %v1569_v4, %v1391_v40  ;;  %v1571_v26 = vpop.f32.mrb[29].mxu0  ;;  %v2000_v4 = vld [vmem:[#allocation2] sm:$0x3]  ;;  %v2001_v40 = vld [vmem:[#allocation2 + $0x8] sm:$0x3] }
 0x44b   :  { %v1572_v6 = vadd.f32 %v1571_v26, %v1395_v16  ;;  %v2292_v26 = vadd.f32 %v2074_v50, %v2000_v4  ;;  %v2293_v16 = vadd.f32 %v2076_v39, %v2001_v40  ;;  %v1411_v50 = vrot.slane %v9305_v61, %v1410_v57 }
 0x44c   :  { %1738 = vst [vmem:[#allocation2 + $0x50] sm:$0xff] %v1570_v3  ;;  %6118 = vmatpush1.bf16.msra.mxu0 %v9194_v18 }
 0x44d   :  { %1739 = vst [vmem:[#allocation2 + $0x58] sm:$0xff] %v1572_v6  ;;  %6120 = vmatprep.subr.bf16.mxu0 %v9198_v53  ;;  %v5172_v52 = vmul.f32 -1.442695, %v2292_v26  ;;  %v5173_v31 = vmul.f32 -1.442695, %v2293_v16 }
 0x44f   :  { %7875 = vpow2.f32 %v5172_v52 }
 0x450   :  { %6122 = vmatpush1.bf16.msra.mxu0 %v9202_v35  ;;  %7877 = vpow2.f32 %v5173_v31  ;;  %v2005_v31 = vld [vmem:[#allocation2 + $0x28] sm:$0x3] }
 0x451   :  { %6124 = vmatprep.subr.bf16.mxu0 %v9206_v13 }
 0x454   :  { %6126 = vmatpush1.bf16.msra.mxu0 %v9210_v49 }
 0x455   :  { %6128 = vmatprep.subr.bf16.mxu0 %v9214_v29 }
 0x458   :  { %6130 = vmatpush1.bf16.msra.mxu0 %v9218_v0 }
 0x459   :  { %6132 = vmatprep.subr.bf16.mxu0 %v9222_v46  ;;  %v7876_v3 = vpop.eup %7875 }
 0x45a   :  { %v7878_v6 = vpop.eup %7877 }
 0x45b   :  { %v2307_v39 = vadd.f32 1.0, %v7878_v6 }
 0x45c   :  { %6134 = vmatpush1.bf16.msra.mxu0 %v9226_v21 }
 0x45d   :  { %6136 = vmatprep.subr.bf16.mxu0 %v9230_v56 }
 0x460   :  { %6138 = vmatpush1.bf16.msra.mxu0 %v9234_v24 }
 0x461   :  { %6140 = vmatprep.subr.bf16.mxu0 %v9238_v12 }
 0x464   :  { %6142 = vmatpush1.bf16.msra.mxu0 %v9242_v54 }
 0x465   :  { %6144 = vmatprep.subr.bf16.mxu0 %v9246_v32 }
 0x468   :  { %6146 = vmatpush1.bf16.msra.mxu0 %v9250_v8 }
 0x469   :  { %6148 = vmatprep.subr.bf16.mxu0 %v9254_v10 }
 0x46c   :  { %6150 = vmatpush1.bf16.msra.mxu0 %v9258_v38  ;;  %v1407_v38 = vrot.slane %v9305_v61, %v1406_v63 }
 0x46d   :  { %6152 = vmatprep.subr.bf16.mxu0 %v9262_v1  ;;  %v2306_v1 = vadd.f32 1.0, %v7876_v3 }
 0x46f   :  { %7879 = vrcp.f32 %v2306_v1 }
 0x470   :  { %6154 = vmatpush1.bf16.msra.mxu0 %v9266_v55  ;;  %v2004_v55 = vld [vmem:[#allocation2 + $0x20] sm:$0x3]  ;;  %7881 = vrcp.f32 %v2307_v39 }
 0x471   :  { %6220 = vmatprep.subr.bf16.mxu0 %v9270_v17 }
 0x479   :  { %v7880_v6 = vpop.eup %7879 }
 0x485   :  { %v1717_v4 = vpop.f32.mrb[30].mxu0 }
 0x486   :  { %v1718_v40 = vadd.f32 %v1717_v4, %v1407_v38  ;;  %v2216_v17 = vpop.f32.mrb[14].mxu1  ;;  %v1719_v26 = vpop.f32.mrb[31].mxu0 }
 0x487   :  { %v2296_v16 = vadd.f32 %v2216_v17, %v2004_v55  ;;  %v1720_v52 = vadd.f32 %v1719_v26, %v1411_v50  ;;  %v2218_v10 = vpop.f32.mrb[15].mxu1  ;;  %v7882_v4 = vpop.eup %7881  ;;  %v2002_v26 = vld [vmem:[#allocation2 + $0x10] sm:$0x3] }
 0x488   :  { %1734 = vst [vmem:[#allocation2 + $0x30] sm:$0xff] %v1718_v40  ;;  %v2297_v28 = vadd.f32 %v2218_v10, %v2005_v31  ;;  %v2003_v40 = vld [vmem:[#allocation2 + $0x18] sm:$0x3] }
 0x489   :  { %7883 = vtanh.f32 %v2296_v16  ;;  %1735 = vst [vmem:[#allocation2 + $0x38] sm:$0xff] %v1720_v52  ;;  %v1723_v63 = vpop.f32.mrb[32].mxu0 }
 0x48a   :  { %7885 = vtanh.f32 %v2297_v28  ;;  %v1724_v3 = vadd.f32 %v1723_v63, %v1407_v38  ;;  %v1725_v61 = vpop.f32.mrb[33].mxu0 }
 0x48b   :  { %v1726_v57 = vadd.f32 %v1725_v61, %v1411_v50 }
 0x48c   :  { %1742 = vst [vmem:[#allocation2 + $0x70] sm:$0xff] %v1724_v3 }
 0x48d   :  { %1743 = vst [vmem:[#allocation2 + $0x78] sm:$0xff] %v1726_v57 }
 0x493   :  { %v7884_v8 = vpop.eup %7883 }
 0x494   :  { %v7886_v1 = vpop.eup %7885  ;;  %v2340_v55 = vmul.f32 %v7884_v8, %v7880_v6 }
 0x495   :  { %v2341_v17 = vmul.f32 %v7886_v1, %v7882_v4  ;;  %v2006_v4 = vld [vmem:[#allocation2 + $0x30] sm:$0x3] }
 0x4c6   :  { %v2145_v32 = vpop.f32.mrb[34].mxu0 }
 0x4c7   :  { %v2294_v39 = vadd.f32 %v2145_v32, %v2002_v26  ;;  %v2147_v10 = vpop.f32.mrb[35].mxu0 }
 0x4c8   :  { %v2295_v16 = vadd.f32 %v2147_v10, %v2003_v40 }
 0x4c9   :  { %v5174_v52 = vmul.f32 -1.442695, %v2294_v39  ;;  %v2007_v39 = vld [vmem:[#allocation2 + $0x38] sm:$0x3] }
 0x4ca   :  { %v5175_v31 = vmul.f32 -1.442695, %v2295_v16 }
 0x4cb   :  { %7887 = vpow2.f32 %v5174_v52 }
 0x4cc   :  { %7889 = vpow2.f32 %v5175_v31 }
 0x4d5   :  { %v7888_v38 = vpop.eup %7887 }
 0x4d6   :  { %v7890_v50 = vpop.eup %7889  ;;  %v2318_v28 = vadd.f32 1.0, %v7888_v38 }
 0x4d7   :  { %v2319_v63 = vadd.f32 1.0, %v7890_v50 }
 0x4d8   :  { %7891 = vrcp.f32 %v2318_v28 }
 0x4d9   :  { %7893 = vrcp.f32 %v2319_v63 }
 0x4e2   :  { %v7892_v3 = vpop.eup %7891 }
 0x4e3   :  { %v7894_v61 = vpop.eup %7893  ;;  %v2338_v8 = vmul.f32 0.0, %v7892_v3 }
 0x4e4   :  { %v2339_v57 = vmul.f32 0.0, %v7894_v61 }
 0x4e5   :  { %v9427_v6 = vadd.f32 %v2340_v55, %v2338_v8 }
 0x4e6   :  { %v9429_v32 = vadd.f32 %v2341_v17, %v2339_v57  ;;  %v10878_v57 = vld [vmem:[#allocation44_spill] sm:$0xff] }
 0x506   :  { %v2287_v1 = vpop.f32.mrb[36].mxu0 }
 0x507   :  { %v2298_v26 = vadd.f32 %v2287_v1, %v2006_v4  ;;  %v2289_v40 = vpop.f32.mrb[37].mxu0  ;;  %v10879_v4 = vld [vmem:[#allocation45_spill] sm:$0xff]  ;;  %v10880_v1 = vld [vmem:[#allocation107_spill] sm:$0xff] }
 0x508   :  { %v2299_v10 = vadd.f32 %v2289_v40, %v2007_v39  ;;  %v10882_v39 = vld [vmem:[#allocation108_spill] sm:$0xff]  ;;  %v10883_v40 = vld [vmem:[#allocation47_spill] sm:$0xff] }
 0x509   :  { %v5176_v16 = vmul.f32 -1.442695, %v2298_v26  ;;  %v10881_v26 = vld [vmem:[#allocation46_spill] sm:$0xff] }
 0x50a   :  { %v5177_v52 = vmul.f32 -1.442695, %v2299_v10  ;;  %v10884_v10 = vld [vmem:[#allocation109_spill] sm:$0xff] }
 0x50b   :  { %7895 = vpow2.f32 %v5176_v16  ;;  %v10885_v16 = vld [vmem:[#allocation48_spill] sm:$0xff] }
 0x50c   :  { %7897 = vpow2.f32 %v5177_v52  ;;  %v10886_v52 = vld [vmem:[#allocation110_spill] sm:$0xff] }
 0x50d   :  { %7899 = vtanh.f32 %v9427_v6 }
 0x50e   :  { %7901 = vtanh.f32 %v9429_v32 }
 0x515   :  { %v7896_v31 = vpop.eup %7895 }
 0x516   :  { %v7898_v38 = vpop.eup %7897  ;;  %v2332_v50 = vadd.f32 1.0, %v7896_v31  ;;  %v10887_v31 = vld [vmem:[#allocation49_spill] sm:$0xff] }
 0x517   :  { %v2333_v55 = vadd.f32 1.0, %v7898_v38  ;;  %v7900_v17 = vpop.eup %7899  ;;  %v10888_v38 = vld [vmem:[#allocation111_spill] sm:$0xff] }
 0x518   :  { %7903 = vrcp.f32 %v2332_v50  ;;  %v7902_v28 = vpop.eup %7901  ;;  %v10889_v50 = vld [vmem:[#allocation50_spill] sm:$0xff] }
 0x519   :  { %7905 = vrcp.f32 %v2333_v55  ;;  %v10890_v55 = vld [vmem:[#allocation112_spill] sm:$0xff] }
 0x522   :  { %v7904_v63 = vpop.eup %7903 }
 0x523   :  { %v7906_v3 = vpop.eup %7905  ;;  %v9433_v61 = vmul.f32 %v7904_v63, %v7900_v17  ;;  %v10891_v17 = vld [vmem:[#allocation51_spill] sm:$0xff]  ;;  %v10893_v63 = vld [vmem:[#allocation52_spill] sm:$0xff] }
 0x524   :  { %v2347_v8 = vmul.f32 %v7906_v3, %v7902_v28  ;;  %v10892_v28 = vld [vmem:[#allocation113_spill] sm:$0xff]  ;;  %v10894_v3 = vld [vmem:[#allocation114_spill] sm:$0xff] }
 0x525   :  { %2348 = vst [vmem:[#allocation3] sm:$0x3] %v9433_v61 }
 0x526   :  { %2349 = vst [vmem:[#allocation3 + $0x8] sm:$0x3] %v2347_v8  ;;  %2422 = vmatprep.mubr.f32.mxu1 %v2347_v8  ;;  %2493 = vmatprep.mubr.f32.mxu0 %v2347_v8 }
 0x527   :  { %2423 = vmatmul.mubr.f32.vlgmr.msra.gmra.mrb[16].mxu1 %v9433_v61  ;;  %2494 = vmatmul.mubr.f32.vlgmr.msra.gmra.mrb[38].mxu0 %v9433_v61 }
 0x528   :  { %6158 = vmatpush1.bf16.msra.mxu1 %v9041_v20  ;;  %6222 = vmatpush1.bf16.msra.mxu0 %v9274_v19 }
 0x529   :  { %2564 = vmatprep.mubr.f32.mxu1 %v2347_v8  ;;  %2635 = vmatprep.mubr.f32.mxu0 %v2347_v8  ;;  %v10895_v8 = vld [vmem:[#allocation53_spill] sm:$0xff] }
 0x52a   :  { %6160 = vmatprep.subr.bf16.mxu1 %v10878_v57  ;;  %6224 = vmatprep.subr.bf16.mxu0 %v9278_v48 }
 0x52c   :  { %6162 = vmatpush1.bf16.msra.mxu1 %v10879_v4  ;;  %6226 = vmatpush1.bf16.msra.mxu0 %v10880_v1 }
 0x52d   :  { %6164 = vmatprep.subr.bf16.mxu1 %v10881_v26  ;;  %6228 = vmatprep.subr.bf16.mxu0 %v10882_v39 }
 0x530   :  { %6166 = vmatpush1.bf16.msra.mxu1 %v10883_v40  ;;  %6230 = vmatpush1.bf16.msra.mxu0 %v10884_v10 }
 0x531   :  { %6168 = vmatprep.subr.bf16.mxu1 %v10885_v16  ;;  %6232 = vmatprep.subr.bf16.mxu0 %v10886_v52  ;;  %v10896_v16 = vld [vmem:[#allocation115_spill] sm:$0xff]  ;;  %v10897_v52 = vld [vmem:[#allocation54_spill] sm:$0xff] }
 0x534   :  { %6170 = vmatpush1.bf16.msra.mxu1 %v10887_v31  ;;  %6234 = vmatpush1.bf16.msra.mxu0 %v10888_v38  ;;  %v10898_v38 = vld [vmem:[#allocation55_spill] sm:$0xff] }
 0x535   :  { %6172 = vmatprep.subr.bf16.mxu1 %v10889_v50  ;;  %6236 = vmatprep.subr.bf16.mxu0 %v10890_v55  ;;  %v10899_v55 = vld [vmem:[#allocation56_spill] sm:$0xff] }
 0x538   :  { %6174 = vmatpush1.bf16.msra.mxu1 %v10891_v17  ;;  %6238 = vmatpush1.bf16.msra.mxu0 %v10892_v28  ;;  %v10900_v28 = vld [vmem:[#allocation57_spill] sm:$0xff] }
 0x539   :  { %6176 = vmatprep.subr.bf16.mxu1 %v10893_v63  ;;  %6240 = vmatprep.subr.bf16.mxu0 %v10894_v3  ;;  %v10901_v3 = vld [vmem:[#allocation58_spill] sm:$0xff] }
 0x53c   :  { %6178 = vmatpush1.bf16.msra.mxu1 %v10895_v8  ;;  %6242 = vmatpush1.bf16.msra.mxu0 %v10896_v16  ;;  %v10902_v16 = vld [vmem:[#allocation59_spill] sm:$0xff] }
 0x53d   :  { %6180 = vmatprep.subr.bf16.mxu1 %v10897_v52  ;;  %6244 = vmatprep.subr.bf16.mxu0 %v9324_v33  ;;  %v10903_v33 = vld [vmem:[#allocation60_spill] sm:$0xff] }
 0x540   :  { %6182 = vmatpush1.bf16.msra.mxu1 %v10898_v38  ;;  %6246 = vmatpush1.bf16.msra.mxu0 %v9327_v62  ;;  %v10904_v62 = vld [vmem:[#allocation61_spill] sm:$0xff] }
 0x541   :  { %6184 = vmatprep.subr.bf16.mxu1 %v10899_v55  ;;  %6248 = vmatprep.subr.bf16.mxu0 %v9330_v22  ;;  %v10905_v22 = vld [vmem:[#allocation62_spill] sm:$0xff] }
 0x544   :  { %6186 = vmatpush1.bf16.msra.mxu1 %v10900_v28  ;;  %6250 = vmatpush1.bf16.msra.mxu0 %v9333_v45  ;;  %v10906_v45 = vld [vmem:[#allocation63_spill] sm:$0xff] }
 0x545   :  { %6188 = vmatprep.subr.bf16.mxu1 %v10901_v3  ;;  %6252 = vmatprep.subr.bf16.mxu0 %v9336_v2  ;;  %v10907_v2 = vld [vmem:[#allocation64_spill] sm:$0xff] }
 0x548   :  { %6190 = vmatpush1.bf16.msra.mxu1 %v10902_v16  ;;  %6254 = vmatpush1.bf16.msra.mxu0 %v9339_v7  ;;  %v10908_v16 = vld [vmem:[#allocation126_spill] sm:$0xff]  ;;  %v10909_v7 = vld [vmem:[#allocation65_spill] sm:$0xff] }
 0x549   :  { %6192 = vmatprep.subr.bf16.mxu1 %v10903_v33  ;;  %6256 = vmatprep.subr.bf16.mxu0 %v9342_v23  ;;  %v10910_v33 = vld [vmem:[#allocation127_spill] sm:$0xff]  ;;  %v10911_v23 = vld [vmem:[#allocation66_spill] sm:$0xff] }
 0x54c   :  { %6194 = vmatpush1.bf16.msra.mxu1 %v10904_v62  ;;  %6258 = vmatpush1.bf16.msra.mxu0 %v9345_v43  ;;  %v10912_v62 = vld [vmem:[#allocation128_spill] sm:$0xff]  ;;  %v10913_v43 = vld [vmem:[#allocation67_spill] sm:$0xff] }
 0x54d   :  { %6196 = vmatprep.subr.bf16.mxu1 %v10905_v22  ;;  %6260 = vmatprep.subr.bf16.mxu0 %v9348_v42  ;;  %v10914_v22 = vld [vmem:[#allocation129_spill] sm:$0xff]  ;;  %v10915_v42 = vld [vmem:[#allocation68_spill] sm:$0xff] }
 0x550   :  { %6198 = vmatpush1.bf16.msra.mxu1 %v10906_v45  ;;  %6262 = vmatpush1.bf16.msra.mxu0 %v9351_v58  ;;  %v10916_v58 = vld [vmem:[#allocation69_spill] sm:$0xff] }
 0x551   :  { %6200 = vmatprep.subr.bf16.mxu1 %v10907_v2  ;;  %6264 = vmatprep.subr.bf16.mxu0 %v10908_v16  ;;  %v10917_v16 = vld [vmem:[#allocation70_spill] sm:$0xff] }
 0x554   :  { %6202 = vmatpush1.bf16.msra.mxu1 %v10909_v7  ;;  %6266 = vmatpush1.bf16.msra.mxu0 %v10910_v33  ;;  %v10918_v33 = vld [vmem:[#allocation71_spill] sm:$0xff] }
 0x555   :  { %6204 = vmatprep.subr.bf16.mxu1 %v10911_v23  ;;  %6268 = vmatprep.subr.bf16.mxu0 %v10912_v62  ;;  %v10919_v62 = vld [vmem:[#allocation72_spill] sm:$0xff] }
 0x558   :  { %6206 = vmatpush1.bf16.msra.mxu1 %v10913_v43  ;;  %6270 = vmatpush1.bf16.msra.mxu0 %v10914_v22  ;;  %v10920_v22 = vld [vmem:[#allocation73_spill] sm:$0xff] }
 0x559   :  { %6208 = vmatprep.subr.bf16.mxu1 %v10915_v42  ;;  %6272 = vmatprep.subr.bf16.mxu0 %v9366_v51  ;;  %v10921_v51 = vld [vmem:[#allocation11_spill] sm:$0xff] }
 0x55c   :  { %6210 = vmatpush1.bf16.msra.mxu1 %v10916_v58  ;;  %6274 = vmatpush1.bf16.msra.mxu0 %v9369_v9 }
 0x55d   :  { %6212 = vmatprep.subr.bf16.mxu1 %v10917_v16  ;;  %6276 = vmatprep.subr.bf16.mxu0 %v9372_v11  ;;  %v10922_v11 = vld [vmem:[#allocation12_spill] sm:$0xff] }
 0x560   :  { %6214 = vmatpush1.bf16.msra.mxu1 %v10918_v33  ;;  %6278 = vmatpush1.bf16.msra.mxu0 %v9375_v44  ;;  %v10923_v44 = vld [vmem:[#allocation13_spill] sm:$0xff] }
 0x561   :  { %6216 = vmatprep.subr.bf16.mxu1 %v10919_v62  ;;  %6280 = vmatprep.subr.bf16.mxu0 %v9378_v41  ;;  %v10924_v41 = vld [vmem:[#allocation14_spill] sm:$0xff] }
 0x564   :  { %6218 = vmatpush1.bf16.msra.mxu1 %v10920_v22  ;;  %6282 = vmatpush1.bf16.msra.mxu0 %v9381_v30  ;;  %v10925_v30 = vld [vmem:[#allocation15_spill] sm:$0xff] }
 0x565   :  { %6284 = vmatprep.subr.bf16.mxu1 %v10921_v51  ;;  %6348 = vmatprep.subr.bf16.mxu0 %v9138_v14  ;;  %v10926_v14 = vld [vmem:[#allocation16_spill] sm:$0xff] }
 0x567   :  { %2565 = vmatmul.mubr.f32.vlgmr.msra.gmra.mrb[18].mxu1 %v9433_v61  ;;  %2636 = vmatmul.mubr.f32.vlgmr.msra.gmra.mrb[40].mxu0 %v9433_v61  ;;  %v10927_v61 = vld [vmem:[#allocation17_spill] sm:$0xff] }
 0x568   :  { %6286 = vmatpush1.bf16.msra.mxu1 %v10922_v11  ;;  %6350 = vmatpush1.bf16.msra.mxu0 %v9143_v15  ;;  %v10928_v15 = vld [vmem:[#allocation18_spill] sm:$0xff] }
 0x569   :  { %6288 = vmatprep.subr.bf16.mxu1 %v10923_v44  ;;  %6352 = vmatprep.subr.bf16.mxu0 %v9145_v5  ;;  %v10929_v44 = vld [vmem:[#allocation81_spill] sm:$0xff]  ;;  %v10930_v5 = vld [vmem:[#allocation19_spill] sm:$0xff] }
 0x56c   :  { %6290 = vmatpush1.bf16.msra.mxu1 %v10924_v41  ;;  %6354 = vmatpush1.bf16.msra.mxu0 %v9152_v34  ;;  %v10931_v41 = vld [vmem:[#allocation82_spill] sm:$0xff]  ;;  %v10932_v34 = vld [vmem:[#allocation20_spill] sm:$0xff] }
 0x56d   :  { %6292 = vmatprep.subr.bf16.mxu1 %v10925_v30  ;;  %6356 = vmatprep.subr.bf16.mxu0 %v9156_v25  ;;  %v10933_v25 = vld [vmem:[#allocation21_spill] sm:$0xff] }
 0x570   :  { %6294 = vmatpush1.bf16.msra.mxu1 %v10926_v14  ;;  %6358 = vmatpush1.bf16.msra.mxu0 %v9162_v60  ;;  %v10934_v60 = vld [vmem:[#allocation22_spill] sm:$0xff] }
 0x571   :  { %6296 = vmatprep.subr.bf16.mxu1 %v10927_v61  ;;  %6360 = vmatprep.subr.bf16.mxu0 %v9166_v47  ;;  %v10935_v47 = vld [vmem:[#allocation23_spill] sm:$0xff] }
 0x574   :  { %6298 = vmatpush1.bf16.msra.mxu1 %v10928_v15  ;;  %6362 = vmatpush1.bf16.msra.mxu0 %v10929_v44  ;;  %v10936_v44 = vld [vmem:[#allocation24_spill] sm:$0xff] }
 0x575   :  { %6300 = vmatprep.subr.bf16.mxu1 %v10930_v5  ;;  %6364 = vmatprep.subr.bf16.mxu0 %v10931_v41  ;;  %v10937_v41 = vld [vmem:[#allocation25_spill] sm:$0xff] }
 0x578   :  { %6302 = vmatpush1.bf16.msra.mxu1 %v10932_v34  ;;  %6366 = vmatpush1.bf16.msra.mxu0 %v9178_v59  ;;  %v10938_v59 = vld [vmem:[#allocation26_spill] sm:$0xff] }
 0x579   :  { %6304 = vmatprep.subr.bf16.mxu1 %v10933_v25  ;;  %6368 = vmatprep.subr.bf16.mxu0 %v9182_v37  ;;  %v10939_v37 = vld [vmem:[#allocation27_spill] sm:$0xff] }
 0x57c   :  { %6306 = vmatpush1.bf16.msra.mxu1 %v10934_v60  ;;  %6370 = vmatpush1.bf16.msra.mxu0 %v9186_v36  ;;  %v10940_v36 = vld [vmem:[#allocation28_spill] sm:$0xff] }
 0x57d   :  { %6308 = vmatprep.subr.bf16.mxu1 %v10935_v47  ;;  %6372 = vmatprep.subr.bf16.mxu0 %v9190_v27  ;;  %v10941_v27 = vld [vmem:[#allocation29_spill] sm:$0xff] }
 0x580   :  { %6310 = vmatpush1.bf16.msra.mxu1 %v10936_v44  ;;  %6374 = vmatpush1.bf16.msra.mxu0 %v9194_v18  ;;  %v10942_v18 = vld [vmem:[#allocation30_spill] sm:$0xff] }
 0x581   :  { %6312 = vmatprep.subr.bf16.mxu1 %v10937_v41  ;;  %6376 = vmatprep.subr.bf16.mxu0 %v9198_v53  ;;  %v10943_v53 = vld [vmem:[#allocation31_spill] sm:$0xff]  ;;  %v2715_v41 = vrot.slane %v9429_v32, 6 }
 0x584   :  { %6314 = vmatpush1.bf16.msra.mxu1 %v10938_v59  ;;  %6378 = vmatpush1.bf16.msra.mxu0 %v9202_v35  ;;  %v10944_v35 = vld [vmem:[#allocation32_spill] sm:$0xff] }
 0x585   :  { %6316 = vmatprep.subr.bf16.mxu1 %v10939_v37  ;;  %6380 = vmatprep.subr.bf16.mxu0 %v9206_v13  ;;  %v10945_v13 = vld [vmem:[#allocation33_spill] sm:$0xff] }
 0x588   :  { %6318 = vmatpush1.bf16.msra.mxu1 %v10940_v36  ;;  %6382 = vmatpush1.bf16.msra.mxu0 %v9210_v49  ;;  %v10946_v49 = vld [vmem:[#allocation34_spill] sm:$0xff] }
 0x589   :  { %6320 = vmatprep.subr.bf16.mxu1 %v10941_v27  ;;  %6384 = vmatprep.subr.bf16.mxu0 %v9214_v29  ;;  %v10947_v29 = vld [vmem:[#allocation35_spill] sm:$0xff]  ;;  %v2353_v36 = vld [vmem:[#allocation2 + $0x18] sm:$0xc] }
 0x58c   :  { %6322 = vmatpush1.bf16.msra.mxu1 %v10942_v18  ;;  %6386 = vmatpush1.bf16.msra.mxu0 %v9218_v0  ;;  %v10948_v0 = vld [vmem:[#allocation36_spill] sm:$0xff] }
 0x58d   :  { %6324 = vmatprep.subr.bf16.mxu1 %v10943_v53  ;;  %6388 = vmatprep.subr.bf16.mxu0 %v9222_v46  ;;  %v10949_v46 = vld [vmem:[#allocation37_spill] sm:$0xff] }
 0x590   :  { %6326 = vmatpush1.bf16.msra.mxu1 %v10944_v35  ;;  %6390 = vmatpush1.bf16.msra.mxu0 %v9226_v21  ;;  %v10950_v35 = vld [vmem:[#allocation100_spill] sm:$0xff]  ;;  %v10951_v21 = vld [vmem:[#allocation38_spill] sm:$0xff] }
 0x591   :  { %6328 = vmatprep.subr.bf16.mxu1 %v10945_v13  ;;  %6392 = vmatprep.subr.bf16.mxu0 %v9230_v56  ;;  %v10952_v13 = vld [vmem:[#allocation101_spill] sm:$0xff]  ;;  %v10953_v56 = vld [vmem:[#allocation39_spill] sm:$0xff] }
 0x594   :  { %6330 = vmatpush1.bf16.msra.mxu1 %v10946_v49  ;;  %6394 = vmatpush1.bf16.msra.mxu0 %v9234_v24  ;;  %v10954_v49 = vld [vmem:[#allocation102_spill] sm:$0xff]  ;;  %v10955_v24 = vld [vmem:[#allocation40_spill] sm:$0xff] }
 0x595   :  { %6332 = vmatprep.subr.bf16.mxu1 %v10947_v29  ;;  %6396 = vmatprep.subr.bf16.mxu0 %v9238_v12  ;;  %v10956_v29 = vld [vmem:[#allocation103_spill] sm:$0xff]  ;;  %v10957_v12 = vld [vmem:[#allocation41_spill] sm:$0xff] }
 0x598   :  { %6334 = vmatpush1.bf16.msra.mxu1 %v10948_v0  ;;  %6398 = vmatpush1.bf16.msra.mxu0 %v9242_v54  ;;  %v10958_v0 = vld [vmem:[#allocation104_spill] sm:$0xff]  ;;  %v10959_v54 = vld [vmem:[#allocation42_spill] sm:$0xff] }
 0x599   :  { %6336 = vmatprep.subr.bf16.mxu1 %v10949_v46  ;;  %6400 = vmatprep.subr.bf16.mxu0 %v10950_v35  ;;  %v10960_v46 = vld [vmem:[#allocation105_spill] sm:$0xff]  ;;  %v10961_v35 = vld [vmem:[#allocation43_spill] sm:$0xff] }
 0x59c   :  { %6338 = vmatpush1.bf16.msra.mxu1 %v10951_v21  ;;  %6402 = vmatpush1.bf16.msra.mxu0 %v10952_v13  ;;  %v10962_v21 = vld [vmem:[#allocation106_spill] sm:$0xff] }
 0x59d   :  { %6340 = vmatprep.subr.bf16.mxu1 %v10953_v56  ;;  %6404 = vmatprep.subr.bf16.mxu0 %v10954_v49 }
 0x5a0   :  { %6342 = vmatpush1.bf16.msra.mxu1 %v10955_v24  ;;  %6406 = vmatpush1.bf16.msra.mxu0 %v10956_v29  ;;  %v2352_v24 = vld [vmem:[#allocation2 + $0x10] sm:$0xc] }
 0x5a1   :  { %6344 = vmatprep.subr.bf16.mxu1 %v10957_v12  ;;  %6408 = vmatprep.subr.bf16.mxu0 %v10958_v0 }
 0x5a4   :  { %6346 = vmatpush1.bf16.msra.mxu1 %v10959_v54  ;;  %6410 = vmatpush1.bf16.msra.mxu0 %v10960_v46 }
 0x5a5   :  { %6412 = vmatprep.subr.bf16.mxu1 %v10961_v35  ;;  %6476 = vmatprep.subr.bf16.mxu0 %v10962_v21  ;;  %v2714_v21 = vrot.slane %v9427_v6, 6 }
 0x5fa   :  { %v2424_v13 = vpop.f32.mrb[16].mxu1  ;;  %v2495_v56 = vpop.f32.mrb[38].mxu0 }
 0x5fb   :  { %v2652_v53 = vrot.slane %v2495_v56, 6  ;;  %v2426_v49 = vpop.f32.mrb[17].mxu1  ;;  %v2497_v18 = vpop.f32.mrb[39].mxu0 }
 0x5fc   :  { %v2653_v27 = vrot.slane %v2497_v18, 6 }
 0x5fd   :  { %v2668_v29 = vadd.f32 %v2652_v53, %v2352_v24  ;;  %v2650_v53 = vrot.slane %v2424_v13, 6  ;;  %v2354_v13 = vld [vmem:[#allocation2 + $0x20] sm:$0xc] }
 0x5fe   :  { %v2669_v12 = vadd.f32 %v2653_v27, %v2353_v36  ;;  %v2651_v36 = vrot.slane %v2426_v49, 6  ;;  %v2350_v27 = vld [vmem:[#allocation2] sm:$0xc]  ;;  %v2356_v49 = vld [vmem:[#allocation2 + $0x30] sm:$0xc] }
 0x5ff   :  { %v5180_v37 = vmul.f32 -1.442695, %v2668_v29  ;;  %v2666_v29 = vadd.f32 %v2650_v53, %v2350_v27 }
 0x600   :  { %v5181_v0 = vmul.f32 -1.442695, %v2669_v12 }
 0x601   :  { %7907 = vpow2.f32 %v5180_v37  ;;  %v2351_v37 = vld [vmem:[#allocation2 + $0x8] sm:$0xc]  ;;  %v5178_v12 = vmul.f32 -1.442695, %v2666_v29 }
 0x602   :  { %7909 = vpow2.f32 %v5181_v0  ;;  %v2667_v0 = vadd.f32 %v2651_v36, %v2351_v37  ;;  %v2355_v29 = vld [vmem:[#allocation2 + $0x28] sm:$0xc]  ;;  %v2357_v37 = vld [vmem:[#allocation2 + $0x38] sm:$0xc] }
 0x60b   :  { %v7908_v54 = vpop.eup %7907 }
 0x60c   :  { %v2692_v46 = vadd.f32 1.0, %v7908_v54  ;;  %v7910_v59 = vpop.eup %7909  ;;  %v5179_v54 = vmul.f32 -1.442695, %v2667_v0 }
 0x60d   :  { %v2693_v35 = vadd.f32 1.0, %v7910_v59 }
 0x60e   :  { %7911 = vrcp.f32 %v2692_v46 }
 0x60f   :  { %7913 = vrcp.f32 %v2693_v35 }
 0x610   :  { %7915 = vpow2.f32 %v5178_v12 }
 0x611   :  { %7917 = vpow2.f32 %v5179_v54 }
 0x618   :  { %v7912_v56 = vpop.eup %7911 }
 0x619   :  { %v2718_v44 = vmul.f32 %v7912_v56, %v2714_v21  ;;  %v7914_v18 = vpop.eup %7913 }
 0x61a   :  { %v2719_v24 = vmul.f32 %v7914_v18, %v2715_v41  ;;  %v7916_v59 = vpop.eup %7915 }
 0x61b   :  { %v7918_v35 = vpop.eup %7917  ;;  %v2680_v46 = vadd.f32 1.0, %v7916_v59 }
 0x61c   :  { %v2681_v6 = vadd.f32 1.0, %v7918_v35 }
 0x61d   :  { %7919 = vrcp.f32 %v2680_v46 }
 0x61e   :  { %7921 = vrcp.f32 %v2681_v6 }
 0x63a   :  { %v2566_v47 = vpop.f32.mrb[18].mxu1  ;;  %v2637_v60 = vpop.f32.mrb[40].mxu0 }
 0x63b   :  { %v2654_v32 = vrot.slane %v2566_v47, 6  ;;  %v2656_v21 = vrot.slane %v2637_v60, 6  ;;  %v2568_v56 = vpop.f32.mrb[19].mxu1  ;;  %v2639_v41 = vpop.f32.mrb[41].mxu0 }
 0x63c   :  { %v2655_v18 = vrot.slane %v2568_v56, 6  ;;  %v2657_v53 = vrot.slane %v2639_v41, 6  ;;  %v7920_v60 = vpop.eup %7919 }
 0x63d   :  { %v2670_v36 = vadd.f32 %v2654_v32, %v2354_v13  ;;  %v2672_v27 = vadd.f32 %v2656_v21, %v2356_v49  ;;  %v7922_v47 = vpop.eup %7921 }
 0x63e   :  { %v2671_v0 = vadd.f32 %v2655_v18, %v2355_v29  ;;  %v2673_v12 = vadd.f32 %v2657_v53, %v2357_v37 }
 0x63f   :  { %7923 = vtanh.f32 %v2670_v36  ;;  %v5182_v54 = vmul.f32 -1.442695, %v2672_v27 }
 0x640   :  { %7925 = vtanh.f32 %v2671_v0  ;;  %v5183_v59 = vmul.f32 -1.442695, %v2673_v12  ;;  %v10964_v0 = vld [vmem:[#allocation110_spill] sm:$0xff]  ;;  %v10965_v12 = vld [vmem:[#allocation111_spill] sm:$0xff] }
 0x641   :  { %7927 = vpow2.f32 %v5182_v54  ;;  %v10966_v54 = vld [vmem:[#allocation112_spill] sm:$0xff] }
 0x642   :  { %7929 = vpow2.f32 %v5183_v59  ;;  %v10967_v59 = vld [vmem:[#allocation113_spill] sm:$0xff] }
 0x649   :  { %v7924_v35 = vpop.eup %7923 }
 0x64a   :  { %v7926_v25 = vpop.eup %7925  ;;  %v2720_v56 = vmul.f32 %v7924_v35, %v7920_v60  ;;  %v10968_v60 = vld [vmem:[#allocation114_spill] sm:$0xff]  ;;  %v10970_v35 = vld [vmem:[#allocation116_spill] sm:$0xff] }
 0x64b   :  { %v7928_v41 = vpop.eup %7927  ;;  %v2721_v46 = vmul.f32 %v7926_v25, %v7922_v47  ;;  %v10969_v47 = vld [vmem:[#allocation115_spill] sm:$0xff] }
 0x64c   :  { %v7930_v32 = vpop.eup %7929  ;;  %v9570_v21 = vadd.f32 %v2720_v56, %v2718_v44  ;;  %v2706_v13 = vadd.f32 1.0, %v7928_v41  ;;  %v10971_v56 = vld [vmem:[#allocation117_spill] sm:$0xff]  ;;  %v10972_v41 = vld [vmem:[#allocation118_spill] sm:$0xff] }
 0x64d   :  { %v9572_v6 = vadd.f32 %v2721_v46, %v2719_v24  ;;  %v2707_v49 = vadd.f32 1.0, %v7930_v32  ;;  %v10963_v24 = vld [vmem:[#allocation48_spill] sm:$0xff]  ;;  %v10973_v46 = vld [vmem:[#allocation119_spill] sm:$0xff] }
 0x64e   :  { %7931 = vtanh.f32 %v9570_v21  ;;  %v10974_v32 = vld [vmem:[#allocation120_spill] sm:$0xff] }
 0x64f   :  { %7933 = vrcp.f32 %v2706_v13  ;;  %v10975_v13 = vld [vmem:[#allocation59_spill] sm:$0xff] }
 0x650   :  { %7935 = vtanh.f32 %v9572_v6 }
 0x651   :  { %7937 = vrcp.f32 %v2707_v49  ;;  %v10976_v49 = vld [vmem:[#allocation121_spill] sm:$0xff] }
 0x658   :  { %v7932_v18 = vpop.eup %7931 }
 0x659   :  { %v7934_v53 = vpop.eup %7933 }
 0x65a   :  { %v7936_v36 = vpop.eup %7935  ;;  %v2726_v27 = vmul.f32 %v7934_v53, %v7932_v18  ;;  %v10977_v18 = vld [vmem:[#allocation60_spill] sm:$0xff]  ;;  %v10978_v53 = vld [vmem:[#allocation122_spill] sm:$0xff] }
 0x65b   :  { %v7938_v29 = vpop.eup %7937 }
 0x65c   :  { %v2727_v37 = vmul.f32 %v7938_v29, %v7936_v36  ;;  %2728 = vst [vmem:[#allocation3] sm:$0xc] %v2726_v27  ;;  %v9576_v44 = vrot.slane %v2726_v27, 2  ;;  %v10979_v36 = vld [vmem:[#allocation61_spill] sm:$0xff]  ;;  %v10980_v27 = vld [vmem:[#allocation123_spill] sm:$0xff]  ;;  %v10981_v29 = vld [vmem:[#allocation62_spill] sm:$0xff] }
 0x65e   :  { %2729 = vst [vmem:[#allocation3 + $0x8] sm:$0xc] %v2727_v37  ;;  %v2741_v25 = vrot.slane %v2727_v37, 2  ;;  %v10982_v37 = vld [vmem:[#allocation124_spill] sm:$0xff] }
 0x660   :  { %2808 = vmatprep.mubr.f32.mxu1 %v2741_v25  ;;  %2879 = vmatprep.mubr.f32.mxu0 %v2741_v25 }
 0x661   :  { %2809 = vmatmul.mubr.f32.vlgmr.msra.gmra.mrb[20].mxu1 %v9576_v44  ;;  %2880 = vmatmul.mubr.f32.vlgmr.msra.gmra.mrb[42].mxu0 %v9576_v44 }
 0x662   :  { %6414 = vmatpush1.bf16.msra.mxu1 %v9041_v20  ;;  %6478 = vmatpush1.bf16.msra.mxu0 %v9274_v19 }
 0x663   :  { %2950 = vmatprep.mubr.f32.mxu1 %v2741_v25  ;;  %3021 = vmatprep.mubr.f32.mxu0 %v2741_v25  ;;  %v10983_v25 = vld [vmem:[#allocation125_spill] sm:$0xff] }
 0x664   :  { %6416 = vmatprep.subr.bf16.mxu1 %v10878_v57  ;;  %6480 = vmatprep.subr.bf16.mxu0 %v9278_v48 }
 0x666   :  { %6418 = vmatpush1.bf16.msra.mxu1 %v10879_v4  ;;  %6482 = vmatpush1.bf16.msra.mxu0 %v10880_v1 }
 0x667   :  { %6420 = vmatprep.subr.bf16.mxu1 %v10881_v26  ;;  %6484 = vmatprep.subr.bf16.mxu0 %v10882_v39 }
 0x66a   :  { %6422 = vmatpush1.bf16.msra.mxu1 %v10883_v40  ;;  %6486 = vmatpush1.bf16.msra.mxu0 %v10884_v10 }
 0x66b   :  { %6424 = vmatprep.subr.bf16.mxu1 %v10963_v24  ;;  %6488 = vmatprep.subr.bf16.mxu0 %v10964_v0 }
 0x66e   :  { %6426 = vmatpush1.bf16.msra.mxu1 %v10887_v31  ;;  %6490 = vmatpush1.bf16.msra.mxu0 %v10965_v12 }
 0x66f   :  { %6428 = vmatprep.subr.bf16.mxu1 %v10889_v50  ;;  %6492 = vmatprep.subr.bf16.mxu0 %v10966_v54 }
 0x672   :  { %6430 = vmatpush1.bf16.msra.mxu1 %v10891_v17  ;;  %6494 = vmatpush1.bf16.msra.mxu0 %v10967_v59 }
 0x673   :  { %6432 = vmatprep.subr.bf16.mxu1 %v10893_v63  ;;  %6496 = vmatprep.subr.bf16.mxu0 %v10968_v60 }
 0x676   :  { %6434 = vmatpush1.bf16.msra.mxu1 %v10895_v8  ;;  %6498 = vmatpush1.bf16.msra.mxu0 %v10969_v47 }
 0x677   :  { %6436 = vmatprep.subr.bf16.mxu1 %v10897_v52  ;;  %6500 = vmatprep.subr.bf16.mxu0 %v10970_v35 }
 0x67a   :  { %6438 = vmatpush1.bf16.msra.mxu1 %v10898_v38  ;;  %6502 = vmatpush1.bf16.msra.mxu0 %v10971_v56 }
 0x67b   :  { %6440 = vmatprep.subr.bf16.mxu1 %v10899_v55  ;;  %6504 = vmatprep.subr.bf16.mxu0 %v10972_v41 }
 0x67e   :  { %6442 = vmatpush1.bf16.msra.mxu1 %v10900_v28  ;;  %6506 = vmatpush1.bf16.msra.mxu0 %v10973_v46 }
 0x67f   :  { %6444 = vmatprep.subr.bf16.mxu1 %v10901_v3  ;;  %6508 = vmatprep.subr.bf16.mxu0 %v10974_v32 }
 0x682   :  { %6446 = vmatpush1.bf16.msra.mxu1 %v10975_v13  ;;  %6510 = vmatpush1.bf16.msra.mxu0 %v10976_v49  ;;  %v10984_v13 = vld [vmem:[#allocation126_spill] sm:$0xff] }
 0x683   :  { %6448 = vmatprep.subr.bf16.mxu1 %v10977_v18  ;;  %6512 = vmatprep.subr.bf16.mxu0 %v10978_v53  ;;  %v10985_v18 = vld [vmem:[#allocation127_spill] sm:$0xff] }
 0x686   :  { %6450 = vmatpush1.bf16.msra.mxu1 %v10979_v36  ;;  %6514 = vmatpush1.bf16.msra.mxu0 %v10980_v27  ;;  %v10986_v36 = vld [vmem:[#allocation128_spill] sm:$0xff] }
 0x687   :  { %6452 = vmatprep.subr.bf16.mxu1 %v10981_v29  ;;  %6516 = vmatprep.subr.bf16.mxu0 %v10982_v37  ;;  %v10987_v29 = vld [vmem:[#allocation129_spill] sm:$0xff] }
 0x68a   :  { %6454 = vmatpush1.bf16.msra.mxu1 %v10906_v45  ;;  %6518 = vmatpush1.bf16.msra.mxu0 %v10983_v25  ;;  %v10988_v45 = vld [vmem:[#allocation130_spill] sm:$0xff] }
 0x68b   :  { %6456 = vmatprep.subr.bf16.mxu1 %v10907_v2  ;;  %6520 = vmatprep.subr.bf16.mxu0 %v10984_v13 }
 0x68e   :  { %6458 = vmatpush1.bf16.msra.mxu1 %v10909_v7  ;;  %6522 = vmatpush1.bf16.msra.mxu0 %v10985_v18  ;;  %v10989_v7 = vld [vmem:[#allocation132_spill] sm:$0xff] }
 0x68f   :  { %6460 = vmatprep.subr.bf16.mxu1 %v10911_v23  ;;  %6524 = vmatprep.subr.bf16.mxu0 %v10986_v36  ;;  %v10990_v23 = vld [vmem:[#allocation133_spill] sm:$0xff] }
 0x692   :  { %6462 = vmatpush1.bf16.msra.mxu1 %v10913_v43  ;;  %6526 = vmatpush1.bf16.msra.mxu0 %v10987_v29  ;;  %v10991_v43 = vld [vmem:[#allocation134_spill] sm:$0xff] }
 0x693   :  { %6464 = vmatprep.subr.bf16.mxu1 %v10915_v42  ;;  %6528 = vmatprep.subr.bf16.mxu0 %v10988_v45  ;;  %v10992_v42 = vld [vmem:[#allocation135_spill] sm:$0xff] }
 0x696   :  { %6466 = vmatpush1.bf16.msra.mxu1 %v10916_v58  ;;  %6530 = vmatpush1.bf16.msra.mxu0 %v9369_v9  ;;  %v10993_v58 = vld [vmem:[#allocation74_spill] sm:$0xff] }
 0x697   :  { %6468 = vmatprep.subr.bf16.mxu1 %v10917_v16  ;;  %6532 = vmatprep.subr.bf16.mxu0 %v10989_v7  ;;  %v3101_v16 = vrot.slane %v9572_v6, 6 }
 0x69a   :  { %6470 = vmatpush1.bf16.msra.mxu1 %v10918_v33  ;;  %6534 = vmatpush1.bf16.msra.mxu0 %v10990_v23  ;;  %v10994_v33 = vld [vmem:[#allocation75_spill] sm:$0xff]  ;;  %v10995_v23 = vld [vmem:[#allocation13_spill] sm:$0xff] }
 0x69b   :  { %6472 = vmatprep.subr.bf16.mxu1 %v10919_v62  ;;  %6536 = vmatprep.subr.bf16.mxu0 %v10991_v43  ;;  %v10996_v62 = vld [vmem:[#allocation76_spill] sm:$0xff]  ;;  %v10997_v43 = vld [vmem:[#allocation14_spill] sm:$0xff] }
 0x69e   :  { %6474 = vmatpush1.bf16.msra.mxu1 %v10920_v22  ;;  %6538 = vmatpush1.bf16.msra.mxu0 %v10992_v42  ;;  %v10998_v22 = vld [vmem:[#allocation77_spill] sm:$0xff] }
 0x69f   :  { %6540 = vmatprep.subr.bf16.mxu1 %v10921_v51  ;;  %6604 = vmatprep.subr.bf16.mxu0 %v10993_v58  ;;  %v10999_v51 = vld [vmem:[#allocation78_spill] sm:$0xff]  ;;  %v11000_v58 = vld [vmem:[#allocation79_spill] sm:$0xff] }
 0x6a1   :  { %2951 = vmatmul.mubr.f32.vlgmr.msra.gmra.mrb[22].mxu1 %v9576_v44  ;;  %3022 = vmatmul.mubr.f32.vlgmr.msra.gmra.mrb[44].mxu0 %v9576_v44  ;;  %v11001_v44 = vld [vmem:[#allocation80_spill] sm:$0xff] }
 0x6a2   :  { %6542 = vmatpush1.bf16.msra.mxu1 %v10922_v11  ;;  %6606 = vmatpush1.bf16.msra.mxu0 %v10994_v33  ;;  %v2733_v11 = vld [vmem:[#allocation2 + $0x18] sm:$0x30] }
 0x6a3   :  { %6544 = vmatprep.subr.bf16.mxu1 %v10995_v23  ;;  %6608 = vmatprep.subr.bf16.mxu0 %v10996_v62  ;;  %v11002_v23 = vld [vmem:[#allocation81_spill] sm:$0xff] }
 0x6a6   :  { %6546 = vmatpush1.bf16.msra.mxu1 %v10997_v43  ;;  %6610 = vmatpush1.bf16.msra.mxu0 %v10998_v22  ;;  %v11003_v43 = vld [vmem:[#allocation82_spill] sm:$0xff] }
 0x6a7   :  { %6548 = vmatprep.subr.bf16.mxu1 %v10925_v30  ;;  %6612 = vmatprep.subr.bf16.mxu0 %v10999_v51  ;;  %v11004_v30 = vld [vmem:[#allocation83_spill] sm:$0xff]  ;;  %v11005_v51 = vld [vmem:[#allocation21_spill] sm:$0xff] }
 0x6aa   :  { %6550 = vmatpush1.bf16.msra.mxu1 %v10926_v14  ;;  %6614 = vmatpush1.bf16.msra.mxu0 %v11000_v58  ;;  %v11006_v14 = vld [vmem:[#allocation84_spill] sm:$0xff]  ;;  %v11007_v58 = vld [vmem:[#allocation22_spill] sm:$0xff] }
 0x6ab   :  { %6552 = vmatprep.subr.bf16.mxu1 %v10927_v61  ;;  %6616 = vmatprep.subr.bf16.mxu0 %v11001_v44  ;;  %v11008_v61 = vld [vmem:[#allocation85_spill] sm:$0xff]  ;;  %v11009_v44 = vld [vmem:[#allocation23_spill] sm:$0xff] }
 0x6ae   :  { %6554 = vmatpush1.bf16.msra.mxu1 %v10928_v15  ;;  %6618 = vmatpush1.bf16.msra.mxu0 %v11002_v23  ;;  %v11010_v15 = vld [vmem:[#allocation86_spill] sm:$0xff]  ;;  %v11011_v23 = vld [vmem:[#allocation24_spill] sm:$0xff] }
 0x6af   :  { %6556 = vmatprep.subr.bf16.mxu1 %v10930_v5  ;;  %6620 = vmatprep.subr.bf16.mxu0 %v11003_v43  ;;  %v11012_v5 = vld [vmem:[#allocation87_spill] sm:$0xff]  ;;  %v11013_v43 = vld [vmem:[#allocation25_spill] sm:$0xff] }
 0x6b2   :  { %6558 = vmatpush1.bf16.msra.mxu1 %v10932_v34  ;;  %6622 = vmatpush1.bf16.msra.mxu0 %v11004_v30  ;;  %v11014_v34 = vld [vmem:[#allocation88_spill] sm:$0xff]  ;;  %v11015_v30 = vld [vmem:[#allocation26_spill] sm:$0xff] }
 0x6b3   :  { %6560 = vmatprep.subr.bf16.mxu1 %v11005_v51  ;;  %6624 = vmatprep.subr.bf16.mxu0 %v11006_v14  ;;  %v11016_v51 = vld [vmem:[#allocation89_spill] sm:$0xff]  ;;  %v11017_v14 = vld [vmem:[#allocation27_spill] sm:$0xff] }
 0x6b6   :  { %6562 = vmatpush1.bf16.msra.mxu1 %v11007_v58  ;;  %6626 = vmatpush1.bf16.msra.mxu0 %v11008_v61  ;;  %v11018_v58 = vld [vmem:[#allocation90_spill] sm:$0xff]  ;;  %v11019_v61 = vld [vmem:[#allocation28_spill] sm:$0xff] }
 0x6b7   :  { %6564 = vmatprep.subr.bf16.mxu1 %v11009_v44  ;;  %6628 = vmatprep.subr.bf16.mxu0 %v11010_v15  ;;  %v11020_v44 = vld [vmem:[#allocation91_spill] sm:$0xff]  ;;  %v11021_v15 = vld [vmem:[#allocation29_spill] sm:$0xff] }
 0x6ba   :  { %6566 = vmatpush1.bf16.msra.mxu1 %v11011_v23  ;;  %6630 = vmatpush1.bf16.msra.mxu0 %v11012_v5  ;;  %v11022_v23 = vld [vmem:[#allocation92_spill] sm:$0xff]  ;;  %v11023_v5 = vld [vmem:[#allocation30_spill] sm:$0xff] }
 0x6bb   :  { %6568 = vmatprep.subr.bf16.mxu1 %v11013_v43  ;;  %6632 = vmatprep.subr.bf16.mxu0 %v11014_v34  ;;  %v11024_v43 = vld [vmem:[#allocation93_spill] sm:$0xff]  ;;  %v11025_v34 = vld [vmem:[#allocation31_spill] sm:$0xff] }
 0x6be   :  { %6570 = vmatpush1.bf16.msra.mxu1 %v11015_v30  ;;  %6634 = vmatpush1.bf16.msra.mxu0 %v11016_v51  ;;  %v11026_v30 = vld [vmem:[#allocation94_spill] sm:$0xff]  ;;  %v11027_v51 = vld [vmem:[#allocation32_spill] sm:$0xff] }
 0x6bf   :  { %6572 = vmatprep.subr.bf16.mxu1 %v11017_v14  ;;  %6636 = vmatprep.subr.bf16.mxu0 %v11018_v58  ;;  %v11028_v14 = vld [vmem:[#allocation95_spill] sm:$0xff]  ;;  %v11029_v58 = vld [vmem:[#allocation33_spill] sm:$0xff] }
 0x6c2   :  { %6574 = vmatpush1.bf16.msra.mxu1 %v11019_v61  ;;  %6638 = vmatpush1.bf16.msra.mxu0 %v11020_v44  ;;  %v11030_v61 = vld [vmem:[#allocation96_spill] sm:$0xff]  ;;  %v11031_v44 = vld [vmem:[#allocation34_spill] sm:$0xff] }
 0x6c3   :  { %6576 = vmatprep.subr.bf16.mxu1 %v11021_v15  ;;  %6640 = vmatprep.subr.bf16.mxu0 %v11022_v23  ;;  %v11032_v15 = vld [vmem:[#allocation97_spill] sm:$0xff]  ;;  %v11033_v23 = vld [vmem:[#allocation35_spill] sm:$0xff] }
 0x6c6   :  { %6578 = vmatpush1.bf16.msra.mxu1 %v11023_v5  ;;  %6642 = vmatpush1.bf16.msra.mxu0 %v11024_v43  ;;  %v11034_v5 = vld [vmem:[#allocation98_spill] sm:$0xff]  ;;  %v11035_v43 = vld [vmem:[#allocation36_spill] sm:$0xff] }
 0x6c7   :  { %6580 = vmatprep.subr.bf16.mxu1 %v11025_v34  ;;  %6644 = vmatprep.subr.bf16.mxu0 %v11026_v30  ;;  %v11036_v34 = vld [vmem:[#allocation99_spill] sm:$0xff]  ;;  %v11037_v30 = vld [vmem:[#allocation37_spill] sm:$0xff] }
 0x6ca   :  { %6582 = vmatpush1.bf16.msra.mxu1 %v11027_v51  ;;  %6646 = vmatpush1.bf16.msra.mxu0 %v11028_v14  ;;  %v11038_v51 = vld [vmem:[#allocation100_spill] sm:$0xff]  ;;  %v11039_v14 = vld [vmem:[#allocation38_spill] sm:$0xff] }
 0x6cb   :  { %6584 = vmatprep.subr.bf16.mxu1 %v11029_v58  ;;  %6648 = vmatprep.subr.bf16.mxu0 %v11030_v61  ;;  %v11040_v58 = vld [vmem:[#allocation101_spill] sm:$0xff]  ;;  %v11041_v61 = vld [vmem:[#allocation39_spill] sm:$0xff] }
 0x6ce   :  { %6586 = vmatpush1.bf16.msra.mxu1 %v11031_v44  ;;  %6650 = vmatpush1.bf16.msra.mxu0 %v11032_v15  ;;  %v11042_v44 = vld [vmem:[#allocation102_spill] sm:$0xff]  ;;  %v11043_v15 = vld [vmem:[#allocation40_spill] sm:$0xff] }
 0x6cf   :  { %6588 = vmatprep.subr.bf16.mxu1 %v11033_v23  ;;  %6652 = vmatprep.subr.bf16.mxu0 %v11034_v5  ;;  %v11044_v23 = vld [vmem:[#allocation103_spill] sm:$0xff]  ;;  %v11045_v5 = vld [vmem:[#allocation41_spill] sm:$0xff] }
 0x6d2   :  { %6590 = vmatpush1.bf16.msra.mxu1 %v11035_v43  ;;  %6654 = vmatpush1.bf16.msra.mxu0 %v11036_v34  ;;  %v11046_v43 = vld [vmem:[#allocation104_spill] sm:$0xff]  ;;  %v11047_v34 = vld [vmem:[#allocation42_spill] sm:$0xff] }
 0x6d3   :  { %6592 = vmatprep.subr.bf16.mxu1 %v11037_v30  ;;  %6656 = vmatprep.subr.bf16.mxu0 %v11038_v51  ;;  %v11048_v30 = vld [vmem:[#allocation105_spill] sm:$0xff]  ;;  %v11049_v51 = vld [vmem:[#allocation43_spill] sm:$0xff] }
 0x6d6   :  { %6594 = vmatpush1.bf16.msra.mxu1 %v11039_v14  ;;  %6658 = vmatpush1.bf16.msra.mxu0 %v11040_v58  ;;  %v11050_v14 = vld [vmem:[#allocation106_spill] sm:$0xff] }
 0x6d7   :  { %6596 = vmatprep.subr.bf16.mxu1 %v11041_v61  ;;  %6660 = vmatprep.subr.bf16.mxu0 %v11042_v44 }
 0x6da   :  { %6598 = vmatpush1.bf16.msra.mxu1 %v11043_v15  ;;  %6662 = vmatpush1.bf16.msra.mxu0 %v11044_v23  ;;  %v2732_v15 = vld [vmem:[#allocation2 + $0x10] sm:$0x30] }
 0x6db   :  { %6600 = vmatprep.subr.bf16.mxu1 %v11045_v5  ;;  %6664 = vmatprep.subr.bf16.mxu0 %v11046_v43 }
 0x6de   :  { %6602 = vmatpush1.bf16.msra.mxu1 %v11047_v34  ;;  %6666 = vmatpush1.bf16.msra.mxu0 %v11048_v30 }
 0x6df   :  { %6668 = vmatprep.subr.bf16.mxu1 %v11049_v51  ;;  %6732 = vmatprep.subr.bf16.mxu0 %v11050_v14  ;;  %v3100_v14 = vrot.slane %v9570_v21, 6 }
 0x734   :  { %v2810_v58 = vpop.f32.mrb[20].mxu1  ;;  %v2881_v61 = vpop.f32.mrb[42].mxu0 }
 0x735   :  { %v3038_v22 = vrot.slane %v2881_v61, 4  ;;  %v2812_v44 = vpop.f32.mrb[21].mxu1  ;;  %v2883_v62 = vpop.f32.mrb[43].mxu0 }
 0x736   :  { %v3039_v33 = vrot.slane %v2883_v62, 4 }
 0x737   :  { %v3054_v23 = vadd.f32 %v3038_v22, %v2732_v15  ;;  %v3036_v22 = vrot.slane %v2810_v58, 4  ;;  %v2734_v58 = vld [vmem:[#allocation2 + $0x20] sm:$0x30] }
 0x738   :  { %v3055_v5 = vadd.f32 %v3039_v33, %v2733_v11  ;;  %v3037_v33 = vrot.slane %v2812_v44, 4  ;;  %v2736_v44 = vld [vmem:[#allocation2 + $0x30] sm:$0x30] }
 0x739   :  { %v5186_v42 = vmul.f32 -1.442695, %v3054_v23  ;;  %v2730_v23 = vld [vmem:[#allocation2] sm:$0x30] }
 0x73a   :  { %v5187_v43 = vmul.f32 -1.442695, %v3055_v5  ;;  %v3052_v5 = vadd.f32 %v3036_v22, %v2730_v23 }
 0x73b   :  { %7939 = vpow2.f32 %v5186_v42  ;;  %v2731_v42 = vld [vmem:[#allocation2 + $0x8] sm:$0x30] }
 0x73c   :  { %7941 = vpow2.f32 %v5187_v43  ;;  %v3053_v43 = vadd.f32 %v3037_v33, %v2731_v42  ;;  %v5184_v11 = vmul.f32 -1.442695, %v3052_v5  ;;  %v2735_v5 = vld [vmem:[#allocation2 + $0x28] sm:$0x30]  ;;  %v2737_v42 = vld [vmem:[#allocation2 + $0x38] sm:$0x30] }
 0x745   :  { %v7940_v34 = vpop.eup %7939 }
 0x746   :  { %v3078_v30 = vadd.f32 1.0, %v7940_v34  ;;  %v7942_v7 = vpop.eup %7941  ;;  %v5185_v34 = vmul.f32 -1.442695, %v3053_v43 }
 0x747   :  { %v3079_v51 = vadd.f32 1.0, %v7942_v7 }
 0x748   :  { %7943 = vrcp.f32 %v3078_v30 }
 0x749   :  { %7945 = vrcp.f32 %v3079_v51 }
 0x74a   :  { %7947 = vpow2.f32 %v5184_v11 }
 0x74b   :  { %7949 = vpow2.f32 %v5185_v34 }
 0x752   :  { %v7944_v61 = vpop.eup %7943 }
 0x753   :  { %v3104_v9 = vmul.f32 %v7944_v61, %v3100_v14  ;;  %v7946_v62 = vpop.eup %7945 }
 0x754   :  { %v3105_v15 = vmul.f32 %v7946_v62, %v3101_v16  ;;  %v7948_v7 = vpop.eup %7947 }
 0x755   :  { %v7950_v51 = vpop.eup %7949  ;;  %v3066_v30 = vadd.f32 1.0, %v7948_v7 }
 0x756   :  { %v3067_v21 = vadd.f32 1.0, %v7950_v51 }
 0x757   :  { %7951 = vrcp.f32 %v3066_v30 }
 0x758   :  { %7953 = vrcp.f32 %v3067_v21 }
 0x774   :  { %v2952_v45 = vpop.f32.mrb[22].mxu1  ;;  %v3023_v29 = vpop.f32.mrb[44].mxu0 }
 0x775   :  { %v3040_v6 = vrot.slane %v2952_v45, 4  ;;  %v3042_v14 = vrot.slane %v3023_v29, 4  ;;  %v2954_v61 = vpop.f32.mrb[23].mxu1  ;;  %v3025_v16 = vpop.f32.mrb[45].mxu0 }
 0x776   :  { %v3041_v62 = vrot.slane %v2954_v61, 4  ;;  %v3043_v22 = vrot.slane %v3025_v16, 4  ;;  %v7952_v45 = vpop.eup %7951 }
 0x777   :  { %v3056_v33 = vadd.f32 %v3040_v6, %v2734_v58  ;;  %v3058_v23 = vadd.f32 %v3042_v14, %v2736_v44  ;;  %v7954_v29 = vpop.eup %7953 }
 0x778   :  { %v3057_v43 = vadd.f32 %v3041_v62, %v2735_v5  ;;  %v3059_v11 = vadd.f32 %v3043_v22, %v2737_v42 }
 0x779   :  { %7955 = vtanh.f32 %v3056_v33  ;;  %v5188_v34 = vmul.f32 -1.442695, %v3058_v23 }
 0x77a   :  { %7957 = vtanh.f32 %v3057_v43  ;;  %v5189_v7 = vmul.f32 -1.442695, %v3059_v11  ;;  %v11052_v43 = vld [vmem:[#allocation60_spill] sm:$0xff]  ;;  %v11053_v11 = vld [vmem:[#allocation61_spill] sm:$0xff] }
 0x77b   :  { %7959 = vpow2.f32 %v5188_v34  ;;  %v11054_v34 = vld [vmem:[#allocation62_spill] sm:$0xff] }
 0x77c   :  { %7961 = vpow2.f32 %v5189_v7  ;;  %v11055_v7 = vld [vmem:[#allocation63_spill] sm:$0xff] }
 0x783   :  { %v7956_v51 = vpop.eup %7955 }
 0x784   :  { %v7958_v36 = vpop.eup %7957  ;;  %v3106_v61 = vmul.f32 %v7956_v51, %v7952_v45  ;;  %v11056_v45 = vld [vmem:[#allocation65_spill] sm:$0xff]  ;;  %v11058_v51 = vld [vmem:[#allocation128_spill] sm:$0xff] }
 0x785   :  { %v7960_v16 = vpop.eup %7959  ;;  %v3107_v30 = vmul.f32 %v7958_v36, %v7954_v29  ;;  %v11057_v29 = vld [vmem:[#allocation66_spill] sm:$0xff] }
 0x786   :  { %v7962_v6 = vpop.eup %7961  ;;  %v9712_v14 = vadd.f32 %v3106_v61, %v3104_v9  ;;  %v3092_v58 = vadd.f32 1.0, %v7960_v16  ;;  %v11059_v61 = vld [vmem:[#allocation67_spill] sm:$0xff]  ;;  %v11060_v16 = vld [vmem:[#allocation129_spill] sm:$0xff] }
 0x787   :  { %v9714_v21 = vadd.f32 %v3107_v30, %v3105_v15  ;;  %v3093_v44 = vadd.f32 1.0, %v7962_v6  ;;  %v11051_v15 = vld [vmem:[#allocation59_spill] sm:$0xff]  ;;  %v11061_v30 = vld [vmem:[#allocation68_spill] sm:$0xff]  ;;  %v11062_v6 = vld [vmem:[#allocation130_spill] sm:$0xff] }
 0x788   :  { %7963 = vtanh.f32 %v9712_v14 }
 0x789   :  { %7965 = vrcp.f32 %v3092_v58  ;;  %v11063_v58 = vld [vmem:[#allocation69_spill] sm:$0xff] }
 0x78a   :  { %7967 = vtanh.f32 %v9714_v21 }
 0x78b   :  { %7969 = vrcp.f32 %v3093_v44  ;;  %v11064_v44 = vld [vmem:[#allocation131_spill] sm:$0xff] }
 0x792   :  { %v7964_v62 = vpop.eup %7963 }
 0x793   :  { %v7966_v22 = vpop.eup %7965 }
 0x794   :  { %v7968_v33 = vpop.eup %7967  ;;  %v3112_v23 = vmul.f32 %v7966_v22, %v7964_v62  ;;  %v11065_v62 = vld [vmem:[#allocation70_spill] sm:$0xff]  ;;  %v11066_v22 = vld [vmem:[#allocation132_spill] sm:$0xff] }
 0x795   :  { %v7970_v5 = vpop.eup %7969 }
 0x796   :  { %v3113_v42 = vmul.f32 %v7970_v5, %v7968_v33  ;;  %3114 = vst [vmem:[#allocation3] sm:$0x30] %v3112_v23  ;;  %v9718_v36 = vrot.slane %v3112_v23, 4  ;;  %v11067_v33 = vld [vmem:[#allocation71_spill] sm:$0xff]  ;;  %v11068_v23 = vld [vmem:[#allocation133_spill] sm:$0xff]  ;;  %v11069_v5 = vld [vmem:[#allocation72_spill] sm:$0xff] }
 0x798   :  { %3115 = vst [vmem:[#allocation3 + $0x8] sm:$0x30] %v3113_v42  ;;  %v3127_v9 = vrot.slane %v3113_v42, 4  ;;  %v11070_v42 = vld [vmem:[#allocation134_spill] sm:$0xff] }
 0x79a   :  { %3194 = vmatprep.mubr.f32.mxu1 %v3127_v9  ;;  %3265 = vmatprep.mubr.f32.mxu0 %v3127_v9 }
 0x79b   :  { %3195 = vmatmul.mubr.f32.vlgmr.msra.gmra.mrb[24].mxu1 %v9718_v36  ;;  %3266 = vmatmul.mubr.f32.vlgmr.msra.gmra.mrb[46].mxu0 %v9718_v36 }
 0x79c   :  { %6670 = vmatpush1.bf16.msra.mxu1 %v9041_v20  ;;  %6734 = vmatpush1.bf16.msra.mxu0 %v9274_v19 }
 0x79d   :  { %3336 = vmatprep.mubr.f32.mxu1 %v3127_v9  ;;  %3407 = vmatprep.mubr.f32.mxu0 %v3127_v9  ;;  %v11071_v9 = vld [vmem:[#allocation73_spill] sm:$0xff] }
 0x79e   :  { %6672 = vmatprep.subr.bf16.mxu1 %v10878_v57  ;;  %6736 = vmatprep.subr.bf16.mxu0 %v9278_v48 }
 0x7a0   :  { %6674 = vmatpush1.bf16.msra.mxu1 %v10879_v4  ;;  %6738 = vmatpush1.bf16.msra.mxu0 %v10880_v1 }
 0x7a1   :  { %6676 = vmatprep.subr.bf16.mxu1 %v10881_v26  ;;  %6740 = vmatprep.subr.bf16.mxu0 %v10882_v39 }
 0x7a4   :  { %6678 = vmatpush1.bf16.msra.mxu1 %v10883_v40  ;;  %6742 = vmatpush1.bf16.msra.mxu0 %v10884_v10 }
 0x7a5   :  { %6680 = vmatprep.subr.bf16.mxu1 %v10963_v24  ;;  %6744 = vmatprep.subr.bf16.mxu0 %v10964_v0 }
 0x7a8   :  { %6682 = vmatpush1.bf16.msra.mxu1 %v10887_v31  ;;  %6746 = vmatpush1.bf16.msra.mxu0 %v10965_v12 }
 0x7a9   :  { %6684 = vmatprep.subr.bf16.mxu1 %v10889_v50  ;;  %6748 = vmatprep.subr.bf16.mxu0 %v10966_v54 }
 0x7ac   :  { %6686 = vmatpush1.bf16.msra.mxu1 %v10891_v17  ;;  %6750 = vmatpush1.bf16.msra.mxu0 %v10967_v59 }
 0x7ad   :  { %6688 = vmatprep.subr.bf16.mxu1 %v10893_v63  ;;  %6752 = vmatprep.subr.bf16.mxu0 %v10968_v60 }
 0x7b0   :  { %6690 = vmatpush1.bf16.msra.mxu1 %v10895_v8  ;;  %6754 = vmatpush1.bf16.msra.mxu0 %v10969_v47 }
 0x7b1   :  { %6692 = vmatprep.subr.bf16.mxu1 %v10897_v52  ;;  %6756 = vmatprep.subr.bf16.mxu0 %v10970_v35 }
 0x7b4   :  { %6694 = vmatpush1.bf16.msra.mxu1 %v10898_v38  ;;  %6758 = vmatpush1.bf16.msra.mxu0 %v10971_v56 }
 0x7b5   :  { %6696 = vmatprep.subr.bf16.mxu1 %v10899_v55  ;;  %6760 = vmatprep.subr.bf16.mxu0 %v10972_v41 }
 0x7b8   :  { %6698 = vmatpush1.bf16.msra.mxu1 %v10900_v28  ;;  %6762 = vmatpush1.bf16.msra.mxu0 %v10973_v46 }
 0x7b9   :  { %6700 = vmatprep.subr.bf16.mxu1 %v10901_v3  ;;  %6764 = vmatprep.subr.bf16.mxu0 %v10974_v32 }
 0x7bc   :  { %6702 = vmatpush1.bf16.msra.mxu1 %v11051_v15  ;;  %6766 = vmatpush1.bf16.msra.mxu0 %v10976_v49 }
 0x7bd   :  { %6704 = vmatprep.subr.bf16.mxu1 %v11052_v43  ;;  %6768 = vmatprep.subr.bf16.mxu0 %v10978_v53 }
 0x7c0   :  { %6706 = vmatpush1.bf16.msra.mxu1 %v11053_v11  ;;  %6770 = vmatpush1.bf16.msra.mxu0 %v10980_v27 }
 0x7c1   :  { %6708 = vmatprep.subr.bf16.mxu1 %v11054_v34  ;;  %6772 = vmatprep.subr.bf16.mxu0 %v10982_v37 }
 0x7c4   :  { %6710 = vmatpush1.bf16.msra.mxu1 %v11055_v7  ;;  %6774 = vmatpush1.bf16.msra.mxu0 %v10983_v25 }
 0x7c5   :  { %6712 = vmatprep.subr.bf16.mxu1 %v10907_v2  ;;  %6776 = vmatprep.subr.bf16.mxu0 %v10984_v13 }
 0x7c8   :  { %6714 = vmatpush1.bf16.msra.mxu1 %v11056_v45  ;;  %6778 = vmatpush1.bf16.msra.mxu0 %v10985_v18  ;;  %v3487_v45 = vrot.slane %v9714_v21, 6 }
 0x7c9   :  { %6716 = vmatprep.subr.bf16.mxu1 %v11057_v29  ;;  %6780 = vmatprep.subr.bf16.mxu0 %v11058_v51  ;;  %v3119_v51 = vld [vmem:[#allocation2 + $0x18] sm:$0xc0] }
 0x7cc   :  { %6718 = vmatpush1.bf16.msra.mxu1 %v11059_v61  ;;  %6782 = vmatpush1.bf16.msra.mxu0 %v11060_v16 }
 0x7cd   :  { %6720 = vmatprep.subr.bf16.mxu1 %v11061_v30  ;;  %6784 = vmatprep.subr.bf16.mxu0 %v11062_v6  ;;  %v11072_v30 = vld [vmem:[#allocation135_spill] sm:$0xff] }
 0x7ce   :  { %v11073_v6 = vld [vmem:[#allocation11_spill] sm:$0xff] }
 0x7d0   :  { %6722 = vmatpush1.bf16.msra.mxu1 %v11063_v58  ;;  %6786 = vmatpush1.bf16.msra.mxu0 %v11064_v44  ;;  %v11074_v58 = vld [vmem:[#allocation74_spill] sm:$0xff] }
 0x7d1   :  { %6724 = vmatprep.subr.bf16.mxu1 %v11065_v62  ;;  %6788 = vmatprep.subr.bf16.mxu0 %v11066_v22  ;;  %v11075_v22 = vld [vmem:[#allocation12_spill] sm:$0xff]  ;;  %v11084_v62 = vld [vmem:[#allocation79_spill] sm:$0xff] }
 0x7d4   :  { %6726 = vmatpush1.bf16.msra.mxu1 %v11067_v33  ;;  %6790 = vmatpush1.bf16.msra.mxu0 %v11068_v23  ;;  %v11076_v33 = vld [vmem:[#allocation75_spill] sm:$0xff]  ;;  %v11077_v23 = vld [vmem:[#allocation13_spill] sm:$0xff] }
 0x7d5   :  { %6728 = vmatprep.subr.bf16.mxu1 %v11069_v5  ;;  %6792 = vmatprep.subr.bf16.mxu0 %v11070_v42  ;;  %v11078_v5 = vld [vmem:[#allocation76_spill] sm:$0xff]  ;;  %v11079_v42 = vld [vmem:[#allocation14_spill] sm:$0xff] }
 0x7d8   :  { %6730 = vmatpush1.bf16.msra.mxu1 %v11071_v9  ;;  %6794 = vmatpush1.bf16.msra.mxu0 %v11072_v30  ;;  %v11080_v9 = vld [vmem:[#allocation77_spill] sm:$0xff]  ;;  %v11081_v30 = vld [vmem:[#allocation15_spill] sm:$0xff] }
 0x7d9   :  { %6796 = vmatprep.subr.bf16.mxu1 %v11073_v6  ;;  %6860 = vmatprep.subr.bf16.mxu0 %v11074_v58  ;;  %v11082_v6 = vld [vmem:[#allocation78_spill] sm:$0xff]  ;;  %v11083_v58 = vld [vmem:[#allocation16_spill] sm:$0xff] }
 0x7db   :  { %3337 = vmatmul.mubr.f32.vlgmr.msra.gmra.mrb[26].mxu1 %v9718_v36  ;;  %3408 = vmatmul.mubr.f32.vlgmr.msra.gmra.mrb[48].mxu0 %v9718_v36  ;;  %v11085_v36 = vld [vmem:[#allocation17_spill] sm:$0xff] }
 0x7dc   :  { %6798 = vmatpush1.bf16.msra.mxu1 %v11075_v22  ;;  %6862 = vmatpush1.bf16.msra.mxu0 %v11076_v33  ;;  %v11086_v22 = vld [vmem:[#allocation80_spill] sm:$0xff]  ;;  %v11087_v33 = vld [vmem:[#allocation18_spill] sm:$0xff] }
 0x7dd   :  { %6800 = vmatprep.subr.bf16.mxu1 %v11077_v23  ;;  %6864 = vmatprep.subr.bf16.mxu0 %v11078_v5  ;;  %v11088_v23 = vld [vmem:[#allocation81_spill] sm:$0xff]  ;;  %v11089_v5 = vld [vmem:[#allocation19_spill] sm:$0xff] }
 0x7e0   :  { %6802 = vmatpush1.bf16.msra.mxu1 %v11079_v42  ;;  %6866 = vmatpush1.bf16.msra.mxu0 %v11080_v9  ;;  %v11090_v42 = vld [vmem:[#allocation82_spill] sm:$0xff]  ;;  %v11091_v9 = vld [vmem:[#allocation20_spill] sm:$0xff] }
 0x7e1   :  { %6804 = vmatprep.subr.bf16.mxu1 %v11081_v30  ;;  %6868 = vmatprep.subr.bf16.mxu0 %v11082_v6  ;;  %v11092_v30 = vld [vmem:[#allocation83_spill] sm:$0xff]  ;;  %v11093_v6 = vld [vmem:[#allocation21_spill] sm:$0xff] }
 0x7e4   :  { %6806 = vmatpush1.bf16.msra.mxu1 %v11083_v58  ;;  %6870 = vmatpush1.bf16.msra.mxu0 %v11084_v62  ;;  %v11094_v58 = vld [vmem:[#allocation84_spill] sm:$0xff]  ;;  %v11095_v62 = vld [vmem:[#allocation22_spill] sm:$0xff] }
 0x7e5   :  { %6808 = vmatprep.subr.bf16.mxu1 %v11085_v36  ;;  %6872 = vmatprep.subr.bf16.mxu0 %v11086_v22  ;;  %v11096_v36 = vld [vmem:[#allocation85_spill] sm:$0xff]  ;;  %v11097_v22 = vld [vmem:[#allocation23_spill] sm:$0xff] }
 0x7e8   :  { %6810 = vmatpush1.bf16.msra.mxu1 %v11087_v33  ;;  %6874 = vmatpush1.bf16.msra.mxu0 %v11088_v23  ;;  %v11098_v33 = vld [vmem:[#allocation86_spill] sm:$0xff]  ;;  %v11099_v23 = vld [vmem:[#allocation24_spill] sm:$0xff] }
 0x7e9   :  { %6812 = vmatprep.subr.bf16.mxu1 %v11089_v5  ;;  %6876 = vmatprep.subr.bf16.mxu0 %v11090_v42  ;;  %v11100_v5 = vld [vmem:[#allocation87_spill] sm:$0xff]  ;;  %v11101_v42 = vld [vmem:[#allocation25_spill] sm:$0xff] }
 0x7ec   :  { %6814 = vmatpush1.bf16.msra.mxu1 %v11091_v9  ;;  %6878 = vmatpush1.bf16.msra.mxu0 %v11092_v30  ;;  %v11102_v9 = vld [vmem:[#allocation88_spill] sm:$0xff]  ;;  %v11103_v30 = vld [vmem:[#allocation26_spill] sm:$0xff] }
 0x7ed   :  { %6816 = vmatprep.subr.bf16.mxu1 %v11093_v6  ;;  %6880 = vmatprep.subr.bf16.mxu0 %v11094_v58  ;;  %v11104_v6 = vld [vmem:[#allocation89_spill] sm:$0xff]  ;;  %v11105_v58 = vld [vmem:[#allocation27_spill] sm:$0xff] }
 0x7f0   :  { %6818 = vmatpush1.bf16.msra.mxu1 %v11095_v62  ;;  %6882 = vmatpush1.bf16.msra.mxu0 %v11096_v36  ;;  %v11106_v62 = vld [vmem:[#allocation90_spill] sm:$0xff]  ;;  %v11107_v36 = vld [vmem:[#allocation28_spill] sm:$0xff] }
 0x7f1   :  { %6820 = vmatprep.subr.bf16.mxu1 %v11097_v22  ;;  %6884 = vmatprep.subr.bf16.mxu0 %v11098_v33  ;;  %v11108_v22 = vld [vmem:[#allocation91_spill] sm:$0xff]  ;;  %v11109_v33 = vld [vmem:[#allocation29_spill] sm:$0xff] }
 0x7f4   :  { %6822 = vmatpush1.bf16.msra.mxu1 %v11099_v23  ;;  %6886 = vmatpush1.bf16.msra.mxu0 %v11100_v5  ;;  %v11110_v23 = vld [vmem:[#allocation92_spill] sm:$0xff]  ;;  %v11111_v5 = vld [vmem:[#allocation30_spill] sm:$0xff] }
 0x7f5   :  { %6824 = vmatprep.subr.bf16.mxu1 %v11101_v42  ;;  %6888 = vmatprep.subr.bf16.mxu0 %v11102_v9  ;;  %v11112_v42 = vld [vmem:[#allocation93_spill] sm:$0xff]  ;;  %v11113_v9 = vld [vmem:[#allocation31_spill] sm:$0xff] }
 0x7f8   :  { %6826 = vmatpush1.bf16.msra.mxu1 %v11103_v30  ;;  %6890 = vmatpush1.bf16.msra.mxu0 %v11104_v6  ;;  %v11114_v30 = vld [vmem:[#allocation94_spill] sm:$0xff]  ;;  %v11115_v6 = vld [vmem:[#allocation32_spill] sm:$0xff] }
 0x7f9   :  { %6828 = vmatprep.subr.bf16.mxu1 %v11105_v58  ;;  %6892 = vmatprep.subr.bf16.mxu0 %v11106_v62  ;;  %v11116_v58 = vld [vmem:[#allocation95_spill] sm:$0xff]  ;;  %v11117_v62 = vld [vmem:[#allocation33_spill] sm:$0xff] }
 0x7fc   :  { %6830 = vmatpush1.bf16.msra.mxu1 %v11107_v36  ;;  %6894 = vmatpush1.bf16.msra.mxu0 %v11108_v22  ;;  %v11118_v36 = vld [vmem:[#allocation96_spill] sm:$0xff]  ;;  %v11119_v22 = vld [vmem:[#allocation34_spill] sm:$0xff] }
 0x7fd   :  { %6832 = vmatprep.subr.bf16.mxu1 %v11109_v33  ;;  %6896 = vmatprep.subr.bf16.mxu0 %v11110_v23  ;;  %v11120_v33 = vld [vmem:[#allocation97_spill] sm:$0xff]  ;;  %v11121_v23 = vld [vmem:[#allocation35_spill] sm:$0xff] }
 0x800   :  { %6834 = vmatpush1.bf16.msra.mxu1 %v11111_v5  ;;  %6898 = vmatpush1.bf16.msra.mxu0 %v11112_v42  ;;  %v11122_v5 = vld [vmem:[#allocation98_spill] sm:$0xff]  ;;  %v11123_v42 = vld [vmem:[#allocation36_spill] sm:$0xff] }
 0x801   :  { %6836 = vmatprep.subr.bf16.mxu1 %v11113_v9  ;;  %6900 = vmatprep.subr.bf16.mxu0 %v11114_v30  ;;  %v11124_v9 = vld [vmem:[#allocation99_spill] sm:$0xff]  ;;  %v11125_v30 = vld [vmem:[#allocation37_spill] sm:$0xff] }
 0x804   :  { %6838 = vmatpush1.bf16.msra.mxu1 %v11115_v6  ;;  %6902 = vmatpush1.bf16.msra.mxu0 %v11116_v58  ;;  %v11126_v6 = vld [vmem:[#allocation100_spill] sm:$0xff]  ;;  %v11127_v58 = vld [vmem:[#allocation38_spill] sm:$0xff] }
 0x805   :  { %6840 = vmatprep.subr.bf16.mxu1 %v11117_v62  ;;  %6904 = vmatprep.subr.bf16.mxu0 %v11118_v36  ;;  %v11128_v62 = vld [vmem:[#allocation101_spill] sm:$0xff]  ;;  %v11129_v36 = vld [vmem:[#allocation39_spill] sm:$0xff] }
 0x808   :  { %6842 = vmatpush1.bf16.msra.mxu1 %v11119_v22  ;;  %6906 = vmatpush1.bf16.msra.mxu0 %v11120_v33  ;;  %v11130_v22 = vld [vmem:[#allocation102_spill] sm:$0xff]  ;;  %v11131_v33 = vld [vmem:[#allocation40_spill] sm:$0xff] }
 0x809   :  { %6844 = vmatprep.subr.bf16.mxu1 %v11121_v23  ;;  %6908 = vmatprep.subr.bf16.mxu0 %v11122_v5  ;;  %v11132_v23 = vld [vmem:[#allocation103_spill] sm:$0xff]  ;;  %v11133_v5 = vld [vmem:[#allocation41_spill] sm:$0xff] }
 0x80c   :  { %6846 = vmatpush1.bf16.msra.mxu1 %v11123_v42  ;;  %6910 = vmatpush1.bf16.msra.mxu0 %v11124_v9  ;;  %v11134_v42 = vld [vmem:[#allocation104_spill] sm:$0xff]  ;;  %v11135_v9 = vld [vmem:[#allocation42_spill] sm:$0xff] }
 0x80d   :  { %6848 = vmatprep.subr.bf16.mxu1 %v11125_v30  ;;  %6912 = vmatprep.subr.bf16.mxu0 %v11126_v6  ;;  %v11136_v30 = vld [vmem:[#allocation105_spill] sm:$0xff]  ;;  %v11137_v6 = vld [vmem:[#allocation43_spill] sm:$0xff] }
 0x810   :  { %6850 = vmatpush1.bf16.msra.mxu1 %v11127_v58  ;;  %6914 = vmatpush1.bf16.msra.mxu0 %v11128_v62  ;;  %v11138_v58 = vld [vmem:[#allocation106_spill] sm:$0xff] }
 0x811   :  { %6852 = vmatprep.subr.bf16.mxu1 %v11129_v36  ;;  %6916 = vmatprep.subr.bf16.mxu0 %v11130_v22 }
 0x814   :  { %6854 = vmatpush1.bf16.msra.mxu1 %v11131_v33  ;;  %6918 = vmatpush1.bf16.msra.mxu0 %v11132_v23  ;;  %v3118_v33 = vld [vmem:[#allocation2 + $0x10] sm:$0xc0] }
 0x815   :  { %6856 = vmatprep.subr.bf16.mxu1 %v11133_v5  ;;  %6920 = vmatprep.subr.bf16.mxu0 %v11134_v42 }
 0x818   :  { %6858 = vmatpush1.bf16.msra.mxu1 %v11135_v9  ;;  %6922 = vmatpush1.bf16.msra.mxu0 %v11136_v30 }
 0x819   :  { %6924 = vmatprep.subr.bf16.mxu1 %v11137_v6  ;;  %6988 = vmatprep.subr.bf16.mxu0 %v11138_v58  ;;  %v3486_v58 = vrot.slane %v9712_v14, 6 }
 0x86e   :  { %v3196_v62 = vpop.f32.mrb[24].mxu1  ;;  %v3267_v36 = vpop.f32.mrb[46].mxu0 }
 0x86f   :  { %v3424_v44 = vrot.slane %v3267_v36, 2  ;;  %v3198_v22 = vpop.f32.mrb[25].mxu1  ;;  %v3269_v16 = vpop.f32.mrb[47].mxu0 }
 0x870   :  { %v3425_v61 = vrot.slane %v3269_v16, 2 }
 0x871   :  { %v3440_v23 = vadd.f32 %v3424_v44, %v3118_v33  ;;  %v3422_v33 = vrot.slane %v3196_v62, 2  ;;  %v3120_v62 = vld [vmem:[#allocation2 + $0x20] sm:$0xc0] }
 0x872   :  { %v3441_v5 = vadd.f32 %v3425_v61, %v3119_v51  ;;  %v3423_v51 = vrot.slane %v3198_v22, 2  ;;  %v3116_v61 = vld [vmem:[#allocation2] sm:$0xc0]  ;;  %v3122_v22 = vld [vmem:[#allocation2 + $0x30] sm:$0xc0] }
 0x873   :  { %v5192_v29 = vmul.f32 -1.442695, %v3440_v23  ;;  %v3438_v23 = vadd.f32 %v3422_v33, %v3116_v61 }
 0x874   :  { %v5193_v42 = vmul.f32 -1.442695, %v3441_v5 }
 0x875   :  { %7971 = vpow2.f32 %v5192_v29  ;;  %v3117_v29 = vld [vmem:[#allocation2 + $0x8] sm:$0xc0] }
 0x876   :  { %7973 = vpow2.f32 %v5193_v42  ;;  %v3439_v5 = vadd.f32 %v3423_v51, %v3117_v29  ;;  %v5190_v42 = vmul.f32 -1.442695, %v3438_v23  ;;  %v3121_v23 = vld [vmem:[#allocation2 + $0x28] sm:$0xc0]  ;;  %v3123_v29 = vld [vmem:[#allocation2 + $0x38] sm:$0xc0] }
 0x87f   :  { %v7972_v9 = vpop.eup %7971 }
 0x880   :  { %v3464_v30 = vadd.f32 1.0, %v7972_v9  ;;  %v7974_v18 = vpop.eup %7973  ;;  %v5191_v9 = vmul.f32 -1.442695, %v3439_v5 }
 0x881   :  { %v3465_v6 = vadd.f32 1.0, %v7974_v18 }
 0x882   :  { %7975 = vrcp.f32 %v3464_v30 }
 0x883   :  { %7977 = vrcp.f32 %v3465_v6 }
 0x884   :  { %7979 = vpow2.f32 %v5190_v42 }
 0x885   :  { %7981 = vpow2.f32 %v5191_v9 }
 0x88c   :  { %v7976_v36 = vpop.eup %7975 }
 0x88d   :  { %v3490_v13 = vmul.f32 %v7976_v36, %v3486_v58  ;;  %v7978_v16 = vpop.eup %7977 }
 0x88e   :  { %v3491_v44 = vmul.f32 %v7978_v16, %v3487_v45  ;;  %v7980_v18 = vpop.eup %7979 }
 0x88f   :  { %v7982_v30 = vpop.eup %7981  ;;  %v3452_v6 = vadd.f32 1.0, %v7980_v18 }
 0x890   :  { %v3453_v14 = vadd.f32 1.0, %v7982_v30 }
 0x891   :  { %7983 = vrcp.f32 %v3452_v6 }
 0x892   :  { %7985 = vrcp.f32 %v3453_v14 }
 0x8ae   :  { %v3338_v2 = vpop.f32.mrb[26].mxu1  ;;  %v3409_v25 = vpop.f32.mrb[48].mxu0 }
 0x8af   :  { %v3426_v21 = vrot.slane %v3338_v2, 2  ;;  %v3428_v58 = vrot.slane %v3409_v25, 2  ;;  %v3340_v36 = vpop.f32.mrb[27].mxu1  ;;  %v3411_v45 = vpop.f32.mrb[49].mxu0 }
 0x8b0   :  { %v3427_v16 = vrot.slane %v3340_v36, 2  ;;  %v3429_v33 = vrot.slane %v3411_v45, 2  ;;  %v7984_v2 = vpop.eup %7983 }
 0x8b1   :  { %v3442_v51 = vadd.f32 %v3426_v21, %v3120_v62  ;;  %v3444_v61 = vadd.f32 %v3428_v58, %v3122_v22  ;;  %v7986_v25 = vpop.eup %7985 }
 0x8b2   :  { %v3443_v5 = vadd.f32 %v3427_v16, %v3121_v23  ;;  %v3445_v42 = vadd.f32 %v3429_v33, %v3123_v29 }
 0x8b3   :  { %7987 = vtanh.f32 %v3442_v51  ;;  %v5194_v9 = vmul.f32 -1.442695, %v3444_v61 }
 0x8b4   :  { %7989 = vtanh.f32 %v3443_v5  ;;  %v5195_v18 = vmul.f32 -1.442695, %v3445_v42  ;;  %v11140_v5 = vld [vmem:[#allocation125_spill] sm:$0xff]  ;;  %v11141_v42 = vld [vmem:[#allocation64_spill] sm:$0xff] }
 0x8b5   :  { %7991 = vpow2.f32 %v5194_v9  ;;  %v11142_v9 = vld [vmem:[#allocation126_spill] sm:$0xff] }
 0x8b6   :  { %7993 = vpow2.f32 %v5195_v18  ;;  %v11143_v18 = vld [vmem:[#allocation65_spill] sm:$0xff] }
 0x8bd   :  { %v7988_v30 = vpop.eup %7987 }
 0x8be   :  { %v7990_v7 = vpop.eup %7989  ;;  %v3492_v36 = vmul.f32 %v7988_v30, %v7984_v2  ;;  %v11144_v2 = vld [vmem:[#allocation127_spill] sm:$0xff]  ;;  %v11146_v30 = vld [vmem:[#allocation128_spill] sm:$0xff] }
 0x8bf   :  { %v7992_v45 = vpop.eup %7991  ;;  %v3493_v6 = vmul.f32 %v7990_v7, %v7986_v25  ;;  %v11145_v25 = vld [vmem:[#allocation66_spill] sm:$0xff] }
 0x8c0   :  { %v7994_v21 = vpop.eup %7993  ;;  %v9854_v58 = vadd.f32 %v3492_v36, %v3490_v13  ;;  %v3478_v62 = vadd.f32 1.0, %v7992_v45  ;;  %v11147_v36 = vld [vmem:[#allocation67_spill] sm:$0xff]  ;;  %v11148_v45 = vld [vmem:[#allocation129_spill] sm:$0xff] }
 0x8c1   :  { %v9856_v14 = vadd.f32 %v3493_v6, %v3491_v44  ;;  %v3479_v22 = vadd.f32 1.0, %v7994_v21  ;;  %v11139_v44 = vld [vmem:[#allocation63_spill] sm:$0xff]  ;;  %v11149_v6 = vld [vmem:[#allocation68_spill] sm:$0xff]  ;;  %v11150_v21 = vld [vmem:[#allocation130_spill] sm:$0xff] }
 0x8c2   :  { %7995 = vtanh.f32 %v9854_v58 }
 0x8c3   :  { %7997 = vrcp.f32 %v3478_v62  ;;  %v11151_v62 = vld [vmem:[#allocation69_spill] sm:$0xff] }
 0x8c4   :  { %7999 = vtanh.f32 %v9856_v14 }
 0x8c5   :  { %8001 = vrcp.f32 %v3479_v22  ;;  %v11152_v22 = vld [vmem:[#allocation131_spill] sm:$0xff] }
 0x8cc   :  { %v7996_v16 = vpop.eup %7995 }
 0x8cd   :  { %v7998_v33 = vpop.eup %7997 }
 0x8ce   :  { %v8000_v51 = vpop.eup %7999  ;;  %v3498_v61 = vmul.f32 %v7998_v33, %v7996_v16  ;;  %v11153_v16 = vld [vmem:[#allocation70_spill] sm:$0xff]  ;;  %v11154_v33 = vld [vmem:[#allocation132_spill] sm:$0xff] }
 0x8cf   :  { %v8002_v23 = vpop.eup %8001 }
 0x8d0   :  { %v3499_v29 = vmul.f32 %v8002_v23, %v8000_v51  ;;  %3500 = vst [vmem:[#allocation3] sm:$0xc0] %v3498_v61  ;;  %v9860_v7 = vrot.slane %v3498_v61, 6  ;;  %v11155_v51 = vld [vmem:[#allocation71_spill] sm:$0xff]  ;;  %v11156_v61 = vld [vmem:[#allocation133_spill] sm:$0xff]  ;;  %v11157_v23 = vld [vmem:[#allocation72_spill] sm:$0xff] }
 0x8d2   :  { %3501 = vst [vmem:[#allocation3 + $0x8] sm:$0xc0] %v3499_v29  ;;  %v3513_v13 = vrot.slane %v3499_v29, 6  ;;  %v11158_v29 = vld [vmem:[#allocation134_spill] sm:$0xff] }
 0x8d4   :  { %3580 = vmatprep.mubr.f32.mxu1 %v3513_v13  ;;  %3651 = vmatprep.mubr.f32.mxu0 %v3513_v13 }
 0x8d5   :  { %3581 = vmatmul.mubr.f32.vlgmr.msra.gmra.mrb[28].mxu1 %v9860_v7  ;;  %3652 = vmatmul.mubr.f32.vlgmr.msra.gmra.mrb[50].mxu0 %v9860_v7 }
 0x8d6   :  { %6926 = vmatpush1.bf16.msra.mxu1 %v9041_v20  ;;  %6990 = vmatpush1.bf16.msra.mxu0 %v9274_v19 }
 0x8d7   :  { %3722 = vmatprep.mubr.f32.mxu1 %v3513_v13  ;;  %3793 = vmatprep.mubr.f32.mxu0 %v3513_v13  ;;  %v11159_v13 = vld [vmem:[#allocation73_spill] sm:$0xff] }
 0x8d8   :  { %6928 = vmatprep.subr.bf16.mxu1 %v10878_v57  ;;  %6992 = vmatprep.subr.bf16.mxu0 %v9278_v48 }
 0x8da   :  { %6930 = vmatpush1.bf16.msra.mxu1 %v10879_v4  ;;  %6994 = vmatpush1.bf16.msra.mxu0 %v10880_v1 }
 0x8db   :  { %6932 = vmatprep.subr.bf16.mxu1 %v10881_v26  ;;  %6996 = vmatprep.subr.bf16.mxu0 %v10882_v39 }
 0x8de   :  { %6934 = vmatpush1.bf16.msra.mxu1 %v10883_v40  ;;  %6998 = vmatpush1.bf16.msra.mxu0 %v10884_v10 }
 0x8df   :  { %6936 = vmatprep.subr.bf16.mxu1 %v10963_v24  ;;  %7000 = vmatprep.subr.bf16.mxu0 %v10964_v0 }
 0x8e2   :  { %6938 = vmatpush1.bf16.msra.mxu1 %v10887_v31  ;;  %7002 = vmatpush1.bf16.msra.mxu0 %v10965_v12 }
 0x8e3   :  { %6940 = vmatprep.subr.bf16.mxu1 %v10889_v50  ;;  %7004 = vmatprep.subr.bf16.mxu0 %v10966_v54 }
 0x8e6   :  { %6942 = vmatpush1.bf16.msra.mxu1 %v10891_v17  ;;  %7006 = vmatpush1.bf16.msra.mxu0 %v10967_v59 }
 0x8e7   :  { %6944 = vmatprep.subr.bf16.mxu1 %v10893_v63  ;;  %7008 = vmatprep.subr.bf16.mxu0 %v10968_v60 }
 0x8ea   :  { %6946 = vmatpush1.bf16.msra.mxu1 %v10895_v8  ;;  %7010 = vmatpush1.bf16.msra.mxu0 %v10969_v47 }
 0x8eb   :  { %6948 = vmatprep.subr.bf16.mxu1 %v10897_v52  ;;  %7012 = vmatprep.subr.bf16.mxu0 %v10970_v35 }
 0x8ee   :  { %6950 = vmatpush1.bf16.msra.mxu1 %v10898_v38  ;;  %7014 = vmatpush1.bf16.msra.mxu0 %v10971_v56 }
 0x8ef   :  { %6952 = vmatprep.subr.bf16.mxu1 %v10899_v55  ;;  %7016 = vmatprep.subr.bf16.mxu0 %v10972_v41 }
 0x8f2   :  { %6954 = vmatpush1.bf16.msra.mxu1 %v10900_v28  ;;  %7018 = vmatpush1.bf16.msra.mxu0 %v10973_v46 }
 0x8f3   :  { %6956 = vmatprep.subr.bf16.mxu1 %v10901_v3  ;;  %7020 = vmatprep.subr.bf16.mxu0 %v10974_v32 }
 0x8f6   :  { %6958 = vmatpush1.bf16.msra.mxu1 %v11051_v15  ;;  %7022 = vmatpush1.bf16.msra.mxu0 %v10976_v49 }
 0x8f7   :  { %6960 = vmatprep.subr.bf16.mxu1 %v11052_v43  ;;  %7024 = vmatprep.subr.bf16.mxu0 %v10978_v53 }
 0x8fa   :  { %6962 = vmatpush1.bf16.msra.mxu1 %v11053_v11  ;;  %7026 = vmatpush1.bf16.msra.mxu0 %v10980_v27 }
 0x8fb   :  { %6964 = vmatprep.subr.bf16.mxu1 %v11054_v34  ;;  %7028 = vmatprep.subr.bf16.mxu0 %v10982_v37 }
 0x8fe   :  { %6966 = vmatpush1.bf16.msra.mxu1 %v11139_v44  ;;  %7030 = vmatpush1.bf16.msra.mxu0 %v11140_v5 }
 0x8ff   :  { %6968 = vmatprep.subr.bf16.mxu1 %v11141_v42  ;;  %7032 = vmatprep.subr.bf16.mxu0 %v11142_v9  ;;  %v3502_v9 = vld [vmem:[#allocation2 + $0x40] sm:$0x3]  ;;  %v3508_v42 = vld [vmem:[#allocation2 + $0x70] sm:$0x3] }
 0x902   :  { %6970 = vmatpush1.bf16.msra.mxu1 %v11143_v18  ;;  %7034 = vmatpush1.bf16.msra.mxu0 %v11144_v2 }
 0x903   :  { %6972 = vmatprep.subr.bf16.mxu1 %v11145_v25  ;;  %7036 = vmatprep.subr.bf16.mxu0 %v11146_v30 }
 0x906   :  { %6974 = vmatpush1.bf16.msra.mxu1 %v11147_v36  ;;  %7038 = vmatpush1.bf16.msra.mxu0 %v11148_v45 }
 0x907   :  { %6976 = vmatprep.subr.bf16.mxu1 %v11149_v6  ;;  %7040 = vmatprep.subr.bf16.mxu0 %v11150_v21  ;;  %v11160_v6 = vld [vmem:[#allocation135_spill] sm:$0xff] }
 0x908   :  { %v11161_v21 = vld [vmem:[#allocation11_spill] sm:$0xff] }
 0x90a   :  { %6978 = vmatpush1.bf16.msra.mxu1 %v11151_v62  ;;  %7042 = vmatpush1.bf16.msra.mxu0 %v11152_v22  ;;  %v11162_v62 = vld [vmem:[#allocation74_spill] sm:$0xff] }
 0x90b   :  { %6980 = vmatprep.subr.bf16.mxu1 %v11153_v16  ;;  %7044 = vmatprep.subr.bf16.mxu0 %v11154_v33  ;;  %v11163_v33 = vld [vmem:[#allocation12_spill] sm:$0xff]  ;;  %v11172_v16 = vld [vmem:[#allocation79_spill] sm:$0xff] }
 0x90e   :  { %6982 = vmatpush1.bf16.msra.mxu1 %v11155_v51  ;;  %7046 = vmatpush1.bf16.msra.mxu0 %v11156_v61  ;;  %v11164_v51 = vld [vmem:[#allocation75_spill] sm:$0xff]  ;;  %v11165_v61 = vld [vmem:[#allocation13_spill] sm:$0xff] }
 0x90f   :  { %6984 = vmatprep.subr.bf16.mxu1 %v11157_v23  ;;  %7048 = vmatprep.subr.bf16.mxu0 %v11158_v29  ;;  %v11166_v23 = vld [vmem:[#allocation76_spill] sm:$0xff]  ;;  %v11167_v29 = vld [vmem:[#allocation14_spill] sm:$0xff] }
 0x912   :  { %6986 = vmatpush1.bf16.msra.mxu1 %v11159_v13  ;;  %7050 = vmatpush1.bf16.msra.mxu0 %v11160_v6  ;;  %v11168_v13 = vld [vmem:[#allocation77_spill] sm:$0xff]  ;;  %v11169_v6 = vld [vmem:[#allocation15_spill] sm:$0xff] }
 0x913   :  { %7052 = vmatprep.subr.bf16.mxu1 %v11161_v21  ;;  %7116 = vmatprep.subr.bf16.mxu0 %v11162_v62  ;;  %v11170_v21 = vld [vmem:[#allocation78_spill] sm:$0xff]  ;;  %v11171_v62 = vld [vmem:[#allocation16_spill] sm:$0xff] }
 0x915   :  { %3723 = vmatmul.mubr.f32.vlgmr.msra.gmra.mrb[30].mxu1 %v9860_v7  ;;  %3794 = vmatmul.mubr.f32.vlgmr.msra.gmra.mrb[52].mxu0 %v9860_v7  ;;  %v11173_v7 = vld [vmem:[#allocation17_spill] sm:$0xff] }
 0x916   :  { %7054 = vmatpush1.bf16.msra.mxu1 %v11163_v33  ;;  %7118 = vmatpush1.bf16.msra.mxu0 %v11164_v51  ;;  %v11174_v33 = vld [vmem:[#allocation80_spill] sm:$0xff]  ;;  %v11175_v51 = vld [vmem:[#allocation18_spill] sm:$0xff] }
 0x917   :  { %7056 = vmatprep.subr.bf16.mxu1 %v11165_v61  ;;  %7120 = vmatprep.subr.bf16.mxu0 %v11166_v23  ;;  %v11176_v61 = vld [vmem:[#allocation81_spill] sm:$0xff]  ;;  %v11177_v23 = vld [vmem:[#allocation19_spill] sm:$0xff] }
 0x91a   :  { %7058 = vmatpush1.bf16.msra.mxu1 %v11167_v29  ;;  %7122 = vmatpush1.bf16.msra.mxu0 %v11168_v13  ;;  %v11178_v29 = vld [vmem:[#allocation82_spill] sm:$0xff]  ;;  %v11179_v13 = vld [vmem:[#allocation20_spill] sm:$0xff] }
 0x91b   :  { %7060 = vmatprep.subr.bf16.mxu1 %v11169_v6  ;;  %7124 = vmatprep.subr.bf16.mxu0 %v11170_v21  ;;  %v11180_v6 = vld [vmem:[#allocation83_spill] sm:$0xff]  ;;  %v11181_v21 = vld [vmem:[#allocation21_spill] sm:$0xff] }
 0x91e   :  { %7062 = vmatpush1.bf16.msra.mxu1 %v11171_v62  ;;  %7126 = vmatpush1.bf16.msra.mxu0 %v11172_v16  ;;  %v11182_v62 = vld [vmem:[#allocation84_spill] sm:$0xff]  ;;  %v11183_v16 = vld [vmem:[#allocation22_spill] sm:$0xff] }
 0x91f   :  { %7064 = vmatprep.subr.bf16.mxu1 %v11173_v7  ;;  %7128 = vmatprep.subr.bf16.mxu0 %v11174_v33  ;;  %v11184_v7 = vld [vmem:[#allocation85_spill] sm:$0xff]  ;;  %v11185_v33 = vld [vmem:[#allocation23_spill] sm:$0xff] }
 0x922   :  { %7066 = vmatpush1.bf16.msra.mxu1 %v11175_v51  ;;  %7130 = vmatpush1.bf16.msra.mxu0 %v11176_v61  ;;  %v11186_v51 = vld [vmem:[#allocation86_spill] sm:$0xff]  ;;  %v11187_v61 = vld [vmem:[#allocation24_spill] sm:$0xff] }
 0x923   :  { %7068 = vmatprep.subr.bf16.mxu1 %v11177_v23  ;;  %7132 = vmatprep.subr.bf16.mxu0 %v11178_v29  ;;  %v11188_v23 = vld [vmem:[#allocation87_spill] sm:$0xff]  ;;  %v11189_v29 = vld [vmem:[#allocation25_spill] sm:$0xff] }
 0x926   :  { %7070 = vmatpush1.bf16.msra.mxu1 %v11179_v13  ;;  %7134 = vmatpush1.bf16.msra.mxu0 %v11180_v6  ;;  %v11190_v13 = vld [vmem:[#allocation88_spill] sm:$0xff]  ;;  %v11191_v6 = vld [vmem:[#allocation26_spill] sm:$0xff] }
 0x927   :  { %7072 = vmatprep.subr.bf16.mxu1 %v11181_v21  ;;  %7136 = vmatprep.subr.bf16.mxu0 %v11182_v62  ;;  %v11192_v21 = vld [vmem:[#allocation89_spill] sm:$0xff]  ;;  %v11193_v62 = vld [vmem:[#allocation27_spill] sm:$0xff] }
 0x92a   :  { %7074 = vmatpush1.bf16.msra.mxu1 %v11183_v16  ;;  %7138 = vmatpush1.bf16.msra.mxu0 %v11184_v7  ;;  %v11194_v16 = vld [vmem:[#allocation90_spill] sm:$0xff]  ;;  %v11195_v7 = vld [vmem:[#allocation28_spill] sm:$0xff] }
 0x92b   :  { %7076 = vmatprep.subr.bf16.mxu1 %v11185_v33  ;;  %7140 = vmatprep.subr.bf16.mxu0 %v11186_v51  ;;  %v11196_v33 = vld [vmem:[#allocation91_spill] sm:$0xff]  ;;  %v11197_v51 = vld [vmem:[#allocation29_spill] sm:$0xff] }
 0x92e   :  { %7078 = vmatpush1.bf16.msra.mxu1 %v11187_v61  ;;  %7142 = vmatpush1.bf16.msra.mxu0 %v11188_v23  ;;  %v11198_v61 = vld [vmem:[#allocation92_spill] sm:$0xff]  ;;  %v11199_v23 = vld [vmem:[#allocation30_spill] sm:$0xff] }
 0x92f   :  { %7080 = vmatprep.subr.bf16.mxu1 %v11189_v29  ;;  %7144 = vmatprep.subr.bf16.mxu0 %v11190_v13  ;;  %v11200_v29 = vld [vmem:[#allocation93_spill] sm:$0xff]  ;;  %v11201_v13 = vld [vmem:[#allocation31_spill] sm:$0xff] }
 0x932   :  { %7082 = vmatpush1.bf16.msra.mxu1 %v11191_v6  ;;  %7146 = vmatpush1.bf16.msra.mxu0 %v11192_v21  ;;  %v11202_v6 = vld [vmem:[#allocation94_spill] sm:$0xff]  ;;  %v11203_v21 = vld [vmem:[#allocation32_spill] sm:$0xff] }
 0x933   :  { %7084 = vmatprep.subr.bf16.mxu1 %v11193_v62  ;;  %7148 = vmatprep.subr.bf16.mxu0 %v11194_v16  ;;  %v11204_v62 = vld [vmem:[#allocation95_spill] sm:$0xff]  ;;  %v11205_v16 = vld [vmem:[#allocation33_spill] sm:$0xff] }
 0x936   :  { %7086 = vmatpush1.bf16.msra.mxu1 %v11195_v7  ;;  %7150 = vmatpush1.bf16.msra.mxu0 %v11196_v33  ;;  %v11206_v7 = vld [vmem:[#allocation96_spill] sm:$0xff]  ;;  %v11207_v33 = vld [vmem:[#allocation34_spill] sm:$0xff] }
 0x937   :  { %7088 = vmatprep.subr.bf16.mxu1 %v11197_v51  ;;  %7152 = vmatprep.subr.bf16.mxu0 %v11198_v61  ;;  %v11208_v51 = vld [vmem:[#allocation97_spill] sm:$0xff]  ;;  %v11209_v61 = vld [vmem:[#allocation35_spill] sm:$0xff] }
 0x93a   :  { %7090 = vmatpush1.bf16.msra.mxu1 %v11199_v23  ;;  %7154 = vmatpush1.bf16.msra.mxu0 %v11200_v29  ;;  %v11210_v23 = vld [vmem:[#allocation98_spill] sm:$0xff]  ;;  %v11211_v29 = vld [vmem:[#allocation36_spill] sm:$0xff] }
 0x93b   :  { %7092 = vmatprep.subr.bf16.mxu1 %v11201_v13  ;;  %7156 = vmatprep.subr.bf16.mxu0 %v11202_v6  ;;  %v11212_v13 = vld [vmem:[#allocation99_spill] sm:$0xff]  ;;  %v11213_v6 = vld [vmem:[#allocation37_spill] sm:$0xff] }
 0x93e   :  { %7094 = vmatpush1.bf16.msra.mxu1 %v11203_v21  ;;  %7158 = vmatpush1.bf16.msra.mxu0 %v11204_v62  ;;  %v11214_v21 = vld [vmem:[#allocation100_spill] sm:$0xff]  ;;  %v11215_v62 = vld [vmem:[#allocation38_spill] sm:$0xff] }
 0x93f   :  { %7096 = vmatprep.subr.bf16.mxu1 %v11205_v16  ;;  %7160 = vmatprep.subr.bf16.mxu0 %v11206_v7  ;;  %v11216_v16 = vld [vmem:[#allocation101_spill] sm:$0xff]  ;;  %v11217_v7 = vld [vmem:[#allocation39_spill] sm:$0xff] }
 0x942   :  { %7098 = vmatpush1.bf16.msra.mxu1 %v11207_v33  ;;  %7162 = vmatpush1.bf16.msra.mxu0 %v11208_v51  ;;  %v11218_v33 = vld [vmem:[#allocation102_spill] sm:$0xff]  ;;  %v11219_v51 = vld [vmem:[#allocation40_spill] sm:$0xff] }
 0x943   :  { %7100 = vmatprep.subr.bf16.mxu1 %v11209_v61  ;;  %7164 = vmatprep.subr.bf16.mxu0 %v11210_v23  ;;  %v11220_v61 = vld [vmem:[#allocation103_spill] sm:$0xff]  ;;  %v11221_v23 = vld [vmem:[#allocation41_spill] sm:$0xff] }
 0x946   :  { %7102 = vmatpush1.bf16.msra.mxu1 %v11211_v29  ;;  %7166 = vmatpush1.bf16.msra.mxu0 %v11212_v13  ;;  %v11222_v29 = vld [vmem:[#allocation104_spill] sm:$0xff]  ;;  %v11223_v13 = vld [vmem:[#allocation42_spill] sm:$0xff] }
 0x947   :  { %7104 = vmatprep.subr.bf16.mxu1 %v11213_v6  ;;  %7168 = vmatprep.subr.bf16.mxu0 %v11214_v21  ;;  %v11224_v6 = vld [vmem:[#allocation105_spill] sm:$0xff]  ;;  %v11225_v21 = vld [vmem:[#allocation43_spill] sm:$0xff] }
 0x94a   :  { %7106 = vmatpush1.bf16.msra.mxu1 %v11215_v62  ;;  %7170 = vmatpush1.bf16.msra.mxu0 %v11216_v16  ;;  %v11226_v62 = vld [vmem:[#allocation106_spill] sm:$0xff] }
 0x94b   :  { %7108 = vmatprep.subr.bf16.mxu1 %v11217_v7  ;;  %7172 = vmatprep.subr.bf16.mxu0 %v11218_v33  ;;  %v3504_v7 = vld [vmem:[#allocation2 + $0x50] sm:$0x3] }
 0x94e   :  { %7110 = vmatpush1.bf16.msra.mxu1 %v11219_v51  ;;  %7174 = vmatpush1.bf16.msra.mxu0 %v11220_v61  ;;  %v3505_v51 = vld [vmem:[#allocation2 + $0x58] sm:$0x3] }
 0x94f   :  { %7112 = vmatprep.subr.bf16.mxu1 %v11221_v23  ;;  %7176 = vmatprep.subr.bf16.mxu0 %v11222_v29 }
 0x952   :  { %7114 = vmatpush1.bf16.msra.mxu1 %v11223_v13  ;;  %7178 = vmatpush1.bf16.msra.mxu0 %v11224_v6 }
 0x953   :  { %7180 = vmatprep.subr.bf16.mxu1 %v11225_v21  ;;  %7244 = vmatprep.subr.bf16.mxu0 %v11226_v62  ;;  %v3848_v62 = vrot.slane %v9854_v58, 6 }
 0x9a8   :  { %v3582_v16 = vpop.f32.mrb[28].mxu1  ;;  %v3653_v22 = vpop.f32.mrb[50].mxu0 }
 0x9a9   :  { %v3802_v33 = vadd.f32 %v3653_v22, %v3504_v7  ;;  %v3584_v45 = vpop.f32.mrb[29].mxu1  ;;  %v3655_v36 = vpop.f32.mrb[51].mxu0  ;;  %v3849_v22 = vrot.slane %v9856_v14, 6 }
 0x9aa   :  { %v3803_v61 = vadd.f32 %v3655_v36, %v3505_v51  ;;  %v3800_v36 = vadd.f32 %v3582_v16, %v3502_v9  ;;  %v3509_v9 = vld [vmem:[#allocation2 + $0x78] sm:$0x3] }
 0x9ab   :  { %v5198_v30 = vmul.f32 -1.442695, %v3802_v33  ;;  %v3503_v33 = vld [vmem:[#allocation2 + $0x48] sm:$0x3] }
 0x9ac   :  { %v5199_v23 = vmul.f32 -1.442695, %v3803_v61  ;;  %v3801_v51 = vadd.f32 %v3584_v45, %v3503_v33 }
 0x9ad   :  { %8003 = vpow2.f32 %v5198_v30  ;;  %v5196_v30 = vmul.f32 -1.442695, %v3800_v36 }
 0x9ae   :  { %8005 = vpow2.f32 %v5199_v23  ;;  %v5197_v61 = vmul.f32 -1.442695, %v3801_v51 }
 0x9b7   :  { %v8004_v29 = vpop.eup %8003 }
 0x9b8   :  { %v3826_v13 = vadd.f32 1.0, %v8004_v29  ;;  %v8006_v25 = vpop.eup %8005 }
 0x9b9   :  { %v3827_v6 = vadd.f32 1.0, %v8006_v25 }
 0x9ba   :  { %8007 = vrcp.f32 %v3826_v13  ;;  %v3506_v13 = vld [vmem:[#allocation2 + $0x60] sm:$0x3] }
 0x9bb   :  { %8009 = vrcp.f32 %v3827_v6 }
 0x9bc   :  { %8011 = vpow2.f32 %v5196_v30 }
 0x9bd   :  { %8013 = vpow2.f32 %v5197_v61 }
 0x9c4   :  { %v8008_v21 = vpop.eup %8007 }
 0x9c5   :  { %v3852_v2 = vmul.f32 %v8008_v21, %v3848_v62  ;;  %v8010_v7 = vpop.eup %8009 }
 0x9c6   :  { %v3853_v18 = vmul.f32 %v8010_v7, %v3849_v22  ;;  %v8012_v23 = vpop.eup %8011  ;;  %v3507_v22 = vld [vmem:[#allocation2 + $0x68] sm:$0x3] }
 0x9c7   :  { %v8014_v29 = vpop.eup %8013  ;;  %v3814_v25 = vadd.f32 1.0, %v8012_v23 }
 0x9c8   :  { %v3815_v6 = vadd.f32 1.0, %v8014_v29 }
 0x9c9   :  { %8015 = vrcp.f32 %v3814_v25 }
 0x9ca   :  { %8017 = vrcp.f32 %v3815_v6 }
 0x9d3   :  { %v8016_v30 = vpop.eup %8015 }
 0x9d4   :  { %v8018_v61 = vpop.eup %8017 }
 0x9e8   :  { %v3724_v58 = vpop.f32.mrb[30].mxu1  ;;  %v3795_v21 = vpop.f32.mrb[52].mxu0 }
 0x9e9   :  { %v3804_v14 = vadd.f32 %v3724_v58, %v3506_v13  ;;  %v3806_v62 = vadd.f32 %v3795_v21, %v3508_v42  ;;  %v3726_v7 = vpop.f32.mrb[31].mxu1  ;;  %v3797_v16 = vpop.f32.mrb[53].mxu0 }
 0x9ea   :  { %v3805_v45 = vadd.f32 %v3726_v7, %v3507_v22  ;;  %v3807_v36 = vadd.f32 %v3797_v16, %v3509_v9 }
 0x9eb   :  { %8019 = vtanh.f32 %v3804_v14  ;;  %v5200_v33 = vmul.f32 -1.442695, %v3806_v62 }
 0x9ec   :  { %8021 = vtanh.f32 %v3805_v45  ;;  %v5201_v51 = vmul.f32 -1.442695, %v3807_v36  ;;  %v11230_v36 = vld [vmem:[#allocation65_spill] sm:$0xff] }
 0x9ed   :  { %8023 = vpow2.f32 %v5200_v33  ;;  %v11231_v33 = vld [vmem:[#allocation127_spill] sm:$0xff] }
 0x9ee   :  { %8025 = vpow2.f32 %v5201_v51  ;;  %v11232_v51 = vld [vmem:[#allocation66_spill] sm:$0xff] }
 0x9f5   :  { %v8020_v23 = vpop.eup %8019 }
 0x9f6   :  { %v8022_v29 = vpop.eup %8021  ;;  %v3854_v25 = vmul.f32 %v8020_v23, %v8016_v30  ;;  %v11233_v30 = vld [vmem:[#allocation128_spill] sm:$0xff]  ;;  %v11235_v23 = vld [vmem:[#allocation129_spill] sm:$0xff] }
 0x9f7   :  { %v8024_v13 = vpop.eup %8023  ;;  %v3855_v42 = vmul.f32 %v8022_v29, %v8018_v61  ;;  %v11234_v61 = vld [vmem:[#allocation67_spill] sm:$0xff]  ;;  %v11236_v29 = vld [vmem:[#allocation68_spill] sm:$0xff] }
 0x9f8   :  { %v8026_v58 = vpop.eup %8025  ;;  %v9996_v21 = vadd.f32 %v3854_v25, %v3852_v2  ;;  %v3840_v5 = vadd.f32 1.0, %v8024_v13  ;;  %v11229_v2 = vld [vmem:[#allocation126_spill] sm:$0xff]  ;;  %v11238_v13 = vld [vmem:[#allocation69_spill] sm:$0xff] }
 0x9f9   :  { %v9998_v6 = vadd.f32 %v3855_v42, %v3853_v18  ;;  %v3841_v22 = vadd.f32 1.0, %v8026_v58  ;;  %v11228_v18 = vld [vmem:[#allocation64_spill] sm:$0xff]  ;;  %v11237_v25 = vld [vmem:[#allocation130_spill] sm:$0xff]  ;;  %v11239_v42 = vld [vmem:[#allocation131_spill] sm:$0xff] }
 0x9fa   :  { %8027 = vtanh.f32 %v9996_v21  ;;  %v11240_v58 = vld [vmem:[#allocation70_spill] sm:$0xff] }
 0x9fb   :  { %8029 = vrcp.f32 %v3840_v5  ;;  %v11227_v5 = vld [vmem:[#allocation125_spill] sm:$0xff] }
 0x9fc   :  { %8031 = vtanh.f32 %v9998_v6 }
 0x9fd   :  { %8033 = vrcp.f32 %v3841_v22  ;;  %v11241_v22 = vld [vmem:[#allocation132_spill] sm:$0xff] }
 0xa04   :  { %v8028_v14 = vpop.eup %8027 }
 0xa05   :  { %v8030_v62 = vpop.eup %8029 }
 0xa06   :  { %v8032_v7 = vpop.eup %8031  ;;  %v10002_v9 = vmul.f32 %v8030_v62, %v8028_v14  ;;  %v11242_v14 = vld [vmem:[#allocation71_spill] sm:$0xff]  ;;  %v11243_v62 = vld [vmem:[#allocation133_spill] sm:$0xff] }
 0xa07   :  { %v8034_v16 = vpop.eup %8033 }
 0xa08   :  { %v3861_v45 = vmul.f32 %v8034_v16, %v8032_v7  ;;  %3862 = vst [vmem:[#allocation3 + $0x10] sm:$0x3] %v10002_v9  ;;  %v11244_v7 = vld [vmem:[#allocation72_spill] sm:$0xff]  ;;  %v11245_v16 = vld [vmem:[#allocation134_spill] sm:$0xff] }
 0xa0a   :  { %3863 = vst [vmem:[#allocation3 + $0x18] sm:$0x3] %v3861_v45  ;;  %3936 = vmatprep.mubr.f32.mxu1 %v3861_v45  ;;  %4007 = vmatprep.mubr.f32.mxu0 %v3861_v45 }
 0xa0b   :  { %3937 = vmatmul.mubr.f32.vlgmr.msra.gmra.mrb[32].mxu1 %v10002_v9  ;;  %4008 = vmatmul.mubr.f32.vlgmr.msra.gmra.mrb[54].mxu0 %v10002_v9 }
 0xa0c   :  { %7182 = vmatpush1.bf16.msra.mxu1 %v9041_v20  ;;  %7246 = vmatpush1.bf16.msra.mxu0 %v9274_v19 }
 0xa0d   :  { %4078 = vmatprep.mubr.f32.mxu1 %v3861_v45  ;;  %4149 = vmatprep.mubr.f32.mxu0 %v3861_v45  ;;  %v11246_v45 = vld [vmem:[#allocation73_spill] sm:$0xff] }
 0xa0e   :  { %7184 = vmatprep.subr.bf16.mxu1 %v10878_v57  ;;  %7248 = vmatprep.subr.bf16.mxu0 %v9278_v48 }
 0xa10   :  { %7186 = vmatpush1.bf16.msra.mxu1 %v10879_v4  ;;  %7250 = vmatpush1.bf16.msra.mxu0 %v10880_v1 }
 0xa11   :  { %7188 = vmatprep.subr.bf16.mxu1 %v10881_v26  ;;  %7252 = vmatprep.subr.bf16.mxu0 %v10882_v39 }
 0xa14   :  { %7190 = vmatpush1.bf16.msra.mxu1 %v10883_v40  ;;  %7254 = vmatpush1.bf16.msra.mxu0 %v10884_v10 }
 0xa15   :  { %7192 = vmatprep.subr.bf16.mxu1 %v10963_v24  ;;  %7256 = vmatprep.subr.bf16.mxu0 %v10964_v0 }
 0xa18   :  { %7194 = vmatpush1.bf16.msra.mxu1 %v10887_v31  ;;  %7258 = vmatpush1.bf16.msra.mxu0 %v10965_v12 }
 0xa19   :  { %7196 = vmatprep.subr.bf16.mxu1 %v10889_v50  ;;  %7260 = vmatprep.subr.bf16.mxu0 %v10966_v54 }
 0xa1c   :  { %7198 = vmatpush1.bf16.msra.mxu1 %v10891_v17  ;;  %7262 = vmatpush1.bf16.msra.mxu0 %v10967_v59 }
 0xa1d   :  { %7200 = vmatprep.subr.bf16.mxu1 %v10893_v63  ;;  %7264 = vmatprep.subr.bf16.mxu0 %v10968_v60 }
 0xa20   :  { %7202 = vmatpush1.bf16.msra.mxu1 %v10895_v8  ;;  %7266 = vmatpush1.bf16.msra.mxu0 %v10969_v47 }
 0xa21   :  { %7204 = vmatprep.subr.bf16.mxu1 %v10897_v52  ;;  %7268 = vmatprep.subr.bf16.mxu0 %v10970_v35 }
 0xa24   :  { %7206 = vmatpush1.bf16.msra.mxu1 %v10898_v38  ;;  %7270 = vmatpush1.bf16.msra.mxu0 %v10971_v56 }
 0xa25   :  { %7208 = vmatprep.subr.bf16.mxu1 %v10899_v55  ;;  %7272 = vmatprep.subr.bf16.mxu0 %v10972_v41 }
 0xa28   :  { %7210 = vmatpush1.bf16.msra.mxu1 %v10900_v28  ;;  %7274 = vmatpush1.bf16.msra.mxu0 %v10973_v46 }
 0xa29   :  { %7212 = vmatprep.subr.bf16.mxu1 %v10901_v3  ;;  %7276 = vmatprep.subr.bf16.mxu0 %v10974_v32 }
 0xa2c   :  { %7214 = vmatpush1.bf16.msra.mxu1 %v11051_v15  ;;  %7278 = vmatpush1.bf16.msra.mxu0 %v10976_v49 }
 0xa2d   :  { %7216 = vmatprep.subr.bf16.mxu1 %v11052_v43  ;;  %7280 = vmatprep.subr.bf16.mxu0 %v10978_v53 }
 0xa30   :  { %7218 = vmatpush1.bf16.msra.mxu1 %v11053_v11  ;;  %7282 = vmatpush1.bf16.msra.mxu0 %v10980_v27 }
 0xa31   :  { %7220 = vmatprep.subr.bf16.mxu1 %v11054_v34  ;;  %7284 = vmatprep.subr.bf16.mxu0 %v10982_v37 }
 0xa34   :  { %7222 = vmatpush1.bf16.msra.mxu1 %v11139_v44  ;;  %7286 = vmatpush1.bf16.msra.mxu0 %v11227_v5 }
 0xa35   :  { %7224 = vmatprep.subr.bf16.mxu1 %v11228_v18  ;;  %7288 = vmatprep.subr.bf16.mxu0 %v11229_v2 }
 0xa38   :  { %7226 = vmatpush1.bf16.msra.mxu1 %v11230_v36  ;;  %7290 = vmatpush1.bf16.msra.mxu0 %v11231_v33  ;;  %v4229_v36 = vrot.slane %v9998_v6, 6 }
 0xa39   :  { %7228 = vmatprep.subr.bf16.mxu1 %v11232_v51  ;;  %7292 = vmatprep.subr.bf16.mxu0 %v11233_v30  ;;  %v3867_v30 = vld [vmem:[#allocation2 + $0x58] sm:$0xc] }
 0xa3c   :  { %7230 = vmatpush1.bf16.msra.mxu1 %v11234_v61  ;;  %7294 = vmatpush1.bf16.msra.mxu0 %v11235_v23 }
 0xa3d   :  { %7232 = vmatprep.subr.bf16.mxu1 %v11236_v29  ;;  %7296 = vmatprep.subr.bf16.mxu0 %v11237_v25  ;;  %v11247_v29 = vld [vmem:[#allocation135_spill] sm:$0xff] }
 0xa3e   :  { %v11248_v25 = vld [vmem:[#allocation11_spill] sm:$0xff] }
 0xa40   :  { %7234 = vmatpush1.bf16.msra.mxu1 %v11238_v13  ;;  %7298 = vmatpush1.bf16.msra.mxu0 %v11239_v42  ;;  %v11249_v13 = vld [vmem:[#allocation74_spill] sm:$0xff] }
 0xa41   :  { %7236 = vmatprep.subr.bf16.mxu1 %v11240_v58  ;;  %7300 = vmatprep.subr.bf16.mxu0 %v11241_v22  ;;  %v11250_v22 = vld [vmem:[#allocation12_spill] sm:$0xff]  ;;  %v11259_v58 = vld [vmem:[#allocation79_spill] sm:$0xff] }
 0xa44   :  { %7238 = vmatpush1.bf16.msra.mxu1 %v11242_v14  ;;  %7302 = vmatpush1.bf16.msra.mxu0 %v11243_v62  ;;  %v11251_v14 = vld [vmem:[#allocation75_spill] sm:$0xff]  ;;  %v11252_v62 = vld [vmem:[#allocation13_spill] sm:$0xff] }
 0xa45   :  { %7240 = vmatprep.subr.bf16.mxu1 %v11244_v7  ;;  %7304 = vmatprep.subr.bf16.mxu0 %v11245_v16  ;;  %v11253_v7 = vld [vmem:[#allocation76_spill] sm:$0xff]  ;;  %v11254_v16 = vld [vmem:[#allocation14_spill] sm:$0xff] }
 0xa48   :  { %7242 = vmatpush1.bf16.msra.mxu1 %v11246_v45  ;;  %7306 = vmatpush1.bf16.msra.mxu0 %v11247_v29  ;;  %v11255_v45 = vld [vmem:[#allocation77_spill] sm:$0xff]  ;;  %v11256_v29 = vld [vmem:[#allocation15_spill] sm:$0xff] }
 0xa49   :  { %7308 = vmatprep.subr.bf16.mxu1 %v11248_v25  ;;  %7372 = vmatprep.subr.bf16.mxu0 %v11249_v13  ;;  %v11257_v25 = vld [vmem:[#allocation78_spill] sm:$0xff]  ;;  %v11258_v13 = vld [vmem:[#allocation16_spill] sm:$0xff] }
 0xa4b   :  { %4079 = vmatmul.mubr.f32.vlgmr.msra.gmra.mrb[34].mxu1 %v10002_v9  ;;  %4150 = vmatmul.mubr.f32.vlgmr.msra.gmra.mrb[56].mxu0 %v10002_v9  ;;  %v11260_v9 = vld [vmem:[#allocation17_spill] sm:$0xff] }
 0xa4c   :  { %7310 = vmatpush1.bf16.msra.mxu1 %v11250_v22  ;;  %7374 = vmatpush1.bf16.msra.mxu0 %v11251_v14  ;;  %v11261_v22 = vld [vmem:[#allocation80_spill] sm:$0xff]  ;;  %v11262_v14 = vld [vmem:[#allocation18_spill] sm:$0xff] }
 0xa4d   :  { %7312 = vmatprep.subr.bf16.mxu1 %v11252_v62  ;;  %7376 = vmatprep.subr.bf16.mxu0 %v11253_v7  ;;  %v11263_v62 = vld [vmem:[#allocation81_spill] sm:$0xff]  ;;  %v11264_v7 = vld [vmem:[#allocation19_spill] sm:$0xff] }
 0xa50   :  { %7314 = vmatpush1.bf16.msra.mxu1 %v11254_v16  ;;  %7378 = vmatpush1.bf16.msra.mxu0 %v11255_v45  ;;  %v11265_v16 = vld [vmem:[#allocation82_spill] sm:$0xff]  ;;  %v11266_v45 = vld [vmem:[#allocation20_spill] sm:$0xff] }
 0xa51   :  { %7316 = vmatprep.subr.bf16.mxu1 %v11256_v29  ;;  %7380 = vmatprep.subr.bf16.mxu0 %v11257_v25  ;;  %v11267_v29 = vld [vmem:[#allocation83_spill] sm:$0xff]  ;;  %v11268_v25 = vld [vmem:[#allocation21_spill] sm:$0xff] }
 0xa54   :  { %7318 = vmatpush1.bf16.msra.mxu1 %v11258_v13  ;;  %7382 = vmatpush1.bf16.msra.mxu0 %v11259_v58  ;;  %v11269_v13 = vld [vmem:[#allocation84_spill] sm:$0xff]  ;;  %v11270_v58 = vld [vmem:[#allocation22_spill] sm:$0xff] }
 0xa55   :  { %7320 = vmatprep.subr.bf16.mxu1 %v11260_v9  ;;  %7384 = vmatprep.subr.bf16.mxu0 %v11261_v22  ;;  %v11271_v9 = vld [vmem:[#allocation85_spill] sm:$0xff]  ;;  %v11272_v22 = vld [vmem:[#allocation23_spill] sm:$0xff] }
 0xa58   :  { %7322 = vmatpush1.bf16.msra.mxu1 %v11262_v14  ;;  %7386 = vmatpush1.bf16.msra.mxu0 %v11263_v62  ;;  %v11273_v14 = vld [vmem:[#allocation86_spill] sm:$0xff]  ;;  %v11274_v62 = vld [vmem:[#allocation24_spill] sm:$0xff] }
 0xa59   :  { %7324 = vmatprep.subr.bf16.mxu1 %v11264_v7  ;;  %7388 = vmatprep.subr.bf16.mxu0 %v11265_v16  ;;  %v11275_v7 = vld [vmem:[#allocation87_spill] sm:$0xff]  ;;  %v11276_v16 = vld [vmem:[#allocation25_spill] sm:$0xff] }
 0xa5c   :  { %7326 = vmatpush1.bf16.msra.mxu1 %v11266_v45  ;;  %7390 = vmatpush1.bf16.msra.mxu0 %v11267_v29  ;;  %v11277_v45 = vld [vmem:[#allocation88_spill] sm:$0xff]  ;;  %v11278_v29 = vld [vmem:[#allocation26_spill] sm:$0xff] }
 0xa5d   :  { %7328 = vmatprep.subr.bf16.mxu1 %v11268_v25  ;;  %7392 = vmatprep.subr.bf16.mxu0 %v11269_v13  ;;  %v11279_v25 = vld [vmem:[#allocation89_spill] sm:$0xff]  ;;  %v11280_v13 = vld [vmem:[#allocation27_spill] sm:$0xff] }
 0xa60   :  { %7330 = vmatpush1.bf16.msra.mxu1 %v11270_v58  ;;  %7394 = vmatpush1.bf16.msra.mxu0 %v11271_v9  ;;  %v11281_v58 = vld [vmem:[#allocation90_spill] sm:$0xff]  ;;  %v11282_v9 = vld [vmem:[#allocation28_spill] sm:$0xff] }
 0xa61   :  { %7332 = vmatprep.subr.bf16.mxu1 %v11272_v22  ;;  %7396 = vmatprep.subr.bf16.mxu0 %v11273_v14  ;;  %v11283_v22 = vld [vmem:[#allocation91_spill] sm:$0xff]  ;;  %v11284_v14 = vld [vmem:[#allocation29_spill] sm:$0xff] }
 0xa64   :  { %7334 = vmatpush1.bf16.msra.mxu1 %v11274_v62  ;;  %7398 = vmatpush1.bf16.msra.mxu0 %v11275_v7  ;;  %v11285_v62 = vld [vmem:[#allocation92_spill] sm:$0xff]  ;;  %v11286_v7 = vld [vmem:[#allocation30_spill] sm:$0xff] }
 0xa65   :  { %7336 = vmatprep.subr.bf16.mxu1 %v11276_v16  ;;  %7400 = vmatprep.subr.bf16.mxu0 %v11277_v45  ;;  %v11287_v16 = vld [vmem:[#allocation93_spill] sm:$0xff]  ;;  %v11288_v45 = vld [vmem:[#allocation31_spill] sm:$0xff] }
 0xa68   :  { %7338 = vmatpush1.bf16.msra.mxu1 %v11278_v29  ;;  %7402 = vmatpush1.bf16.msra.mxu0 %v11279_v25  ;;  %v11289_v29 = vld [vmem:[#allocation94_spill] sm:$0xff]  ;;  %v11290_v25 = vld [vmem:[#allocation32_spill] sm:$0xff] }
 0xa69   :  { %7340 = vmatprep.subr.bf16.mxu1 %v11280_v13  ;;  %7404 = vmatprep.subr.bf16.mxu0 %v11281_v58  ;;  %v11291_v13 = vld [vmem:[#allocation95_spill] sm:$0xff]  ;;  %v11292_v58 = vld [vmem:[#allocation33_spill] sm:$0xff] }
 0xa6c   :  { %7342 = vmatpush1.bf16.msra.mxu1 %v11282_v9  ;;  %7406 = vmatpush1.bf16.msra.mxu0 %v11283_v22  ;;  %v11293_v9 = vld [vmem:[#allocation96_spill] sm:$0xff]  ;;  %v11294_v22 = vld [vmem:[#allocation34_spill] sm:$0xff] }
 0xa6d   :  { %7344 = vmatprep.subr.bf16.mxu1 %v11284_v14  ;;  %7408 = vmatprep.subr.bf16.mxu0 %v11285_v62  ;;  %v11295_v14 = vld [vmem:[#allocation97_spill] sm:$0xff]  ;;  %v11296_v62 = vld [vmem:[#allocation35_spill] sm:$0xff] }
 0xa70   :  { %7346 = vmatpush1.bf16.msra.mxu1 %v11286_v7  ;;  %7410 = vmatpush1.bf16.msra.mxu0 %v11287_v16  ;;  %v11297_v7 = vld [vmem:[#allocation98_spill] sm:$0xff]  ;;  %v11298_v16 = vld [vmem:[#allocation36_spill] sm:$0xff] }
 0xa71   :  { %7348 = vmatprep.subr.bf16.mxu1 %v11288_v45  ;;  %7412 = vmatprep.subr.bf16.mxu0 %v11289_v29  ;;  %v11299_v45 = vld [vmem:[#allocation99_spill] sm:$0xff]  ;;  %v11300_v29 = vld [vmem:[#allocation37_spill] sm:$0xff] }
 0xa74   :  { %7350 = vmatpush1.bf16.msra.mxu1 %v11290_v25  ;;  %7414 = vmatpush1.bf16.msra.mxu0 %v11291_v13  ;;  %v11301_v25 = vld [vmem:[#allocation100_spill] sm:$0xff]  ;;  %v11302_v13 = vld [vmem:[#allocation38_spill] sm:$0xff] }
 0xa75   :  { %7352 = vmatprep.subr.bf16.mxu1 %v11292_v58  ;;  %7416 = vmatprep.subr.bf16.mxu0 %v11293_v9  ;;  %v11303_v58 = vld [vmem:[#allocation101_spill] sm:$0xff]  ;;  %v11304_v9 = vld [vmem:[#allocation39_spill] sm:$0xff] }
 0xa78   :  { %7354 = vmatpush1.bf16.msra.mxu1 %v11294_v22  ;;  %7418 = vmatpush1.bf16.msra.mxu0 %v11295_v14  ;;  %v11305_v22 = vld [vmem:[#allocation102_spill] sm:$0xff]  ;;  %v11306_v14 = vld [vmem:[#allocation40_spill] sm:$0xff] }
 0xa79   :  { %7356 = vmatprep.subr.bf16.mxu1 %v11296_v62  ;;  %7420 = vmatprep.subr.bf16.mxu0 %v11297_v7  ;;  %v11307_v62 = vld [vmem:[#allocation103_spill] sm:$0xff]  ;;  %v11308_v7 = vld [vmem:[#allocation41_spill] sm:$0xff] }
 0xa7c   :  { %7358 = vmatpush1.bf16.msra.mxu1 %v11298_v16  ;;  %7422 = vmatpush1.bf16.msra.mxu0 %v11299_v45  ;;  %v11309_v16 = vld [vmem:[#allocation104_spill] sm:$0xff]  ;;  %v11310_v45 = vld [vmem:[#allocation42_spill] sm:$0xff] }
 0xa7d   :  { %7360 = vmatprep.subr.bf16.mxu1 %v11300_v29  ;;  %7424 = vmatprep.subr.bf16.mxu0 %v11301_v25  ;;  %v11311_v29 = vld [vmem:[#allocation105_spill] sm:$0xff]  ;;  %v11312_v25 = vld [vmem:[#allocation43_spill] sm:$0xff] }
 0xa80   :  { %7362 = vmatpush1.bf16.msra.mxu1 %v11302_v13  ;;  %7426 = vmatpush1.bf16.msra.mxu0 %v11303_v58  ;;  %v11313_v13 = vld [vmem:[#allocation106_spill] sm:$0xff] }
 0xa81   :  { %7364 = vmatprep.subr.bf16.mxu1 %v11304_v9  ;;  %7428 = vmatprep.subr.bf16.mxu0 %v11305_v22 }
 0xa84   :  { %7366 = vmatpush1.bf16.msra.mxu1 %v11306_v14  ;;  %7430 = vmatpush1.bf16.msra.mxu0 %v11307_v62  ;;  %v3866_v14 = vld [vmem:[#allocation2 + $0x50] sm:$0xc] }
 0xa85   :  { %7368 = vmatprep.subr.bf16.mxu1 %v11308_v7  ;;  %7432 = vmatprep.subr.bf16.mxu0 %v11309_v16 }
 0xa88   :  { %7370 = vmatpush1.bf16.msra.mxu1 %v11310_v45  ;;  %7434 = vmatpush1.bf16.msra.mxu0 %v11311_v29 }
 0xa89   :  { %7436 = vmatprep.subr.bf16.mxu1 %v11312_v25  ;;  %7500 = vmatprep.subr.bf16.mxu0 %v11313_v13  ;;  %v4228_v13 = vrot.slane %v9996_v21, 6 }
 0xade   :  { %v3938_v58 = vpop.f32.mrb[32].mxu1  ;;  %v4009_v9 = vpop.f32.mrb[54].mxu0 }
 0xadf   :  { %v4166_v42 = vrot.slane %v4009_v9, 6  ;;  %v3940_v22 = vpop.f32.mrb[33].mxu1  ;;  %v4011_v23 = vpop.f32.mrb[55].mxu0 }
 0xae0   :  { %v4167_v61 = vrot.slane %v4011_v23, 6 }
 0xae1   :  { %v4182_v62 = vadd.f32 %v4166_v42, %v3866_v14  ;;  %v4164_v14 = vrot.slane %v3938_v58, 6  ;;  %v3868_v58 = vld [vmem:[#allocation2 + $0x60] sm:$0xc] }
 0xae2   :  { %v4183_v7 = vadd.f32 %v4167_v61, %v3867_v30  ;;  %v4165_v30 = vrot.slane %v3940_v22, 6  ;;  %v3864_v61 = vld [vmem:[#allocation2 + $0x40] sm:$0xc]  ;;  %v3870_v22 = vld [vmem:[#allocation2 + $0x70] sm:$0xc] }
 0xae3   :  { %v5204_v51 = vmul.f32 -1.442695, %v4182_v62  ;;  %v4180_v62 = vadd.f32 %v4164_v14, %v3864_v61 }
 0xae4   :  { %v5205_v16 = vmul.f32 -1.442695, %v4183_v7 }
 0xae5   :  { %8035 = vpow2.f32 %v5204_v51  ;;  %v3865_v51 = vld [vmem:[#allocation2 + $0x48] sm:$0xc] }
 0xae6   :  { %8037 = vpow2.f32 %v5205_v16  ;;  %v4181_v7 = vadd.f32 %v4165_v30, %v3865_v51  ;;  %v5202_v16 = vmul.f32 -1.442695, %v4180_v62  ;;  %v3869_v62 = vld [vmem:[#allocation2 + $0x68] sm:$0xc]  ;;  %v3871_v51 = vld [vmem:[#allocation2 + $0x78] sm:$0xc] }
 0xaef   :  { %v8036_v45 = vpop.eup %8035 }
 0xaf0   :  { %v4206_v29 = vadd.f32 1.0, %v8036_v45  ;;  %v8038_v33 = vpop.eup %8037  ;;  %v5203_v45 = vmul.f32 -1.442695, %v4181_v7 }
 0xaf1   :  { %v4207_v25 = vadd.f32 1.0, %v8038_v33 }
 0xaf2   :  { %8039 = vrcp.f32 %v4206_v29 }
 0xaf3   :  { %8041 = vrcp.f32 %v4207_v25 }
 0xaf4   :  { %8043 = vpow2.f32 %v5202_v16 }
 0xaf5   :  { %8045 = vpow2.f32 %v5203_v45 }
 0xafc   :  { %v8040_v9 = vpop.eup %8039 }
 0xafd   :  { %v4232_v2 = vmul.f32 %v8040_v9, %v4228_v13  ;;  %v8042_v23 = vpop.eup %8041 }
 0xafe   :  { %v4233_v42 = vmul.f32 %v8042_v23, %v4229_v36  ;;  %v8044_v33 = vpop.eup %8043 }
 0xaff   :  { %v8046_v29 = vpop.eup %8045  ;;  %v4194_v25 = vadd.f32 1.0, %v8044_v33 }
 0xb00   :  { %v4195_v21 = vadd.f32 1.0, %v8046_v29 }
 0xb01   :  { %8047 = vrcp.f32 %v4194_v25 }
 0xb02   :  { %8049 = vrcp.f32 %v4195_v21 }
 0xb1e   :  { %v4080_v18 = vpop.f32.mrb[34].mxu1  ;;  %v4151_v5 = vpop.f32.mrb[56].mxu0 }
 0xb1f   :  { %v4168_v6 = vrot.slane %v4080_v18, 6  ;;  %v4170_v13 = vrot.slane %v4151_v5, 6  ;;  %v4082_v9 = vpop.f32.mrb[35].mxu1  ;;  %v4153_v36 = vpop.f32.mrb[57].mxu0 }
 0xb20   :  { %v4169_v23 = vrot.slane %v4082_v9, 6  ;;  %v4171_v14 = vrot.slane %v4153_v36, 6  ;;  %v8048_v5 = vpop.eup %8047 }
 0xb21   :  { %v4184_v30 = vadd.f32 %v4168_v6, %v3868_v58  ;;  %v4186_v61 = vadd.f32 %v4170_v13, %v3870_v22  ;;  %v8050_v18 = vpop.eup %8049 }
 0xb22   :  { %v4185_v7 = vadd.f32 %v4169_v23, %v3869_v62  ;;  %v4187_v16 = vadd.f32 %v4171_v14, %v3871_v51 }
 0xb23   :  { %8051 = vtanh.f32 %v4184_v30  ;;  %v5206_v45 = vmul.f32 -1.442695, %v4186_v61 }
 0xb24   :  { %8053 = vtanh.f32 %v4185_v7  ;;  %v5207_v33 = vmul.f32 -1.442695, %v4187_v16  ;;  %v11315_v7 = vld [vmem:[#allocation125_spill] sm:$0xff]  ;;  %v11316_v16 = vld [vmem:[#allocation64_spill] sm:$0xff] }
 0xb25   :  { %8055 = vpow2.f32 %v5206_v45  ;;  %v11317_v45 = vld [vmem:[#allocation126_spill] sm:$0xff] }
 0xb26   :  { %8057 = vpow2.f32 %v5207_v33  ;;  %v11318_v33 = vld [vmem:[#allocation65_spill] sm:$0xff] }
 0xb2d   :  { %v8052_v29 = vpop.eup %8051 }
 0xb2e   :  { %v8054_v44 = vpop.eup %8053  ;;  %v4234_v9 = vmul.f32 %v8052_v29, %v8048_v5  ;;  %v11319_v5 = vld [vmem:[#allocation127_spill] sm:$0xff]  ;;  %v11321_v29 = vld [vmem:[#allocation128_spill] sm:$0xff] }
 0xb2f   :  { %v8056_v36 = vpop.eup %8055  ;;  %v4235_v25 = vmul.f32 %v8054_v44, %v8050_v18  ;;  %v11320_v18 = vld [vmem:[#allocation66_spill] sm:$0xff] }
 0xb30   :  { %v8058_v6 = vpop.eup %8057  ;;  %v10139_v13 = vadd.f32 %v4234_v9, %v4232_v2  ;;  %v4220_v58 = vadd.f32 1.0, %v8056_v36  ;;  %v11322_v9 = vld [vmem:[#allocation67_spill] sm:$0xff]  ;;  %v11323_v36 = vld [vmem:[#allocation129_spill] sm:$0xff] }
 0xb31   :  { %v10141_v21 = vadd.f32 %v4235_v25, %v4233_v42  ;;  %v4221_v22 = vadd.f32 1.0, %v8058_v6  ;;  %v11314_v42 = vld [vmem:[#allocation63_spill] sm:$0xff]  ;;  %v11324_v25 = vld [vmem:[#allocation68_spill] sm:$0xff]  ;;  %v11325_v6 = vld [vmem:[#allocation130_spill] sm:$0xff] }
 0xb32   :  { %8059 = vtanh.f32 %v10139_v13 }
 0xb33   :  { %8061 = vrcp.f32 %v4220_v58  ;;  %v11326_v58 = vld [vmem:[#allocation69_spill] sm:$0xff] }
 0xb34   :  { %8063 = vtanh.f32 %v10141_v21 }
 0xb35   :  { %8065 = vrcp.f32 %v4221_v22  ;;  %v11327_v22 = vld [vmem:[#allocation131_spill] sm:$0xff] }
 0xb3c   :  { %v8060_v23 = vpop.eup %8059 }
 0xb3d   :  { %v8062_v14 = vpop.eup %8061 }
 0xb3e   :  { %v8064_v30 = vpop.eup %8063  ;;  %v4240_v61 = vmul.f32 %v8062_v14, %v8060_v23  ;;  %v11328_v23 = vld [vmem:[#allocation70_spill] sm:$0xff]  ;;  %v11329_v14 = vld [vmem:[#allocation132_spill] sm:$0xff] }
 0xb3f   :  { %v8066_v62 = vpop.eup %8065 }
 0xb40   :  { %v4241_v51 = vmul.f32 %v8066_v62, %v8064_v30  ;;  %4242 = vst [vmem:[#allocation3 + $0x10] sm:$0xc] %v4240_v61  ;;  %v10145_v2 = vrot.slane %v4240_v61, 2  ;;  %v11330_v30 = vld [vmem:[#allocation71_spill] sm:$0xff]  ;;  %v11331_v61 = vld [vmem:[#allocation133_spill] sm:$0xff]  ;;  %v11332_v62 = vld [vmem:[#allocation72_spill] sm:$0xff] }
 0xb42   :  { %4243 = vst [vmem:[#allocation3 + $0x18] sm:$0xc] %v4241_v51  ;;  %v4255_v44 = vrot.slane %v4241_v51, 2  ;;  %v11333_v51 = vld [vmem:[#allocation134_spill] sm:$0xff] }
 0xb44   :  { %4322 = vmatprep.mubr.f32.mxu1 %v4255_v44  ;;  %4393 = vmatprep.mubr.f32.mxu0 %v4255_v44 }
 0xb45   :  { %4323 = vmatmul.mubr.f32.vlgmr.msra.gmra.mrb[36].mxu1 %v10145_v2  ;;  %4394 = vmatmul.mubr.f32.vlgmr.msra.gmra.mrb[58].mxu0 %v10145_v2 }
 0xb46   :  { %7438 = vmatpush1.bf16.msra.mxu1 %v9041_v20  ;;  %7502 = vmatpush1.bf16.msra.mxu0 %v9274_v19 }
 0xb47   :  { %4464 = vmatprep.mubr.f32.mxu1 %v4255_v44  ;;  %4535 = vmatprep.mubr.f32.mxu0 %v4255_v44  ;;  %v11334_v44 = vld [vmem:[#allocation73_spill] sm:$0xff] }
 0xb48   :  { %7440 = vmatprep.subr.bf16.mxu1 %v10878_v57  ;;  %7504 = vmatprep.subr.bf16.mxu0 %v9278_v48 }
 0xb4a   :  { %7442 = vmatpush1.bf16.msra.mxu1 %v10879_v4  ;;  %7506 = vmatpush1.bf16.msra.mxu0 %v10880_v1 }
 0xb4b   :  { %7444 = vmatprep.subr.bf16.mxu1 %v10881_v26  ;;  %7508 = vmatprep.subr.bf16.mxu0 %v10882_v39 }
 0xb4e   :  { %7446 = vmatpush1.bf16.msra.mxu1 %v10883_v40  ;;  %7510 = vmatpush1.bf16.msra.mxu0 %v10884_v10 }
 0xb4f   :  { %7448 = vmatprep.subr.bf16.mxu1 %v10963_v24  ;;  %7512 = vmatprep.subr.bf16.mxu0 %v10964_v0 }
 0xb52   :  { %7450 = vmatpush1.bf16.msra.mxu1 %v10887_v31  ;;  %7514 = vmatpush1.bf16.msra.mxu0 %v10965_v12 }
 0xb53   :  { %7452 = vmatprep.subr.bf16.mxu1 %v10889_v50  ;;  %7516 = vmatprep.subr.bf16.mxu0 %v10966_v54 }
 0xb56   :  { %7454 = vmatpush1.bf16.msra.mxu1 %v10891_v17  ;;  %7518 = vmatpush1.bf16.msra.mxu0 %v10967_v59 }
 0xb57   :  { %7456 = vmatprep.subr.bf16.mxu1 %v10893_v63  ;;  %7520 = vmatprep.subr.bf16.mxu0 %v10968_v60 }
 0xb5a   :  { %7458 = vmatpush1.bf16.msra.mxu1 %v10895_v8  ;;  %7522 = vmatpush1.bf16.msra.mxu0 %v10969_v47 }
 0xb5b   :  { %7460 = vmatprep.subr.bf16.mxu1 %v10897_v52  ;;  %7524 = vmatprep.subr.bf16.mxu0 %v10970_v35 }
 0xb5e   :  { %7462 = vmatpush1.bf16.msra.mxu1 %v10898_v38  ;;  %7526 = vmatpush1.bf16.msra.mxu0 %v10971_v56 }
 0xb5f   :  { %7464 = vmatprep.subr.bf16.mxu1 %v10899_v55  ;;  %7528 = vmatprep.subr.bf16.mxu0 %v10972_v41 }
 0xb62   :  { %7466 = vmatpush1.bf16.msra.mxu1 %v10900_v28  ;;  %7530 = vmatpush1.bf16.msra.mxu0 %v10973_v46 }
 0xb63   :  { %7468 = vmatprep.subr.bf16.mxu1 %v10901_v3  ;;  %7532 = vmatprep.subr.bf16.mxu0 %v10974_v32 }
 0xb66   :  { %7470 = vmatpush1.bf16.msra.mxu1 %v11051_v15  ;;  %7534 = vmatpush1.bf16.msra.mxu0 %v10976_v49 }
 0xb67   :  { %7472 = vmatprep.subr.bf16.mxu1 %v11052_v43  ;;  %7536 = vmatprep.subr.bf16.mxu0 %v10978_v53 }
 0xb6a   :  { %7474 = vmatpush1.bf16.msra.mxu1 %v11053_v11  ;;  %7538 = vmatpush1.bf16.msra.mxu0 %v10980_v27 }
 0xb6b   :  { %7476 = vmatprep.subr.bf16.mxu1 %v11054_v34  ;;  %7540 = vmatprep.subr.bf16.mxu0 %v10982_v37 }
 0xb6e   :  { %7478 = vmatpush1.bf16.msra.mxu1 %v11314_v42  ;;  %7542 = vmatpush1.bf16.msra.mxu0 %v11315_v7 }
 0xb6f   :  { %7480 = vmatprep.subr.bf16.mxu1 %v11316_v16  ;;  %7544 = vmatprep.subr.bf16.mxu0 %v11317_v45 }
 0xb72   :  { %7482 = vmatpush1.bf16.msra.mxu1 %v11318_v33  ;;  %7546 = vmatpush1.bf16.msra.mxu0 %v11319_v5  ;;  %v4615_v33 = vrot.slane %v10141_v21, 6 }
 0xb73   :  { %7484 = vmatprep.subr.bf16.mxu1 %v11320_v18  ;;  %7548 = vmatprep.subr.bf16.mxu0 %v11321_v29  ;;  %v4247_v29 = vld [vmem:[#allocation2 + $0x58] sm:$0x30] }
 0xb76   :  { %7486 = vmatpush1.bf16.msra.mxu1 %v11322_v9  ;;  %7550 = vmatpush1.bf16.msra.mxu0 %v11323_v36 }
 0xb77   :  { %7488 = vmatprep.subr.bf16.mxu1 %v11324_v25  ;;  %7552 = vmatprep.subr.bf16.mxu0 %v11325_v6  ;;  %v11335_v25 = vld [vmem:[#allocation135_spill] sm:$0xff] }
 0xb78   :  { %v11336_v6 = vld [vmem:[#allocation11_spill] sm:$0xff] }
 0xb7a   :  { %7490 = vmatpush1.bf16.msra.mxu1 %v11326_v58  ;;  %7554 = vmatpush1.bf16.msra.mxu0 %v11327_v22  ;;  %v11337_v58 = vld [vmem:[#allocation74_spill] sm:$0xff] }
 0xb7b   :  { %7492 = vmatprep.subr.bf16.mxu1 %v11328_v23  ;;  %7556 = vmatprep.subr.bf16.mxu0 %v11329_v14  ;;  %v11338_v14 = vld [vmem:[#allocation12_spill] sm:$0xff]  ;;  %v11347_v23 = vld [vmem:[#allocation79_spill] sm:$0xff] }
 0xb7e   :  { %7494 = vmatpush1.bf16.msra.mxu1 %v11330_v30  ;;  %7558 = vmatpush1.bf16.msra.mxu0 %v11331_v61  ;;  %v11339_v30 = vld [vmem:[#allocation75_spill] sm:$0xff]  ;;  %v11340_v61 = vld [vmem:[#allocation13_spill] sm:$0xff] }
 0xb7f   :  { %7496 = vmatprep.subr.bf16.mxu1 %v11332_v62  ;;  %7560 = vmatprep.subr.bf16.mxu0 %v11333_v51  ;;  %v11341_v62 = vld [vmem:[#allocation76_spill] sm:$0xff]  ;;  %v11342_v51 = vld [vmem:[#allocation14_spill] sm:$0xff] }
 0xb82   :  { %7498 = vmatpush1.bf16.msra.mxu1 %v11334_v44  ;;  %7562 = vmatpush1.bf16.msra.mxu0 %v11335_v25  ;;  %v11343_v44 = vld [vmem:[#allocation77_spill] sm:$0xff]  ;;  %v11344_v25 = vld [vmem:[#allocation15_spill] sm:$0xff] }
 0xb83   :  { %7564 = vmatprep.subr.bf16.mxu1 %v11336_v6  ;;  %7628 = vmatprep.subr.bf16.mxu0 %v11337_v58  ;;  %v11345_v6 = vld [vmem:[#allocation78_spill] sm:$0xff]  ;;  %v11346_v58 = vld [vmem:[#allocation16_spill] sm:$0xff] }
 0xb85   :  { %4465 = vmatmul.mubr.f32.vlgmr.msra.gmra.mrb[38].mxu1 %v10145_v2  ;;  %4536 = vmatmul.mubr.f32.vlgmr.msra.gmra.mrb[60].mxu0 %v10145_v2  ;;  %v11348_v2 = vld [vmem:[#allocation17_spill] sm:$0xff] }
 0xb86   :  { %7566 = vmatpush1.bf16.msra.mxu1 %v11338_v14  ;;  %7630 = vmatpush1.bf16.msra.mxu0 %v11339_v30  ;;  %v11349_v14 = vld [vmem:[#allocation80_spill] sm:$0xff]  ;;  %v11350_v30 = vld [vmem:[#allocation18_spill] sm:$0xff] }
 0xb87   :  { %7568 = vmatprep.subr.bf16.mxu1 %v11340_v61  ;;  %7632 = vmatprep.subr.bf16.mxu0 %v11341_v62  ;;  %v11351_v61 = vld [vmem:[#allocation81_spill] sm:$0xff]  ;;  %v11352_v62 = vld [vmem:[#allocation19_spill] sm:$0xff] }
 0xb8a   :  { %7570 = vmatpush1.bf16.msra.mxu1 %v11342_v51  ;;  %7634 = vmatpush1.bf16.msra.mxu0 %v11343_v44  ;;  %v11353_v51 = vld [vmem:[#allocation82_spill] sm:$0xff]  ;;  %v11354_v44 = vld [vmem:[#allocation20_spill] sm:$0xff] }
 0xb8b   :  { %7572 = vmatprep.subr.bf16.mxu1 %v11344_v25  ;;  %7636 = vmatprep.subr.bf16.mxu0 %v11345_v6  ;;  %v11355_v25 = vld [vmem:[#allocation83_spill] sm:$0xff]  ;;  %v11356_v6 = vld [vmem:[#allocation21_spill] sm:$0xff] }
 0xb8e   :  { %7574 = vmatpush1.bf16.msra.mxu1 %v11346_v58  ;;  %7638 = vmatpush1.bf16.msra.mxu0 %v11347_v23  ;;  %v11357_v58 = vld [vmem:[#allocation84_spill] sm:$0xff]  ;;  %v11358_v23 = vld [vmem:[#allocation22_spill] sm:$0xff] }
 0xb8f   :  { %7576 = vmatprep.subr.bf16.mxu1 %v11348_v2  ;;  %7640 = vmatprep.subr.bf16.mxu0 %v11349_v14  ;;  %v11359_v2 = vld [vmem:[#allocation85_spill] sm:$0xff]  ;;  %v11360_v14 = vld [vmem:[#allocation23_spill] sm:$0xff] }
 0xb92   :  { %7578 = vmatpush1.bf16.msra.mxu1 %v11350_v30  ;;  %7642 = vmatpush1.bf16.msra.mxu0 %v11351_v61  ;;  %v11361_v30 = vld [vmem:[#allocation86_spill] sm:$0xff]  ;;  %v11362_v61 = vld [vmem:[#allocation24_spill] sm:$0xff] }
 0xb93   :  { %7580 = vmatprep.subr.bf16.mxu1 %v11352_v62  ;;  %7644 = vmatprep.subr.bf16.mxu0 %v11353_v51  ;;  %v11363_v62 = vld [vmem:[#allocation87_spill] sm:$0xff]  ;;  %v11364_v51 = vld [vmem:[#allocation25_spill] sm:$0xff] }
 0xb96   :  { %7582 = vmatpush1.bf16.msra.mxu1 %v11354_v44  ;;  %7646 = vmatpush1.bf16.msra.mxu0 %v11355_v25  ;;  %v11365_v44 = vld [vmem:[#allocation88_spill] sm:$0xff]  ;;  %v11366_v25 = vld [vmem:[#allocation26_spill] sm:$0xff] }
 0xb97   :  { %7584 = vmatprep.subr.bf16.mxu1 %v11356_v6  ;;  %7648 = vmatprep.subr.bf16.mxu0 %v11357_v58  ;;  %v11367_v6 = vld [vmem:[#allocation89_spill] sm:$0xff]  ;;  %v11368_v58 = vld [vmem:[#allocation27_spill] sm:$0xff] }
 0xb9a   :  { %7586 = vmatpush1.bf16.msra.mxu1 %v11358_v23  ;;  %7650 = vmatpush1.bf16.msra.mxu0 %v11359_v2  ;;  %v11369_v23 = vld [vmem:[#allocation90_spill] sm:$0xff]  ;;  %v11370_v2 = vld [vmem:[#allocation28_spill] sm:$0xff] }
 0xb9b   :  { %7588 = vmatprep.subr.bf16.mxu1 %v11360_v14  ;;  %7652 = vmatprep.subr.bf16.mxu0 %v11361_v30  ;;  %v11371_v14 = vld [vmem:[#allocation91_spill] sm:$0xff]  ;;  %v11372_v30 = vld [vmem:[#allocation29_spill] sm:$0xff] }
 0xb9e   :  { %7590 = vmatpush1.bf16.msra.mxu1 %v11362_v61  ;;  %7654 = vmatpush1.bf16.msra.mxu0 %v11363_v62  ;;  %v11373_v61 = vld [vmem:[#allocation92_spill] sm:$0xff]  ;;  %v11374_v62 = vld [vmem:[#allocation30_spill] sm:$0xff] }
 0xb9f   :  { %7592 = vmatprep.subr.bf16.mxu1 %v11364_v51  ;;  %7656 = vmatprep.subr.bf16.mxu0 %v11365_v44  ;;  %v11375_v51 = vld [vmem:[#allocation93_spill] sm:$0xff]  ;;  %v11376_v44 = vld [vmem:[#allocation31_spill] sm:$0xff] }
 0xba2   :  { %7594 = vmatpush1.bf16.msra.mxu1 %v11366_v25  ;;  %7658 = vmatpush1.bf16.msra.mxu0 %v11367_v6  ;;  %v11377_v25 = vld [vmem:[#allocation94_spill] sm:$0xff]  ;;  %v11378_v6 = vld [vmem:[#allocation32_spill] sm:$0xff] }
 0xba3   :  { %7596 = vmatprep.subr.bf16.mxu1 %v11368_v58  ;;  %7660 = vmatprep.subr.bf16.mxu0 %v11369_v23  ;;  %v11379_v58 = vld [vmem:[#allocation95_spill] sm:$0xff]  ;;  %v11380_v23 = vld [vmem:[#allocation33_spill] sm:$0xff] }
 0xba6   :  { %7598 = vmatpush1.bf16.msra.mxu1 %v11370_v2  ;;  %7662 = vmatpush1.bf16.msra.mxu0 %v11371_v14  ;;  %v11381_v2 = vld [vmem:[#allocation96_spill] sm:$0xff]  ;;  %v11382_v14 = vld [vmem:[#allocation34_spill] sm:$0xff] }
 0xba7   :  { %7600 = vmatprep.subr.bf16.mxu1 %v11372_v30  ;;  %7664 = vmatprep.subr.bf16.mxu0 %v11373_v61  ;;  %v11383_v30 = vld [vmem:[#allocation97_spill] sm:$0xff]  ;;  %v11384_v61 = vld [vmem:[#allocation35_spill] sm:$0xff] }
 0xbaa   :  { %7602 = vmatpush1.bf16.msra.mxu1 %v11374_v62  ;;  %7666 = vmatpush1.bf16.msra.mxu0 %v11375_v51  ;;  %v11385_v62 = vld [vmem:[#allocation98_spill] sm:$0xff]  ;;  %v11386_v51 = vld [vmem:[#allocation36_spill] sm:$0xff] }
 0xbab   :  { %7604 = vmatprep.subr.bf16.mxu1 %v11376_v44  ;;  %7668 = vmatprep.subr.bf16.mxu0 %v11377_v25  ;;  %v11387_v44 = vld [vmem:[#allocation99_spill] sm:$0xff]  ;;  %v11388_v25 = vld [vmem:[#allocation37_spill] sm:$0xff] }
 0xbae   :  { %7606 = vmatpush1.bf16.msra.mxu1 %v11378_v6  ;;  %7670 = vmatpush1.bf16.msra.mxu0 %v11379_v58  ;;  %v11389_v6 = vld [vmem:[#allocation100_spill] sm:$0xff]  ;;  %v11390_v58 = vld [vmem:[#allocation38_spill] sm:$0xff] }
 0xbaf   :  { %7608 = vmatprep.subr.bf16.mxu1 %v11380_v23  ;;  %7672 = vmatprep.subr.bf16.mxu0 %v11381_v2  ;;  %v11391_v23 = vld [vmem:[#allocation101_spill] sm:$0xff]  ;;  %v11392_v2 = vld [vmem:[#allocation39_spill] sm:$0xff] }
 0xbb2   :  { %7610 = vmatpush1.bf16.msra.mxu1 %v11382_v14  ;;  %7674 = vmatpush1.bf16.msra.mxu0 %v11383_v30  ;;  %v11393_v14 = vld [vmem:[#allocation102_spill] sm:$0xff]  ;;  %v11394_v30 = vld [vmem:[#allocation40_spill] sm:$0xff] }
 0xbb3   :  { %7612 = vmatprep.subr.bf16.mxu1 %v11384_v61  ;;  %7676 = vmatprep.subr.bf16.mxu0 %v11385_v62  ;;  %v11395_v61 = vld [vmem:[#allocation103_spill] sm:$0xff]  ;;  %v11396_v62 = vld [vmem:[#allocation41_spill] sm:$0xff] }
 0xbb6   :  { %7614 = vmatpush1.bf16.msra.mxu1 %v11386_v51  ;;  %7678 = vmatpush1.bf16.msra.mxu0 %v11387_v44  ;;  %v11397_v51 = vld [vmem:[#allocation104_spill] sm:$0xff]  ;;  %v11398_v44 = vld [vmem:[#allocation42_spill] sm:$0xff] }
 0xbb7   :  { %7616 = vmatprep.subr.bf16.mxu1 %v11388_v25  ;;  %7680 = vmatprep.subr.bf16.mxu0 %v11389_v6  ;;  %v11399_v25 = vld [vmem:[#allocation105_spill] sm:$0xff]  ;;  %v11400_v6 = vld [vmem:[#allocation43_spill] sm:$0xff] }
 0xbba   :  { %7618 = vmatpush1.bf16.msra.mxu1 %v11390_v58  ;;  %7682 = vmatpush1.bf16.msra.mxu0 %v11391_v23  ;;  %v11401_v58 = vld [vmem:[#allocation106_spill] sm:$0xff] }
 0xbbb   :  { %7620 = vmatprep.subr.bf16.mxu1 %v11392_v2  ;;  %7684 = vmatprep.subr.bf16.mxu0 %v11393_v14 }
 0xbbe   :  { %7622 = vmatpush1.bf16.msra.mxu1 %v11394_v30  ;;  %7686 = vmatpush1.bf16.msra.mxu0 %v11395_v61  ;;  %v4246_v30 = vld [vmem:[#allocation2 + $0x50] sm:$0x30] }
 0xbbf   :  { %7624 = vmatprep.subr.bf16.mxu1 %v11396_v62  ;;  %7688 = vmatprep.subr.bf16.mxu0 %v11397_v51 }
 0xbc2   :  { %7626 = vmatpush1.bf16.msra.mxu1 %v11398_v44  ;;  %7690 = vmatpush1.bf16.msra.mxu0 %v11399_v25 }
 0xbc3   :  { %7692 = vmatprep.subr.bf16.mxu1 %v11400_v6  ;;  %7756 = vmatprep.subr.bf16.mxu0 %v11401_v58  ;;  %v4614_v58 = vrot.slane %v10139_v13, 6 }
 0xc18   :  { %v4324_v23 = vpop.f32.mrb[36].mxu1  ;;  %v4395_v2 = vpop.f32.mrb[58].mxu0 }
 0xc19   :  { %v4552_v22 = vrot.slane %v4395_v2, 4  ;;  %v4326_v14 = vpop.f32.mrb[37].mxu1  ;;  %v4397_v36 = vpop.f32.mrb[59].mxu0 }
 0xc1a   :  { %v4553_v9 = vrot.slane %v4397_v36, 4 }
 0xc1b   :  { %v4568_v61 = vadd.f32 %v4552_v22, %v4246_v30  ;;  %v4550_v30 = vrot.slane %v4324_v23, 4  ;;  %v4248_v23 = vld [vmem:[#allocation2 + $0x60] sm:$0x30] }
 0xc1c   :  { %v4569_v62 = vadd.f32 %v4553_v9, %v4247_v29  ;;  %v4551_v29 = vrot.slane %v4326_v14, 4  ;;  %v4244_v9 = vld [vmem:[#allocation2 + $0x40] sm:$0x30]  ;;  %v4250_v14 = vld [vmem:[#allocation2 + $0x70] sm:$0x30] }
 0xc1d   :  { %v5210_v18 = vmul.f32 -1.442695, %v4568_v61  ;;  %v4566_v61 = vadd.f32 %v4550_v30, %v4244_v9 }
 0xc1e   :  { %v5211_v51 = vmul.f32 -1.442695, %v4569_v62 }
 0xc1f   :  { %8067 = vpow2.f32 %v5210_v18  ;;  %v4245_v18 = vld [vmem:[#allocation2 + $0x48] sm:$0x30] }
 0xc20   :  { %8069 = vpow2.f32 %v5211_v51  ;;  %v4567_v62 = vadd.f32 %v4551_v29, %v4245_v18  ;;  %v5208_v51 = vmul.f32 -1.442695, %v4566_v61  ;;  %v4249_v61 = vld [vmem:[#allocation2 + $0x68] sm:$0x30]  ;;  %v4251_v18 = vld [vmem:[#allocation2 + $0x78] sm:$0x30] }
 0xc29   :  { %v8068_v44 = vpop.eup %8067 }
 0xc2a   :  { %v4592_v25 = vadd.f32 1.0, %v8068_v44  ;;  %v8070_v5 = vpop.eup %8069  ;;  %v5209_v44 = vmul.f32 -1.442695, %v4567_v62 }
 0xc2b   :  { %v4593_v6 = vadd.f32 1.0, %v8070_v5 }
 0xc2c   :  { %8071 = vrcp.f32 %v4592_v25 }
 0xc2d   :  { %8073 = vrcp.f32 %v4593_v6 }
 0xc2e   :  { %8075 = vpow2.f32 %v5208_v51 }
 0xc2f   :  { %8077 = vpow2.f32 %v5209_v44 }
 0xc36   :  { %v8072_v2 = vpop.eup %8071 }
 0xc37   :  { %v4618_v45 = vmul.f32 %v8072_v2, %v4614_v58  ;;  %v8074_v36 = vpop.eup %8073 }
 0xc38   :  { %v4619_v22 = vmul.f32 %v8074_v36, %v4615_v33  ;;  %v8076_v5 = vpop.eup %8075 }
 0xc39   :  { %v8078_v25 = vpop.eup %8077  ;;  %v4580_v6 = vadd.f32 1.0, %v8076_v5 }
 0xc3a   :  { %v4581_v13 = vadd.f32 1.0, %v8078_v25 }
 0xc3b   :  { %8079 = vrcp.f32 %v4580_v6 }
 0xc3c   :  { %8081 = vrcp.f32 %v4581_v13 }
 0xc58   :  { %v4466_v16 = vpop.f32.mrb[38].mxu1  ;;  %v4537_v7 = vpop.f32.mrb[60].mxu0 }
 0xc59   :  { %v4554_v21 = vrot.slane %v4466_v16, 4  ;;  %v4556_v58 = vrot.slane %v4537_v7, 4  ;;  %v4468_v2 = vpop.f32.mrb[39].mxu1  ;;  %v4539_v33 = vpop.f32.mrb[61].mxu0 }
 0xc5a   :  { %v4555_v36 = vrot.slane %v4468_v2, 4  ;;  %v4557_v30 = vrot.slane %v4539_v33, 4  ;;  %v8080_v7 = vpop.eup %8079 }
 0xc5b   :  { %v4570_v29 = vadd.f32 %v4554_v21, %v4248_v23  ;;  %v4572_v9 = vadd.f32 %v4556_v58, %v4250_v14  ;;  %v8082_v16 = vpop.eup %8081 }
 0xc5c   :  { %v4571_v62 = vadd.f32 %v4555_v36, %v4249_v61  ;;  %v4573_v51 = vadd.f32 %v4557_v30, %v4251_v18 }
 0xc5d   :  { %8083 = vtanh.f32 %v4570_v29  ;;  %v5212_v44 = vmul.f32 -1.442695, %v4572_v9 }
 0xc5e   :  { %8085 = vtanh.f32 %v4571_v62  ;;  %v5213_v5 = vmul.f32 -1.442695, %v4573_v51  ;;  %v5043_v62 = vld [vmem:[%s10474_s10 + $0xb8] sm:$0xff] }
 0xc5f   :  { %8087 = vpow2.f32 %v5212_v44 }
 0xc60   :  { %8089 = vpow2.f32 %v5213_v5  ;;  %v5026_v5 = vld [vmem:[%s10474_s10 + $0x30] sm:$0xff] }
 0xc67   :  { %v8084_v25 = vpop.eup %8083 }
 0xc68   :  { %v8086_v42 = vpop.eup %8085  ;;  %v4620_v2 = vmul.f32 %v8084_v25, %v8080_v7  ;;  %v5027_v7 = vld [vmem:[%s10474_s10 + $0x38] sm:$0xff]  ;;  %v5045_v25 = vld [vmem:[%s10474_s10 + $0xc8] sm:$0xff] }
 0xc69   :  { %v8088_v33 = vpop.eup %8087  ;;  %v4621_v6 = vmul.f32 %v8086_v42, %v8082_v16  ;;  %v5044_v16 = vld [vmem:[%s10474_s10 + $0xc0] sm:$0xff] }
 0xc6a   :  { %v8090_v21 = vpop.eup %8089  ;;  %v10281_v58 = vadd.f32 %v4620_v2, %v4618_v45  ;;  %v4606_v23 = vadd.f32 1.0, %v8088_v33  ;;  %v7833_v2 = vpack.c.bf16 %v5027_v7, %v5026_v5  ;;  %v7835_v33 = vpack.c.bf16 %v5045_v25, %v5044_v16 }
 0xc6b   :  { %v10283_v13 = vadd.f32 %v4621_v6, %v4619_v22  ;;  %v4607_v14 = vadd.f32 1.0, %v8090_v21  ;;  %v5042_v22 = vld [vmem:[%s10474_s10 + $0xb0] sm:$0xff]  ;;  %v5028_v6 = vld [vmem:[%s10474_s10 + $0x40] sm:$0xff]  ;;  %v5029_v21 = vld [vmem:[%s10474_s10 + $0x48] sm:$0xff] }
 0xc6c   :  { %8091 = vtanh.f32 %v10281_v58  ;;  %v7831_v44 = vpack.c.bf16 %v5043_v62, %v5042_v22 }
 0xc6d   :  { %8093 = vrcp.f32 %v4606_v23  ;;  %v5046_v23 = vld [vmem:[%s10474_s10 + $0xd0] sm:$0xff] }
 0xc6e   :  { %8095 = vtanh.f32 %v10283_v13 }
 0xc6f   :  { %8097 = vrcp.f32 %v4607_v14  ;;  %v5047_v14 = vld [vmem:[%s10474_s10 + $0xd8] sm:$0xff] }
 0xc76   :  { %v8092_v36 = vpop.eup %8091 }
 0xc77   :  { %v8094_v30 = vpop.eup %8093 }
 0xc78   :  { %v8096_v29 = vpop.eup %8095  ;;  %v4626_v9 = vmul.f32 %v8094_v30, %v8092_v36  ;;  %v7837_v36 = vpack.c.bf16 %v5029_v21, %v5028_v6  ;;  %v7839_v30 = vpack.c.bf16 %v5047_v14, %v5046_v23 }
 0xc79   :  { %v8098_v61 = vpop.eup %8097 }
 0xc7a   :  { %v4627_v18 = vmul.f32 %v8098_v61, %v8096_v29  ;;  %4628 = vst [vmem:[#allocation3 + $0x10] sm:$0x30] %v4626_v9  ;;  %v10287_v45 = vrot.slane %v4626_v9, 4  ;;  %v5030_v29 = vld [vmem:[%s10474_s10 + $0x50] sm:$0xff]  ;;  %v5031_v9 = vld [vmem:[%s10474_s10 + $0x58] sm:$0xff]  ;;  %v5048_v61 = vld [vmem:[%s10474_s10 + $0xe0] sm:$0xff] }
 0xc7c   :  { %4629 = vst [vmem:[#allocation3 + $0x18] sm:$0x30] %v4627_v18  ;;  %v4641_v42 = vrot.slane %v4627_v18, 4  ;;  %v5049_v18 = vld [vmem:[%s10474_s10 + $0xe8] sm:$0xff] }
 0xc7e   :  { %4708 = vmatprep.mubr.f32.mxu1 %v4641_v42  ;;  %4779 = vmatprep.mubr.f32.mxu0 %v4641_v42 }
 0xc7f   :  { %4709 = vmatmul.mubr.f32.vlgmr.msra.gmra.mrb[40].mxu1 %v10287_v45  ;;  %4780 = vmatmul.mubr.f32.vlgmr.msra.gmra.mrb[62].mxu0 %v10287_v45 }
 0xc80   :  { %7694 = vmatpush1.bf16.msra.mxu1 %v9041_v20  ;;  %7758 = vmatpush1.bf16.msra.mxu0 %v9274_v19  ;;  %v11402_v19 = vld [vmem:[#allocation63_spill] sm:$0xff]  ;;  %v11403_v20 = vld [vmem:[#allocation125_spill] sm:$0xff] }
 0xc81   :  { %4850 = vmatprep.mubr.f32.mxu1 %v4641_v42  ;;  %4921 = vmatprep.mubr.f32.mxu0 %v4641_v42  ;;  %v7841_v42 = vpack.c.bf16 %v5031_v9, %v5030_v29 }
 0xc82   :  { %7696 = vmatprep.subr.bf16.mxu1 %v10878_v57  ;;  %7760 = vmatprep.subr.bf16.mxu0 %v9278_v48  ;;  %v11404_v48 = vld [vmem:[#allocation64_spill] sm:$0xff]  ;;  %v11405_v57 = vld [vmem:[#allocation126_spill] sm:$0xff] }
 0xc84   :  { %7698 = vmatpush1.bf16.msra.mxu1 %v10879_v4  ;;  %7762 = vmatpush1.bf16.msra.mxu0 %v10880_v1  ;;  %v11406_v4 = vld [vmem:[#allocation65_spill] sm:$0xff]  ;;  %v11407_v1 = vld [vmem:[#allocation127_spill] sm:$0xff] }
 0xc85   :  { %7700 = vmatprep.subr.bf16.mxu1 %v10881_v26  ;;  %7764 = vmatprep.subr.bf16.mxu0 %v10882_v39  ;;  %v11408_v26 = vld [vmem:[#allocation66_spill] sm:$0xff]  ;;  %v11409_v39 = vld [vmem:[#allocation128_spill] sm:$0xff] }
 0xc88   :  { %7702 = vmatpush1.bf16.msra.mxu1 %v10883_v40  ;;  %7766 = vmatpush1.bf16.msra.mxu0 %v10884_v10  ;;  %v11410_v40 = vld [vmem:[#allocation67_spill] sm:$0xff]  ;;  %v11411_v10 = vld [vmem:[#allocation129_spill] sm:$0xff] }
 0xc89   :  { %7704 = vmatprep.subr.bf16.mxu1 %v10963_v24  ;;  %7768 = vmatprep.subr.bf16.mxu0 %v10964_v0  ;;  %v11420_v24 = vld [vmem:[#allocation72_spill] sm:$0xff]  ;;  %v11421_v0 = vld [vmem:[#allocation134_spill] sm:$0xff] }
 0xc8c   :  { %7706 = vmatpush1.bf16.msra.mxu1 %v10887_v31  ;;  %7770 = vmatpush1.bf16.msra.mxu0 %v10965_v12  ;;  %v11413_v31 = vld [vmem:[#allocation130_spill] sm:$0xff] }
 0xc8d   :  { %7708 = vmatprep.subr.bf16.mxu1 %v10889_v50  ;;  %7772 = vmatprep.subr.bf16.mxu0 %v10966_v54  ;;  %v11415_v50 = vld [vmem:[#allocation131_spill] sm:$0xff] }
 0xc8e   :  { %v5020_v54 = vld [vmem:[%s10474_s10] sm:$0xff] }
 0xc90   :  { %7710 = vmatpush1.bf16.msra.mxu1 %v10891_v17  ;;  %7774 = vmatpush1.bf16.msra.mxu0 %v10967_v59  ;;  %v11417_v17 = vld [vmem:[#allocation132_spill] sm:$0xff] }
 0xc91   :  { %7712 = vmatprep.subr.bf16.mxu1 %v10893_v63  ;;  %7776 = vmatprep.subr.bf16.mxu0 %v10968_v60  ;;  %v5037_v63 = vld [vmem:[%s10474_s10 + $0x88] sm:$0xff]  ;;  %v5038_v60 = vld [vmem:[%s10474_s10 + $0x90] sm:$0xff] }
 0xc92   :  { %v5021_v59 = vld [vmem:[%s10474_s10 + $0x8] sm:$0xff] }
 0xc94   :  { %7714 = vmatpush1.bf16.msra.mxu1 %v10895_v8  ;;  %7778 = vmatpush1.bf16.msra.mxu0 %v10969_v47  ;;  %v11419_v8 = vld [vmem:[#allocation133_spill] sm:$0xff]  ;;  %v5039_v47 = vld [vmem:[%s10474_s10 + $0x98] sm:$0xff] }
 0xc95   :  { %7716 = vmatprep.subr.bf16.mxu1 %v10897_v52  ;;  %7780 = vmatprep.subr.bf16.mxu0 %v10970_v35  ;;  %v11412_v52 = vld [vmem:[#allocation68_spill] sm:$0xff]  ;;  %v11422_v35 = vld [vmem:[#allocation73_spill] sm:$0xff] }
 0xc98   :  { %7718 = vmatpush1.bf16.msra.mxu1 %v10898_v38  ;;  %7782 = vmatpush1.bf16.msra.mxu0 %v10971_v56  ;;  %v11414_v38 = vld [vmem:[#allocation69_spill] sm:$0xff]  ;;  %v11423_v56 = vld [vmem:[#allocation135_spill] sm:$0xff] }
 0xc99   :  { %7720 = vmatprep.subr.bf16.mxu1 %v10899_v55  ;;  %7784 = vmatprep.subr.bf16.mxu0 %v10972_v41  ;;  %v11416_v55 = vld [vmem:[#allocation70_spill] sm:$0xff]  ;;  %v7821_v41 = vpack.c.bf16 %v5021_v59, %v5020_v54 }
 0xc9c   :  { %7722 = vmatpush1.bf16.msra.mxu1 %v10900_v28  ;;  %7786 = vmatpush1.bf16.msra.mxu0 %v10973_v46  ;;  %v5036_v28 = vld [vmem:[%s10474_s10 + $0x80] sm:$0xff]  ;;  %v7823_v46 = vpack.c.bf16 %v5039_v47, %v5038_v60  ;;  %v5000_v47 = vrot.slane %v10281_v58, 6 }
 0xc9d   :  { %7724 = vmatprep.subr.bf16.mxu1 %v10901_v3  ;;  %7788 = vmatprep.subr.bf16.mxu0 %v10974_v32  ;;  %v11418_v3 = vld [vmem:[#allocation71_spill] sm:$0xff]  ;;  %v7819_v12 = vpack.c.bf16 %v5037_v63, %v5036_v28  ;;  %v5022_v32 = vld [vmem:[%s10474_s10 + $0x10] sm:$0xff] }
 0xca0   :  { %7726 = vmatpush1.bf16.msra.mxu1 %v11051_v15  ;;  %7790 = vmatpush1.bf16.msra.mxu0 %v10976_v49  ;;  %v5023_v49 = vld [vmem:[%s10474_s10 + $0x18] sm:$0xff] }
 0xca1   :  { %7728 = vmatprep.subr.bf16.mxu1 %v11052_v43  ;;  %7792 = vmatprep.subr.bf16.mxu0 %v10978_v53  ;;  %v5040_v53 = vld [vmem:[%s10474_s10 + $0xa0] sm:$0xff]  ;;  %v7825_v15 = vpack.c.bf16 %v5023_v49, %v5022_v32 }
 0xca4   :  { %7730 = vmatpush1.bf16.msra.mxu1 %v11053_v11  ;;  %7794 = vmatpush1.bf16.msra.mxu0 %v10980_v27  ;;  %v5041_v27 = vld [vmem:[%s10474_s10 + $0xa8] sm:$0xff]  ;;  %v5024_v11 = vld [vmem:[%s10474_s10 + $0x20] sm:$0xff] }
 0xca5   :  { %7732 = vmatprep.subr.bf16.mxu1 %v11054_v34  ;;  %7796 = vmatprep.subr.bf16.mxu0 %v10982_v37  ;;  %v5017_v37 = vld [vmem:[#allocation3 + $0x8] sm:$0xff]  ;;  %v7827_v43 = vpack.c.bf16 %v5041_v27, %v5040_v53  ;;  %v4630_v27 = vld [vmem:[#allocation2 + $0x40] sm:$0xc0] }
 0xca6   :  { %v5025_v34 = vld [vmem:[%s10474_s10 + $0x28] sm:$0xff] }
 0xca7   :  { %v7829_v51 = vpack.c.bf16 %v5025_v34, %v5024_v11 }
 0xca8   :  { %7734 = vmatpush1.bf16.msra.mxu1 %v11402_v19  ;;  %7798 = vmatpush1.bf16.msra.mxu0 %v11403_v20  ;;  %v5032_v19 = vld [vmem:[%s10474_s10 + $0x60] sm:$0xff]  ;;  %v5033_v20 = vld [vmem:[%s10474_s10 + $0x68] sm:$0xff] }
 0xca9   :  { %7736 = vmatprep.subr.bf16.mxu1 %v11404_v48  ;;  %7800 = vmatprep.subr.bf16.mxu0 %v11405_v57  ;;  %v5050_v48 = vld [vmem:[%s10474_s10 + $0xf0] sm:$0xff]  ;;  %v5051_v57 = vld [vmem:[%s10474_s10 + $0xf8] sm:$0xff] }
 0xcac   :  { %7738 = vmatpush1.bf16.msra.mxu1 %v11406_v4  ;;  %7802 = vmatpush1.bf16.msra.mxu0 %v11407_v1  ;;  %v7845_v4 = vpack.c.bf16 %v5033_v20, %v5032_v19  ;;  %v7847_v1 = vpack.c.bf16 %v5051_v57, %v5050_v48 }
 0xcad   :  { %7740 = vmatprep.subr.bf16.mxu1 %v11408_v26  ;;  %7804 = vmatprep.subr.bf16.mxu0 %v11409_v39  ;;  %v5034_v26 = vld [vmem:[%s10474_s10 + $0x70] sm:$0xff]  ;;  %v5035_v39 = vld [vmem:[%s10474_s10 + $0x78] sm:$0xff] }
 0xcb0   :  { %7742 = vmatpush1.bf16.msra.mxu1 %v11410_v40  ;;  %7806 = vmatpush1.bf16.msra.mxu0 %v11411_v10  ;;  %v7849_v40 = vpack.c.bf16 %v5035_v39, %v5034_v26  ;;  %v5016_v10 = vld [vmem:[#allocation3] sm:$0xff] }
 0xcb1   :  { %7744 = vmatprep.subr.bf16.mxu1 %v11412_v52  ;;  %7808 = vmatprep.subr.bf16.mxu0 %v11413_v31 }
 0xcb4   :  { %7746 = vmatpush1.bf16.msra.mxu1 %v11414_v38  ;;  %7810 = vmatpush1.bf16.msra.mxu0 %v11415_v50 }
 0xcb5   :  { %7748 = vmatprep.subr.bf16.mxu1 %v11416_v55  ;;  %7812 = vmatprep.subr.bf16.mxu0 %v11417_v17  ;;  %v4632_v17 = vld [vmem:[#allocation2 + $0x50] sm:$0xc0] }
 0xcb8   :  { %7750 = vmatpush1.bf16.msra.mxu1 %v11418_v3  ;;  %7814 = vmatpush1.bf16.msra.mxu0 %v11419_v8  ;;  %v4633_v3 = vld [vmem:[#allocation2 + $0x58] sm:$0xc0] }
 0xcb9   :  { %7752 = vmatprep.subr.bf16.mxu1 %v11420_v24  ;;  %7816 = vmatprep.subr.bf16.mxu0 %v11421_v0 }
 0xcbc   :  { %7754 = vmatpush1.bf16.msra.mxu1 %v11422_v35  ;;  %7818 = vmatpush1.bf16.msra.mxu0 %v11423_v56  ;;  %v5001_v56 = vrot.slane %v10283_v13, 6 }
 0xcbd   :  { %7820 = vmatprep.subr.bf16.mxu1 %v7819_v12 }
 0xcbf   :  { %4851 = vmatmul.mubr.f32.vlgmr.msra.gmra.mrb[42].mxu1 %v10287_v45  ;;  %4922 = vmatmul.mubr.f32.vlgmr.msra.gmra.mrb[64].mxu0 %v10287_v45  ;;  %v7843_v45 = vpack.c.bf16 %v5049_v18, %v5048_v61 }
 0xcc0   :  { %7822 = vmatpush3.bf16.msra.mxu1 %v7821_v41  ;;  %5123 = vmatprep.mubr.f32.mxu1 %v5017_v37 }
 0xcc1   :  { %7824 = vmatprep.subr.bf16.mxu1 %v7823_v46 }
 0xcc4   :  { %7826 = vmatpush3.bf16.msra.mxu1 %v7825_v15  ;;  %v4631_v15 = vld [vmem:[#allocation2 + $0x48] sm:$0xc0] }
 0xcc5   :  { %7828 = vmatprep.subr.bf16.mxu1 %v7827_v43 }
 0xcc8   :  { %7830 = vmatpush3.bf16.msra.mxu1 %v7829_v51 }
 0xcc9   :  { %7832 = vmatprep.subr.bf16.mxu1 %v7831_v44 }
 0xccc   :  { %7834 = vmatpush3.bf16.msra.mxu1 %v7833_v2  ;;  %v4634_v2 = vld [vmem:[#allocation2 + $0x60] sm:$0xc0] }
 0xccd   :  { %7836 = vmatprep.subr.bf16.mxu1 %v7835_v33  ;;  %v4636_v33 = vld [vmem:[#allocation2 + $0x70] sm:$0xc0] }
 0xcd0   :  { %7838 = vmatpush3.bf16.msra.mxu1 %v7837_v36  ;;  %v4635_v36 = vld [vmem:[#allocation2 + $0x68] sm:$0xc0] }
 0xcd1   :  { %7840 = vmatprep.subr.bf16.mxu1 %v7839_v30  ;;  %v4637_v30 = vld [vmem:[#allocation2 + $0x78] sm:$0xc0] }
 0xcd4   :  { %7842 = vmatpush3.bf16.msra.mxu1 %v7841_v42 }
 0xcd5   :  { %7844 = vmatprep.subr.bf16.mxu1 %v7843_v45 }
 0xcd8   :  { %7846 = vmatpush3.bf16.msra.mxu1 %v7845_v4 }
 0xcd9   :  { %7848 = vmatprep.subr.bf16.mxu1 %v7847_v1 }
 0xcdc   :  { %7850 = vmatpush3.bf16.msra.mxu1 %v7849_v40 }
 0xcdf   :  { %5124 = vmatmul.mubr.f32.vlgmr.msra.gmra.mrb[44].mxu1 %v5016_v10 }
 0xd52   :  { %v4710_v52 = vpop.f32.mrb[40].mxu1  ;;  %v4781_v31 = vpop.f32.mrb[62].mxu0 }
 0xd53   :  { %v4938_v38 = vrot.slane %v4781_v31, 2  ;;  %v4712_v50 = vpop.f32.mrb[41].mxu1  ;;  %v4783_v55 = vpop.f32.mrb[63].mxu0  ;;  %v4936_v49 = vrot.slane %v4710_v52, 2 }
 0xd54   :  { %v4939_v28 = vrot.slane %v4783_v55, 2  ;;  %v4937_v53 = vrot.slane %v4712_v50, 2 }
 0xd55   :  { %v4954_v63 = vadd.f32 %v4938_v38, %v4632_v17  ;;  %v4952_v37 = vadd.f32 %v4936_v49, %v4630_v27 }
 0xd56   :  { %v4955_v8 = vadd.f32 %v4939_v28, %v4633_v3  ;;  %v4953_v43 = vadd.f32 %v4937_v53, %v4631_v15  ;;  %v5220_v28 = vld [vmem:[%s10475_s11] ss:$0 sm:$0xff] }
 0xd57   :  { %v5216_v24 = vmul.f32 -1.442695, %v4954_v63  ;;  %v5214_v11 = vmul.f32 -1.442695, %v4952_v37 }
 0xd58   :  { %v5217_v0 = vmul.f32 -1.442695, %v4955_v8  ;;  %v5215_v34 = vmul.f32 -1.442695, %v4953_v43 }
 0xd59   :  { %8099 = vpow2.f32 %v5216_v24 }
 0xd5a   :  { %8101 = vpow2.f32 %v5217_v0 }
 0xd63   :  { %v8100_v12 = vpop.eup %8099 }
 0xd64   :  { %v4978_v54 = vadd.f32 1.0, %v8100_v12  ;;  %v8102_v59 = vpop.eup %8101 }
 0xd65   :  { %v4979_v60 = vadd.f32 1.0, %v8102_v59 }
 0xd66   :  { %8103 = vrcp.f32 %v4978_v54 }
 0xd67   :  { %8105 = vrcp.f32 %v4979_v60 }
 0xd68   :  { %8107 = vpow2.f32 %v5214_v11 }
 0xd69   :  { %8109 = vpow2.f32 %v5215_v34 }
 0xd70   :  { %v8104_v35 = vpop.eup %8103 }
 0xd71   :  { %v5004_v41 = vmul.f32 %v8104_v35, %v5000_v47  ;;  %v8106_v46 = vpop.eup %8105 }
 0xd72   :  { %v5005_v32 = vmul.f32 %v8106_v46, %v5001_v56  ;;  %v8108_v22 = vpop.eup %8107 }
 0xd73   :  { %v8110_v62 = vpop.eup %8109  ;;  %v4966_v51 = vadd.f32 1.0, %v8108_v22 }
 0xd74   :  { %v4967_v58 = vadd.f32 1.0, %v8110_v62 }
 0xd75   :  { %8111 = vrcp.f32 %v4966_v51 }
 0xd76   :  { %8113 = vrcp.f32 %v4967_v58 }
 0xd7f   :  { %v8112_v42 = vpop.eup %8111 }
 0xd80   :  { %v8114_v45 = vpop.eup %8113 }
 0xd92   :  { %v4852_v44 = vpop.f32.mrb[42].mxu1  ;;  %v4923_v5 = vpop.f32.mrb[64].mxu0 }
 0xd93   :  { %v4940_v13 = vrot.slane %v4852_v44, 2  ;;  %v4942_v7 = vrot.slane %v4923_v5, 2  ;;  %v4854_v16 = vpop.f32.mrb[43].mxu1  ;;  %v4925_v25 = vpop.f32.mrb[65].mxu0 }
 0xd94   :  { %v4941_v6 = vrot.slane %v4854_v16, 2  ;;  %v4943_v21 = vrot.slane %v4925_v25, 2 }
 0xd95   :  { %v4956_v23 = vadd.f32 %v4940_v13, %v4634_v2  ;;  %v4958_v14 = vadd.f32 %v4942_v7, %v4636_v33 }
 0xd96   :  { %v4957_v29 = vadd.f32 %v4941_v6, %v4635_v36  ;;  %v4959_v9 = vadd.f32 %v4943_v21, %v4637_v30 }
 0xd97   :  { %8115 = vtanh.f32 %v4956_v23  ;;  %v5218_v61 = vmul.f32 -1.442695, %v4958_v14 }
 0xd98   :  { %8117 = vtanh.f32 %v4957_v29  ;;  %v5219_v18 = vmul.f32 -1.442695, %v4959_v9 }
 0xd99   :  { %8119 = vpow2.f32 %v5218_v61 }
 0xd9a   :  { %8121 = vpow2.f32 %v5219_v18 }
 0xda1   :  { %v8116_v19 = vpop.eup %8115 }
 0xda2   :  { %v8118_v20 = vpop.eup %8117  ;;  %v5006_v48 = vmul.f32 %v8116_v19, %v8112_v42 }
 0xda3   :  { %v8120_v57 = vpop.eup %8119  ;;  %v5007_v4 = vmul.f32 %v8118_v20, %v8114_v45 }
 0xda4   :  { %v8122_v1 = vpop.eup %8121  ;;  %v5008_v26 = vadd.f32 %v5006_v48, %v5004_v41  ;;  %v4992_v39 = vadd.f32 1.0, %v8120_v57 }
 0xda5   :  { %v5009_v40 = vadd.f32 %v5007_v4, %v5005_v32  ;;  %v4993_v10 = vadd.f32 1.0, %v8122_v1 }
 0xda6   :  { %8123 = vtanh.f32 %v5008_v26 }
 0xda7   :  { %8125 = vrcp.f32 %v4992_v39 }
 0xda8   :  { %8127 = vtanh.f32 %v5009_v40 }
 0xda9   :  { %8129 = vrcp.f32 %v4993_v10 }
 0xdb0   :  { %v8124_v52 = vpop.eup %8123 }
 0xdb1   :  { %v8126_v31 = vpop.eup %8125 }
 0xdb2   :  { %v8128_v38 = vpop.eup %8127  ;;  %v5012_v50 = vmul.f32 %v8126_v31, %v8124_v52  ;;  %v5272_v55 = vpop.f32.mrb[44].mxu1 }
 0xdb3   :  { %v8130_v17 = vpop.eup %8129  ;;  %v5273_v63 = vpop.f32.mrb[45].mxu1 }
 0xdb4   :  { %5014 = vst [vmem:[#allocation3 + $0x10] sm:$0xc0] %v5012_v50  ;;  %v5013_v3 = vmul.f32 %v8130_v17, %v8128_v38  ;;  %v5274_v8 = vadd.f32 %v5273_v63, %v5272_v55 }
 0xdb6   :  { %5015 = vst [vmem:[#allocation3 + $0x18] sm:$0xc0] %v5013_v3  ;;  %v5126_v24 = vadd.f32 %v5274_v8, %v5220_v28 }
 0xdb8   :  { %5134 = vst.msk [vmem:[%s10476_s12] sm:$0xff] %vm372_vm2, %v5126_v24 }
 0xdbb   :  { %v5018_v12 = vld [vmem:[#allocation3 + $0x10] sm:$0xff] }
 0xdbd   :  { %v5019_v0 = vld [vmem:[#allocation3 + $0x18] sm:$0xff] }
 0xdbe   :  { %5128 = vmatprep.mubr.f32.mxu1 %v5019_v0 }
 0xdbf   :  { %5129 = vmatmul.mubr.f32.gmra.mrb[46].mxu1 %v5018_v12 }
 0xe92   :  { %v5275_v54 = vpop.f32.mrb[46].mxu1 }
 0xe93   :  { %v5276_v59 = vpop.f32.mrb[47].mxu1 }
 0xe94   :  { %v5277_v60 = vadd.f32 %v5276_v59, %v5275_v54 }
 0xe96   :  { %v5131_v47 = vadd.f32 %v5277_v60, %v5220_v28 }
 0xe98   :  { %5135 = vst.msk [vmem:[%s10476_s12 + $0x8] sm:$0xff] %vm372_vm2, %v5131_v47 }
 0xe99   :  { %5140 = vsyncpa [#allocation5], 1 }
 0xe9a   :  { %5141 = vsyncpa [#allocation7], 1 }

</bundles_post_ra>
